<compile_context>
chip_gen: v5e
topology: v5e:2x2
jax: 0.10.0
libtpu: 0.0.40
codegen_flags: <defaults>
</compile_context>

<pallas_src>
import functools

import jax
import jax.numpy as jnp
from jax.experimental import pallas as pl
from jax.experimental.pallas import tpu as pltpu


# ----------------------------------------------------------------------------
# In-kernel helpers (operate on values already loaded from VMEM refs)
# ----------------------------------------------------------------------------
def _mm(a, w, b):
    """bf16 MXU matmul with f32 accumulation: a @ w + b."""
    y = jnp.dot(a.astype(jnp.bfloat16), w.astype(jnp.bfloat16),
                preferred_element_type=jnp.float32)
    return y + b


def _layer_norm(h, g, b, eps=1e-5):
    mu = jnp.mean(h, axis=-1, keepdims=True)
    var = jnp.mean(jnp.square(h - mu), axis=-1, keepdims=True)
    return (h - mu) * jax.lax.rsqrt(var + eps) * g + b


def _softmax_attend(q, k, v, *, batch, q_len, kv_len, num_heads, mask):
    """Multi-head softmax attention on VMEM-resident 2-D slabs.

    q: (batch*q_len, M); k, v: (batch*kv_len, M); mask: (q_len, kv_len) or None.
    Returns (batch*q_len, M).  Per-(batch, head) loop is a static Python loop
    over tiny 2-D matmuls (all data already in VMEM/vregs).
    """
    M = q.shape[-1]
    dh = M // num_heads
    scale = 1.0 / float(dh) ** 0.5
    rows = []
    for n in range(batch):
        q_n = q[n * q_len:(n + 1) * q_len, :]
        k_n = k[n * kv_len:(n + 1) * kv_len, :]
        v_n = v[n * kv_len:(n + 1) * kv_len, :]
        heads = []
        for h in range(num_heads):
            qh = q_n[:, h * dh:(h + 1) * dh]
            kh = k_n[:, h * dh:(h + 1) * dh]
            vh = v_n[:, h * dh:(h + 1) * dh]
            s = jax.lax.dot_general(
                qh.astype(jnp.bfloat16), kh.astype(jnp.bfloat16),
                dimension_numbers=(((1,), (1,)), ((), ())),
                preferred_element_type=jnp.float32) * scale      # (q_len, kv_len)
            if mask is not None:
                s = s + mask
            s = s - jnp.max(s, axis=-1, keepdims=True)
            p = jnp.exp(s)
            denom = jnp.sum(p, axis=-1, keepdims=True)
            p = p * pl.reciprocal(denom, approx=True)
            oh = jnp.dot(p.astype(jnp.bfloat16), vh.astype(jnp.bfloat16),
                         preferred_element_type=jnp.float32)      # (q_len, dh)
            heads.append(oh)
        rows.append(jnp.concatenate(heads, axis=-1))              # (q_len, M)
    return jnp.concatenate(rows, axis=0)                          # (batch*q_len, M)


# ----------------------------------------------------------------------------
# Fused encoder / decoder kernels (one pallas_call each, everything in VMEM)
# ----------------------------------------------------------------------------
def _encoder_kernel(x_ref,
                    wqkv_ref, bqkv_ref, wo_ref, bo_ref,
                    ln1_g_ref, ln1_b_ref,
                    w1_ref, b1_ref, w2_ref, b2_ref,
                    ln2_g_ref, ln2_b_ref,
                    o_ref, *, num_layers, num_heads, batch, seq):
    x = x_ref[...]                                                # (batch*seq, M) f32
    M = x.shape[-1]
    for l in range(num_layers):
        qkv = _mm(x, wqkv_ref[l], bqkv_ref[l])                    # fused QKV
        attn = _softmax_attend(qkv[:, :M], qkv[:, M:2 * M], qkv[:, 2 * M:],
                               batch=batch, q_len=seq, kv_len=seq,
                               num_heads=num_heads, mask=None)
        attn = _mm(attn, wo_ref[l], bo_ref[l])
        h = _layer_norm(x + attn, ln1_g_ref[l], ln1_b_ref[l])
        ff = jnp.maximum(_mm(h, w1_ref[l], b1_ref[l]), 0.0)
        ff = _mm(ff, w2_ref[l], b2_ref[l])
        x = _layer_norm(h + ff, ln2_g_ref[l], ln2_b_ref[l])
    o_ref[...] = x


def _decoder_kernel(x_ref, enc_ref,
                    s_wqkv_ref, s_bqkv_ref, s_wo_ref, s_bo_ref,
                    ln1_g_ref, ln1_b_ref,
                    c_wq_ref, c_bq_ref, c_wkv_ref, c_bkv_ref, c_wo_ref, c_bo_ref,
                    ln2_g_ref, ln2_b_ref,
                    w1_ref, b1_ref, w2_ref, b2_ref,
                    ln3_g_ref, ln3_b_ref,
                    wout_ref, bout_ref,
                    o_ref, *, num_layers, num_heads, batch, seq):
    x = x_ref[...]                                                # (batch*seq, M) f32
    enc = enc_ref[...]                                            # (batch*seq, M) f32
    M = x.shape[-1]

    # Causal additive mask built in-kernel (no HBM input, computed once).
    row = jax.lax.broadcasted_iota(jnp.int32, (seq, seq), 0)
    col = jax.lax.broadcasted_iota(jnp.int32, (seq, seq), 1)
    causal = jnp.where(col > row, jnp.float32(-1e9), jnp.float32(0.0))

    for l in range(num_layers):
        # masked self-attention
        qkv = _mm(x, s_wqkv_ref[l], s_bqkv_ref[l])
        sa = _softmax_attend(qkv[:, :M], qkv[:, M:2 * M], qkv[:, 2 * M:],
                             batch=batch, q_len=seq, kv_len=seq,
                             num_heads=num_heads, mask=causal)
        sa = _mm(sa, s_wo_ref[l], s_bo_ref[l])
        h = _layer_norm(x + sa, ln1_g_ref[l], ln1_b_ref[l])
        # cross-attention on encoder output (fused K/V projection)
        cq = _mm(h, c_wq_ref[l], c_bq_ref[l])
        ckv = _mm(enc, c_wkv_ref[l], c_bkv_ref[l])
        ca = _softmax_attend(cq, ckv[:, :M], ckv[:, M:],
                             batch=batch, q_len=seq, kv_len=seq,
                             num_heads=num_heads, mask=None)
        ca = _mm(ca, c_wo_ref[l], c_bo_ref[l])
        h2 = _layer_norm(h + ca, ln2_g_ref[l], ln2_b_ref[l])
        # feed-forward
        ff = jnp.maximum(_mm(h2, w1_ref[l], b1_ref[l]), 0.0)
        ff = _mm(ff, w2_ref[l], b2_ref[l])
        x = _layer_norm(h2 + ff, ln3_g_ref[l], ln3_b_ref[l])

    # vocab projection -> lane-dense padded (rows, 128) output slab
    o_ref[...] = _mm(x, wout_ref[...], bout_ref[...])


ENC_PARAM_NAMES = ("wqkv", "bqkv", "wo", "bo", "ln1_g", "ln1_b",
                   "w1", "b1", "w2", "b2", "ln2_g", "ln2_b")
DEC_PARAM_NAMES = ("s_wqkv", "s_bqkv", "s_wo", "s_bo", "ln1_g", "ln1_b",
                   "c_wq", "c_bq", "c_wkv", "c_bkv", "c_wo", "c_bo",
                   "ln2_g", "ln2_b", "w1", "b1", "w2", "b2", "ln3_g", "ln3_b")

_VMEM_SPEC = pl.BlockSpec(memory_space=pltpu.MemorySpace.VMEM)


def encoder_forward(x2d, enc_p, *, batch, seq, num_heads):
    num_layers = enc_p["wqkv"].shape[0]
    args = [x2d] + [enc_p[n] for n in ENC_PARAM_NAMES]
    return pl.pallas_call(
        functools.partial(_encoder_kernel, num_layers=num_layers,
                          num_heads=num_heads, batch=batch, seq=seq),
        in_specs=[_VMEM_SPEC] * len(args),
        out_specs=_VMEM_SPEC,
        out_shape=jax.ShapeDtypeStruct(x2d.shape, jnp.float32),
    )(*args)


def decoder_forward(x2d, enc2d, dec_p, wout, bout, *, batch, seq, num_heads):
    num_layers = dec_p["s_wqkv"].shape[0]
    vpad = wout.shape[1]
    args = [x2d, enc2d] + [dec_p[n] for n in DEC_PARAM_NAMES] + [wout, bout]
    return pl.pallas_call(
        functools.partial(_decoder_kernel, num_layers=num_layers,
                          num_heads=num_heads, batch=batch, seq=seq),
        in_specs=[_VMEM_SPEC] * len(args),
        out_specs=_VMEM_SPEC,
        out_shape=jax.ShapeDtypeStruct((x2d.shape[0], vpad), jnp.float32),
    )(*args)


# ----------------------------------------------------------------------------
# Full model forward (embedding gather / sentiment concat / slicing in XLA)
# ----------------------------------------------------------------------------
def emoji_transformer_forward(params, que, que_pos, ans, ans_pos, sentiment,
                              num_heads, vocab_len):
    N, K = ans.shape
    M = que_pos.shape[-1]

    # encoder embedding (emb_dim - 1) + sentiment channel -> emb_dim
    que_emb = jnp.take(params["encode_embedding"], que, axis=0)          # (N,K,M-1)
    sent = jnp.broadcast_to(sentiment.reshape(N, 1, 1).astype(jnp.float32),
                            (N, que.shape[1], 1))
    que_emb = jnp.concatenate([que_emb, sent], axis=-1)                  # (N,K,M)
    que_emb_pos = (que_emb + que_pos).reshape(N * K, M)

    # decoder embedding; feed all K positions (causal mask makes rows 0..K-2
    # identical to running on the [:-1] teacher-forcing input) and slice later
    ans_emb = jnp.take(params["decode_embedding"], ans, axis=0)          # (N,K,M)
    dec_in = (ans_emb + ans_pos).reshape(N * K, M)

    enc_out = encoder_forward(que_emb_pos, params["encoder"],
                              batch=N, seq=K, num_heads=num_heads)
    logits_pad = decoder_forward(dec_in, enc_out, params["decoder"],
                                 params["wout"], params["bout"],
                                 batch=N, seq=K, num_heads=num_heads)
    logits = logits_pad.reshape(N, K, -1)[:, :K - 1, :vocab_len]
    return logits.reshape(N * (K - 1), vocab_len)


# ----------------------------------------------------------------------------
# Deterministic parameter initialization (matmul weights stored in bf16)
# ----------------------------------------------------------------------------
def init_params(key, num_enc_layers, num_dec_layers, emb_dim, ff_dim, vocab_len):
    M, F = emb_dim, ff_dim
    vpad = ((vocab_len + 127) // 128) * 128
    keys = iter(jax.random.split(key, 64))

    def nk():
        return next(keys)

    def w(shape, fan_in):
        return (jax.random.normal(nk(), shape, jnp.float32)
                * (float(fan_in) ** -0.5)).astype(jnp.bfloat16)

    def zeros(shape):
        return jnp.zeros(shape, jnp.float32)

    def ones(shape):
        return jnp.ones(shape, jnp.float32)

    Le, Ld = num_enc_layers, num_dec_layers
    encoder = dict(
        wqkv=w((Le, M, 3 * M), M), bqkv=zeros((Le, 1, 3 * M)),
        wo=w((Le, M, M), M), bo=zeros((Le, 1, M)),
        ln1_g=ones((Le, 1, M)), ln1_b=zeros((Le, 1, M)),
        w1=w((Le, M, F), M), b1=zeros((Le, 1, F)),
        w2=w((Le, F, M), F), b2=zeros((Le, 1, M)),
        ln2_g=ones((Le, 1, M)), ln2_b=zeros((Le, 1, M)),
    )
    decoder = dict(
        s_wqkv=w((Ld, M, 3 * M), M), s_bqkv=zeros((Ld, 1, 3 * M)),
        s_wo=w((Ld, M, M), M), s_bo=zeros((Ld, 1, M)),
        ln1_g=ones((Ld, 1, M)), ln1_b=zeros((Ld, 1, M)),
        c_wq=w((Ld, M, M), M), c_bq=zeros((Ld, 1, M)),
        c_wkv=w((Ld, M, 2 * M), M), c_bkv=zeros((Ld, 1, 2 * M)),
        c_wo=w((Ld, M, M), M), c_bo=zeros((Ld, 1, M)),
        ln2_g=ones((Ld, 1, M)), ln2_b=zeros((Ld, 1, M)),
        w1=w((Ld, M, F), M), b1=zeros((Ld, 1, F)),
        w2=w((Ld, F, M), F), b2=zeros((Ld, 1, M)),
        ln3_g=ones((Ld, 1, M)), ln3_b=zeros((Ld, 1, M)),
    )
    wout = jnp.zeros((M, vpad), jnp.bfloat16).at[:, :vocab_len].set(
        w((M, vocab_len), M))
    bout = zeros((1, vpad))
    return dict(
        encode_embedding=jax.random.normal(nk(), (vocab_len, M - 1), jnp.float32) * 0.02,
        decode_embedding=jax.random.normal(nk(), (vocab_len, M), jnp.float32) * 0.02,
        encoder=encoder,
        decoder=decoder,
        wout=wout,
        bout=bout,
    )


# ----------------------------------------------------------------------------
if __name__ == "__main__":
    N, K = 2, 8
    num_enc_layers = 2
    num_dec_layers = 2
    num_heads = 4
    emb_dim = 32
    ff_dim = 64
    vocab_len = 40

    key = jax.random.PRNGKey(0)
    k_par, k_que, k_ans, k_qpos, k_apos, k_sent = jax.random.split(key, 6)
    params = init_params(k_par, num_enc_layers, num_dec_layers, emb_dim, ff_dim, vocab_len)

    que = jax.random.randint(k_que, (N, K), 0, vocab_len, dtype=jnp.int32)
    ans = jax.random.randint(k_ans, (N, K), 0, vocab_len, dtype=jnp.int32)
    que_pos = jax.random.normal(k_qpos, (N, K, emb_dim), jnp.float32) * 0.02
    ans_pos = jax.random.normal(k_apos, (N, K, emb_dim), jnp.float32) * 0.02
    sentiment = jax.random.normal(k_sent, (N, 1), jnp.float32)

    # TODO(synk): dropout (p given in __init__) is inference-mode identity here.
    fwd = jax.jit(functools.partial(emoji_transformer_forward,
                                    num_heads=num_heads, vocab_len=vocab_len))
    out = fwd(params, que, que_pos, ans, ans_pos, sentiment)
    out = jax.block_until_ready(out)
    assert out.shape == (N * (K - 1), vocab_len), out.shape
    assert bool(jnp.all(jnp.isfinite(out)))
    print("KERNEL_OK")
</pallas_src>

<mosaic_0001>
module attributes {stable_mosaic.version = 11 : i64} {
  func.func @_encoder_kernel(%arg0: memref<16x32xf32, #tpu.memory_space<vmem>>, %arg1: memref<2x32x96xbf16, #tpu.memory_space<vmem>>, %arg2: memref<2x1x96xf32, #tpu.memory_space<vmem>>, %arg3: memref<2x32x32xbf16, #tpu.memory_space<vmem>>, %arg4: memref<2x1x32xf32, #tpu.memory_space<vmem>>, %arg5: memref<2x1x32xf32, #tpu.memory_space<vmem>>, %arg6: memref<2x1x32xf32, #tpu.memory_space<vmem>>, %arg7: memref<2x32x64xbf16, #tpu.memory_space<vmem>>, %arg8: memref<2x1x64xf32, #tpu.memory_space<vmem>>, %arg9: memref<2x64x32xbf16, #tpu.memory_space<vmem>>, %arg10: memref<2x1x32xf32, #tpu.memory_space<vmem>>, %arg11: memref<2x1x32xf32, #tpu.memory_space<vmem>>, %arg12: memref<2x1x32xf32, #tpu.memory_space<vmem>>, %arg13: memref<16x32xf32, #tpu.memory_space<vmem>>) attributes {dimension_semantics = [], scalar_prefetch = 0 : i64, scratch_operands = 0 : i64, tpu.core_type = #tpu.core_type<tc>} {
    %c0 = arith.constant 0 : index
    %c0_0 = arith.constant 0 : index
    %0 = vector.load %arg0[%c0, %c0_0] : memref<16x32xf32, #tpu.memory_space<vmem>>, vector<16x32xf32>
    %c0_1 = arith.constant 0 : index
    %c0_2 = arith.constant 0 : index
    %c0_3 = arith.constant 0 : index
    %1 = vector.load %arg1[%c0_1, %c0_2, %c0_3] : memref<2x32x96xbf16, #tpu.memory_space<vmem>>, vector<1x32x96xbf16>
    %2 = vector.shape_cast %1 : vector<1x32x96xbf16> to vector<32x96xbf16>
    %c0_4 = arith.constant 0 : index
    %c0_5 = arith.constant 0 : index
    %c0_6 = arith.constant 0 : index
    %3 = vector.load %arg2[%c0_4, %c0_5, %c0_6] : memref<2x1x96xf32, #tpu.memory_space<vmem>>, vector<1x1x96xf32>
    %4 = vector.shape_cast %3 : vector<1x1x96xf32> to vector<1x96xf32>
    %5 = arith.truncf %0 : vector<16x32xf32> to vector<16x32xbf16>
    %cst = arith.constant dense<0.000000e+00> : vector<16x96xf32>
    %6 = tpu.matmul %5, %2, %cst {dimension_numbers = #tpu.dot_dimension_numbers<[1], [0], [0], [1], [0, 0, 1, 1], [], []>} : vector<16x32xbf16>, vector<32x96xbf16>, vector<16x96xf32> -> vector<16x96xf32>
    %7 = vector.broadcast %4 : vector<1x96xf32> to vector<16x96xf32>
    %8 = arith.addf %6, %7 : vector<16x96xf32>
    %9 = vector.extract_strided_slice %8 {offsets = [0, 0], sizes = [16, 32], strides = [1, 1]} : vector<16x96xf32> to vector<16x32xf32>
    %10 = vector.extract_strided_slice %8 {offsets = [0, 32], sizes = [16, 32], strides = [1, 1]} : vector<16x96xf32> to vector<16x32xf32>
    %11 = vector.extract_strided_slice %8 {offsets = [0, 64], sizes = [16, 32], strides = [1, 1]} : vector<16x96xf32> to vector<16x32xf32>
    %12 = vector.extract_strided_slice %9 {offsets = [0, 0], sizes = [8, 32], strides = [1, 1]} : vector<16x32xf32> to vector<8x32xf32>
    %13 = vector.extract_strided_slice %10 {offsets = [0, 0], sizes = [8, 32], strides = [1, 1]} : vector<16x32xf32> to vector<8x32xf32>
    %14 = vector.extract_strided_slice %11 {offsets = [0, 0], sizes = [8, 32], strides = [1, 1]} : vector<16x32xf32> to vector<8x32xf32>
    %15 = vector.extract_strided_slice %12 {offsets = [0, 0], sizes = [8, 8], strides = [1, 1]} : vector<8x32xf32> to vector<8x8xf32>
    %16 = vector.extract_strided_slice %13 {offsets = [0, 0], sizes = [8, 8], strides = [1, 1]} : vector<8x32xf32> to vector<8x8xf32>
    %17 = vector.extract_strided_slice %14 {offsets = [0, 0], sizes = [8, 8], strides = [1, 1]} : vector<8x32xf32> to vector<8x8xf32>
    %18 = arith.truncf %15 : vector<8x8xf32> to vector<8x8xbf16>
    %19 = arith.truncf %16 : vector<8x8xf32> to vector<8x8xbf16>
    %cst_7 = arith.constant dense<0.000000e+00> : vector<8x8xf32>
    %20 = tpu.matmul %18, %19, %cst_7 {dimension_numbers = #tpu.dot_dimension_numbers<[1], [1], [0], [0], [0, 0, 1, 0], [], []>} : vector<8x8xbf16>, vector<8x8xbf16>, vector<8x8xf32> -> vector<8x8xf32>
    %cst_8 = arith.constant 0.353553385 : f32
    %21 = vector.broadcast %cst_8 : f32 to vector<8x8xf32>
    %22 = arith.mulf %20, %21 : vector<8x8xf32>
    %cst_9 = arith.constant dense<0xFF800000> : vector<8xf32>
    %23 = vector.multi_reduction <maximumf>, %22, %cst_9 [1] : vector<8x8xf32> to vector<8xf32>
    %24 = vector.shape_cast %23 : vector<8xf32> to vector<8x1xf32>
    %25 = vector.broadcast %24 : vector<8x1xf32> to vector<8x8xf32>
    %26 = arith.subf %22, %25 : vector<8x8xf32>
    %27 = math.exp %26 : vector<8x8xf32>
    %cst_10 = arith.constant dense<0.000000e+00> : vector<8xf32>
    %28 = vector.multi_reduction <add>, %27, %cst_10 [1] : vector<8x8xf32> to vector<8xf32>
    %29 = vector.shape_cast %28 : vector<8xf32> to vector<8x1xf32>
    %30 = tpu.reciprocal %29 {approx = true} : vector<8x1xf32> -> vector<8x1xf32>
    %31 = vector.broadcast %30 : vector<8x1xf32> to vector<8x8xf32>
    %32 = arith.mulf %27, %31 : vector<8x8xf32>
    %33 = arith.truncf %32 : vector<8x8xf32> to vector<8x8xbf16>
    %34 = arith.truncf %17 : vector<8x8xf32> to vector<8x8xbf16>
    %cst_11 = arith.constant dense<0.000000e+00> : vector<8x8xf32>
    %35 = tpu.matmul %33, %34, %cst_11 {dimension_numbers = #tpu.dot_dimension_numbers<[1], [0], [0], [1], [0, 0, 1, 1], [], []>} : vector<8x8xbf16>, vector<8x8xbf16>, vector<8x8xf32> -> vector<8x8xf32>
    %36 = vector.extract_strided_slice %12 {offsets = [0, 8], sizes = [8, 8], strides = [1, 1]} : vector<8x32xf32> to vector<8x8xf32>
    %37 = vector.extract_strided_slice %13 {offsets = [0, 8], sizes = [8, 8], strides = [1, 1]} : vector<8x32xf32> to vector<8x8xf32>
    %38 = vector.extract_strided_slice %14 {offsets = [0, 8], sizes = [8, 8], strides = [1, 1]} : vector<8x32xf32> to vector<8x8xf32>
    %39 = arith.truncf %36 : vector<8x8xf32> to vector<8x8xbf16>
    %40 = arith.truncf %37 : vector<8x8xf32> to vector<8x8xbf16>
    %cst_12 = arith.constant dense<0.000000e+00> : vector<8x8xf32>
    %41 = tpu.matmul %39, %40, %cst_12 {dimension_numbers = #tpu.dot_dimension_numbers<[1], [1], [0], [0], [0, 0, 1, 0], [], []>} : vector<8x8xbf16>, vector<8x8xbf16>, vector<8x8xf32> -> vector<8x8xf32>
    %cst_13 = arith.constant 0.353553385 : f32
    %42 = vector.broadcast %cst_13 : f32 to vector<8x8xf32>
    %43 = arith.mulf %41, %42 : vector<8x8xf32>
    %cst_14 = arith.constant dense<0xFF800000> : vector<8xf32>
    %44 = vector.multi_reduction <maximumf>, %43, %cst_14 [1] : vector<8x8xf32> to vector<8xf32>
    %45 = vector.shape_cast %44 : vector<8xf32> to vector<8x1xf32>
    %46 = vector.broadcast %45 : vector<8x1xf32> to vector<8x8xf32>
    %47 = arith.subf %43, %46 : vector<8x8xf32>
    %48 = math.exp %47 : vector<8x8xf32>
    %cst_15 = arith.constant dense<0.000000e+00> : vector<8xf32>
    %49 = vector.multi_reduction <add>, %48, %cst_15 [1] : vector<8x8xf32> to vector<8xf32>
    %50 = vector.shape_cast %49 : vector<8xf32> to vector<8x1xf32>
    %51 = tpu.reciprocal %50 {approx = true} : vector<8x1xf32> -> vector<8x1xf32>
    %52 = vector.broadcast %51 : vector<8x1xf32> to vector<8x8xf32>
    %53 = arith.mulf %48, %52 : vector<8x8xf32>
    %54 = arith.truncf %53 : vector<8x8xf32> to vector<8x8xbf16>
    %55 = arith.truncf %38 : vector<8x8xf32> to vector<8x8xbf16>
    %cst_16 = arith.constant dense<0.000000e+00> : vector<8x8xf32>
    %56 = tpu.matmul %54, %55, %cst_16 {dimension_numbers = #tpu.dot_dimension_numbers<[1], [0], [0], [1], [0, 0, 1, 1], [], []>} : vector<8x8xbf16>, vector<8x8xbf16>, vector<8x8xf32> -> vector<8x8xf32>
    %57 = vector.extract_strided_slice %12 {offsets = [0, 16], sizes = [8, 8], strides = [1, 1]} : vector<8x32xf32> to vector<8x8xf32>
    %58 = vector.extract_strided_slice %13 {offsets = [0, 16], sizes = [8, 8], strides = [1, 1]} : vector<8x32xf32> to vector<8x8xf32>
    %59 = vector.extract_strided_slice %14 {offsets = [0, 16], sizes = [8, 8], strides = [1, 1]} : vector<8x32xf32> to vector<8x8xf32>
    %60 = arith.truncf %57 : vector<8x8xf32> to vector<8x8xbf16>
    %61 = arith.truncf %58 : vector<8x8xf32> to vector<8x8xbf16>
    %cst_17 = arith.constant dense<0.000000e+00> : vector<8x8xf32>
    %62 = tpu.matmul %60, %61, %cst_17 {dimension_numbers = #tpu.dot_dimension_numbers<[1], [1], [0], [0], [0, 0, 1, 0], [], []>} : vector<8x8xbf16>, vector<8x8xbf16>, vector<8x8xf32> -> vector<8x8xf32>
    %cst_18 = arith.constant 0.353553385 : f32
    %63 = vector.broadcast %cst_18 : f32 to vector<8x8xf32>
    %64 = arith.mulf %62, %63 : vector<8x8xf32>
    %cst_19 = arith.constant dense<0xFF800000> : vector<8xf32>
    %65 = vector.multi_reduction <maximumf>, %64, %cst_19 [1] : vector<8x8xf32> to vector<8xf32>
    %66 = vector.shape_cast %65 : vector<8xf32> to vector<8x1xf32>
    %67 = vector.broadcast %66 : vector<8x1xf32> to vector<8x8xf32>
    %68 = arith.subf %64, %67 : vector<8x8xf32>
    %69 = math.exp %68 : vector<8x8xf32>
    %cst_20 = arith.constant dense<0.000000e+00> : vector<8xf32>
    %70 = vector.multi_reduction <add>, %69, %cst_20 [1] : vector<8x8xf32> to vector<8xf32>
    %71 = vector.shape_cast %70 : vector<8xf32> to vector<8x1xf32>
    %72 = tpu.reciprocal %71 {approx = true} : vector<8x1xf32> -> vector<8x1xf32>
    %73 = vector.broadcast %72 : vector<8x1xf32> to vector<8x8xf32>
    %74 = arith.mulf %69, %73 : vector<8x8xf32>
    %75 = arith.truncf %74 : vector<8x8xf32> to vector<8x8xbf16>
    %76 = arith.truncf %59 : vector<8x8xf32> to vector<8x8xbf16>
    %cst_21 = arith.constant dense<0.000000e+00> : vector<8x8xf32>
    %77 = tpu.matmul %75, %76, %cst_21 {dimension_numbers = #tpu.dot_dimension_numbers<[1], [0], [0], [1], [0, 0, 1, 1], [], []>} : vector<8x8xbf16>, vector<8x8xbf16>, vector<8x8xf32> -> vector<8x8xf32>
    %78 = vector.extract_strided_slice %12 {offsets = [0, 24], sizes = [8, 8], strides = [1, 1]} : vector<8x32xf32> to vector<8x8xf32>
    %79 = vector.extract_strided_slice %13 {offsets = [0, 24], sizes = [8, 8], strides = [1, 1]} : vector<8x32xf32> to vector<8x8xf32>
    %80 = vector.extract_strided_slice %14 {offsets = [0, 24], sizes = [8, 8], strides = [1, 1]} : vector<8x32xf32> to vector<8x8xf32>
    %81 = arith.truncf %78 : vector<8x8xf32> to vector<8x8xbf16>
    %82 = arith.truncf %79 : vector<8x8xf32> to vector<8x8xbf16>
    %cst_22 = arith.constant dense<0.000000e+00> : vector<8x8xf32>
    %83 = tpu.matmul %81, %82, %cst_22 {dimension_numbers = #tpu.dot_dimension_numbers<[1], [1], [0], [0], [0, 0, 1, 0], [], []>} : vector<8x8xbf16>, vector<8x8xbf16>, vector<8x8xf32> -> vector<8x8xf32>
    %cst_23 = arith.constant 0.353553385 : f32
    %84 = vector.broadcast %cst_23 : f32 to vector<8x8xf32>
    %85 = arith.mulf %83, %84 : vector<8x8xf32>
    %cst_24 = arith.constant dense<0xFF800000> : vector<8xf32>
    %86 = vector.multi_reduction <maximumf>, %85, %cst_24 [1] : vector<8x8xf32> to vector<8xf32>
    %87 = vector.shape_cast %86 : vector<8xf32> to vector<8x1xf32>
    %88 = vector.broadcast %87 : vector<8x1xf32> to vector<8x8xf32>
    %89 = arith.subf %85, %88 : vector<8x8xf32>
    %90 = math.exp %89 : vector<8x8xf32>
    %cst_25 = arith.constant dense<0.000000e+00> : vector<8xf32>
    %91 = vector.multi_reduction <add>, %90, %cst_25 [1] : vector<8x8xf32> to vector<8xf32>
    %92 = vector.shape_cast %91 : vector<8xf32> to vector<8x1xf32>
    %93 = tpu.reciprocal %92 {approx = true} : vector<8x1xf32> -> vector<8x1xf32>
    %94 = vector.broadcast %93 : vector<8x1xf32> to vector<8x8xf32>
    %95 = arith.mulf %90, %94 : vector<8x8xf32>
    %96 = arith.truncf %95 : vector<8x8xf32> to vector<8x8xbf16>
    %97 = arith.truncf %80 : vector<8x8xf32> to vector<8x8xbf16>
    %cst_26 = arith.constant dense<0.000000e+00> : vector<8x8xf32>
    %98 = tpu.matmul %96, %97, %cst_26 {dimension_numbers = #tpu.dot_dimension_numbers<[1], [0], [0], [1], [0, 0, 1, 1], [], []>} : vector<8x8xbf16>, vector<8x8xbf16>, vector<8x8xf32> -> vector<8x8xf32>
    %99 = tpu.concatenate %35, %56, %77, %98 in 1 : vector<8x8xf32>, vector<8x8xf32>, vector<8x8xf32>, vector<8x8xf32> -> vector<8x32xf32>
    %100 = vector.extract_strided_slice %9 {offsets = [8, 0], sizes = [8, 32], strides = [1, 1]} : vector<16x32xf32> to vector<8x32xf32>
    %101 = vector.extract_strided_slice %10 {offsets = [8, 0], sizes = [8, 32], strides = [1, 1]} : vector<16x32xf32> to vector<8x32xf32>
    %102 = vector.extract_strided_slice %11 {offsets = [8, 0], sizes = [8, 32], strides = [1, 1]} : vector<16x32xf32> to vector<8x32xf32>
    %103 = vector.extract_strided_slice %100 {offsets = [0, 0], sizes = [8, 8], strides = [1, 1]} : vector<8x32xf32> to vector<8x8xf32>
    %104 = vector.extract_strided_slice %101 {offsets = [0, 0], sizes = [8, 8], strides = [1, 1]} : vector<8x32xf32> to vector<8x8xf32>
    %105 = vector.extract_strided_slice %102 {offsets = [0, 0], sizes = [8, 8], strides = [1, 1]} : vector<8x32xf32> to vector<8x8xf32>
    %106 = arith.truncf %103 : vector<8x8xf32> to vector<8x8xbf16>
    %107 = arith.truncf %104 : vector<8x8xf32> to vector<8x8xbf16>
    %cst_27 = arith.constant dense<0.000000e+00> : vector<8x8xf32>
    %108 = tpu.matmul %106, %107, %cst_27 {dimension_numbers = #tpu.dot_dimension_numbers<[1], [1], [0], [0], [0, 0, 1, 0], [], []>} : vector<8x8xbf16>, vector<8x8xbf16>, vector<8x8xf32> -> vector<8x8xf32>
    %cst_28 = arith.constant 0.353553385 : f32
    %109 = vector.broadcast %cst_28 : f32 to vector<8x8xf32>
    %110 = arith.mulf %108, %109 : vector<8x8xf32>
    %cst_29 = arith.constant dense<0xFF800000> : vector<8xf32>
    %111 = vector.multi_reduction <maximumf>, %110, %cst_29 [1] : vector<8x8xf32> to vector<8xf32>
    %112 = vector.shape_cast %111 : vector<8xf32> to vector<8x1xf32>
    %113 = vector.broadcast %112 : vector<8x1xf32> to vector<8x8xf32>
    %114 = arith.subf %110, %113 : vector<8x8xf32>
    %115 = math.exp %114 : vector<8x8xf32>
    %cst_30 = arith.constant dense<0.000000e+00> : vector<8xf32>
    %116 = vector.multi_reduction <add>, %115, %cst_30 [1] : vector<8x8xf32> to vector<8xf32>
    %117 = vector.shape_cast %116 : vector<8xf32> to vector<8x1xf32>
    %118 = tpu.reciprocal %117 {approx = true} : vector<8x1xf32> -> vector<8x1xf32>
    %119 = vector.broadcast %118 : vector<8x1xf32> to vector<8x8xf32>
    %120 = arith.mulf %115, %119 : vector<8x8xf32>
    %121 = arith.truncf %120 : vector<8x8xf32> to vector<8x8xbf16>
    %122 = arith.truncf %105 : vector<8x8xf32> to vector<8x8xbf16>
    %cst_31 = arith.constant dense<0.000000e+00> : vector<8x8xf32>
    %123 = tpu.matmul %121, %122, %cst_31 {dimension_numbers = #tpu.dot_dimension_numbers<[1], [0], [0], [1], [0, 0, 1, 1], [], []>} : vector<8x8xbf16>, vector<8x8xbf16>, vector<8x8xf32> -> vector<8x8xf32>
    %124 = vector.extract_strided_slice %100 {offsets = [0, 8], sizes = [8, 8], strides = [1, 1]} : vector<8x32xf32> to vector<8x8xf32>
    %125 = vector.extract_strided_slice %101 {offsets = [0, 8], sizes = [8, 8], strides = [1, 1]} : vector<8x32xf32> to vector<8x8xf32>
    %126 = vector.extract_strided_slice %102 {offsets = [0, 8], sizes = [8, 8], strides = [1, 1]} : vector<8x32xf32> to vector<8x8xf32>
    %127 = arith.truncf %124 : vector<8x8xf32> to vector<8x8xbf16>
    %128 = arith.truncf %125 : vector<8x8xf32> to vector<8x8xbf16>
    %cst_32 = arith.constant dense<0.000000e+00> : vector<8x8xf32>
    %129 = tpu.matmul %127, %128, %cst_32 {dimension_numbers = #tpu.dot_dimension_numbers<[1], [1], [0], [0], [0, 0, 1, 0], [], []>} : vector<8x8xbf16>, vector<8x8xbf16>, vector<8x8xf32> -> vector<8x8xf32>
    %cst_33 = arith.constant 0.353553385 : f32
    %130 = vector.broadcast %cst_33 : f32 to vector<8x8xf32>
    %131 = arith.mulf %129, %130 : vector<8x8xf32>
    %cst_34 = arith.constant dense<0xFF800000> : vector<8xf32>
    %132 = vector.multi_reduction <maximumf>, %131, %cst_34 [1] : vector<8x8xf32> to vector<8xf32>
    %133 = vector.shape_cast %132 : vector<8xf32> to vector<8x1xf32>
    %134 = vector.broadcast %133 : vector<8x1xf32> to vector<8x8xf32>
    %135 = arith.subf %131, %134 : vector<8x8xf32>
    %136 = math.exp %135 : vector<8x8xf32>
    %cst_35 = arith.constant dense<0.000000e+00> : vector<8xf32>
    %137 = vector.multi_reduction <add>, %136, %cst_35 [1] : vector<8x8xf32> to vector<8xf32>
    %138 = vector.shape_cast %137 : vector<8xf32> to vector<8x1xf32>
    %139 = tpu.reciprocal %138 {approx = true} : vector<8x1xf32> -> vector<8x1xf32>
    %140 = vector.broadcast %139 : vector<8x1xf32> to vector<8x8xf32>
    %141 = arith.mulf %136, %140 : vector<8x8xf32>
    %142 = arith.truncf %141 : vector<8x8xf32> to vector<8x8xbf16>
    %143 = arith.truncf %126 : vector<8x8xf32> to vector<8x8xbf16>
    %cst_36 = arith.constant dense<0.000000e+00> : vector<8x8xf32>
    %144 = tpu.matmul %142, %143, %cst_36 {dimension_numbers = #tpu.dot_dimension_numbers<[1], [0], [0], [1], [0, 0, 1, 1], [], []>} : vector<8x8xbf16>, vector<8x8xbf16>, vector<8x8xf32> -> vector<8x8xf32>
    %145 = vector.extract_strided_slice %100 {offsets = [0, 16], sizes = [8, 8], strides = [1, 1]} : vector<8x32xf32> to vector<8x8xf32>
    %146 = vector.extract_strided_slice %101 {offsets = [0, 16], sizes = [8, 8], strides = [1, 1]} : vector<8x32xf32> to vector<8x8xf32>
    %147 = vector.extract_strided_slice %102 {offsets = [0, 16], sizes = [8, 8], strides = [1, 1]} : vector<8x32xf32> to vector<8x8xf32>
    %148 = arith.truncf %145 : vector<8x8xf32> to vector<8x8xbf16>
    %149 = arith.truncf %146 : vector<8x8xf32> to vector<8x8xbf16>
    %cst_37 = arith.constant dense<0.000000e+00> : vector<8x8xf32>
    %150 = tpu.matmul %148, %149, %cst_37 {dimension_numbers = #tpu.dot_dimension_numbers<[1], [1], [0], [0], [0, 0, 1, 0], [], []>} : vector<8x8xbf16>, vector<8x8xbf16>, vector<8x8xf32> -> vector<8x8xf32>
    %cst_38 = arith.constant 0.353553385 : f32
    %151 = vector.broadcast %cst_38 : f32 to vector<8x8xf32>
    %152 = arith.mulf %150, %151 : vector<8x8xf32>
    %cst_39 = arith.constant dense<0xFF800000> : vector<8xf32>
    %153 = vector.multi_reduction <maximumf>, %152, %cst_39 [1] : vector<8x8xf32> to vector<8xf32>
    %154 = vector.shape_cast %153 : vector<8xf32> to vector<8x1xf32>
    %155 = vector.broadcast %154 : vector<8x1xf32> to vector<8x8xf32>
    %156 = arith.subf %152, %155 : vector<8x8xf32>
    %157 = math.exp %156 : vector<8x8xf32>
    %cst_40 = arith.constant dense<0.000000e+00> : vector<8xf32>
    %158 = vector.multi_reduction <add>, %157, %cst_40 [1] : vector<8x8xf32> to vector<8xf32>
    %159 = vector.shape_cast %158 : vector<8xf32> to vector<8x1xf32>
    %160 = tpu.reciprocal %159 {approx = true} : vector<8x1xf32> -> vector<8x1xf32>
    %161 = vector.broadcast %160 : vector<8x1xf32> to vector<8x8xf32>
    %162 = arith.mulf %157, %161 : vector<8x8xf32>
    %163 = arith.truncf %162 : vector<8x8xf32> to vector<8x8xbf16>
    %164 = arith.truncf %147 : vector<8x8xf32> to vector<8x8xbf16>
    %cst_41 = arith.constant dense<0.000000e+00> : vector<8x8xf32>
    %165 = tpu.matmul %163, %164, %cst_41 {dimension_numbers = #tpu.dot_dimension_numbers<[1], [0], [0], [1], [0, 0, 1, 1], [], []>} : vector<8x8xbf16>, vector<8x8xbf16>, vector<8x8xf32> -> vector<8x8xf32>
    %166 = vector.extract_strided_slice %100 {offsets = [0, 24], sizes = [8, 8], strides = [1, 1]} : vector<8x32xf32> to vector<8x8xf32>
    %167 = vector.extract_strided_slice %101 {offsets = [0, 24], sizes = [8, 8], strides = [1, 1]} : vector<8x32xf32> to vector<8x8xf32>
    %168 = vector.extract_strided_slice %102 {offsets = [0, 24], sizes = [8, 8], strides = [1, 1]} : vector<8x32xf32> to vector<8x8xf32>
    %169 = arith.truncf %166 : vector<8x8xf32> to vector<8x8xbf16>
    %170 = arith.truncf %167 : vector<8x8xf32> to vector<8x8xbf16>
    %cst_42 = arith.constant dense<0.000000e+00> : vector<8x8xf32>
    %171 = tpu.matmul %169, %170, %cst_42 {dimension_numbers = #tpu.dot_dimension_numbers<[1], [1], [0], [0], [0, 0, 1, 0], [], []>} : vector<8x8xbf16>, vector<8x8xbf16>, vector<8x8xf32> -> vector<8x8xf32>
    %cst_43 = arith.constant 0.353553385 : f32
    %172 = vector.broadcast %cst_43 : f32 to vector<8x8xf32>
    %173 = arith.mulf %171, %172 : vector<8x8xf32>
    %cst_44 = arith.constant dense<0xFF800000> : vector<8xf32>
    %174 = vector.multi_reduction <maximumf>, %173, %cst_44 [1] : vector<8x8xf32> to vector<8xf32>
    %175 = vector.shape_cast %174 : vector<8xf32> to vector<8x1xf32>
    %176 = vector.broadcast %175 : vector<8x1xf32> to vector<8x8xf32>
    %177 = arith.subf %173, %176 : vector<8x8xf32>
    %178 = math.exp %177 : vector<8x8xf32>
    %cst_45 = arith.constant dense<0.000000e+00> : vector<8xf32>
    %179 = vector.multi_reduction <add>, %178, %cst_45 [1] : vector<8x8xf32> to vector<8xf32>
    %180 = vector.shape_cast %179 : vector<8xf32> to vector<8x1xf32>
    %181 = tpu.reciprocal %180 {approx = true} : vector<8x1xf32> -> vector<8x1xf32>
    %182 = vector.broadcast %181 : vector<8x1xf32> to vector<8x8xf32>
    %183 = arith.mulf %178, %182 : vector<8x8xf32>
    %184 = arith.truncf %183 : vector<8x8xf32> to vector<8x8xbf16>
    %185 = arith.truncf %168 : vector<8x8xf32> to vector<8x8xbf16>
    %cst_46 = arith.constant dense<0.000000e+00> : vector<8x8xf32>
    %186 = tpu.matmul %184, %185, %cst_46 {dimension_numbers = #tpu.dot_dimension_numbers<[1], [0], [0], [1], [0, 0, 1, 1], [], []>} : vector<8x8xbf16>, vector<8x8xbf16>, vector<8x8xf32> -> vector<8x8xf32>
    %187 = tpu.concatenate %123, %144, %165, %186 in 1 : vector<8x8xf32>, vector<8x8xf32>, vector<8x8xf32>, vector<8x8xf32> -> vector<8x32xf32>
    %188 = tpu.concatenate %99, %187 in 0 : vector<8x32xf32>, vector<8x32xf32> -> vector<16x32xf32>
    %c0_47 = arith.constant 0 : index
    %c0_48 = arith.constant 0 : index
    %c0_49 = arith.constant 0 : index
    %189 = vector.load %arg3[%c0_47, %c0_48, %c0_49] : memref<2x32x32xbf16, #tpu.memory_space<vmem>>, vector<1x32x32xbf16>
    %190 = vector.shape_cast %189 : vector<1x32x32xbf16> to vector<32x32xbf16>
    %c0_50 = arith.constant 0 : index
    %c0_51 = arith.constant 0 : index
    %c0_52 = arith.constant 0 : index
    %191 = vector.load %arg4[%c0_50, %c0_51, %c0_52] : memref<2x1x32xf32, #tpu.memory_space<vmem>>, vector<1x1x32xf32>
    %192 = vector.shape_cast %191 : vector<1x1x32xf32> to vector<1x32xf32>
    %193 = arith.truncf %188 : vector<16x32xf32> to vector<16x32xbf16>
    %cst_53 = arith.constant dense<0.000000e+00> : vector<16x32xf32>
    %194 = tpu.matmul %193, %190, %cst_53 {dimension_numbers = #tpu.dot_dimension_numbers<[1], [0], [0], [1], [0, 0, 1, 1], [], []>} : vector<16x32xbf16>, vector<32x32xbf16>, vector<16x32xf32> -> vector<16x32xf32>
    %195 = vector.broadcast %192 : vector<1x32xf32> to vector<16x32xf32>
    %196 = arith.addf %194, %195 : vector<16x32xf32>
    %197 = arith.addf %0, %196 : vector<16x32xf32>
    %c0_54 = arith.constant 0 : index
    %c0_55 = arith.constant 0 : index
    %c0_56 = arith.constant 0 : index
    %198 = vector.load %arg5[%c0_54, %c0_55, %c0_56] : memref<2x1x32xf32, #tpu.memory_space<vmem>>, vector<1x1x32xf32>
    %199 = vector.shape_cast %198 : vector<1x1x32xf32> to vector<1x32xf32>
    %c0_57 = arith.constant 0 : index
    %c0_58 = arith.constant 0 : index
    %c0_59 = arith.constant 0 : index
    %200 = vector.load %arg6[%c0_57, %c0_58, %c0_59] : memref<2x1x32xf32, #tpu.memory_space<vmem>>, vector<1x1x32xf32>
    %201 = vector.shape_cast %200 : vector<1x1x32xf32> to vector<1x32xf32>
    %cst_60 = arith.constant dense<0.000000e+00> : vector<16xf32>
    %202 = vector.multi_reduction <add>, %197, %cst_60 [1] : vector<16x32xf32> to vector<16xf32>
    %203 = vector.shape_cast %202 : vector<16xf32> to vector<16x1xf32>
    %cst_61 = arith.constant 3.200000e+01 : f32
    %204 = vector.broadcast %cst_61 : f32 to vector<16x1xf32>
    %205 = arith.divf %203, %204 : vector<16x1xf32>
    %206 = vector.broadcast %205 : vector<16x1xf32> to vector<16x32xf32>
    %207 = arith.subf %197, %206 : vector<16x32xf32>
    %208 = arith.mulf %207, %207 : vector<16x32xf32>
    %cst_62 = arith.constant dense<0.000000e+00> : vector<16xf32>
    %209 = vector.multi_reduction <add>, %208, %cst_62 [1] : vector<16x32xf32> to vector<16xf32>
    %210 = vector.shape_cast %209 : vector<16xf32> to vector<16x1xf32>
    %cst_63 = arith.constant 3.200000e+01 : f32
    %211 = vector.broadcast %cst_63 : f32 to vector<16x1xf32>
    %212 = arith.divf %210, %211 : vector<16x1xf32>
    %213 = vector.broadcast %205 : vector<16x1xf32> to vector<16x32xf32>
    %214 = arith.subf %197, %213 : vector<16x32xf32>
    %cst_64 = arith.constant 9.99999974E-6 : f32
    %215 = vector.broadcast %cst_64 : f32 to vector<16x1xf32>
    %216 = arith.addf %212, %215 : vector<16x1xf32>
    %217 = math.rsqrt %216 : vector<16x1xf32>
    %218 = vector.broadcast %217 : vector<16x1xf32> to vector<16x32xf32>
    %219 = arith.mulf %214, %218 : vector<16x32xf32>
    %220 = vector.broadcast %199 : vector<1x32xf32> to vector<16x32xf32>
    %221 = arith.mulf %219, %220 : vector<16x32xf32>
    %222 = vector.broadcast %201 : vector<1x32xf32> to vector<16x32xf32>
    %223 = arith.addf %221, %222 : vector<16x32xf32>
    %c0_65 = arith.constant 0 : index
    %c0_66 = arith.constant 0 : index
    %c0_67 = arith.constant 0 : index
    %224 = vector.load %arg7[%c0_65, %c0_66, %c0_67] : memref<2x32x64xbf16, #tpu.memory_space<vmem>>, vector<1x32x64xbf16>
    %225 = vector.shape_cast %224 : vector<1x32x64xbf16> to vector<32x64xbf16>
    %c0_68 = arith.constant 0 : index
    %c0_69 = arith.constant 0 : index
    %c0_70 = arith.constant 0 : index
    %226 = vector.load %arg8[%c0_68, %c0_69, %c0_70] : memref<2x1x64xf32, #tpu.memory_space<vmem>>, vector<1x1x64xf32>
    %227 = vector.shape_cast %226 : vector<1x1x64xf32> to vector<1x64xf32>
    %228 = arith.truncf %223 : vector<16x32xf32> to vector<16x32xbf16>
    %cst_71 = arith.constant dense<0.000000e+00> : vector<16x64xf32>
    %229 = tpu.matmul %228, %225, %cst_71 {dimension_numbers = #tpu.dot_dimension_numbers<[1], [0], [0], [1], [0, 0, 1, 1], [], []>} : vector<16x32xbf16>, vector<32x64xbf16>, vector<16x64xf32> -> vector<16x64xf32>
    %230 = vector.broadcast %227 : vector<1x64xf32> to vector<16x64xf32>
    %231 = arith.addf %229, %230 : vector<16x64xf32>
    %cst_72 = arith.constant 0.000000e+00 : f32
    %232 = vector.broadcast %cst_72 : f32 to vector<16x64xf32>
    %233 = arith.maximumf %231, %232 : vector<16x64xf32>
    %c0_73 = arith.constant 0 : index
    %c0_74 = arith.constant 0 : index
    %c0_75 = arith.constant 0 : index
    %234 = vector.load %arg9[%c0_73, %c0_74, %c0_75] : memref<2x64x32xbf16, #tpu.memory_space<vmem>>, vector<1x64x32xbf16>
    %235 = vector.shape_cast %234 : vector<1x64x32xbf16> to vector<64x32xbf16>
    %c0_76 = arith.constant 0 : index
    %c0_77 = arith.constant 0 : index
    %c0_78 = arith.constant 0 : index
    %236 = vector.load %arg10[%c0_76, %c0_77, %c0_78] : memref<2x1x32xf32, #tpu.memory_space<vmem>>, vector<1x1x32xf32>
    %237 = vector.shape_cast %236 : vector<1x1x32xf32> to vector<1x32xf32>
    %238 = arith.truncf %233 : vector<16x64xf32> to vector<16x64xbf16>
    %cst_79 = arith.constant dense<0.000000e+00> : vector<16x32xf32>
    %239 = tpu.matmul %238, %235, %cst_79 {dimension_numbers = #tpu.dot_dimension_numbers<[1], [0], [0], [1], [0, 0, 1, 1], [], []>} : vector<16x64xbf16>, vector<64x32xbf16>, vector<16x32xf32> -> vector<16x32xf32>
    %240 = vector.broadcast %237 : vector<1x32xf32> to vector<16x32xf32>
    %241 = arith.addf %239, %240 : vector<16x32xf32>
    %242 = arith.addf %223, %241 : vector<16x32xf32>
    %c0_80 = arith.constant 0 : index
    %c0_81 = arith.constant 0 : index
    %c0_82 = arith.constant 0 : index
    %243 = vector.load %arg11[%c0_80, %c0_81, %c0_82] : memref<2x1x32xf32, #tpu.memory_space<vmem>>, vector<1x1x32xf32>
    %244 = vector.shape_cast %243 : vector<1x1x32xf32> to vector<1x32xf32>
    %c0_83 = arith.constant 0 : index
    %c0_84 = arith.constant 0 : index
    %c0_85 = arith.constant 0 : index
    %245 = vector.load %arg12[%c0_83, %c0_84, %c0_85] : memref<2x1x32xf32, #tpu.memory_space<vmem>>, vector<1x1x32xf32>
    %246 = vector.shape_cast %245 : vector<1x1x32xf32> to vector<1x32xf32>
    %cst_86 = arith.constant dense<0.000000e+00> : vector<16xf32>
    %247 = vector.multi_reduction <add>, %242, %cst_86 [1] : vector<16x32xf32> to vector<16xf32>
    %248 = vector.shape_cast %247 : vector<16xf32> to vector<16x1xf32>
    %cst_87 = arith.constant 3.200000e+01 : f32
    %249 = vector.broadcast %cst_87 : f32 to vector<16x1xf32>
    %250 = arith.divf %248, %249 : vector<16x1xf32>
    %251 = vector.broadcast %250 : vector<16x1xf32> to vector<16x32xf32>
    %252 = arith.subf %242, %251 : vector<16x32xf32>
    %253 = arith.mulf %252, %252 : vector<16x32xf32>
    %cst_88 = arith.constant dense<0.000000e+00> : vector<16xf32>
    %254 = vector.multi_reduction <add>, %253, %cst_88 [1] : vector<16x32xf32> to vector<16xf32>
    %255 = vector.shape_cast %254 : vector<16xf32> to vector<16x1xf32>
    %cst_89 = arith.constant 3.200000e+01 : f32
    %256 = vector.broadcast %cst_89 : f32 to vector<16x1xf32>
    %257 = arith.divf %255, %256 : vector<16x1xf32>
    %258 = vector.broadcast %250 : vector<16x1xf32> to vector<16x32xf32>
    %259 = arith.subf %242, %258 : vector<16x32xf32>
    %cst_90 = arith.constant 9.99999974E-6 : f32
    %260 = vector.broadcast %cst_90 : f32 to vector<16x1xf32>
    %261 = arith.addf %257, %260 : vector<16x1xf32>
    %262 = math.rsqrt %261 : vector<16x1xf32>
    %263 = vector.broadcast %262 : vector<16x1xf32> to vector<16x32xf32>
    %264 = arith.mulf %259, %263 : vector<16x32xf32>
    %265 = vector.broadcast %244 : vector<1x32xf32> to vector<16x32xf32>
    %266 = arith.mulf %264, %265 : vector<16x32xf32>
    %267 = vector.broadcast %246 : vector<1x32xf32> to vector<16x32xf32>
    %268 = arith.addf %266, %267 : vector<16x32xf32>
    %c1 = arith.constant 1 : index
    %c0_91 = arith.constant 0 : index
    %c0_92 = arith.constant 0 : index
    %269 = vector.load %arg1[%c1, %c0_91, %c0_92] : memref<2x32x96xbf16, #tpu.memory_space<vmem>>, vector<1x32x96xbf16>
    %270 = vector.shape_cast %269 : vector<1x32x96xbf16> to vector<32x96xbf16>
    %c1_93 = arith.constant 1 : index
    %c0_94 = arith.constant 0 : index
    %c0_95 = arith.constant 0 : index
    %271 = vector.load %arg2[%c1_93, %c0_94, %c0_95] : memref<2x1x96xf32, #tpu.memory_space<vmem>>, vector<1x1x96xf32>
    %272 = vector.shape_cast %271 : vector<1x1x96xf32> to vector<1x96xf32>
    %273 = arith.truncf %268 : vector<16x32xf32> to vector<16x32xbf16>
    %cst_96 = arith.constant dense<0.000000e+00> : vector<16x96xf32>
    %274 = tpu.matmul %273, %270, %cst_96 {dimension_numbers = #tpu.dot_dimension_numbers<[1], [0], [0], [1], [0, 0, 1, 1], [], []>} : vector<16x32xbf16>, vector<32x96xbf16>, vector<16x96xf32> -> vector<16x96xf32>
    %275 = vector.broadcast %272 : vector<1x96xf32> to vector<16x96xf32>
    %276 = arith.addf %274, %275 : vector<16x96xf32>
    %277 = vector.extract_strided_slice %276 {offsets = [0, 0], sizes = [16, 32], strides = [1, 1]} : vector<16x96xf32> to vector<16x32xf32>
    %278 = vector.extract_strided_slice %276 {offsets = [0, 32], sizes = [16, 32], strides = [1, 1]} : vector<16x96xf32> to vector<16x32xf32>
    %279 = vector.extract_strided_slice %276 {offsets = [0, 64], sizes = [16, 32], strides = [1, 1]} : vector<16x96xf32> to vector<16x32xf32>
    %280 = vector.extract_strided_slice %277 {offsets = [0, 0], sizes = [8, 32], strides = [1, 1]} : vector<16x32xf32> to vector<8x32xf32>
    %281 = vector.extract_strided_slice %278 {offsets = [0, 0], sizes = [8, 32], strides = [1, 1]} : vector<16x32xf32> to vector<8x32xf32>
    %282 = vector.extract_strided_slice %279 {offsets = [0, 0], sizes = [8, 32], strides = [1, 1]} : vector<16x32xf32> to vector<8x32xf32>
    %283 = vector.extract_strided_slice %280 {offsets = [0, 0], sizes = [8, 8], strides = [1, 1]} : vector<8x32xf32> to vector<8x8xf32>
    %284 = vector.extract_strided_slice %281 {offsets = [0, 0], sizes = [8, 8], strides = [1, 1]} : vector<8x32xf32> to vector<8x8xf32>
    %285 = vector.extract_strided_slice %282 {offsets = [0, 0], sizes = [8, 8], strides = [1, 1]} : vector<8x32xf32> to vector<8x8xf32>
    %286 = arith.truncf %283 : vector<8x8xf32> to vector<8x8xbf16>
    %287 = arith.truncf %284 : vector<8x8xf32> to vector<8x8xbf16>
    %cst_97 = arith.constant dense<0.000000e+00> : vector<8x8xf32>
    %288 = tpu.matmul %286, %287, %cst_97 {dimension_numbers = #tpu.dot_dimension_numbers<[1], [1], [0], [0], [0, 0, 1, 0], [], []>} : vector<8x8xbf16>, vector<8x8xbf16>, vector<8x8xf32> -> vector<8x8xf32>
    %cst_98 = arith.constant 0.353553385 : f32
    %289 = vector.broadcast %cst_98 : f32 to vector<8x8xf32>
    %290 = arith.mulf %288, %289 : vector<8x8xf32>
    %cst_99 = arith.constant dense<0xFF800000> : vector<8xf32>
    %291 = vector.multi_reduction <maximumf>, %290, %cst_99 [1] : vector<8x8xf32> to vector<8xf32>
    %292 = vector.shape_cast %291 : vector<8xf32> to vector<8x1xf32>
    %293 = vector.broadcast %292 : vector<8x1xf32> to vector<8x8xf32>
    %294 = arith.subf %290, %293 : vector<8x8xf32>
    %295 = math.exp %294 : vector<8x8xf32>
    %cst_100 = arith.constant dense<0.000000e+00> : vector<8xf32>
    %296 = vector.multi_reduction <add>, %295, %cst_100 [1] : vector<8x8xf32> to vector<8xf32>
    %297 = vector.shape_cast %296 : vector<8xf32> to vector<8x1xf32>
    %298 = tpu.reciprocal %297 {approx = true} : vector<8x1xf32> -> vector<8x1xf32>
    %299 = vector.broadcast %298 : vector<8x1xf32> to vector<8x8xf32>
    %300 = arith.mulf %295, %299 : vector<8x8xf32>
    %301 = arith.truncf %300 : vector<8x8xf32> to vector<8x8xbf16>
    %302 = arith.truncf %285 : vector<8x8xf32> to vector<8x8xbf16>
    %cst_101 = arith.constant dense<0.000000e+00> : vector<8x8xf32>
    %303 = tpu.matmul %301, %302, %cst_101 {dimension_numbers = #tpu.dot_dimension_numbers<[1], [0], [0], [1], [0, 0, 1, 1], [], []>} : vector<8x8xbf16>, vector<8x8xbf16>, vector<8x8xf32> -> vector<8x8xf32>
    %304 = vector.extract_strided_slice %280 {offsets = [0, 8], sizes = [8, 8], strides = [1, 1]} : vector<8x32xf32> to vector<8x8xf32>
    %305 = vector.extract_strided_slice %281 {offsets = [0, 8], sizes = [8, 8], strides = [1, 1]} : vector<8x32xf32> to vector<8x8xf32>
    %306 = vector.extract_strided_slice %282 {offsets = [0, 8], sizes = [8, 8], strides = [1, 1]} : vector<8x32xf32> to vector<8x8xf32>
    %307 = arith.truncf %304 : vector<8x8xf32> to vector<8x8xbf16>
    %308 = arith.truncf %305 : vector<8x8xf32> to vector<8x8xbf16>
    %cst_102 = arith.constant dense<0.000000e+00> : vector<8x8xf32>
    %309 = tpu.matmul %307, %308, %cst_102 {dimension_numbers = #tpu.dot_dimension_numbers<[1], [1], [0], [0], [0, 0, 1, 0], [], []>} : vector<8x8xbf16>, vector<8x8xbf16>, vector<8x8xf32> -> vector<8x8xf32>
    %cst_103 = arith.constant 0.353553385 : f32
    %310 = vector.broadcast %cst_103 : f32 to vector<8x8xf32>
    %311 = arith.mulf %309, %310 : vector<8x8xf32>
    %cst_104 = arith.constant dense<0xFF800000> : vector<8xf32>
    %312 = vector.multi_reduction <maximumf>, %311, %cst_104 [1] : vector<8x8xf32> to vector<8xf32>
    %313 = vector.shape_cast %312 : vector<8xf32> to vector<8x1xf32>
    %314 = vector.broadcast %313 : vector<8x1xf32> to vector<8x8xf32>
    %315 = arith.subf %311, %314 : vector<8x8xf32>
    %316 = math.exp %315 : vector<8x8xf32>
    %cst_105 = arith.constant dense<0.000000e+00> : vector<8xf32>
    %317 = vector.multi_reduction <add>, %316, %cst_105 [1] : vector<8x8xf32> to vector<8xf32>
    %318 = vector.shape_cast %317 : vector<8xf32> to vector<8x1xf32>
    %319 = tpu.reciprocal %318 {approx = true} : vector<8x1xf32> -> vector<8x1xf32>
    %320 = vector.broadcast %319 : vector<8x1xf32> to vector<8x8xf32>
    %321 = arith.mulf %316, %320 : vector<8x8xf32>
    %322 = arith.truncf %321 : vector<8x8xf32> to vector<8x8xbf16>
    %323 = arith.truncf %306 : vector<8x8xf32> to vector<8x8xbf16>
    %cst_106 = arith.constant dense<0.000000e+00> : vector<8x8xf32>
    %324 = tpu.matmul %322, %323, %cst_106 {dimension_numbers = #tpu.dot_dimension_numbers<[1], [0], [0], [1], [0, 0, 1, 1], [], []>} : vector<8x8xbf16>, vector<8x8xbf16>, vector<8x8xf32> -> vector<8x8xf32>
    %325 = vector.extract_strided_slice %280 {offsets = [0, 16], sizes = [8, 8], strides = [1, 1]} : vector<8x32xf32> to vector<8x8xf32>
    %326 = vector.extract_strided_slice %281 {offsets = [0, 16], sizes = [8, 8], strides = [1, 1]} : vector<8x32xf32> to vector<8x8xf32>
    %327 = vector.extract_strided_slice %282 {offsets = [0, 16], sizes = [8, 8], strides = [1, 1]} : vector<8x32xf32> to vector<8x8xf32>
    %328 = arith.truncf %325 : vector<8x8xf32> to vector<8x8xbf16>
    %329 = arith.truncf %326 : vector<8x8xf32> to vector<8x8xbf16>
    %cst_107 = arith.constant dense<0.000000e+00> : vector<8x8xf32>
    %330 = tpu.matmul %328, %329, %cst_107 {dimension_numbers = #tpu.dot_dimension_numbers<[1], [1], [0], [0], [0, 0, 1, 0], [], []>} : vector<8x8xbf16>, vector<8x8xbf16>, vector<8x8xf32> -> vector<8x8xf32>
    %cst_108 = arith.constant 0.353553385 : f32
    %331 = vector.broadcast %cst_108 : f32 to vector<8x8xf32>
    %332 = arith.mulf %330, %331 : vector<8x8xf32>
    %cst_109 = arith.constant dense<0xFF800000> : vector<8xf32>
    %333 = vector.multi_reduction <maximumf>, %332, %cst_109 [1] : vector<8x8xf32> to vector<8xf32>
    %334 = vector.shape_cast %333 : vector<8xf32> to vector<8x1xf32>
    %335 = vector.broadcast %334 : vector<8x1xf32> to vector<8x8xf32>
    %336 = arith.subf %332, %335 : vector<8x8xf32>
    %337 = math.exp %336 : vector<8x8xf32>
    %cst_110 = arith.constant dense<0.000000e+00> : vector<8xf32>
    %338 = vector.multi_reduction <add>, %337, %cst_110 [1] : vector<8x8xf32> to vector<8xf32>
    %339 = vector.shape_cast %338 : vector<8xf32> to vector<8x1xf32>
    %340 = tpu.reciprocal %339 {approx = true} : vector<8x1xf32> -> vector<8x1xf32>
    %341 = vector.broadcast %340 : vector<8x1xf32> to vector<8x8xf32>
    %342 = arith.mulf %337, %341 : vector<8x8xf32>
    %343 = arith.truncf %342 : vector<8x8xf32> to vector<8x8xbf16>
    %344 = arith.truncf %327 : vector<8x8xf32> to vector<8x8xbf16>
    %cst_111 = arith.constant dense<0.000000e+00> : vector<8x8xf32>
    %345 = tpu.matmul %343, %344, %cst_111 {dimension_numbers = #tpu.dot_dimension_numbers<[1], [0], [0], [1], [0, 0, 1, 1], [], []>} : vector<8x8xbf16>, vector<8x8xbf16>, vector<8x8xf32> -> vector<8x8xf32>
    %346 = vector.extract_strided_slice %280 {offsets = [0, 24], sizes = [8, 8], strides = [1, 1]} : vector<8x32xf32> to vector<8x8xf32>
    %347 = vector.extract_strided_slice %281 {offsets = [0, 24], sizes = [8, 8], strides = [1, 1]} : vector<8x32xf32> to vector<8x8xf32>
    %348 = vector.extract_strided_slice %282 {offsets = [0, 24], sizes = [8, 8], strides = [1, 1]} : vector<8x32xf32> to vector<8x8xf32>
    %349 = arith.truncf %346 : vector<8x8xf32> to vector<8x8xbf16>
    %350 = arith.truncf %347 : vector<8x8xf32> to vector<8x8xbf16>
    %cst_112 = arith.constant dense<0.000000e+00> : vector<8x8xf32>
    %351 = tpu.matmul %349, %350, %cst_112 {dimension_numbers = #tpu.dot_dimension_numbers<[1], [1], [0], [0], [0, 0, 1, 0], [], []>} : vector<8x8xbf16>, vector<8x8xbf16>, vector<8x8xf32> -> vector<8x8xf32>
    %cst_113 = arith.constant 0.353553385 : f32
    %352 = vector.broadcast %cst_113 : f32 to vector<8x8xf32>
    %353 = arith.mulf %351, %352 : vector<8x8xf32>
    %cst_114 = arith.constant dense<0xFF800000> : vector<8xf32>
    %354 = vector.multi_reduction <maximumf>, %353, %cst_114 [1] : vector<8x8xf32> to vector<8xf32>
    %355 = vector.shape_cast %354 : vector<8xf32> to vector<8x1xf32>
    %356 = vector.broadcast %355 : vector<8x1xf32> to vector<8x8xf32>
    %357 = arith.subf %353, %356 : vector<8x8xf32>
    %358 = math.exp %357 : vector<8x8xf32>
    %cst_115 = arith.constant dense<0.000000e+00> : vector<8xf32>
    %359 = vector.multi_reduction <add>, %358, %cst_115 [1] : vector<8x8xf32> to vector<8xf32>
    %360 = vector.shape_cast %359 : vector<8xf32> to vector<8x1xf32>
    %361 = tpu.reciprocal %360 {approx = true} : vector<8x1xf32> -> vector<8x1xf32>
    %362 = vector.broadcast %361 : vector<8x1xf32> to vector<8x8xf32>
    %363 = arith.mulf %358, %362 : vector<8x8xf32>
    %364 = arith.truncf %363 : vector<8x8xf32> to vector<8x8xbf16>
    %365 = arith.truncf %348 : vector<8x8xf32> to vector<8x8xbf16>
    %cst_116 = arith.constant dense<0.000000e+00> : vector<8x8xf32>
    %366 = tpu.matmul %364, %365, %cst_116 {dimension_numbers = #tpu.dot_dimension_numbers<[1], [0], [0], [1], [0, 0, 1, 1], [], []>} : vector<8x8xbf16>, vector<8x8xbf16>, vector<8x8xf32> -> vector<8x8xf32>
    %367 = tpu.concatenate %303, %324, %345, %366 in 1 : vector<8x8xf32>, vector<8x8xf32>, vector<8x8xf32>, vector<8x8xf32> -> vector<8x32xf32>
    %368 = vector.extract_strided_slice %277 {offsets = [8, 0], sizes = [8, 32], strides = [1, 1]} : vector<16x32xf32> to vector<8x32xf32>
    %369 = vector.extract_strided_slice %278 {offsets = [8, 0], sizes = [8, 32], strides = [1, 1]} : vector<16x32xf32> to vector<8x32xf32>
    %370 = vector.extract_strided_slice %279 {offsets = [8, 0], sizes = [8, 32], strides = [1, 1]} : vector<16x32xf32> to vector<8x32xf32>
    %371 = vector.extract_strided_slice %368 {offsets = [0, 0], sizes = [8, 8], strides = [1, 1]} : vector<8x32xf32> to vector<8x8xf32>
    %372 = vector.extract_strided_slice %369 {offsets = [0, 0], sizes = [8, 8], strides = [1, 1]} : vector<8x32xf32> to vector<8x8xf32>
    %373 = vector.extract_strided_slice %370 {offsets = [0, 0], sizes = [8, 8], strides = [1, 1]} : vector<8x32xf32> to vector<8x8xf32>
    %374 = arith.truncf %371 : vector<8x8xf32> to vector<8x8xbf16>
    %375 = arith.truncf %372 : vector<8x8xf32> to vector<8x8xbf16>
    %cst_117 = arith.constant dense<0.000000e+00> : vector<8x8xf32>
    %376 = tpu.matmul %374, %375, %cst_117 {dimension_numbers = #tpu.dot_dimension_numbers<[1], [1], [0], [0], [0, 0, 1, 0], [], []>} : vector<8x8xbf16>, vector<8x8xbf16>, vector<8x8xf32> -> vector<8x8xf32>
    %cst_118 = arith.constant 0.353553385 : f32
    %377 = vector.broadcast %cst_118 : f32 to vector<8x8xf32>
    %378 = arith.mulf %376, %377 : vector<8x8xf32>
    %cst_119 = arith.constant dense<0xFF800000> : vector<8xf32>
    %379 = vector.multi_reduction <maximumf>, %378, %cst_119 [1] : vector<8x8xf32> to vector<8xf32>
    %380 = vector.shape_cast %379 : vector<8xf32> to vector<8x1xf32>
    %381 = vector.broadcast %380 : vector<8x1xf32> to vector<8x8xf32>
    %382 = arith.subf %378, %381 : vector<8x8xf32>
    %383 = math.exp %382 : vector<8x8xf32>
    %cst_120 = arith.constant dense<0.000000e+00> : vector<8xf32>
    %384 = vector.multi_reduction <add>, %383, %cst_120 [1] : vector<8x8xf32> to vector<8xf32>
    %385 = vector.shape_cast %384 : vector<8xf32> to vector<8x1xf32>
    %386 = tpu.reciprocal %385 {approx = true} : vector<8x1xf32> -> vector<8x1xf32>
    %387 = vector.broadcast %386 : vector<8x1xf32> to vector<8x8xf32>
    %388 = arith.mulf %383, %387 : vector<8x8xf32>
    %389 = arith.truncf %388 : vector<8x8xf32> to vector<8x8xbf16>
    %390 = arith.truncf %373 : vector<8x8xf32> to vector<8x8xbf16>
    %cst_121 = arith.constant dense<0.000000e+00> : vector<8x8xf32>
    %391 = tpu.matmul %389, %390, %cst_121 {dimension_numbers = #tpu.dot_dimension_numbers<[1], [0], [0], [1], [0, 0, 1, 1], [], []>} : vector<8x8xbf16>, vector<8x8xbf16>, vector<8x8xf32> -> vector<8x8xf32>
    %392 = vector.extract_strided_slice %368 {offsets = [0, 8], sizes = [8, 8], strides = [1, 1]} : vector<8x32xf32> to vector<8x8xf32>
    %393 = vector.extract_strided_slice %369 {offsets = [0, 8], sizes = [8, 8], strides = [1, 1]} : vector<8x32xf32> to vector<8x8xf32>
    %394 = vector.extract_strided_slice %370 {offsets = [0, 8], sizes = [8, 8], strides = [1, 1]} : vector<8x32xf32> to vector<8x8xf32>
    %395 = arith.truncf %392 : vector<8x8xf32> to vector<8x8xbf16>
    %396 = arith.truncf %393 : vector<8x8xf32> to vector<8x8xbf16>
    %cst_122 = arith.constant dense<0.000000e+00> : vector<8x8xf32>
    %397 = tpu.matmul %395, %396, %cst_122 {dimension_numbers = #tpu.dot_dimension_numbers<[1], [1], [0], [0], [0, 0, 1, 0], [], []>} : vector<8x8xbf16>, vector<8x8xbf16>, vector<8x8xf32> -> vector<8x8xf32>
    %cst_123 = arith.constant 0.353553385 : f32
    %398 = vector.broadcast %cst_123 : f32 to vector<8x8xf32>
    %399 = arith.mulf %397, %398 : vector<8x8xf32>
    %cst_124 = arith.constant dense<0xFF800000> : vector<8xf32>
    %400 = vector.multi_reduction <maximumf>, %399, %cst_124 [1] : vector<8x8xf32> to vector<8xf32>
    %401 = vector.shape_cast %400 : vector<8xf32> to vector<8x1xf32>
    %402 = vector.broadcast %401 : vector<8x1xf32> to vector<8x8xf32>
    %403 = arith.subf %399, %402 : vector<8x8xf32>
    %404 = math.exp %403 : vector<8x8xf32>
    %cst_125 = arith.constant dense<0.000000e+00> : vector<8xf32>
    %405 = vector.multi_reduction <add>, %404, %cst_125 [1] : vector<8x8xf32> to vector<8xf32>
    %406 = vector.shape_cast %405 : vector<8xf32> to vector<8x1xf32>
    %407 = tpu.reciprocal %406 {approx = true} : vector<8x1xf32> -> vector<8x1xf32>
    %408 = vector.broadcast %407 : vector<8x1xf32> to vector<8x8xf32>
    %409 = arith.mulf %404, %408 : vector<8x8xf32>
    %410 = arith.truncf %409 : vector<8x8xf32> to vector<8x8xbf16>
    %411 = arith.truncf %394 : vector<8x8xf32> to vector<8x8xbf16>
    %cst_126 = arith.constant dense<0.000000e+00> : vector<8x8xf32>
    %412 = tpu.matmul %410, %411, %cst_126 {dimension_numbers = #tpu.dot_dimension_numbers<[1], [0], [0], [1], [0, 0, 1, 1], [], []>} : vector<8x8xbf16>, vector<8x8xbf16>, vector<8x8xf32> -> vector<8x8xf32>
    %413 = vector.extract_strided_slice %368 {offsets = [0, 16], sizes = [8, 8], strides = [1, 1]} : vector<8x32xf32> to vector<8x8xf32>
    %414 = vector.extract_strided_slice %369 {offsets = [0, 16], sizes = [8, 8], strides = [1, 1]} : vector<8x32xf32> to vector<8x8xf32>
    %415 = vector.extract_strided_slice %370 {offsets = [0, 16], sizes = [8, 8], strides = [1, 1]} : vector<8x32xf32> to vector<8x8xf32>
    %416 = arith.truncf %413 : vector<8x8xf32> to vector<8x8xbf16>
    %417 = arith.truncf %414 : vector<8x8xf32> to vector<8x8xbf16>
    %cst_127 = arith.constant dense<0.000000e+00> : vector<8x8xf32>
    %418 = tpu.matmul %416, %417, %cst_127 {dimension_numbers = #tpu.dot_dimension_numbers<[1], [1], [0], [0], [0, 0, 1, 0], [], []>} : vector<8x8xbf16>, vector<8x8xbf16>, vector<8x8xf32> -> vector<8x8xf32>
    %cst_128 = arith.constant 0.353553385 : f32
    %419 = vector.broadcast %cst_128 : f32 to vector<8x8xf32>
    %420 = arith.mulf %418, %419 : vector<8x8xf32>
    %cst_129 = arith.constant dense<0xFF800000> : vector<8xf32>
    %421 = vector.multi_reduction <maximumf>, %420, %cst_129 [1] : vector<8x8xf32> to vector<8xf32>
    %422 = vector.shape_cast %421 : vector<8xf32> to vector<8x1xf32>
    %423 = vector.broadcast %422 : vector<8x1xf32> to vector<8x8xf32>
    %424 = arith.subf %420, %423 : vector<8x8xf32>
    %425 = math.exp %424 : vector<8x8xf32>
    %cst_130 = arith.constant dense<0.000000e+00> : vector<8xf32>
    %426 = vector.multi_reduction <add>, %425, %cst_130 [1] : vector<8x8xf32> to vector<8xf32>
    %427 = vector.shape_cast %426 : vector<8xf32> to vector<8x1xf32>
    %428 = tpu.reciprocal %427 {approx = true} : vector<8x1xf32> -> vector<8x1xf32>
    %429 = vector.broadcast %428 : vector<8x1xf32> to vector<8x8xf32>
    %430 = arith.mulf %425, %429 : vector<8x8xf32>
    %431 = arith.truncf %430 : vector<8x8xf32> to vector<8x8xbf16>
    %432 = arith.truncf %415 : vector<8x8xf32> to vector<8x8xbf16>
    %cst_131 = arith.constant dense<0.000000e+00> : vector<8x8xf32>
    %433 = tpu.matmul %431, %432, %cst_131 {dimension_numbers = #tpu.dot_dimension_numbers<[1], [0], [0], [1], [0, 0, 1, 1], [], []>} : vector<8x8xbf16>, vector<8x8xbf16>, vector<8x8xf32> -> vector<8x8xf32>
    %434 = vector.extract_strided_slice %368 {offsets = [0, 24], sizes = [8, 8], strides = [1, 1]} : vector<8x32xf32> to vector<8x8xf32>
    %435 = vector.extract_strided_slice %369 {offsets = [0, 24], sizes = [8, 8], strides = [1, 1]} : vector<8x32xf32> to vector<8x8xf32>
    %436 = vector.extract_strided_slice %370 {offsets = [0, 24], sizes = [8, 8], strides = [1, 1]} : vector<8x32xf32> to vector<8x8xf32>
    %437 = arith.truncf %434 : vector<8x8xf32> to vector<8x8xbf16>
    %438 = arith.truncf %435 : vector<8x8xf32> to vector<8x8xbf16>
    %cst_132 = arith.constant dense<0.000000e+00> : vector<8x8xf32>
    %439 = tpu.matmul %437, %438, %cst_132 {dimension_numbers = #tpu.dot_dimension_numbers<[1], [1], [0], [0], [0, 0, 1, 0], [], []>} : vector<8x8xbf16>, vector<8x8xbf16>, vector<8x8xf32> -> vector<8x8xf32>
    %cst_133 = arith.constant 0.353553385 : f32
    %440 = vector.broadcast %cst_133 : f32 to vector<8x8xf32>
    %441 = arith.mulf %439, %440 : vector<8x8xf32>
    %cst_134 = arith.constant dense<0xFF800000> : vector<8xf32>
    %442 = vector.multi_reduction <maximumf>, %441, %cst_134 [1] : vector<8x8xf32> to vector<8xf32>
    %443 = vector.shape_cast %442 : vector<8xf32> to vector<8x1xf32>
    %444 = vector.broadcast %443 : vector<8x1xf32> to vector<8x8xf32>
    %445 = arith.subf %441, %444 : vector<8x8xf32>
    %446 = math.exp %445 : vector<8x8xf32>
    %cst_135 = arith.constant dense<0.000000e+00> : vector<8xf32>
    %447 = vector.multi_reduction <add>, %446, %cst_135 [1] : vector<8x8xf32> to vector<8xf32>
    %448 = vector.shape_cast %447 : vector<8xf32> to vector<8x1xf32>
    %449 = tpu.reciprocal %448 {approx = true} : vector<8x1xf32> -> vector<8x1xf32>
    %450 = vector.broadcast %449 : vector<8x1xf32> to vector<8x8xf32>
    %451 = arith.mulf %446, %450 : vector<8x8xf32>
    %452 = arith.truncf %451 : vector<8x8xf32> to vector<8x8xbf16>
    %453 = arith.truncf %436 : vector<8x8xf32> to vector<8x8xbf16>
    %cst_136 = arith.constant dense<0.000000e+00> : vector<8x8xf32>
    %454 = tpu.matmul %452, %453, %cst_136 {dimension_numbers = #tpu.dot_dimension_numbers<[1], [0], [0], [1], [0, 0, 1, 1], [], []>} : vector<8x8xbf16>, vector<8x8xbf16>, vector<8x8xf32> -> vector<8x8xf32>
    %455 = tpu.concatenate %391, %412, %433, %454 in 1 : vector<8x8xf32>, vector<8x8xf32>, vector<8x8xf32>, vector<8x8xf32> -> vector<8x32xf32>
    %456 = tpu.concatenate %367, %455 in 0 : vector<8x32xf32>, vector<8x32xf32> -> vector<16x32xf32>
    %c1_137 = arith.constant 1 : index
    %c0_138 = arith.constant 0 : index
    %c0_139 = arith.constant 0 : index
    %457 = vector.load %arg3[%c1_137, %c0_138, %c0_139] : memref<2x32x32xbf16, #tpu.memory_space<vmem>>, vector<1x32x32xbf16>
    %458 = vector.shape_cast %457 : vector<1x32x32xbf16> to vector<32x32xbf16>
    %c1_140 = arith.constant 1 : index
    %c0_141 = arith.constant 0 : index
    %c0_142 = arith.constant 0 : index
    %459 = vector.load %arg4[%c1_140, %c0_141, %c0_142] : memref<2x1x32xf32, #tpu.memory_space<vmem>>, vector<1x1x32xf32>
    %460 = vector.shape_cast %459 : vector<1x1x32xf32> to vector<1x32xf32>
    %461 = arith.truncf %456 : vector<16x32xf32> to vector<16x32xbf16>
    %cst_143 = arith.constant dense<0.000000e+00> : vector<16x32xf32>
    %462 = tpu.matmul %461, %458, %cst_143 {dimension_numbers = #tpu.dot_dimension_numbers<[1], [0], [0], [1], [0, 0, 1, 1], [], []>} : vector<16x32xbf16>, vector<32x32xbf16>, vector<16x32xf32> -> vector<16x32xf32>
    %463 = vector.broadcast %460 : vector<1x32xf32> to vector<16x32xf32>
    %464 = arith.addf %462, %463 : vector<16x32xf32>
    %465 = arith.addf %268, %464 : vector<16x32xf32>
    %c1_144 = arith.constant 1 : index
    %c0_145 = arith.constant 0 : index
    %c0_146 = arith.constant 0 : index
    %466 = vector.load %arg5[%c1_144, %c0_145, %c0_146] : memref<2x1x32xf32, #tpu.memory_space<vmem>>, vector<1x1x32xf32>
    %467 = vector.shape_cast %466 : vector<1x1x32xf32> to vector<1x32xf32>
    %c1_147 = arith.constant 1 : index
    %c0_148 = arith.constant 0 : index
    %c0_149 = arith.constant 0 : index
    %468 = vector.load %arg6[%c1_147, %c0_148, %c0_149] : memref<2x1x32xf32, #tpu.memory_space<vmem>>, vector<1x1x32xf32>
    %469 = vector.shape_cast %468 : vector<1x1x32xf32> to vector<1x32xf32>
    %cst_150 = arith.constant dense<0.000000e+00> : vector<16xf32>
    %470 = vector.multi_reduction <add>, %465, %cst_150 [1] : vector<16x32xf32> to vector<16xf32>
    %471 = vector.shape_cast %470 : vector<16xf32> to vector<16x1xf32>
    %cst_151 = arith.constant 3.200000e+01 : f32
    %472 = vector.broadcast %cst_151 : f32 to vector<16x1xf32>
    %473 = arith.divf %471, %472 : vector<16x1xf32>
    %474 = vector.broadcast %473 : vector<16x1xf32> to vector<16x32xf32>
    %475 = arith.subf %465, %474 : vector<16x32xf32>
    %476 = arith.mulf %475, %475 : vector<16x32xf32>
    %cst_152 = arith.constant dense<0.000000e+00> : vector<16xf32>
    %477 = vector.multi_reduction <add>, %476, %cst_152 [1] : vector<16x32xf32> to vector<16xf32>
    %478 = vector.shape_cast %477 : vector<16xf32> to vector<16x1xf32>
    %cst_153 = arith.constant 3.200000e+01 : f32
    %479 = vector.broadcast %cst_153 : f32 to vector<16x1xf32>
    %480 = arith.divf %478, %479 : vector<16x1xf32>
    %481 = vector.broadcast %473 : vector<16x1xf32> to vector<16x32xf32>
    %482 = arith.subf %465, %481 : vector<16x32xf32>
    %cst_154 = arith.constant 9.99999974E-6 : f32
    %483 = vector.broadcast %cst_154 : f32 to vector<16x1xf32>
    %484 = arith.addf %480, %483 : vector<16x1xf32>
    %485 = math.rsqrt %484 : vector<16x1xf32>
    %486 = vector.broadcast %485 : vector<16x1xf32> to vector<16x32xf32>
    %487 = arith.mulf %482, %486 : vector<16x32xf32>
    %488 = vector.broadcast %467 : vector<1x32xf32> to vector<16x32xf32>
    %489 = arith.mulf %487, %488 : vector<16x32xf32>
    %490 = vector.broadcast %469 : vector<1x32xf32> to vector<16x32xf32>
    %491 = arith.addf %489, %490 : vector<16x32xf32>
    %c1_155 = arith.constant 1 : index
    %c0_156 = arith.constant 0 : index
    %c0_157 = arith.constant 0 : index
    %492 = vector.load %arg7[%c1_155, %c0_156, %c0_157] : memref<2x32x64xbf16, #tpu.memory_space<vmem>>, vector<1x32x64xbf16>
    %493 = vector.shape_cast %492 : vector<1x32x64xbf16> to vector<32x64xbf16>
    %c1_158 = arith.constant 1 : index
    %c0_159 = arith.constant 0 : index
    %c0_160 = arith.constant 0 : index
    %494 = vector.load %arg8[%c1_158, %c0_159, %c0_160] : memref<2x1x64xf32, #tpu.memory_space<vmem>>, vector<1x1x64xf32>
    %495 = vector.shape_cast %494 : vector<1x1x64xf32> to vector<1x64xf32>
    %496 = arith.truncf %491 : vector<16x32xf32> to vector<16x32xbf16>
    %cst_161 = arith.constant dense<0.000000e+00> : vector<16x64xf32>
    %497 = tpu.matmul %496, %493, %cst_161 {dimension_numbers = #tpu.dot_dimension_numbers<[1], [0], [0], [1], [0, 0, 1, 1], [], []>} : vector<16x32xbf16>, vector<32x64xbf16>, vector<16x64xf32> -> vector<16x64xf32>
    %498 = vector.broadcast %495 : vector<1x64xf32> to vector<16x64xf32>
    %499 = arith.addf %497, %498 : vector<16x64xf32>
    %cst_162 = arith.constant 0.000000e+00 : f32
    %500 = vector.broadcast %cst_162 : f32 to vector<16x64xf32>
    %501 = arith.maximumf %499, %500 : vector<16x64xf32>
    %c1_163 = arith.constant 1 : index
    %c0_164 = arith.constant 0 : index
    %c0_165 = arith.constant 0 : index
    %502 = vector.load %arg9[%c1_163, %c0_164, %c0_165] : memref<2x64x32xbf16, #tpu.memory_space<vmem>>, vector<1x64x32xbf16>
    %503 = vector.shape_cast %502 : vector<1x64x32xbf16> to vector<64x32xbf16>
    %c1_166 = arith.constant 1 : index
    %c0_167 = arith.constant 0 : index
    %c0_168 = arith.constant 0 : index
    %504 = vector.load %arg10[%c1_166, %c0_167, %c0_168] : memref<2x1x32xf32, #tpu.memory_space<vmem>>, vector<1x1x32xf32>
    %505 = vector.shape_cast %504 : vector<1x1x32xf32> to vector<1x32xf32>
    %506 = arith.truncf %501 : vector<16x64xf32> to vector<16x64xbf16>
    %cst_169 = arith.constant dense<0.000000e+00> : vector<16x32xf32>
    %507 = tpu.matmul %506, %503, %cst_169 {dimension_numbers = #tpu.dot_dimension_numbers<[1], [0], [0], [1], [0, 0, 1, 1], [], []>} : vector<16x64xbf16>, vector<64x32xbf16>, vector<16x32xf32> -> vector<16x32xf32>
    %508 = vector.broadcast %505 : vector<1x32xf32> to vector<16x32xf32>
    %509 = arith.addf %507, %508 : vector<16x32xf32>
    %510 = arith.addf %491, %509 : vector<16x32xf32>
    %c1_170 = arith.constant 1 : index
    %c0_171 = arith.constant 0 : index
    %c0_172 = arith.constant 0 : index
    %511 = vector.load %arg11[%c1_170, %c0_171, %c0_172] : memref<2x1x32xf32, #tpu.memory_space<vmem>>, vector<1x1x32xf32>
    %512 = vector.shape_cast %511 : vector<1x1x32xf32> to vector<1x32xf32>
    %c1_173 = arith.constant 1 : index
    %c0_174 = arith.constant 0 : index
    %c0_175 = arith.constant 0 : index
    %513 = vector.load %arg12[%c1_173, %c0_174, %c0_175] : memref<2x1x32xf32, #tpu.memory_space<vmem>>, vector<1x1x32xf32>
    %514 = vector.shape_cast %513 : vector<1x1x32xf32> to vector<1x32xf32>
    %cst_176 = arith.constant dense<0.000000e+00> : vector<16xf32>
    %515 = vector.multi_reduction <add>, %510, %cst_176 [1] : vector<16x32xf32> to vector<16xf32>
    %516 = vector.shape_cast %515 : vector<16xf32> to vector<16x1xf32>
    %cst_177 = arith.constant 3.200000e+01 : f32
    %517 = vector.broadcast %cst_177 : f32 to vector<16x1xf32>
    %518 = arith.divf %516, %517 : vector<16x1xf32>
    %519 = vector.broadcast %518 : vector<16x1xf32> to vector<16x32xf32>
    %520 = arith.subf %510, %519 : vector<16x32xf32>
    %521 = arith.mulf %520, %520 : vector<16x32xf32>
    %cst_178 = arith.constant dense<0.000000e+00> : vector<16xf32>
    %522 = vector.multi_reduction <add>, %521, %cst_178 [1] : vector<16x32xf32> to vector<16xf32>
    %523 = vector.shape_cast %522 : vector<16xf32> to vector<16x1xf32>
    %cst_179 = arith.constant 3.200000e+01 : f32
    %524 = vector.broadcast %cst_179 : f32 to vector<16x1xf32>
    %525 = arith.divf %523, %524 : vector<16x1xf32>
    %526 = vector.broadcast %518 : vector<16x1xf32> to vector<16x32xf32>
    %527 = arith.subf %510, %526 : vector<16x32xf32>
    %cst_180 = arith.constant 9.99999974E-6 : f32
    %528 = vector.broadcast %cst_180 : f32 to vector<16x1xf32>
    %529 = arith.addf %525, %528 : vector<16x1xf32>
    %530 = math.rsqrt %529 : vector<16x1xf32>
    %531 = vector.broadcast %530 : vector<16x1xf32> to vector<16x32xf32>
    %532 = arith.mulf %527, %531 : vector<16x32xf32>
    %533 = vector.broadcast %512 : vector<1x32xf32> to vector<16x32xf32>
    %534 = arith.mulf %532, %533 : vector<16x32xf32>
    %535 = vector.broadcast %514 : vector<1x32xf32> to vector<16x32xf32>
    %536 = arith.addf %534, %535 : vector<16x32xf32>
    %c0_181 = arith.constant 0 : index
    %c0_182 = arith.constant 0 : index
    %537 = vector.load %arg13[%c0_181, %c0_182] : memref<16x32xf32, #tpu.memory_space<vmem>>, vector<16x32xf32>
    tpu.vector_store %arg13[%c0_181, %c0_182], %536 {strides = array<i32>} : memref<16x32xf32, #tpu.memory_space<vmem>>, vector<16x32xf32>,
    return
  }
}

module attributes {stable_mosaic.version = 11 : i64} {
  func.func @_decoder_kernel(%arg0: memref<16x32xf32, #tpu.memory_space<vmem>>, %arg1: memref<16x32xf32, #tpu.memory_space<vmem>>, %arg2: memref<2x32x96xbf16, #tpu.memory_space<vmem>>, %arg3: memref<2x1x96xf32, #tpu.memory_space<vmem>>, %arg4: memref<2x32x32xbf16, #tpu.memory_space<vmem>>, %arg5: memref<2x1x32xf32, #tpu.memory_space<vmem>>, %arg6: memref<2x1x32xf32, #tpu.memory_space<vmem>>, %arg7: memref<2x1x32xf32, #tpu.memory_space<vmem>>, %arg8: memref<2x32x32xbf16, #tpu.memory_space<vmem>>, %arg9: memref<2x1x32xf32, #tpu.memory_space<vmem>>, %arg10: memref<2x32x64xbf16, #tpu.memory_space<vmem>>, %arg11: memref<2x1x64xf32, #tpu.memory_space<vmem>>, %arg12: memref<2x32x32xbf16, #tpu.memory_space<vmem>>, %arg13: memref<2x1x32xf32, #tpu.memory_space<vmem>>, %arg14: memref<2x1x32xf32, #tpu.memory_space<vmem>>, %arg15: memref<2x1x32xf32, #tpu.memory_space<vmem>>, %arg16: memref<2x32x64xbf16, #tpu.memory_space<vmem>>, %arg17: memref<2x1x64xf32, #tpu.memory_space<vmem>>, %arg18: memref<2x64x32xbf16, #tpu.memory_space<vmem>>, %arg19: memref<2x1x32xf32, #tpu.memory_space<vmem>>, %arg20: memref<2x1x32xf32, #tpu.memory_space<vmem>>, %arg21: memref<2x1x32xf32, #tpu.memory_space<vmem>>, %arg22: memref<32x128xbf16, #tpu.memory_space<vmem>>, %arg23: memref<1x128xf32, #tpu.memory_space<vmem>>, %arg24: memref<16x128xf32, #tpu.memory_space<vmem>>) attributes {dimension_semantics = [], scalar_prefetch = 0 : i64, scratch_operands = 0 : i64, tpu.core_type = #tpu.core_type<tc>} {
    %c0 = arith.constant 0 : index
    %c0_0 = arith.constant 0 : index
    %0 = vector.load %arg0[%c0, %c0_0] : memref<16x32xf32, #tpu.memory_space<vmem>>, vector<16x32xf32>
    %c0_1 = arith.constant 0 : index
    %c0_2 = arith.constant 0 : index
    %1 = vector.load %arg1[%c0_1, %c0_2] : memref<16x32xf32, #tpu.memory_space<vmem>>, vector<16x32xf32>
    %2 = tpu.iota {dimensions = array<i32: 0>} : vector<8x8xi32>
    %3 = tpu.iota {dimensions = array<i32: 1>} : vector<8x8xi32>
    %4 = arith.cmpi sgt, %3, %2 : vector<8x8xi32>
    %cst = arith.constant -1.000000e+09 : f32
    %cst_3 = arith.constant 0.000000e+00 : f32
    %5 = vector.broadcast %cst : f32 to vector<8x8xf32>
    %6 = vector.broadcast %cst_3 : f32 to vector<8x8xf32>
    %7 = arith.select %4, %5, %6 : vector<8x8xi1>, vector<8x8xf32>
    %c0_4 = arith.constant 0 : index
    %c0_5 = arith.constant 0 : index
    %c0_6 = arith.constant 0 : index
    %8 = vector.load %arg2[%c0_4, %c0_5, %c0_6] : memref<2x32x96xbf16, #tpu.memory_space<vmem>>, vector<1x32x96xbf16>
    %9 = vector.shape_cast %8 : vector<1x32x96xbf16> to vector<32x96xbf16>
    %c0_7 = arith.constant 0 : index
    %c0_8 = arith.constant 0 : index
    %c0_9 = arith.constant 0 : index
    %10 = vector.load %arg3[%c0_7, %c0_8, %c0_9] : memref<2x1x96xf32, #tpu.memory_space<vmem>>, vector<1x1x96xf32>
    %11 = vector.shape_cast %10 : vector<1x1x96xf32> to vector<1x96xf32>
    %12 = arith.truncf %0 : vector<16x32xf32> to vector<16x32xbf16>
    %cst_10 = arith.constant dense<0.000000e+00> : vector<16x96xf32>
    %13 = tpu.matmul %12, %9, %cst_10 {dimension_numbers = #tpu.dot_dimension_numbers<[1], [0], [0], [1], [0, 0, 1, 1], [], []>} : vector<16x32xbf16>, vector<32x96xbf16>, vector<16x96xf32> -> vector<16x96xf32>
    %14 = vector.broadcast %11 : vector<1x96xf32> to vector<16x96xf32>
    %15 = arith.addf %13, %14 : vector<16x96xf32>
    %16 = vector.extract_strided_slice %15 {offsets = [0, 0], sizes = [16, 32], strides = [1, 1]} : vector<16x96xf32> to vector<16x32xf32>
    %17 = vector.extract_strided_slice %15 {offsets = [0, 32], sizes = [16, 32], strides = [1, 1]} : vector<16x96xf32> to vector<16x32xf32>
    %18 = vector.extract_strided_slice %15 {offsets = [0, 64], sizes = [16, 32], strides = [1, 1]} : vector<16x96xf32> to vector<16x32xf32>
    %19 = vector.extract_strided_slice %16 {offsets = [0, 0], sizes = [8, 32], strides = [1, 1]} : vector<16x32xf32> to vector<8x32xf32>
    %20 = vector.extract_strided_slice %17 {offsets = [0, 0], sizes = [8, 32], strides = [1, 1]} : vector<16x32xf32> to vector<8x32xf32>
    %21 = vector.extract_strided_slice %18 {offsets = [0, 0], sizes = [8, 32], strides = [1, 1]} : vector<16x32xf32> to vector<8x32xf32>
    %22 = vector.extract_strided_slice %19 {offsets = [0, 0], sizes = [8, 8], strides = [1, 1]} : vector<8x32xf32> to vector<8x8xf32>
    %23 = vector.extract_strided_slice %20 {offsets = [0, 0], sizes = [8, 8], strides = [1, 1]} : vector<8x32xf32> to vector<8x8xf32>
    %24 = vector.extract_strided_slice %21 {offsets = [0, 0], sizes = [8, 8], strides = [1, 1]} : vector<8x32xf32> to vector<8x8xf32>
    %25 = arith.truncf %22 : vector<8x8xf32> to vector<8x8xbf16>
    %26 = arith.truncf %23 : vector<8x8xf32> to vector<8x8xbf16>
    %cst_11 = arith.constant dense<0.000000e+00> : vector<8x8xf32>
    %27 = tpu.matmul %25, %26, %cst_11 {dimension_numbers = #tpu.dot_dimension_numbers<[1], [1], [0], [0], [0, 0, 1, 0], [], []>} : vector<8x8xbf16>, vector<8x8xbf16>, vector<8x8xf32> -> vector<8x8xf32>
    %cst_12 = arith.constant 0.353553385 : f32
    %28 = vector.broadcast %cst_12 : f32 to vector<8x8xf32>
    %29 = arith.mulf %27, %28 : vector<8x8xf32>
    %30 = arith.addf %29, %7 : vector<8x8xf32>
    %cst_13 = arith.constant dense<0xFF800000> : vector<8xf32>
    %31 = vector.multi_reduction <maximumf>, %30, %cst_13 [1] : vector<8x8xf32> to vector<8xf32>
    %32 = vector.shape_cast %31 : vector<8xf32> to vector<8x1xf32>
    %33 = vector.broadcast %32 : vector<8x1xf32> to vector<8x8xf32>
    %34 = arith.subf %30, %33 : vector<8x8xf32>
    %35 = math.exp %34 : vector<8x8xf32>
    %cst_14 = arith.constant dense<0.000000e+00> : vector<8xf32>
    %36 = vector.multi_reduction <add>, %35, %cst_14 [1] : vector<8x8xf32> to vector<8xf32>
    %37 = vector.shape_cast %36 : vector<8xf32> to vector<8x1xf32>
    %38 = tpu.reciprocal %37 {approx = true} : vector<8x1xf32> -> vector<8x1xf32>
    %39 = vector.broadcast %38 : vector<8x1xf32> to vector<8x8xf32>
    %40 = arith.mulf %35, %39 : vector<8x8xf32>
    %41 = arith.truncf %40 : vector<8x8xf32> to vector<8x8xbf16>
    %42 = arith.truncf %24 : vector<8x8xf32> to vector<8x8xbf16>
    %cst_15 = arith.constant dense<0.000000e+00> : vector<8x8xf32>
    %43 = tpu.matmul %41, %42, %cst_15 {dimension_numbers = #tpu.dot_dimension_numbers<[1], [0], [0], [1], [0, 0, 1, 1], [], []>} : vector<8x8xbf16>, vector<8x8xbf16>, vector<8x8xf32> -> vector<8x8xf32>
    %44 = vector.extract_strided_slice %19 {offsets = [0, 8], sizes = [8, 8], strides = [1, 1]} : vector<8x32xf32> to vector<8x8xf32>
    %45 = vector.extract_strided_slice %20 {offsets = [0, 8], sizes = [8, 8], strides = [1, 1]} : vector<8x32xf32> to vector<8x8xf32>
    %46 = vector.extract_strided_slice %21 {offsets = [0, 8], sizes = [8, 8], strides = [1, 1]} : vector<8x32xf32> to vector<8x8xf32>
    %47 = arith.truncf %44 : vector<8x8xf32> to vector<8x8xbf16>
    %48 = arith.truncf %45 : vector<8x8xf32> to vector<8x8xbf16>
    %cst_16 = arith.constant dense<0.000000e+00> : vector<8x8xf32>
    %49 = tpu.matmul %47, %48, %cst_16 {dimension_numbers = #tpu.dot_dimension_numbers<[1], [1], [0], [0], [0, 0, 1, 0], [], []>} : vector<8x8xbf16>, vector<8x8xbf16>, vector<8x8xf32> -> vector<8x8xf32>
    %cst_17 = arith.constant 0.353553385 : f32
    %50 = vector.broadcast %cst_17 : f32 to vector<8x8xf32>
    %51 = arith.mulf %49, %50 : vector<8x8xf32>
    %52 = arith.addf %51, %7 : vector<8x8xf32>
    %cst_18 = arith.constant dense<0xFF800000> : vector<8xf32>
    %53 = vector.multi_reduction <maximumf>, %52, %cst_18 [1] : vector<8x8xf32> to vector<8xf32>
    %54 = vector.shape_cast %53 : vector<8xf32> to vector<8x1xf32>
    %55 = vector.broadcast %54 : vector<8x1xf32> to vector<8x8xf32>
    %56 = arith.subf %52, %55 : vector<8x8xf32>
    %57 = math.exp %56 : vector<8x8xf32>
    %cst_19 = arith.constant dense<0.000000e+00> : vector<8xf32>
    %58 = vector.multi_reduction <add>, %57, %cst_19 [1] : vector<8x8xf32> to vector<8xf32>
    %59 = vector.shape_cast %58 : vector<8xf32> to vector<8x1xf32>
    %60 = tpu.reciprocal %59 {approx = true} : vector<8x1xf32> -> vector<8x1xf32>
    %61 = vector.broadcast %60 : vector<8x1xf32> to vector<8x8xf32>
    %62 = arith.mulf %57, %61 : vector<8x8xf32>
    %63 = arith.truncf %62 : vector<8x8xf32> to vector<8x8xbf16>
    %64 = arith.truncf %46 : vector<8x8xf32> to vector<8x8xbf16>
    %cst_20 = arith.constant dense<0.000000e+00> : vector<8x8xf32>
    %65 = tpu.matmul %63, %64, %cst_20 {dimension_numbers = #tpu.dot_dimension_numbers<[1], [0], [0], [1], [0, 0, 1, 1], [], []>} : vector<8x8xbf16>, vector<8x8xbf16>, vector<8x8xf32> -> vector<8x8xf32>
    %66 = vector.extract_strided_slice %19 {offsets = [0, 16], sizes = [8, 8], strides = [1, 1]} : vector<8x32xf32> to vector<8x8xf32>
    %67 = vector.extract_strided_slice %20 {offsets = [0, 16], sizes = [8, 8], strides = [1, 1]} : vector<8x32xf32> to vector<8x8xf32>
    %68 = vector.extract_strided_slice %21 {offsets = [0, 16], sizes = [8, 8], strides = [1, 1]} : vector<8x32xf32> to vector<8x8xf32>
    %69 = arith.truncf %66 : vector<8x8xf32> to vector<8x8xbf16>
    %70 = arith.truncf %67 : vector<8x8xf32> to vector<8x8xbf16>
    %cst_21 = arith.constant dense<0.000000e+00> : vector<8x8xf32>
    %71 = tpu.matmul %69, %70, %cst_21 {dimension_numbers = #tpu.dot_dimension_numbers<[1], [1], [0], [0], [0, 0, 1, 0], [], []>} : vector<8x8xbf16>, vector<8x8xbf16>, vector<8x8xf32> -> vector<8x8xf32>
    %cst_22 = arith.constant 0.353553385 : f32
    %72 = vector.broadcast %cst_22 : f32 to vector<8x8xf32>
    %73 = arith.mulf %71, %72 : vector<8x8xf32>
    %74 = arith.addf %73, %7 : vector<8x8xf32>
    %cst_23 = arith.constant dense<0xFF800000> : vector<8xf32>
    %75 = vector.multi_reduction <maximumf>, %74, %cst_23 [1] : vector<8x8xf32> to vector<8xf32>
    %76 = vector.shape_cast %75 : vector<8xf32> to vector<8x1xf32>
    %77 = vector.broadcast %76 : vector<8x1xf32> to vector<8x8xf32>
    %78 = arith.subf %74, %77 : vector<8x8xf32>
    %79 = math.exp %78 : vector<8x8xf32>
    %cst_24 = arith.constant dense<0.000000e+00> : vector<8xf32>
    %80 = vector.multi_reduction <add>, %79, %cst_24 [1] : vector<8x8xf32> to vector<8xf32>
    %81 = vector.shape_cast %80 : vector<8xf32> to vector<8x1xf32>
    %82 = tpu.reciprocal %81 {approx = true} : vector<8x1xf32> -> vector<8x1xf32>
    %83 = vector.broadcast %82 : vector<8x1xf32> to vector<8x8xf32>
    %84 = arith.mulf %79, %83 : vector<8x8xf32>
    %85 = arith.truncf %84 : vector<8x8xf32> to vector<8x8xbf16>
    %86 = arith.truncf %68 : vector<8x8xf32> to vector<8x8xbf16>
    %cst_25 = arith.constant dense<0.000000e+00> : vector<8x8xf32>
    %87 = tpu.matmul %85, %86, %cst_25 {dimension_numbers = #tpu.dot_dimension_numbers<[1], [0], [0], [1], [0, 0, 1, 1], [], []>} : vector<8x8xbf16>, vector<8x8xbf16>, vector<8x8xf32> -> vector<8x8xf32>
    %88 = vector.extract_strided_slice %19 {offsets = [0, 24], sizes = [8, 8], strides = [1, 1]} : vector<8x32xf32> to vector<8x8xf32>
    %89 = vector.extract_strided_slice %20 {offsets = [0, 24], sizes = [8, 8], strides = [1, 1]} : vector<8x32xf32> to vector<8x8xf32>
    %90 = vector.extract_strided_slice %21 {offsets = [0, 24], sizes = [8, 8], strides = [1, 1]} : vector<8x32xf32> to vector<8x8xf32>
    %91 = arith.truncf %88 : vector<8x8xf32> to vector<8x8xbf16>
    %92 = arith.truncf %89 : vector<8x8xf32> to vector<8x8xbf16>
    %cst_26 = arith.constant dense<0.000000e+00> : vector<8x8xf32>
    %93 = tpu.matmul %91, %92, %cst_26 {dimension_numbers = #tpu.dot_dimension_numbers<[1], [1], [0], [0], [0, 0, 1, 0], [], []>} : vector<8x8xbf16>, vector<8x8xbf16>, vector<8x8xf32> -> vector<8x8xf32>
    %cst_27 = arith.constant 0.353553385 : f32
    %94 = vector.broadcast %cst_27 : f32 to vector<8x8xf32>
    %95 = arith.mulf %93, %94 : vector<8x8xf32>
    %96 = arith.addf %95, %7 : vector<8x8xf32>
    %cst_28 = arith.constant dense<0xFF800000> : vector<8xf32>
    %97 = vector.multi_reduction <maximumf>, %96, %cst_28 [1] : vector<8x8xf32> to vector<8xf32>
    %98 = vector.shape_cast %97 : vector<8xf32> to vector<8x1xf32>
    %99 = vector.broadcast %98 : vector<8x1xf32> to vector<8x8xf32>
    %100 = arith.subf %96, %99 : vector<8x8xf32>
    %101 = math.exp %100 : vector<8x8xf32>
    %cst_29 = arith.constant dense<0.000000e+00> : vector<8xf32>
    %102 = vector.multi_reduction <add>, %101, %cst_29 [1] : vector<8x8xf32> to vector<8xf32>
    %103 = vector.shape_cast %102 : vector<8xf32> to vector<8x1xf32>
    %104 = tpu.reciprocal %103 {approx = true} : vector<8x1xf32> -> vector<8x1xf32>
    %105 = vector.broadcast %104 : vector<8x1xf32> to vector<8x8xf32>
    %106 = arith.mulf %101, %105 : vector<8x8xf32>
    %107 = arith.truncf %106 : vector<8x8xf32> to vector<8x8xbf16>
    %108 = arith.truncf %90 : vector<8x8xf32> to vector<8x8xbf16>
    %cst_30 = arith.constant dense<0.000000e+00> : vector<8x8xf32>
    %109 = tpu.matmul %107, %108, %cst_30 {dimension_numbers = #tpu.dot_dimension_numbers<[1], [0], [0], [1], [0, 0, 1, 1], [], []>} : vector<8x8xbf16>, vector<8x8xbf16>, vector<8x8xf32> -> vector<8x8xf32>
    %110 = tpu.concatenate %43, %65, %87, %109 in 1 : vector<8x8xf32>, vector<8x8xf32>, vector<8x8xf32>, vector<8x8xf32> -> vector<8x32xf32>
    %111 = vector.extract_strided_slice %16 {offsets = [8, 0], sizes = [8, 32], strides = [1, 1]} : vector<16x32xf32> to vector<8x32xf32>
    %112 = vector.extract_strided_slice %17 {offsets = [8, 0], sizes = [8, 32], strides = [1, 1]} : vector<16x32xf32> to vector<8x32xf32>
    %113 = vector.extract_strided_slice %18 {offsets = [8, 0], sizes = [8, 32], strides = [1, 1]} : vector<16x32xf32> to vector<8x32xf32>
    %114 = vector.extract_strided_slice %111 {offsets = [0, 0], sizes = [8, 8], strides = [1, 1]} : vector<8x32xf32> to vector<8x8xf32>
    %115 = vector.extract_strided_slice %112 {offsets = [0, 0], sizes = [8, 8], strides = [1, 1]} : vector<8x32xf32> to vector<8x8xf32>
    %116 = vector.extract_strided_slice %113 {offsets = [0, 0], sizes = [8, 8], strides = [1, 1]} : vector<8x32xf32> to vector<8x8xf32>
    %117 = arith.truncf %114 : vector<8x8xf32> to vector<8x8xbf16>
    %118 = arith.truncf %115 : vector<8x8xf32> to vector<8x8xbf16>
    %cst_31 = arith.constant dense<0.000000e+00> : vector<8x8xf32>
    %119 = tpu.matmul %117, %118, %cst_31 {dimension_numbers = #tpu.dot_dimension_numbers<[1], [1], [0], [0], [0, 0, 1, 0], [], []>} : vector<8x8xbf16>, vector<8x8xbf16>, vector<8x8xf32> -> vector<8x8xf32>
    %cst_32 = arith.constant 0.353553385 : f32
    %120 = vector.broadcast %cst_32 : f32 to vector<8x8xf32>
    %121 = arith.mulf %119, %120 : vector<8x8xf32>
    %122 = arith.addf %121, %7 : vector<8x8xf32>
    %cst_33 = arith.constant dense<0xFF800000> : vector<8xf32>
    %123 = vector.multi_reduction <maximumf>, %122, %cst_33 [1] : vector<8x8xf32> to vector<8xf32>
    %124 = vector.shape_cast %123 : vector<8xf32> to vector<8x1xf32>
    %125 = vector.broadcast %124 : vector<8x1xf32> to vector<8x8xf32>
    %126 = arith.subf %122, %125 : vector<8x8xf32>
    %127 = math.exp %126 : vector<8x8xf32>
    %cst_34 = arith.constant dense<0.000000e+00> : vector<8xf32>
    %128 = vector.multi_reduction <add>, %127, %cst_34 [1] : vector<8x8xf32> to vector<8xf32>
    %129 = vector.shape_cast %128 : vector<8xf32> to vector<8x1xf32>
    %130 = tpu.reciprocal %129 {approx = true} : vector<8x1xf32> -> vector<8x1xf32>
    %131 = vector.broadcast %130 : vector<8x1xf32> to vector<8x8xf32>
    %132 = arith.mulf %127, %131 : vector<8x8xf32>
    %133 = arith.truncf %132 : vector<8x8xf32> to vector<8x8xbf16>
    %134 = arith.truncf %116 : vector<8x8xf32> to vector<8x8xbf16>
    %cst_35 = arith.constant dense<0.000000e+00> : vector<8x8xf32>
    %135 = tpu.matmul %133, %134, %cst_35 {dimension_numbers = #tpu.dot_dimension_numbers<[1], [0], [0], [1], [0, 0, 1, 1], [], []>} : vector<8x8xbf16>, vector<8x8xbf16>, vector<8x8xf32> -> vector<8x8xf32>
    %136 = vector.extract_strided_slice %111 {offsets = [0, 8], sizes = [8, 8], strides = [1, 1]} : vector<8x32xf32> to vector<8x8xf32>
    %137 = vector.extract_strided_slice %112 {offsets = [0, 8], sizes = [8, 8], strides = [1, 1]} : vector<8x32xf32> to vector<8x8xf32>
    %138 = vector.extract_strided_slice %113 {offsets = [0, 8], sizes = [8, 8], strides = [1, 1]} : vector<8x32xf32> to vector<8x8xf32>
    %139 = arith.truncf %136 : vector<8x8xf32> to vector<8x8xbf16>
    %140 = arith.truncf %137 : vector<8x8xf32> to vector<8x8xbf16>
    %cst_36 = arith.constant dense<0.000000e+00> : vector<8x8xf32>
    %141 = tpu.matmul %139, %140, %cst_36 {dimension_numbers = #tpu.dot_dimension_numbers<[1], [1], [0], [0], [0, 0, 1, 0], [], []>} : vector<8x8xbf16>, vector<8x8xbf16>, vector<8x8xf32> -> vector<8x8xf32>
    %cst_37 = arith.constant 0.353553385 : f32
    %142 = vector.broadcast %cst_37 : f32 to vector<8x8xf32>
    %143 = arith.mulf %141, %142 : vector<8x8xf32>
    %144 = arith.addf %143, %7 : vector<8x8xf32>
    %cst_38 = arith.constant dense<0xFF800000> : vector<8xf32>
    %145 = vector.multi_reduction <maximumf>, %144, %cst_38 [1] : vector<8x8xf32> to vector<8xf32>
    %146 = vector.shape_cast %145 : vector<8xf32> to vector<8x1xf32>
    %147 = vector.broadcast %146 : vector<8x1xf32> to vector<8x8xf32>
    %148 = arith.subf %144, %147 : vector<8x8xf32>
    %149 = math.exp %148 : vector<8x8xf32>
    %cst_39 = arith.constant dense<0.000000e+00> : vector<8xf32>
    %150 = vector.multi_reduction <add>, %149, %cst_39 [1] : vector<8x8xf32> to vector<8xf32>
    %151 = vector.shape_cast %150 : vector<8xf32> to vector<8x1xf32>
    %152 = tpu.reciprocal %151 {approx = true} : vector<8x1xf32> -> vector<8x1xf32>
    %153 = vector.broadcast %152 : vector<8x1xf32> to vector<8x8xf32>
    %154 = arith.mulf %149, %153 : vector<8x8xf32>
    %155 = arith.truncf %154 : vector<8x8xf32> to vector<8x8xbf16>
    %156 = arith.truncf %138 : vector<8x8xf32> to vector<8x8xbf16>
    %cst_40 = arith.constant dense<0.000000e+00> : vector<8x8xf32>
    %157 = tpu.matmul %155, %156, %cst_40 {dimension_numbers = #tpu.dot_dimension_numbers<[1], [0], [0], [1], [0, 0, 1, 1], [], []>} : vector<8x8xbf16>, vector<8x8xbf16>, vector<8x8xf32> -> vector<8x8xf32>
    %158 = vector.extract_strided_slice %111 {offsets = [0, 16], sizes = [8, 8], strides = [1, 1]} : vector<8x32xf32> to vector<8x8xf32>
    %159 = vector.extract_strided_slice %112 {offsets = [0, 16], sizes = [8, 8], strides = [1, 1]} : vector<8x32xf32> to vector<8x8xf32>
    %160 = vector.extract_strided_slice %113 {offsets = [0, 16], sizes = [8, 8], strides = [1, 1]} : vector<8x32xf32> to vector<8x8xf32>
    %161 = arith.truncf %158 : vector<8x8xf32> to vector<8x8xbf16>
    %162 = arith.truncf %159 : vector<8x8xf32> to vector<8x8xbf16>
    %cst_41 = arith.constant dense<0.000000e+00> : vector<8x8xf32>
    %163 = tpu.matmul %161, %162, %cst_41 {dimension_numbers = #tpu.dot_dimension_numbers<[1], [1], [0], [0], [0, 0, 1, 0], [], []>} : vector<8x8xbf16>, vector<8x8xbf16>, vector<8x8xf32> -> vector<8x8xf32>
    %cst_42 = arith.constant 0.353553385 : f32
    %164 = vector.broadcast %cst_42 : f32 to vector<8x8xf32>
    %165 = arith.mulf %163, %164 : vector<8x8xf32>
    %166 = arith.addf %165, %7 : vector<8x8xf32>
    %cst_43 = arith.constant dense<0xFF800000> : vector<8xf32>
    %167 = vector.multi_reduction <maximumf>, %166, %cst_43 [1] : vector<8x8xf32> to vector<8xf32>
    %168 = vector.shape_cast %167 : vector<8xf32> to vector<8x1xf32>
    %169 = vector.broadcast %168 : vector<8x1xf32> to vector<8x8xf32>
    %170 = arith.subf %166, %169 : vector<8x8xf32>
    %171 = math.exp %170 : vector<8x8xf32>
    %cst_44 = arith.constant dense<0.000000e+00> : vector<8xf32>
    %172 = vector.multi_reduction <add>, %171, %cst_44 [1] : vector<8x8xf32> to vector<8xf32>
    %173 = vector.shape_cast %172 : vector<8xf32> to vector<8x1xf32>
    %174 = tpu.reciprocal %173 {approx = true} : vector<8x1xf32> -> vector<8x1xf32>
    %175 = vector.broadcast %174 : vector<8x1xf32> to vector<8x8xf32>
    %176 = arith.mulf %171, %175 : vector<8x8xf32>
    %177 = arith.truncf %176 : vector<8x8xf32> to vector<8x8xbf16>
    %178 = arith.truncf %160 : vector<8x8xf32> to vector<8x8xbf16>
    %cst_45 = arith.constant dense<0.000000e+00> : vector<8x8xf32>
    %179 = tpu.matmul %177, %178, %cst_45 {dimension_numbers = #tpu.dot_dimension_numbers<[1], [0], [0], [1], [0, 0, 1, 1], [], []>} : vector<8x8xbf16>, vector<8x8xbf16>, vector<8x8xf32> -> vector<8x8xf32>
    %180 = vector.extract_strided_slice %111 {offsets = [0, 24], sizes = [8, 8], strides = [1, 1]} : vector<8x32xf32> to vector<8x8xf32>
    %181 = vector.extract_strided_slice %112 {offsets = [0, 24], sizes = [8, 8], strides = [1, 1]} : vector<8x32xf32> to vector<8x8xf32>
    %182 = vector.extract_strided_slice %113 {offsets = [0, 24], sizes = [8, 8], strides = [1, 1]} : vector<8x32xf32> to vector<8x8xf32>
    %183 = arith.truncf %180 : vector<8x8xf32> to vector<8x8xbf16>
    %184 = arith.truncf %181 : vector<8x8xf32> to vector<8x8xbf16>
    %cst_46 = arith.constant dense<0.000000e+00> : vector<8x8xf32>
    %185 = tpu.matmul %183, %184, %cst_46 {dimension_numbers = #tpu.dot_dimension_numbers<[1], [1], [0], [0], [0, 0, 1, 0], [], []>} : vector<8x8xbf16>, vector<8x8xbf16>, vector<8x8xf32> -> vector<8x8xf32>
    %cst_47 = arith.constant 0.353553385 : f32
    %186 = vector.broadcast %cst_47 : f32 to vector<8x8xf32>
    %187 = arith.mulf %185, %186 : vector<8x8xf32>
    %188 = arith.addf %187, %7 : vector<8x8xf32>
    %cst_48 = arith.constant dense<0xFF800000> : vector<8xf32>
    %189 = vector.multi_reduction <maximumf>, %188, %cst_48 [1] : vector<8x8xf32> to vector<8xf32>
    %190 = vector.shape_cast %189 : vector<8xf32> to vector<8x1xf32>
    %191 = vector.broadcast %190 : vector<8x1xf32> to vector<8x8xf32>
    %192 = arith.subf %188, %191 : vector<8x8xf32>
    %193 = math.exp %192 : vector<8x8xf32>
    %cst_49 = arith.constant dense<0.000000e+00> : vector<8xf32>
    %194 = vector.multi_reduction <add>, %193, %cst_49 [1] : vector<8x8xf32> to vector<8xf32>
    %195 = vector.shape_cast %194 : vector<8xf32> to vector<8x1xf32>
    %196 = tpu.reciprocal %195 {approx = true} : vector<8x1xf32> -> vector<8x1xf32>
    %197 = vector.broadcast %196 : vector<8x1xf32> to vector<8x8xf32>
    %198 = arith.mulf %193, %197 : vector<8x8xf32>
    %199 = arith.truncf %198 : vector<8x8xf32> to vector<8x8xbf16>
    %200 = arith.truncf %182 : vector<8x8xf32> to vector<8x8xbf16>
    %cst_50 = arith.constant dense<0.000000e+00> : vector<8x8xf32>
    %201 = tpu.matmul %199, %200, %cst_50 {dimension_numbers = #tpu.dot_dimension_numbers<[1], [0], [0], [1], [0, 0, 1, 1], [], []>} : vector<8x8xbf16>, vector<8x8xbf16>, vector<8x8xf32> -> vector<8x8xf32>
    %202 = tpu.concatenate %135, %157, %179, %201 in 1 : vector<8x8xf32>, vector<8x8xf32>, vector<8x8xf32>, vector<8x8xf32> -> vector<8x32xf32>
    %203 = tpu.concatenate %110, %202 in 0 : vector<8x32xf32>, vector<8x32xf32> -> vector<16x32xf32>
    %c0_51 = arith.constant 0 : index
    %c0_52 = arith.constant 0 : index
    %c0_53 = arith.constant 0 : index
    %204 = vector.load %arg4[%c0_51, %c0_52, %c0_53] : memref<2x32x32xbf16, #tpu.memory_space<vmem>>, vector<1x32x32xbf16>
    %205 = vector.shape_cast %204 : vector<1x32x32xbf16> to vector<32x32xbf16>
    %c0_54 = arith.constant 0 : index
    %c0_55 = arith.constant 0 : index
    %c0_56 = arith.constant 0 : index
    %206 = vector.load %arg5[%c0_54, %c0_55, %c0_56] : memref<2x1x32xf32, #tpu.memory_space<vmem>>, vector<1x1x32xf32>
    %207 = vector.shape_cast %206 : vector<1x1x32xf32> to vector<1x32xf32>
    %208 = arith.truncf %203 : vector<16x32xf32> to vector<16x32xbf16>
    %cst_57 = arith.constant dense<0.000000e+00> : vector<16x32xf32>
    %209 = tpu.matmul %208, %205, %cst_57 {dimension_numbers = #tpu.dot_dimension_numbers<[1], [0], [0], [1], [0, 0, 1, 1], [], []>} : vector<16x32xbf16>, vector<32x32xbf16>, vector<16x32xf32> -> vector<16x32xf32>
    %210 = vector.broadcast %207 : vector<1x32xf32> to vector<16x32xf32>
    %211 = arith.addf %209, %210 : vector<16x32xf32>
    %212 = arith.addf %0, %211 : vector<16x32xf32>
    %c0_58 = arith.constant 0 : index
    %c0_59 = arith.constant 0 : index
    %c0_60 = arith.constant 0 : index
    %213 = vector.load %arg6[%c0_58, %c0_59, %c0_60] : memref<2x1x32xf32, #tpu.memory_space<vmem>>, vector<1x1x32xf32>
    %214 = vector.shape_cast %213 : vector<1x1x32xf32> to vector<1x32xf32>
    %c0_61 = arith.constant 0 : index
    %c0_62 = arith.constant 0 : index
    %c0_63 = arith.constant 0 : index
    %215 = vector.load %arg7[%c0_61, %c0_62, %c0_63] : memref<2x1x32xf32, #tpu.memory_space<vmem>>, vector<1x1x32xf32>
    %216 = vector.shape_cast %215 : vector<1x1x32xf32> to vector<1x32xf32>
    %cst_64 = arith.constant dense<0.000000e+00> : vector<16xf32>
    %217 = vector.multi_reduction <add>, %212, %cst_64 [1] : vector<16x32xf32> to vector<16xf32>
    %218 = vector.shape_cast %217 : vector<16xf32> to vector<16x1xf32>
    %cst_65 = arith.constant 3.200000e+01 : f32
    %219 = vector.broadcast %cst_65 : f32 to vector<16x1xf32>
    %220 = arith.divf %218, %219 : vector<16x1xf32>
    %221 = vector.broadcast %220 : vector<16x1xf32> to vector<16x32xf32>
    %222 = arith.subf %212, %221 : vector<16x32xf32>
    %223 = arith.mulf %222, %222 : vector<16x32xf32>
    %cst_66 = arith.constant dense<0.000000e+00> : vector<16xf32>
    %224 = vector.multi_reduction <add>, %223, %cst_66 [1] : vector<16x32xf32> to vector<16xf32>
    %225 = vector.shape_cast %224 : vector<16xf32> to vector<16x1xf32>
    %cst_67 = arith.constant 3.200000e+01 : f32
    %226 = vector.broadcast %cst_67 : f32 to vector<16x1xf32>
    %227 = arith.divf %225, %226 : vector<16x1xf32>
    %228 = vector.broadcast %220 : vector<16x1xf32> to vector<16x32xf32>
    %229 = arith.subf %212, %228 : vector<16x32xf32>
    %cst_68 = arith.constant 9.99999974E-6 : f32
    %230 = vector.broadcast %cst_68 : f32 to vector<16x1xf32>
    %231 = arith.addf %227, %230 : vector<16x1xf32>
    %232 = math.rsqrt %231 : vector<16x1xf32>
    %233 = vector.broadcast %232 : vector<16x1xf32> to vector<16x32xf32>
    %234 = arith.mulf %229, %233 : vector<16x32xf32>
    %235 = vector.broadcast %214 : vector<1x32xf32> to vector<16x32xf32>
    %236 = arith.mulf %234, %235 : vector<16x32xf32>
    %237 = vector.broadcast %216 : vector<1x32xf32> to vector<16x32xf32>
    %238 = arith.addf %236, %237 : vector<16x32xf32>
    %c0_69 = arith.constant 0 : index
    %c0_70 = arith.constant 0 : index
    %c0_71 = arith.constant 0 : index
    %239 = vector.load %arg8[%c0_69, %c0_70, %c0_71] : memref<2x32x32xbf16, #tpu.memory_space<vmem>>, vector<1x32x32xbf16>
    %240 = vector.shape_cast %239 : vector<1x32x32xbf16> to vector<32x32xbf16>
    %c0_72 = arith.constant 0 : index
    %c0_73 = arith.constant 0 : index
    %c0_74 = arith.constant 0 : index
    %241 = vector.load %arg9[%c0_72, %c0_73, %c0_74] : memref<2x1x32xf32, #tpu.memory_space<vmem>>, vector<1x1x32xf32>
    %242 = vector.shape_cast %241 : vector<1x1x32xf32> to vector<1x32xf32>
    %243 = arith.truncf %238 : vector<16x32xf32> to vector<16x32xbf16>
    %cst_75 = arith.constant dense<0.000000e+00> : vector<16x32xf32>
    %244 = tpu.matmul %243, %240, %cst_75 {dimension_numbers = #tpu.dot_dimension_numbers<[1], [0], [0], [1], [0, 0, 1, 1], [], []>} : vector<16x32xbf16>, vector<32x32xbf16>, vector<16x32xf32> -> vector<16x32xf32>
    %245 = vector.broadcast %242 : vector<1x32xf32> to vector<16x32xf32>
    %246 = arith.addf %244, %245 : vector<16x32xf32>
    %c0_76 = arith.constant 0 : index
    %c0_77 = arith.constant 0 : index
    %c0_78 = arith.constant 0 : index
    %247 = vector.load %arg10[%c0_76, %c0_77, %c0_78] : memref<2x32x64xbf16, #tpu.memory_space<vmem>>, vector<1x32x64xbf16>
    %248 = vector.shape_cast %247 : vector<1x32x64xbf16> to vector<32x64xbf16>
    %c0_79 = arith.constant 0 : index
    %c0_80 = arith.constant 0 : index
    %c0_81 = arith.constant 0 : index
    %249 = vector.load %arg11[%c0_79, %c0_80, %c0_81] : memref<2x1x64xf32, #tpu.memory_space<vmem>>, vector<1x1x64xf32>
    %250 = vector.shape_cast %249 : vector<1x1x64xf32> to vector<1x64xf32>
    %251 = arith.truncf %1 : vector<16x32xf32> to vector<16x32xbf16>
    %cst_82 = arith.constant dense<0.000000e+00> : vector<16x64xf32>
    %252 = tpu.matmul %251, %248, %cst_82 {dimension_numbers = #tpu.dot_dimension_numbers<[1], [0], [0], [1], [0, 0, 1, 1], [], []>} : vector<16x32xbf16>, vector<32x64xbf16>, vector<16x64xf32> -> vector<16x64xf32>
    %253 = vector.broadcast %250 : vector<1x64xf32> to vector<16x64xf32>
    %254 = arith.addf %252, %253 : vector<16x64xf32>
    %255 = vector.extract_strided_slice %254 {offsets = [0, 0], sizes = [16, 32], strides = [1, 1]} : vector<16x64xf32> to vector<16x32xf32>
    %256 = vector.extract_strided_slice %254 {offsets = [0, 32], sizes = [16, 32], strides = [1, 1]} : vector<16x64xf32> to vector<16x32xf32>
    %257 = vector.extract_strided_slice %246 {offsets = [0, 0], sizes = [8, 32], strides = [1, 1]} : vector<16x32xf32> to vector<8x32xf32>
    %258 = vector.extract_strided_slice %255 {offsets = [0, 0], sizes = [8, 32], strides = [1, 1]} : vector<16x32xf32> to vector<8x32xf32>
    %259 = vector.extract_strided_slice %256 {offsets = [0, 0], sizes = [8, 32], strides = [1, 1]} : vector<16x32xf32> to vector<8x32xf32>
    %260 = vector.extract_strided_slice %257 {offsets = [0, 0], sizes = [8, 8], strides = [1, 1]} : vector<8x32xf32> to vector<8x8xf32>
    %261 = vector.extract_strided_slice %258 {offsets = [0, 0], sizes = [8, 8], strides = [1, 1]} : vector<8x32xf32> to vector<8x8xf32>
    %262 = vector.extract_strided_slice %259 {offsets = [0, 0], sizes = [8, 8], strides = [1, 1]} : vector<8x32xf32> to vector<8x8xf32>
    %263 = arith.truncf %260 : vector<8x8xf32> to vector<8x8xbf16>
    %264 = arith.truncf %261 : vector<8x8xf32> to vector<8x8xbf16>
    %cst_83 = arith.constant dense<0.000000e+00> : vector<8x8xf32>
    %265 = tpu.matmul %263, %264, %cst_83 {dimension_numbers = #tpu.dot_dimension_numbers<[1], [1], [0], [0], [0, 0, 1, 0], [], []>} : vector<8x8xbf16>, vector<8x8xbf16>, vector<8x8xf32> -> vector<8x8xf32>
    %cst_84 = arith.constant 0.353553385 : f32
    %266 = vector.broadcast %cst_84 : f32 to vector<8x8xf32>
    %267 = arith.mulf %265, %266 : vector<8x8xf32>
    %cst_85 = arith.constant dense<0xFF800000> : vector<8xf32>
    %268 = vector.multi_reduction <maximumf>, %267, %cst_85 [1] : vector<8x8xf32> to vector<8xf32>
    %269 = vector.shape_cast %268 : vector<8xf32> to vector<8x1xf32>
    %270 = vector.broadcast %269 : vector<8x1xf32> to vector<8x8xf32>
    %271 = arith.subf %267, %270 : vector<8x8xf32>
    %272 = math.exp %271 : vector<8x8xf32>
    %cst_86 = arith.constant dense<0.000000e+00> : vector<8xf32>
    %273 = vector.multi_reduction <add>, %272, %cst_86 [1] : vector<8x8xf32> to vector<8xf32>
    %274 = vector.shape_cast %273 : vector<8xf32> to vector<8x1xf32>
    %275 = tpu.reciprocal %274 {approx = true} : vector<8x1xf32> -> vector<8x1xf32>
    %276 = vector.broadcast %275 : vector<8x1xf32> to vector<8x8xf32>
    %277 = arith.mulf %272, %276 : vector<8x8xf32>
    %278 = arith.truncf %277 : vector<8x8xf32> to vector<8x8xbf16>
    %279 = arith.truncf %262 : vector<8x8xf32> to vector<8x8xbf16>
    %cst_87 = arith.constant dense<0.000000e+00> : vector<8x8xf32>
    %280 = tpu.matmul %278, %279, %cst_87 {dimension_numbers = #tpu.dot_dimension_numbers<[1], [0], [0], [1], [0, 0, 1, 1], [], []>} : vector<8x8xbf16>, vector<8x8xbf16>, vector<8x8xf32> -> vector<8x8xf32>
    %281 = vector.extract_strided_slice %257 {offsets = [0, 8], sizes = [8, 8], strides = [1, 1]} : vector<8x32xf32> to vector<8x8xf32>
    %282 = vector.extract_strided_slice %258 {offsets = [0, 8], sizes = [8, 8], strides = [1, 1]} : vector<8x32xf32> to vector<8x8xf32>
    %283 = vector.extract_strided_slice %259 {offsets = [0, 8], sizes = [8, 8], strides = [1, 1]} : vector<8x32xf32> to vector<8x8xf32>
    %284 = arith.truncf %281 : vector<8x8xf32> to vector<8x8xbf16>
    %285 = arith.truncf %282 : vector<8x8xf32> to vector<8x8xbf16>
    %cst_88 = arith.constant dense<0.000000e+00> : vector<8x8xf32>
    %286 = tpu.matmul %284, %285, %cst_88 {dimension_numbers = #tpu.dot_dimension_numbers<[1], [1], [0], [0], [0, 0, 1, 0], [], []>} : vector<8x8xbf16>, vector<8x8xbf16>, vector<8x8xf32> -> vector<8x8xf32>
    %cst_89 = arith.constant 0.353553385 : f32
    %287 = vector.broadcast %cst_89 : f32 to vector<8x8xf32>
    %288 = arith.mulf %286, %287 : vector<8x8xf32>
    %cst_90 = arith.constant dense<0xFF800000> : vector<8xf32>
    %289 = vector.multi_reduction <maximumf>, %288, %cst_90 [1] : vector<8x8xf32> to vector<8xf32>
    %290 = vector.shape_cast %289 : vector<8xf32> to vector<8x1xf32>
    %291 = vector.broadcast %290 : vector<8x1xf32> to vector<8x8xf32>
    %292 = arith.subf %288, %291 : vector<8x8xf32>
    %293 = math.exp %292 : vector<8x8xf32>
    %cst_91 = arith.constant dense<0.000000e+00> : vector<8xf32>
    %294 = vector.multi_reduction <add>, %293, %cst_91 [1] : vector<8x8xf32> to vector<8xf32>
    %295 = vector.shape_cast %294 : vector<8xf32> to vector<8x1xf32>
    %296 = tpu.reciprocal %295 {approx = true} : vector<8x1xf32> -> vector<8x1xf32>
    %297 = vector.broadcast %296 : vector<8x1xf32> to vector<8x8xf32>
    %298 = arith.mulf %293, %297 : vector<8x8xf32>
    %299 = arith.truncf %298 : vector<8x8xf32> to vector<8x8xbf16>
    %300 = arith.truncf %283 : vector<8x8xf32> to vector<8x8xbf16>
    %cst_92 = arith.constant dense<0.000000e+00> : vector<8x8xf32>
    %301 = tpu.matmul %299, %300, %cst_92 {dimension_numbers = #tpu.dot_dimension_numbers<[1], [0], [0], [1], [0, 0, 1, 1], [], []>} : vector<8x8xbf16>, vector<8x8xbf16>, vector<8x8xf32> -> vector<8x8xf32>
    %302 = vector.extract_strided_slice %257 {offsets = [0, 16], sizes = [8, 8], strides = [1, 1]} : vector<8x32xf32> to vector<8x8xf32>
    %303 = vector.extract_strided_slice %258 {offsets = [0, 16], sizes = [8, 8], strides = [1, 1]} : vector<8x32xf32> to vector<8x8xf32>
    %304 = vector.extract_strided_slice %259 {offsets = [0, 16], sizes = [8, 8], strides = [1, 1]} : vector<8x32xf32> to vector<8x8xf32>
    %305 = arith.truncf %302 : vector<8x8xf32> to vector<8x8xbf16>
    %306 = arith.truncf %303 : vector<8x8xf32> to vector<8x8xbf16>
    %cst_93 = arith.constant dense<0.000000e+00> : vector<8x8xf32>
    %307 = tpu.matmul %305, %306, %cst_93 {dimension_numbers = #tpu.dot_dimension_numbers<[1], [1], [0], [0], [0, 0, 1, 0], [], []>} : vector<8x8xbf16>, vector<8x8xbf16>, vector<8x8xf32> -> vector<8x8xf32>
    %cst_94 = arith.constant 0.353553385 : f32
    %308 = vector.broadcast %cst_94 : f32 to vector<8x8xf32>
    %309 = arith.mulf %307, %308 : vector<8x8xf32>
    %cst_95 = arith.constant dense<0xFF800000> : vector<8xf32>
    %310 = vector.multi_reduction <maximumf>, %309, %cst_95 [1] : vector<8x8xf32> to vector<8xf32>
    %311 = vector.shape_cast %310 : vector<8xf32> to vector<8x1xf32>
    %312 = vector.broadcast %311 : vector<8x1xf32> to vector<8x8xf32>
    %313 = arith.subf %309, %312 : vector<8x8xf32>
    %314 = math.exp %313 : vector<8x8xf32>
    %cst_96 = arith.constant dense<0.000000e+00> : vector<8xf32>
    %315 = vector.multi_reduction <add>, %314, %cst_96 [1] : vector<8x8xf32> to vector<8xf32>
    %316 = vector.shape_cast %315 : vector<8xf32> to vector<8x1xf32>
    %317 = tpu.reciprocal %316 {approx = true} : vector<8x1xf32> -> vector<8x1xf32>
    %318 = vector.broadcast %317 : vector<8x1xf32> to vector<8x8xf32>
    %319 = arith.mulf %314, %318 : vector<8x8xf32>
    %320 = arith.truncf %319 : vector<8x8xf32> to vector<8x8xbf16>
    %321 = arith.truncf %304 : vector<8x8xf32> to vector<8x8xbf16>
    %cst_97 = arith.constant dense<0.000000e+00> : vector<8x8xf32>
    %322 = tpu.matmul %320, %321, %cst_97 {dimension_numbers = #tpu.dot_dimension_numbers<[1], [0], [0], [1], [0, 0, 1, 1], [], []>} : vector<8x8xbf16>, vector<8x8xbf16>, vector<8x8xf32> -> vector<8x8xf32>
    %323 = vector.extract_strided_slice %257 {offsets = [0, 24], sizes = [8, 8], strides = [1, 1]} : vector<8x32xf32> to vector<8x8xf32>
    %324 = vector.extract_strided_slice %258 {offsets = [0, 24], sizes = [8, 8], strides = [1, 1]} : vector<8x32xf32> to vector<8x8xf32>
    %325 = vector.extract_strided_slice %259 {offsets = [0, 24], sizes = [8, 8], strides = [1, 1]} : vector<8x32xf32> to vector<8x8xf32>
    %326 = arith.truncf %323 : vector<8x8xf32> to vector<8x8xbf16>
    %327 = arith.truncf %324 : vector<8x8xf32> to vector<8x8xbf16>
    %cst_98 = arith.constant dense<0.000000e+00> : vector<8x8xf32>
    %328 = tpu.matmul %326, %327, %cst_98 {dimension_numbers = #tpu.dot_dimension_numbers<[1], [1], [0], [0], [0, 0, 1, 0], [], []>} : vector<8x8xbf16>, vector<8x8xbf16>, vector<8x8xf32> -> vector<8x8xf32>
    %cst_99 = arith.constant 0.353553385 : f32
    %329 = vector.broadcast %cst_99 : f32 to vector<8x8xf32>
    %330 = arith.mulf %328, %329 : vector<8x8xf32>
    %cst_100 = arith.constant dense<0xFF800000> : vector<8xf32>
    %331 = vector.multi_reduction <maximumf>, %330, %cst_100 [1] : vector<8x8xf32> to vector<8xf32>
    %332 = vector.shape_cast %331 : vector<8xf32> to vector<8x1xf32>
    %333 = vector.broadcast %332 : vector<8x1xf32> to vector<8x8xf32>
    %334 = arith.subf %330, %333 : vector<8x8xf32>
    %335 = math.exp %334 : vector<8x8xf32>
    %cst_101 = arith.constant dense<0.000000e+00> : vector<8xf32>
    %336 = vector.multi_reduction <add>, %335, %cst_101 [1] : vector<8x8xf32> to vector<8xf32>
    %337 = vector.shape_cast %336 : vector<8xf32> to vector<8x1xf32>
    %338 = tpu.reciprocal %337 {approx = true} : vector<8x1xf32> -> vector<8x1xf32>
    %339 = vector.broadcast %338 : vector<8x1xf32> to vector<8x8xf32>
    %340 = arith.mulf %335, %339 : vector<8x8xf32>
    %341 = arith.truncf %340 : vector<8x8xf32> to vector<8x8xbf16>
    %342 = arith.truncf %325 : vector<8x8xf32> to vector<8x8xbf16>
    %cst_102 = arith.constant dense<0.000000e+00> : vector<8x8xf32>
    %343 = tpu.matmul %341, %342, %cst_102 {dimension_numbers = #tpu.dot_dimension_numbers<[1], [0], [0], [1], [0, 0, 1, 1], [], []>} : vector<8x8xbf16>, vector<8x8xbf16>, vector<8x8xf32> -> vector<8x8xf32>
    %344 = tpu.concatenate %280, %301, %322, %343 in 1 : vector<8x8xf32>, vector<8x8xf32>, vector<8x8xf32>, vector<8x8xf32> -> vector<8x32xf32>
    %345 = vector.extract_strided_slice %246 {offsets = [8, 0], sizes = [8, 32], strides = [1, 1]} : vector<16x32xf32> to vector<8x32xf32>
    %346 = vector.extract_strided_slice %255 {offsets = [8, 0], sizes = [8, 32], strides = [1, 1]} : vector<16x32xf32> to vector<8x32xf32>
    %347 = vector.extract_strided_slice %256 {offsets = [8, 0], sizes = [8, 32], strides = [1, 1]} : vector<16x32xf32> to vector<8x32xf32>
    %348 = vector.extract_strided_slice %345 {offsets = [0, 0], sizes = [8, 8], strides = [1, 1]} : vector<8x32xf32> to vector<8x8xf32>
    %349 = vector.extract_strided_slice %346 {offsets = [0, 0], sizes = [8, 8], strides = [1, 1]} : vector<8x32xf32> to vector<8x8xf32>
    %350 = vector.extract_strided_slice %347 {offsets = [0, 0], sizes = [8, 8], strides = [1, 1]} : vector<8x32xf32> to vector<8x8xf32>
    %351 = arith.truncf %348 : vector<8x8xf32> to vector<8x8xbf16>
    %352 = arith.truncf %349 : vector<8x8xf32> to vector<8x8xbf16>
    %cst_103 = arith.constant dense<0.000000e+00> : vector<8x8xf32>
    %353 = tpu.matmul %351, %352, %cst_103 {dimension_numbers = #tpu.dot_dimension_numbers<[1], [1], [0], [0], [0, 0, 1, 0], [], []>} : vector<8x8xbf16>, vector<8x8xbf16>, vector<8x8xf32> -> vector<8x8xf32>
    %cst_104 = arith.constant 0.353553385 : f32
    %354 = vector.broadcast %cst_104 : f32 to vector<8x8xf32>
    %355 = arith.mulf %353, %354 : vector<8x8xf32>
    %cst_105 = arith.constant dense<0xFF800000> : vector<8xf32>
    %356 = vector.multi_reduction <maximumf>, %355, %cst_105 [1] : vector<8x8xf32> to vector<8xf32>
    %357 = vector.shape_cast %356 : vector<8xf32> to vector<8x1xf32>
    %358 = vector.broadcast %357 : vector<8x1xf32> to vector<8x8xf32>
    %359 = arith.subf %355, %358 : vector<8x8xf32>
    %360 = math.exp %359 : vector<8x8xf32>
    %cst_106 = arith.constant dense<0.000000e+00> : vector<8xf32>
    %361 = vector.multi_reduction <add>, %360, %cst_106 [1] : vector<8x8xf32> to vector<8xf32>
    %362 = vector.shape_cast %361 : vector<8xf32> to vector<8x1xf32>
    %363 = tpu.reciprocal %362 {approx = true} : vector<8x1xf32> -> vector<8x1xf32>
    %364 = vector.broadcast %363 : vector<8x1xf32> to vector<8x8xf32>
    %365 = arith.mulf %360, %364 : vector<8x8xf32>
    %366 = arith.truncf %365 : vector<8x8xf32> to vector<8x8xbf16>
    %367 = arith.truncf %350 : vector<8x8xf32> to vector<8x8xbf16>
    %cst_107 = arith.constant dense<0.000000e+00> : vector<8x8xf32>
    %368 = tpu.matmul %366, %367, %cst_107 {dimension_numbers = #tpu.dot_dimension_numbers<[1], [0], [0], [1], [0, 0, 1, 1], [], []>} : vector<8x8xbf16>, vector<8x8xbf16>, vector<8x8xf32> -> vector<8x8xf32>
    %369 = vector.extract_strided_slice %345 {offsets = [0, 8], sizes = [8, 8], strides = [1, 1]} : vector<8x32xf32> to vector<8x8xf32>
    %370 = vector.extract_strided_slice %346 {offsets = [0, 8], sizes = [8, 8], strides = [1, 1]} : vector<8x32xf32> to vector<8x8xf32>
    %371 = vector.extract_strided_slice %347 {offsets = [0, 8], sizes = [8, 8], strides = [1, 1]} : vector<8x32xf32> to vector<8x8xf32>
    %372 = arith.truncf %369 : vector<8x8xf32> to vector<8x8xbf16>
    %373 = arith.truncf %370 : vector<8x8xf32> to vector<8x8xbf16>
    %cst_108 = arith.constant dense<0.000000e+00> : vector<8x8xf32>
    %374 = tpu.matmul %372, %373, %cst_108 {dimension_numbers = #tpu.dot_dimension_numbers<[1], [1], [0], [0], [0, 0, 1, 0], [], []>} : vector<8x8xbf16>, vector<8x8xbf16>, vector<8x8xf32> -> vector<8x8xf32>
    %cst_109 = arith.constant 0.353553385 : f32
    %375 = vector.broadcast %cst_109 : f32 to vector<8x8xf32>
    %376 = arith.mulf %374, %375 : vector<8x8xf32>
    %cst_110 = arith.constant dense<0xFF800000> : vector<8xf32>
    %377 = vector.multi_reduction <maximumf>, %376, %cst_110 [1] : vector<8x8xf32> to vector<8xf32>
    %378 = vector.shape_cast %377 : vector<8xf32> to vector<8x1xf32>
    %379 = vector.broadcast %378 : vector<8x1xf32> to vector<8x8xf32>
    %380 = arith.subf %376, %379 : vector<8x8xf32>
    %381 = math.exp %380 : vector<8x8xf32>
    %cst_111 = arith.constant dense<0.000000e+00> : vector<8xf32>
    %382 = vector.multi_reduction <add>, %381, %cst_111 [1] : vector<8x8xf32> to vector<8xf32>
    %383 = vector.shape_cast %382 : vector<8xf32> to vector<8x1xf32>
    %384 = tpu.reciprocal %383 {approx = true} : vector<8x1xf32> -> vector<8x1xf32>
    %385 = vector.broadcast %384 : vector<8x1xf32> to vector<8x8xf32>
    %386 = arith.mulf %381, %385 : vector<8x8xf32>
    %387 = arith.truncf %386 : vector<8x8xf32> to vector<8x8xbf16>
    %388 = arith.truncf %371 : vector<8x8xf32> to vector<8x8xbf16>
    %cst_112 = arith.constant dense<0.000000e+00> : vector<8x8xf32>
    %389 = tpu.matmul %387, %388, %cst_112 {dimension_numbers = #tpu.dot_dimension_numbers<[1], [0], [0], [1], [0, 0, 1, 1], [], []>} : vector<8x8xbf16>, vector<8x8xbf16>, vector<8x8xf32> -> vector<8x8xf32>
    %390 = vector.extract_strided_slice %345 {offsets = [0, 16], sizes = [8, 8], strides = [1, 1]} : vector<8x32xf32> to vector<8x8xf32>
    %391 = vector.extract_strided_slice %346 {offsets = [0, 16], sizes = [8, 8], strides = [1, 1]} : vector<8x32xf32> to vector<8x8xf32>
    %392 = vector.extract_strided_slice %347 {offsets = [0, 16], sizes = [8, 8], strides = [1, 1]} : vector<8x32xf32> to vector<8x8xf32>
    %393 = arith.truncf %390 : vector<8x8xf32> to vector<8x8xbf16>
    %394 = arith.truncf %391 : vector<8x8xf32> to vector<8x8xbf16>
    %cst_113 = arith.constant dense<0.000000e+00> : vector<8x8xf32>
    %395 = tpu.matmul %393, %394, %cst_113 {dimension_numbers = #tpu.dot_dimension_numbers<[1], [1], [0], [0], [0, 0, 1, 0], [], []>} : vector<8x8xbf16>, vector<8x8xbf16>, vector<8x8xf32> -> vector<8x8xf32>
    %cst_114 = arith.constant 0.353553385 : f32
    %396 = vector.broadcast %cst_114 : f32 to vector<8x8xf32>
    %397 = arith.mulf %395, %396 : vector<8x8xf32>
    %cst_115 = arith.constant dense<0xFF800000> : vector<8xf32>
    %398 = vector.multi_reduction <maximumf>, %397, %cst_115 [1] : vector<8x8xf32> to vector<8xf32>
    %399 = vector.shape_cast %398 : vector<8xf32> to vector<8x1xf32>
    %400 = vector.broadcast %399 : vector<8x1xf32> to vector<8x8xf32>
    %401 = arith.subf %397, %400 : vector<8x8xf32>
    %402 = math.exp %401 : vector<8x8xf32>
    %cst_116 = arith.constant dense<0.000000e+00> : vector<8xf32>
    %403 = vector.multi_reduction <add>, %402, %cst_116 [1] : vector<8x8xf32> to vector<8xf32>
    %404 = vector.shape_cast %403 : vector<8xf32> to vector<8x1xf32>
    %405 = tpu.reciprocal %404 {approx = true} : vector<8x1xf32> -> vector<8x1xf32>
    %406 = vector.broadcast %405 : vector<8x1xf32> to vector<8x8xf32>
    %407 = arith.mulf %402, %406 : vector<8x8xf32>
    %408 = arith.truncf %407 : vector<8x8xf32> to vector<8x8xbf16>
    %409 = arith.truncf %392 : vector<8x8xf32> to vector<8x8xbf16>
    %cst_117 = arith.constant dense<0.000000e+00> : vector<8x8xf32>
    %410 = tpu.matmul %408, %409, %cst_117 {dimension_numbers = #tpu.dot_dimension_numbers<[1], [0], [0], [1], [0, 0, 1, 1], [], []>} : vector<8x8xbf16>, vector<8x8xbf16>, vector<8x8xf32> -> vector<8x8xf32>
    %411 = vector.extract_strided_slice %345 {offsets = [0, 24], sizes = [8, 8], strides = [1, 1]} : vector<8x32xf32> to vector<8x8xf32>
    %412 = vector.extract_strided_slice %346 {offsets = [0, 24], sizes = [8, 8], strides = [1, 1]} : vector<8x32xf32> to vector<8x8xf32>
    %413 = vector.extract_strided_slice %347 {offsets = [0, 24], sizes = [8, 8], strides = [1, 1]} : vector<8x32xf32> to vector<8x8xf32>
    %414 = arith.truncf %411 : vector<8x8xf32> to vector<8x8xbf16>
    %415 = arith.truncf %412 : vector<8x8xf32> to vector<8x8xbf16>
    %cst_118 = arith.constant dense<0.000000e+00> : vector<8x8xf32>
    %416 = tpu.matmul %414, %415, %cst_118 {dimension_numbers = #tpu.dot_dimension_numbers<[1], [1], [0], [0], [0, 0, 1, 0], [], []>} : vector<8x8xbf16>, vector<8x8xbf16>, vector<8x8xf32> -> vector<8x8xf32>
    %cst_119 = arith.constant 0.353553385 : f32
    %417 = vector.broadcast %cst_119 : f32 to vector<8x8xf32>
    %418 = arith.mulf %416, %417 : vector<8x8xf32>
    %cst_120 = arith.constant dense<0xFF800000> : vector<8xf32>
    %419 = vector.multi_reduction <maximumf>, %418, %cst_120 [1] : vector<8x8xf32> to vector<8xf32>
    %420 = vector.shape_cast %419 : vector<8xf32> to vector<8x1xf32>
    %421 = vector.broadcast %420 : vector<8x1xf32> to vector<8x8xf32>
    %422 = arith.subf %418, %421 : vector<8x8xf32>
    %423 = math.exp %422 : vector<8x8xf32>
    %cst_121 = arith.constant dense<0.000000e+00> : vector<8xf32>
    %424 = vector.multi_reduction <add>, %423, %cst_121 [1] : vector<8x8xf32> to vector<8xf32>
    %425 = vector.shape_cast %424 : vector<8xf32> to vector<8x1xf32>
    %426 = tpu.reciprocal %425 {approx = true} : vector<8x1xf32> -> vector<8x1xf32>
    %427 = vector.broadcast %426 : vector<8x1xf32> to vector<8x8xf32>
    %428 = arith.mulf %423, %427 : vector<8x8xf32>
    %429 = arith.truncf %428 : vector<8x8xf32> to vector<8x8xbf16>
    %430 = arith.truncf %413 : vector<8x8xf32> to vector<8x8xbf16>
    %cst_122 = arith.constant dense<0.000000e+00> : vector<8x8xf32>
    %431 = tpu.matmul %429, %430, %cst_122 {dimension_numbers = #tpu.dot_dimension_numbers<[1], [0], [0], [1], [0, 0, 1, 1], [], []>} : vector<8x8xbf16>, vector<8x8xbf16>, vector<8x8xf32> -> vector<8x8xf32>
    %432 = tpu.concatenate %368, %389, %410, %431 in 1 : vector<8x8xf32>, vector<8x8xf32>, vector<8x8xf32>, vector<8x8xf32> -> vector<8x32xf32>
    %433 = tpu.concatenate %344, %432 in 0 : vector<8x32xf32>, vector<8x32xf32> -> vector<16x32xf32>
    %c0_123 = arith.constant 0 : index
    %c0_124 = arith.constant 0 : index
    %c0_125 = arith.constant 0 : index
    %434 = vector.load %arg12[%c0_123, %c0_124, %c0_125] : memref<2x32x32xbf16, #tpu.memory_space<vmem>>, vector<1x32x32xbf16>
    %435 = vector.shape_cast %434 : vector<1x32x32xbf16> to vector<32x32xbf16>
    %c0_126 = arith.constant 0 : index
    %c0_127 = arith.constant 0 : index
    %c0_128 = arith.constant 0 : index
    %436 = vector.load %arg13[%c0_126, %c0_127, %c0_128] : memref<2x1x32xf32, #tpu.memory_space<vmem>>, vector<1x1x32xf32>
    %437 = vector.shape_cast %436 : vector<1x1x32xf32> to vector<1x32xf32>
    %438 = arith.truncf %433 : vector<16x32xf32> to vector<16x32xbf16>
    %cst_129 = arith.constant dense<0.000000e+00> : vector<16x32xf32>
    %439 = tpu.matmul %438, %435, %cst_129 {dimension_numbers = #tpu.dot_dimension_numbers<[1], [0], [0], [1], [0, 0, 1, 1], [], []>} : vector<16x32xbf16>, vector<32x32xbf16>, vector<16x32xf32> -> vector<16x32xf32>
    %440 = vector.broadcast %437 : vector<1x32xf32> to vector<16x32xf32>
    %441 = arith.addf %439, %440 : vector<16x32xf32>
    %442 = arith.addf %238, %441 : vector<16x32xf32>
    %c0_130 = arith.constant 0 : index
    %c0_131 = arith.constant 0 : index
    %c0_132 = arith.constant 0 : index
    %443 = vector.load %arg14[%c0_130, %c0_131, %c0_132] : memref<2x1x32xf32, #tpu.memory_space<vmem>>, vector<1x1x32xf32>
    %444 = vector.shape_cast %443 : vector<1x1x32xf32> to vector<1x32xf32>
    %c0_133 = arith.constant 0 : index
    %c0_134 = arith.constant 0 : index
    %c0_135 = arith.constant 0 : index
    %445 = vector.load %arg15[%c0_133, %c0_134, %c0_135] : memref<2x1x32xf32, #tpu.memory_space<vmem>>, vector<1x1x32xf32>
    %446 = vector.shape_cast %445 : vector<1x1x32xf32> to vector<1x32xf32>
    %cst_136 = arith.constant dense<0.000000e+00> : vector<16xf32>
    %447 = vector.multi_reduction <add>, %442, %cst_136 [1] : vector<16x32xf32> to vector<16xf32>
    %448 = vector.shape_cast %447 : vector<16xf32> to vector<16x1xf32>
    %cst_137 = arith.constant 3.200000e+01 : f32
    %449 = vector.broadcast %cst_137 : f32 to vector<16x1xf32>
    %450 = arith.divf %448, %449 : vector<16x1xf32>
    %451 = vector.broadcast %450 : vector<16x1xf32> to vector<16x32xf32>
    %452 = arith.subf %442, %451 : vector<16x32xf32>
    %453 = arith.mulf %452, %452 : vector<16x32xf32>
    %cst_138 = arith.constant dense<0.000000e+00> : vector<16xf32>
    %454 = vector.multi_reduction <add>, %453, %cst_138 [1] : vector<16x32xf32> to vector<16xf32>
    %455 = vector.shape_cast %454 : vector<16xf32> to vector<16x1xf32>
    %cst_139 = arith.constant 3.200000e+01 : f32
    %456 = vector.broadcast %cst_139 : f32 to vector<16x1xf32>
    %457 = arith.divf %455, %456 : vector<16x1xf32>
    %458 = vector.broadcast %450 : vector<16x1xf32> to vector<16x32xf32>
    %459 = arith.subf %442, %458 : vector<16x32xf32>
    %cst_140 = arith.constant 9.99999974E-6 : f32
    %460 = vector.broadcast %cst_140 : f32 to vector<16x1xf32>
    %461 = arith.addf %457, %460 : vector<16x1xf32>
    %462 = math.rsqrt %461 : vector<16x1xf32>
    %463 = vector.broadcast %462 : vector<16x1xf32> to vector<16x32xf32>
    %464 = arith.mulf %459, %463 : vector<16x32xf32>
    %465 = vector.broadcast %444 : vector<1x32xf32> to vector<16x32xf32>
    %466 = arith.mulf %464, %465 : vector<16x32xf32>
    %467 = vector.broadcast %446 : vector<1x32xf32> to vector<16x32xf32>
    %468 = arith.addf %466, %467 : vector<16x32xf32>
    %c0_141 = arith.constant 0 : index
    %c0_142 = arith.constant 0 : index
    %c0_143 = arith.constant 0 : index
    %469 = vector.load %arg16[%c0_141, %c0_142, %c0_143] : memref<2x32x64xbf16, #tpu.memory_space<vmem>>, vector<1x32x64xbf16>
    %470 = vector.shape_cast %469 : vector<1x32x64xbf16> to vector<32x64xbf16>
    %c0_144 = arith.constant 0 : index
    %c0_145 = arith.constant 0 : index
    %c0_146 = arith.constant 0 : index
    %471 = vector.load %arg17[%c0_144, %c0_145, %c0_146] : memref<2x1x64xf32, #tpu.memory_space<vmem>>, vector<1x1x64xf32>
    %472 = vector.shape_cast %471 : vector<1x1x64xf32> to vector<1x64xf32>
    %473 = arith.truncf %468 : vector<16x32xf32> to vector<16x32xbf16>
    %cst_147 = arith.constant dense<0.000000e+00> : vector<16x64xf32>
    %474 = tpu.matmul %473, %470, %cst_147 {dimension_numbers = #tpu.dot_dimension_numbers<[1], [0], [0], [1], [0, 0, 1, 1], [], []>} : vector<16x32xbf16>, vector<32x64xbf16>, vector<16x64xf32> -> vector<16x64xf32>
    %475 = vector.broadcast %472 : vector<1x64xf32> to vector<16x64xf32>
    %476 = arith.addf %474, %475 : vector<16x64xf32>
    %cst_148 = arith.constant 0.000000e+00 : f32
    %477 = vector.broadcast %cst_148 : f32 to vector<16x64xf32>
    %478 = arith.maximumf %476, %477 : vector<16x64xf32>
    %c0_149 = arith.constant 0 : index
    %c0_150 = arith.constant 0 : index
    %c0_151 = arith.constant 0 : index
    %479 = vector.load %arg18[%c0_149, %c0_150, %c0_151] : memref<2x64x32xbf16, #tpu.memory_space<vmem>>, vector<1x64x32xbf16>
    %480 = vector.shape_cast %479 : vector<1x64x32xbf16> to vector<64x32xbf16>
    %c0_152 = arith.constant 0 : index
    %c0_153 = arith.constant 0 : index
    %c0_154 = arith.constant 0 : index
    %481 = vector.load %arg19[%c0_152, %c0_153, %c0_154] : memref<2x1x32xf32, #tpu.memory_space<vmem>>, vector<1x1x32xf32>
    %482 = vector.shape_cast %481 : vector<1x1x32xf32> to vector<1x32xf32>
    %483 = arith.truncf %478 : vector<16x64xf32> to vector<16x64xbf16>
    %cst_155 = arith.constant dense<0.000000e+00> : vector<16x32xf32>
    %484 = tpu.matmul %483, %480, %cst_155 {dimension_numbers = #tpu.dot_dimension_numbers<[1], [0], [0], [1], [0, 0, 1, 1], [], []>} : vector<16x64xbf16>, vector<64x32xbf16>, vector<16x32xf32> -> vector<16x32xf32>
    %485 = vector.broadcast %482 : vector<1x32xf32> to vector<16x32xf32>
    %486 = arith.addf %484, %485 : vector<16x32xf32>
    %487 = arith.addf %468, %486 : vector<16x32xf32>
    %c0_156 = arith.constant 0 : index
    %c0_157 = arith.constant 0 : index
    %c0_158 = arith.constant 0 : index
    %488 = vector.load %arg20[%c0_156, %c0_157, %c0_158] : memref<2x1x32xf32, #tpu.memory_space<vmem>>, vector<1x1x32xf32>
    %489 = vector.shape_cast %488 : vector<1x1x32xf32> to vector<1x32xf32>
    %c0_159 = arith.constant 0 : index
    %c0_160 = arith.constant 0 : index
    %c0_161 = arith.constant 0 : index
    %490 = vector.load %arg21[%c0_159, %c0_160, %c0_161] : memref<2x1x32xf32, #tpu.memory_space<vmem>>, vector<1x1x32xf32>
    %491 = vector.shape_cast %490 : vector<1x1x32xf32> to vector<1x32xf32>
    %cst_162 = arith.constant dense<0.000000e+00> : vector<16xf32>
    %492 = vector.multi_reduction <add>, %487, %cst_162 [1] : vector<16x32xf32> to vector<16xf32>
    %493 = vector.shape_cast %492 : vector<16xf32> to vector<16x1xf32>
    %cst_163 = arith.constant 3.200000e+01 : f32
    %494 = vector.broadcast %cst_163 : f32 to vector<16x1xf32>
    %495 = arith.divf %493, %494 : vector<16x1xf32>
    %496 = vector.broadcast %495 : vector<16x1xf32> to vector<16x32xf32>
    %497 = arith.subf %487, %496 : vector<16x32xf32>
    %498 = arith.mulf %497, %497 : vector<16x32xf32>
    %cst_164 = arith.constant dense<0.000000e+00> : vector<16xf32>
    %499 = vector.multi_reduction <add>, %498, %cst_164 [1] : vector<16x32xf32> to vector<16xf32>
    %500 = vector.shape_cast %499 : vector<16xf32> to vector<16x1xf32>
    %cst_165 = arith.constant 3.200000e+01 : f32
    %501 = vector.broadcast %cst_165 : f32 to vector<16x1xf32>
    %502 = arith.divf %500, %501 : vector<16x1xf32>
    %503 = vector.broadcast %495 : vector<16x1xf32> to vector<16x32xf32>
    %504 = arith.subf %487, %503 : vector<16x32xf32>
    %cst_166 = arith.constant 9.99999974E-6 : f32
    %505 = vector.broadcast %cst_166 : f32 to vector<16x1xf32>
    %506 = arith.addf %502, %505 : vector<16x1xf32>
    %507 = math.rsqrt %506 : vector<16x1xf32>
    %508 = vector.broadcast %507 : vector<16x1xf32> to vector<16x32xf32>
    %509 = arith.mulf %504, %508 : vector<16x32xf32>
    %510 = vector.broadcast %489 : vector<1x32xf32> to vector<16x32xf32>
    %511 = arith.mulf %509, %510 : vector<16x32xf32>
    %512 = vector.broadcast %491 : vector<1x32xf32> to vector<16x32xf32>
    %513 = arith.addf %511, %512 : vector<16x32xf32>
    %c1 = arith.constant 1 : index
    %c0_167 = arith.constant 0 : index
    %c0_168 = arith.constant 0 : index
    %514 = vector.load %arg2[%c1, %c0_167, %c0_168] : memref<2x32x96xbf16, #tpu.memory_space<vmem>>, vector<1x32x96xbf16>
    %515 = vector.shape_cast %514 : vector<1x32x96xbf16> to vector<32x96xbf16>
    %c1_169 = arith.constant 1 : index
    %c0_170 = arith.constant 0 : index
    %c0_171 = arith.constant 0 : index
    %516 = vector.load %arg3[%c1_169, %c0_170, %c0_171] : memref<2x1x96xf32, #tpu.memory_space<vmem>>, vector<1x1x96xf32>
    %517 = vector.shape_cast %516 : vector<1x1x96xf32> to vector<1x96xf32>
    %518 = arith.truncf %513 : vector<16x32xf32> to vector<16x32xbf16>
    %cst_172 = arith.constant dense<0.000000e+00> : vector<16x96xf32>
    %519 = tpu.matmul %518, %515, %cst_172 {dimension_numbers = #tpu.dot_dimension_numbers<[1], [0], [0], [1], [0, 0, 1, 1], [], []>} : vector<16x32xbf16>, vector<32x96xbf16>, vector<16x96xf32> -> vector<16x96xf32>
    %520 = vector.broadcast %517 : vector<1x96xf32> to vector<16x96xf32>
    %521 = arith.addf %519, %520 : vector<16x96xf32>
    %522 = vector.extract_strided_slice %521 {offsets = [0, 0], sizes = [16, 32], strides = [1, 1]} : vector<16x96xf32> to vector<16x32xf32>
    %523 = vector.extract_strided_slice %521 {offsets = [0, 32], sizes = [16, 32], strides = [1, 1]} : vector<16x96xf32> to vector<16x32xf32>
    %524 = vector.extract_strided_slice %521 {offsets = [0, 64], sizes = [16, 32], strides = [1, 1]} : vector<16x96xf32> to vector<16x32xf32>
    %525 = vector.extract_strided_slice %522 {offsets = [0, 0], sizes = [8, 32], strides = [1, 1]} : vector<16x32xf32> to vector<8x32xf32>
    %526 = vector.extract_strided_slice %523 {offsets = [0, 0], sizes = [8, 32], strides = [1, 1]} : vector<16x32xf32> to vector<8x32xf32>
    %527 = vector.extract_strided_slice %524 {offsets = [0, 0], sizes = [8, 32], strides = [1, 1]} : vector<16x32xf32> to vector<8x32xf32>
    %528 = vector.extract_strided_slice %525 {offsets = [0, 0], sizes = [8, 8], strides = [1, 1]} : vector<8x32xf32> to vector<8x8xf32>
    %529 = vector.extract_strided_slice %526 {offsets = [0, 0], sizes = [8, 8], strides = [1, 1]} : vector<8x32xf32> to vector<8x8xf32>
    %530 = vector.extract_strided_slice %527 {offsets = [0, 0], sizes = [8, 8], strides = [1, 1]} : vector<8x32xf32> to vector<8x8xf32>
    %531 = arith.truncf %528 : vector<8x8xf32> to vector<8x8xbf16>
    %532 = arith.truncf %529 : vector<8x8xf32> to vector<8x8xbf16>
    %cst_173 = arith.constant dense<0.000000e+00> : vector<8x8xf32>
    %533 = tpu.matmul %531, %532, %cst_173 {dimension_numbers = #tpu.dot_dimension_numbers<[1], [1], [0], [0], [0, 0, 1, 0], [], []>} : vector<8x8xbf16>, vector<8x8xbf16>, vector<8x8xf32> -> vector<8x8xf32>
    %cst_174 = arith.constant 0.353553385 : f32
    %534 = vector.broadcast %cst_174 : f32 to vector<8x8xf32>
    %535 = arith.mulf %533, %534 : vector<8x8xf32>
    %536 = arith.addf %535, %7 : vector<8x8xf32>
    %cst_175 = arith.constant dense<0xFF800000> : vector<8xf32>
    %537 = vector.multi_reduction <maximumf>, %536, %cst_175 [1] : vector<8x8xf32> to vector<8xf32>
    %538 = vector.shape_cast %537 : vector<8xf32> to vector<8x1xf32>
    %539 = vector.broadcast %538 : vector<8x1xf32> to vector<8x8xf32>
    %540 = arith.subf %536, %539 : vector<8x8xf32>
    %541 = math.exp %540 : vector<8x8xf32>
    %cst_176 = arith.constant dense<0.000000e+00> : vector<8xf32>
    %542 = vector.multi_reduction <add>, %541, %cst_176 [1] : vector<8x8xf32> to vector<8xf32>
    %543 = vector.shape_cast %542 : vector<8xf32> to vector<8x1xf32>
    %544 = tpu.reciprocal %543 {approx = true} : vector<8x1xf32> -> vector<8x1xf32>
    %545 = vector.broadcast %544 : vector<8x1xf32> to vector<8x8xf32>
    %546 = arith.mulf %541, %545 : vector<8x8xf32>
    %547 = arith.truncf %546 : vector<8x8xf32> to vector<8x8xbf16>
    %548 = arith.truncf %530 : vector<8x8xf32> to vector<8x8xbf16>
    %cst_177 = arith.constant dense<0.000000e+00> : vector<8x8xf32>
    %549 = tpu.matmul %547, %548, %cst_177 {dimension_numbers = #tpu.dot_dimension_numbers<[1], [0], [0], [1], [0, 0, 1, 1], [], []>} : vector<8x8xbf16>, vector<8x8xbf16>, vector<8x8xf32> -> vector<8x8xf32>
    %550 = vector.extract_strided_slice %525 {offsets = [0, 8], sizes = [8, 8], strides = [1, 1]} : vector<8x32xf32> to vector<8x8xf32>
    %551 = vector.extract_strided_slice %526 {offsets = [0, 8], sizes = [8, 8], strides = [1, 1]} : vector<8x32xf32> to vector<8x8xf32>
    %552 = vector.extract_strided_slice %527 {offsets = [0, 8], sizes = [8, 8], strides = [1, 1]} : vector<8x32xf32> to vector<8x8xf32>
    %553 = arith.truncf %550 : vector<8x8xf32> to vector<8x8xbf16>
    %554 = arith.truncf %551 : vector<8x8xf32> to vector<8x8xbf16>
    %cst_178 = arith.constant dense<0.000000e+00> : vector<8x8xf32>
    %555 = tpu.matmul %553, %554, %cst_178 {dimension_numbers = #tpu.dot_dimension_numbers<[1], [1], [0], [0], [0, 0, 1, 0], [], []>} : vector<8x8xbf16>, vector<8x8xbf16>, vector<8x8xf32> -> vector<8x8xf32>
    %cst_179 = arith.constant 0.353553385 : f32
    %556 = vector.broadcast %cst_179 : f32 to vector<8x8xf32>
    %557 = arith.mulf %555, %556 : vector<8x8xf32>
    %558 = arith.addf %557, %7 : vector<8x8xf32>
    %cst_180 = arith.constant dense<0xFF800000> : vector<8xf32>
    %559 = vector.multi_reduction <maximumf>, %558, %cst_180 [1] : vector<8x8xf32> to vector<8xf32>
    %560 = vector.shape_cast %559 : vector<8xf32> to vector<8x1xf32>
    %561 = vector.broadcast %560 : vector<8x1xf32> to vector<8x8xf32>
    %562 = arith.subf %558, %561 : vector<8x8xf32>
    %563 = math.exp %562 : vector<8x8xf32>
    %cst_181 = arith.constant dense<0.000000e+00> : vector<8xf32>
    %564 = vector.multi_reduction <add>, %563, %cst_181 [1] : vector<8x8xf32> to vector<8xf32>
    %565 = vector.shape_cast %564 : vector<8xf32> to vector<8x1xf32>
    %566 = tpu.reciprocal %565 {approx = true} : vector<8x1xf32> -> vector<8x1xf32>
    %567 = vector.broadcast %566 : vector<8x1xf32> to vector<8x8xf32>
    %568 = arith.mulf %563, %567 : vector<8x8xf32>
    %569 = arith.truncf %568 : vector<8x8xf32> to vector<8x8xbf16>
    %570 = arith.truncf %552 : vector<8x8xf32> to vector<8x8xbf16>
    %cst_182 = arith.constant dense<0.000000e+00> : vector<8x8xf32>
    %571 = tpu.matmul %569, %570, %cst_182 {dimension_numbers = #tpu.dot_dimension_numbers<[1], [0], [0], [1], [0, 0, 1, 1], [], []>} : vector<8x8xbf16>, vector<8x8xbf16>, vector<8x8xf32> -> vector<8x8xf32>
    %572 = vector.extract_strided_slice %525 {offsets = [0, 16], sizes = [8, 8], strides = [1, 1]} : vector<8x32xf32> to vector<8x8xf32>
    %573 = vector.extract_strided_slice %526 {offsets = [0, 16], sizes = [8, 8], strides = [1, 1]} : vector<8x32xf32> to vector<8x8xf32>
    %574 = vector.extract_strided_slice %527 {offsets = [0, 16], sizes = [8, 8], strides = [1, 1]} : vector<8x32xf32> to vector<8x8xf32>
    %575 = arith.truncf %572 : vector<8x8xf32> to vector<8x8xbf16>
    %576 = arith.truncf %573 : vector<8x8xf32> to vector<8x8xbf16>
    %cst_183 = arith.constant dense<0.000000e+00> : vector<8x8xf32>
    %577 = tpu.matmul %575, %576, %cst_183 {dimension_numbers = #tpu.dot_dimension_numbers<[1], [1], [0], [0], [0, 0, 1, 0], [], []>} : vector<8x8xbf16>, vector<8x8xbf16>, vector<8x8xf32> -> vector<8x8xf32>
    %cst_184 = arith.constant 0.353553385 : f32
    %578 = vector.broadcast %cst_184 : f32 to vector<8x8xf32>
    %579 = arith.mulf %577, %578 : vector<8x8xf32>
    %580 = arith.addf %579, %7 : vector<8x8xf32>
    %cst_185 = arith.constant dense<0xFF800000> : vector<8xf32>
    %581 = vector.multi_reduction <maximumf>, %580, %cst_185 [1] : vector<8x8xf32> to vector<8xf32>
    %582 = vector.shape_cast %581 : vector<8xf32> to vector<8x1xf32>
    %583 = vector.broadcast %582 : vector<8x1xf32> to vector<8x8xf32>
    %584 = arith.subf %580, %583 : vector<8x8xf32>
    %585 = math.exp %584 : vector<8x8xf32>
    %cst_186 = arith.constant dense<0.000000e+00> : vector<8xf32>
    %586 = vector.multi_reduction <add>, %585, %cst_186 [1] : vector<8x8xf32> to vector<8xf32>
    %587 = vector.shape_cast %586 : vector<8xf32> to vector<8x1xf32>
    %588 = tpu.reciprocal %587 {approx = true} : vector<8x1xf32> -> vector<8x1xf32>
    %589 = vector.broadcast %588 : vector<8x1xf32> to vector<8x8xf32>
    %590 = arith.mulf %585, %589 : vector<8x8xf32>
    %591 = arith.truncf %590 : vector<8x8xf32> to vector<8x8xbf16>
    %592 = arith.truncf %574 : vector<8x8xf32> to vector<8x8xbf16>
    %cst_187 = arith.constant dense<0.000000e+00> : vector<8x8xf32>
    %593 = tpu.matmul %591, %592, %cst_187 {dimension_numbers = #tpu.dot_dimension_numbers<[1], [0], [0], [1], [0, 0, 1, 1], [], []>} : vector<8x8xbf16>, vector<8x8xbf16>, vector<8x8xf32> -> vector<8x8xf32>
    %594 = vector.extract_strided_slice %525 {offsets = [0, 24], sizes = [8, 8], strides = [1, 1]} : vector<8x32xf32> to vector<8x8xf32>
    %595 = vector.extract_strided_slice %526 {offsets = [0, 24], sizes = [8, 8], strides = [1, 1]} : vector<8x32xf32> to vector<8x8xf32>
    %596 = vector.extract_strided_slice %527 {offsets = [0, 24], sizes = [8, 8], strides = [1, 1]} : vector<8x32xf32> to vector<8x8xf32>
    %597 = arith.truncf %594 : vector<8x8xf32> to vector<8x8xbf16>
    %598 = arith.truncf %595 : vector<8x8xf32> to vector<8x8xbf16>
    %cst_188 = arith.constant dense<0.000000e+00> : vector<8x8xf32>
    %599 = tpu.matmul %597, %598, %cst_188 {dimension_numbers = #tpu.dot_dimension_numbers<[1], [1], [0], [0], [0, 0, 1, 0], [], []>} : vector<8x8xbf16>, vector<8x8xbf16>, vector<8x8xf32> -> vector<8x8xf32>
    %cst_189 = arith.constant 0.353553385 : f32
    %600 = vector.broadcast %cst_189 : f32 to vector<8x8xf32>
    %601 = arith.mulf %599, %600 : vector<8x8xf32>
    %602 = arith.addf %601, %7 : vector<8x8xf32>
    %cst_190 = arith.constant dense<0xFF800000> : vector<8xf32>
    %603 = vector.multi_reduction <maximumf>, %602, %cst_190 [1] : vector<8x8xf32> to vector<8xf32>
    %604 = vector.shape_cast %603 : vector<8xf32> to vector<8x1xf32>
    %605 = vector.broadcast %604 : vector<8x1xf32> to vector<8x8xf32>
    %606 = arith.subf %602, %605 : vector<8x8xf32>
    %607 = math.exp %606 : vector<8x8xf32>
    %cst_191 = arith.constant dense<0.000000e+00> : vector<8xf32>
    %608 = vector.multi_reduction <add>, %607, %cst_191 [1] : vector<8x8xf32> to vector<8xf32>
    %609 = vector.shape_cast %608 : vector<8xf32> to vector<8x1xf32>
    %610 = tpu.reciprocal %609 {approx = true} : vector<8x1xf32> -> vector<8x1xf32>
    %611 = vector.broadcast %610 : vector<8x1xf32> to vector<8x8xf32>
    %612 = arith.mulf %607, %611 : vector<8x8xf32>
    %613 = arith.truncf %612 : vector<8x8xf32> to vector<8x8xbf16>
    %614 = arith.truncf %596 : vector<8x8xf32> to vector<8x8xbf16>
    %cst_192 = arith.constant dense<0.000000e+00> : vector<8x8xf32>
    %615 = tpu.matmul %613, %614, %cst_192 {dimension_numbers = #tpu.dot_dimension_numbers<[1], [0], [0], [1], [0, 0, 1, 1], [], []>} : vector<8x8xbf16>, vector<8x8xbf16>, vector<8x8xf32> -> vector<8x8xf32>
    %616 = tpu.concatenate %549, %571, %593, %615 in 1 : vector<8x8xf32>, vector<8x8xf32>, vector<8x8xf32>, vector<8x8xf32> -> vector<8x32xf32>
    %617 = vector.extract_strided_slice %522 {offsets = [8, 0], sizes = [8, 32], strides = [1, 1]} : vector<16x32xf32> to vector<8x32xf32>
    %618 = vector.extract_strided_slice %523 {offsets = [8, 0], sizes = [8, 32], strides = [1, 1]} : vector<16x32xf32> to vector<8x32xf32>
    %619 = vector.extract_strided_slice %524 {offsets = [8, 0], sizes = [8, 32], strides = [1, 1]} : vector<16x32xf32> to vector<8x32xf32>
    %620 = vector.extract_strided_slice %617 {offsets = [0, 0], sizes = [8, 8], strides = [1, 1]} : vector<8x32xf32> to vector<8x8xf32>
    %621 = vector.extract_strided_slice %618 {offsets = [0, 0], sizes = [8, 8], strides = [1, 1]} : vector<8x32xf32> to vector<8x8xf32>
    %622 = vector.extract_strided_slice %619 {offsets = [0, 0], sizes = [8, 8], strides = [1, 1]} : vector<8x32xf32> to vector<8x8xf32>
    %623 = arith.truncf %620 : vector<8x8xf32> to vector<8x8xbf16>
    %624 = arith.truncf %621 : vector<8x8xf32> to vector<8x8xbf16>
    %cst_193 = arith.constant dense<0.000000e+00> : vector<8x8xf32>
    %625 = tpu.matmul %623, %624, %cst_193 {dimension_numbers = #tpu.dot_dimension_numbers<[1], [1], [0], [0], [0, 0, 1, 0], [], []>} : vector<8x8xbf16>, vector<8x8xbf16>, vector<8x8xf32> -> vector<8x8xf32>
    %cst_194 = arith.constant 0.353553385 : f32
    %626 = vector.broadcast %cst_194 : f32 to vector<8x8xf32>
    %627 = arith.mulf %625, %626 : vector<8x8xf32>
    %628 = arith.addf %627, %7 : vector<8x8xf32>
    %cst_195 = arith.constant dense<0xFF800000> : vector<8xf32>
    %629 = vector.multi_reduction <maximumf>, %628, %cst_195 [1] : vector<8x8xf32> to vector<8xf32>
    %630 = vector.shape_cast %629 : vector<8xf32> to vector<8x1xf32>
    %631 = vector.broadcast %630 : vector<8x1xf32> to vector<8x8xf32>
    %632 = arith.subf %628, %631 : vector<8x8xf32>
    %633 = math.exp %632 : vector<8x8xf32>
    %cst_196 = arith.constant dense<0.000000e+00> : vector<8xf32>
    %634 = vector.multi_reduction <add>, %633, %cst_196 [1] : vector<8x8xf32> to vector<8xf32>
    %635 = vector.shape_cast %634 : vector<8xf32> to vector<8x1xf32>
    %636 = tpu.reciprocal %635 {approx = true} : vector<8x1xf32> -> vector<8x1xf32>
    %637 = vector.broadcast %636 : vector<8x1xf32> to vector<8x8xf32>
    %638 = arith.mulf %633, %637 : vector<8x8xf32>
    %639 = arith.truncf %638 : vector<8x8xf32> to vector<8x8xbf16>
    %640 = arith.truncf %622 : vector<8x8xf32> to vector<8x8xbf16>
    %cst_197 = arith.constant dense<0.000000e+00> : vector<8x8xf32>
    %641 = tpu.matmul %639, %640, %cst_197 {dimension_numbers = #tpu.dot_dimension_numbers<[1], [0], [0], [1], [0, 0, 1, 1], [], []>} : vector<8x8xbf16>, vector<8x8xbf16>, vector<8x8xf32> -> vector<8x8xf32>
    %642 = vector.extract_strided_slice %617 {offsets = [0, 8], sizes = [8, 8], strides = [1, 1]} : vector<8x32xf32> to vector<8x8xf32>
    %643 = vector.extract_strided_slice %618 {offsets = [0, 8], sizes = [8, 8], strides = [1, 1]} : vector<8x32xf32> to vector<8x8xf32>
    %644 = vector.extract_strided_slice %619 {offsets = [0, 8], sizes = [8, 8], strides = [1, 1]} : vector<8x32xf32> to vector<8x8xf32>
    %645 = arith.truncf %642 : vector<8x8xf32> to vector<8x8xbf16>
    %646 = arith.truncf %643 : vector<8x8xf32> to vector<8x8xbf16>
    %cst_198 = arith.constant dense<0.000000e+00> : vector<8x8xf32>
    %647 = tpu.matmul %645, %646, %cst_198 {dimension_numbers = #tpu.dot_dimension_numbers<[1], [1], [0], [0], [0, 0, 1, 0], [], []>} : vector<8x8xbf16>, vector<8x8xbf16>, vector<8x8xf32> -> vector<8x8xf32>
    %cst_199 = arith.constant 0.353553385 : f32
    %648 = vector.broadcast %cst_199 : f32 to vector<8x8xf32>
    %649 = arith.mulf %647, %648 : vector<8x8xf32>
    %650 = arith.addf %649, %7 : vector<8x8xf32>
    %cst_200 = arith.constant dense<0xFF800000> : vector<8xf32>
    %651 = vector.multi_reduction <maximumf>, %650, %cst_200 [1] : vector<8x8xf32> to vector<8xf32>
    %652 = vector.shape_cast %651 : vector<8xf32> to vector<8x1xf32>
    %653 = vector.broadcast %652 : vector<8x1xf32> to vector<8x8xf32>
    %654 = arith.subf %650, %653 : vector<8x8xf32>
    %655 = math.exp %654 : vector<8x8xf32>
    %cst_201 = arith.constant dense<0.000000e+00> : vector<8xf32>
    %656 = vector.multi_reduction <add>, %655, %cst_201 [1] : vector<8x8xf32> to vector<8xf32>
    %657 = vector.shape_cast %656 : vector<8xf32> to vector<8x1xf32>
    %658 = tpu.reciprocal %657 {approx = true} : vector<8x1xf32> -> vector<8x1xf32>
    %659 = vector.broadcast %658 : vector<8x1xf32> to vector<8x8xf32>
    %660 = arith.mulf %655, %659 : vector<8x8xf32>
    %661 = arith.truncf %660 : vector<8x8xf32> to vector<8x8xbf16>
    %662 = arith.truncf %644 : vector<8x8xf32> to vector<8x8xbf16>
    %cst_202 = arith.constant dense<0.000000e+00> : vector<8x8xf32>
    %663 = tpu.matmul %661, %662, %cst_202 {dimension_numbers = #tpu.dot_dimension_numbers<[1], [0], [0], [1], [0, 0, 1, 1], [], []>} : vector<8x8xbf16>, vector<8x8xbf16>, vector<8x8xf32> -> vector<8x8xf32>
    %664 = vector.extract_strided_slice %617 {offsets = [0, 16], sizes = [8, 8], strides = [1, 1]} : vector<8x32xf32> to vector<8x8xf32>
    %665 = vector.extract_strided_slice %618 {offsets = [0, 16], sizes = [8, 8], strides = [1, 1]} : vector<8x32xf32> to vector<8x8xf32>
    %666 = vector.extract_strided_slice %619 {offsets = [0, 16], sizes = [8, 8], strides = [1, 1]} : vector<8x32xf32> to vector<8x8xf32>
    %667 = arith.truncf %664 : vector<8x8xf32> to vector<8x8xbf16>
    %668 = arith.truncf %665 : vector<8x8xf32> to vector<8x8xbf16>
    %cst_203 = arith.constant dense<0.000000e+00> : vector<8x8xf32>
    %669 = tpu.matmul %667, %668, %cst_203 {dimension_numbers = #tpu.dot_dimension_numbers<[1], [1], [0], [0], [0, 0, 1, 0], [], []>} : vector<8x8xbf16>, vector<8x8xbf16>, vector<8x8xf32> -> vector<8x8xf32>
    %cst_204 = arith.constant 0.353553385 : f32
    %670 = vector.broadcast %cst_204 : f32 to vector<8x8xf32>
    %671 = arith.mulf %669, %670 : vector<8x8xf32>
    %672 = arith.addf %671, %7 : vector<8x8xf32>
    %cst_205 = arith.constant dense<0xFF800000> : vector<8xf32>
    %673 = vector.multi_reduction <maximumf>, %672, %cst_205 [1] : vector<8x8xf32> to vector<8xf32>
    %674 = vector.shape_cast %673 : vector<8xf32> to vector<8x1xf32>
    %675 = vector.broadcast %674 : vector<8x1xf32> to vector<8x8xf32>
    %676 = arith.subf %672, %675 : vector<8x8xf32>
    %677 = math.exp %676 : vector<8x8xf32>
    %cst_206 = arith.constant dense<0.000000e+00> : vector<8xf32>
    %678 = vector.multi_reduction <add>, %677, %cst_206 [1] : vector<8x8xf32> to vector<8xf32>
    %679 = vector.shape_cast %678 : vector<8xf32> to vector<8x1xf32>
    %680 = tpu.reciprocal %679 {approx = true} : vector<8x1xf32> -> vector<8x1xf32>
    %681 = vector.broadcast %680 : vector<8x1xf32> to vector<8x8xf32>
    %682 = arith.mulf %677, %681 : vector<8x8xf32>
    %683 = arith.truncf %682 : vector<8x8xf32> to vector<8x8xbf16>
    %684 = arith.truncf %666 : vector<8x8xf32> to vector<8x8xbf16>
    %cst_207 = arith.constant dense<0.000000e+00> : vector<8x8xf32>
    %685 = tpu.matmul %683, %684, %cst_207 {dimension_numbers = #tpu.dot_dimension_numbers<[1], [0], [0], [1], [0, 0, 1, 1], [], []>} : vector<8x8xbf16>, vector<8x8xbf16>, vector<8x8xf32> -> vector<8x8xf32>
    %686 = vector.extract_strided_slice %617 {offsets = [0, 24], sizes = [8, 8], strides = [1, 1]} : vector<8x32xf32> to vector<8x8xf32>
    %687 = vector.extract_strided_slice %618 {offsets = [0, 24], sizes = [8, 8], strides = [1, 1]} : vector<8x32xf32> to vector<8x8xf32>
    %688 = vector.extract_strided_slice %619 {offsets = [0, 24], sizes = [8, 8], strides = [1, 1]} : vector<8x32xf32> to vector<8x8xf32>
    %689 = arith.truncf %686 : vector<8x8xf32> to vector<8x8xbf16>
    %690 = arith.truncf %687 : vector<8x8xf32> to vector<8x8xbf16>
    %cst_208 = arith.constant dense<0.000000e+00> : vector<8x8xf32>
    %691 = tpu.matmul %689, %690, %cst_208 {dimension_numbers = #tpu.dot_dimension_numbers<[1], [1], [0], [0], [0, 0, 1, 0], [], []>} : vector<8x8xbf16>, vector<8x8xbf16>, vector<8x8xf32> -> vector<8x8xf32>
    %cst_209 = arith.constant 0.353553385 : f32
    %692 = vector.broadcast %cst_209 : f32 to vector<8x8xf32>
    %693 = arith.mulf %691, %692 : vector<8x8xf32>
    %694 = arith.addf %693, %7 : vector<8x8xf32>
    %cst_210 = arith.constant dense<0xFF800000> : vector<8xf32>
    %695 = vector.multi_reduction <maximumf>, %694, %cst_210 [1] : vector<8x8xf32> to vector<8xf32>
    %696 = vector.shape_cast %695 : vector<8xf32> to vector<8x1xf32>
    %697 = vector.broadcast %696 : vector<8x1xf32> to vector<8x8xf32>
    %698 = arith.subf %694, %697 : vector<8x8xf32>
    %699 = math.exp %698 : vector<8x8xf32>
    %cst_211 = arith.constant dense<0.000000e+00> : vector<8xf32>
    %700 = vector.multi_reduction <add>, %699, %cst_211 [1] : vector<8x8xf32> to vector<8xf32>
    %701 = vector.shape_cast %700 : vector<8xf32> to vector<8x1xf32>
    %702 = tpu.reciprocal %701 {approx = true} : vector<8x1xf32> -> vector<8x1xf32>
    %703 = vector.broadcast %702 : vector<8x1xf32> to vector<8x8xf32>
    %704 = arith.mulf %699, %703 : vector<8x8xf32>
    %705 = arith.truncf %704 : vector<8x8xf32> to vector<8x8xbf16>
    %706 = arith.truncf %688 : vector<8x8xf32> to vector<8x8xbf16>
    %cst_212 = arith.constant dense<0.000000e+00> : vector<8x8xf32>
    %707 = tpu.matmul %705, %706, %cst_212 {dimension_numbers = #tpu.dot_dimension_numbers<[1], [0], [0], [1], [0, 0, 1, 1], [], []>} : vector<8x8xbf16>, vector<8x8xbf16>, vector<8x8xf32> -> vector<8x8xf32>
    %708 = tpu.concatenate %641, %663, %685, %707 in 1 : vector<8x8xf32>, vector<8x8xf32>, vector<8x8xf32>, vector<8x8xf32> -> vector<8x32xf32>
    %709 = tpu.concatenate %616, %708 in 0 : vector<8x32xf32>, vector<8x32xf32> -> vector<16x32xf32>
    %c1_213 = arith.constant 1 : index
    %c0_214 = arith.constant 0 : index
    %c0_215 = arith.constant 0 : index
    %710 = vector.load %arg4[%c1_213, %c0_214, %c0_215] : memref<2x32x32xbf16, #tpu.memory_space<vmem>>, vector<1x32x32xbf16>
    %711 = vector.shape_cast %710 : vector<1x32x32xbf16> to vector<32x32xbf16>
    %c1_216 = arith.constant 1 : index
    %c0_217 = arith.constant 0 : index
    %c0_218 = arith.constant 0 : index
    %712 = vector.load %arg5[%c1_216, %c0_217, %c0_218] : memref<2x1x32xf32, #tpu.memory_space<vmem>>, vector<1x1x32xf32>
    %713 = vector.shape_cast %712 : vector<1x1x32xf32> to vector<1x32xf32>
    %714 = arith.truncf %709 : vector<16x32xf32> to vector<16x32xbf16>
    %cst_219 = arith.constant dense<0.000000e+00> : vector<16x32xf32>
    %715 = tpu.matmul %714, %711, %cst_219 {dimension_numbers = #tpu.dot_dimension_numbers<[1], [0], [0], [1], [0, 0, 1, 1], [], []>} : vector<16x32xbf16>, vector<32x32xbf16>, vector<16x32xf32> -> vector<16x32xf32>
    %716 = vector.broadcast %713 : vector<1x32xf32> to vector<16x32xf32>
    %717 = arith.addf %715, %716 : vector<16x32xf32>
    %718 = arith.addf %513, %717 : vector<16x32xf32>
    %c1_220 = arith.constant 1 : index
    %c0_221 = arith.constant 0 : index
    %c0_222 = arith.constant 0 : index
    %719 = vector.load %arg6[%c1_220, %c0_221, %c0_222] : memref<2x1x32xf32, #tpu.memory_space<vmem>>, vector<1x1x32xf32>
    %720 = vector.shape_cast %719 : vector<1x1x32xf32> to vector<1x32xf32>
    %c1_223 = arith.constant 1 : index
    %c0_224 = arith.constant 0 : index
    %c0_225 = arith.constant 0 : index
    %721 = vector.load %arg7[%c1_223, %c0_224, %c0_225] : memref<2x1x32xf32, #tpu.memory_space<vmem>>, vector<1x1x32xf32>
    %722 = vector.shape_cast %721 : vector<1x1x32xf32> to vector<1x32xf32>
    %cst_226 = arith.constant dense<0.000000e+00> : vector<16xf32>
    %723 = vector.multi_reduction <add>, %718, %cst_226 [1] : vector<16x32xf32> to vector<16xf32>
    %724 = vector.shape_cast %723 : vector<16xf32> to vector<16x1xf32>
    %cst_227 = arith.constant 3.200000e+01 : f32
    %725 = vector.broadcast %cst_227 : f32 to vector<16x1xf32>
    %726 = arith.divf %724, %725 : vector<16x1xf32>
    %727 = vector.broadcast %726 : vector<16x1xf32> to vector<16x32xf32>
    %728 = arith.subf %718, %727 : vector<16x32xf32>
    %729 = arith.mulf %728, %728 : vector<16x32xf32>
    %cst_228 = arith.constant dense<0.000000e+00> : vector<16xf32>
    %730 = vector.multi_reduction <add>, %729, %cst_228 [1] : vector<16x32xf32> to vector<16xf32>
    %731 = vector.shape_cast %730 : vector<16xf32> to vector<16x1xf32>
    %cst_229 = arith.constant 3.200000e+01 : f32
    %732 = vector.broadcast %cst_229 : f32 to vector<16x1xf32>
    %733 = arith.divf %731, %732 : vector<16x1xf32>
    %734 = vector.broadcast %726 : vector<16x1xf32> to vector<16x32xf32>
    %735 = arith.subf %718, %734 : vector<16x32xf32>
    %cst_230 = arith.constant 9.99999974E-6 : f32
    %736 = vector.broadcast %cst_230 : f32 to vector<16x1xf32>
    %737 = arith.addf %733, %736 : vector<16x1xf32>
    %738 = math.rsqrt %737 : vector<16x1xf32>
    %739 = vector.broadcast %738 : vector<16x1xf32> to vector<16x32xf32>
    %740 = arith.mulf %735, %739 : vector<16x32xf32>
    %741 = vector.broadcast %720 : vector<1x32xf32> to vector<16x32xf32>
    %742 = arith.mulf %740, %741 : vector<16x32xf32>
    %743 = vector.broadcast %722 : vector<1x32xf32> to vector<16x32xf32>
    %744 = arith.addf %742, %743 : vector<16x32xf32>
    %c1_231 = arith.constant 1 : index
    %c0_232 = arith.constant 0 : index
    %c0_233 = arith.constant 0 : index
    %745 = vector.load %arg8[%c1_231, %c0_232, %c0_233] : memref<2x32x32xbf16, #tpu.memory_space<vmem>>, vector<1x32x32xbf16>
    %746 = vector.shape_cast %745 : vector<1x32x32xbf16> to vector<32x32xbf16>
    %c1_234 = arith.constant 1 : index
    %c0_235 = arith.constant 0 : index
    %c0_236 = arith.constant 0 : index
    %747 = vector.load %arg9[%c1_234, %c0_235, %c0_236] : memref<2x1x32xf32, #tpu.memory_space<vmem>>, vector<1x1x32xf32>
    %748 = vector.shape_cast %747 : vector<1x1x32xf32> to vector<1x32xf32>
    %749 = arith.truncf %744 : vector<16x32xf32> to vector<16x32xbf16>
    %cst_237 = arith.constant dense<0.000000e+00> : vector<16x32xf32>
    %750 = tpu.matmul %749, %746, %cst_237 {dimension_numbers = #tpu.dot_dimension_numbers<[1], [0], [0], [1], [0, 0, 1, 1], [], []>} : vector<16x32xbf16>, vector<32x32xbf16>, vector<16x32xf32> -> vector<16x32xf32>
    %751 = vector.broadcast %748 : vector<1x32xf32> to vector<16x32xf32>
    %752 = arith.addf %750, %751 : vector<16x32xf32>
    %c1_238 = arith.constant 1 : index
    %c0_239 = arith.constant 0 : index
    %c0_240 = arith.constant 0 : index
    %753 = vector.load %arg10[%c1_238, %c0_239, %c0_240] : memref<2x32x64xbf16, #tpu.memory_space<vmem>>, vector<1x32x64xbf16>
    %754 = vector.shape_cast %753 : vector<1x32x64xbf16> to vector<32x64xbf16>
    %c1_241 = arith.constant 1 : index
    %c0_242 = arith.constant 0 : index
    %c0_243 = arith.constant 0 : index
    %755 = vector.load %arg11[%c1_241, %c0_242, %c0_243] : memref<2x1x64xf32, #tpu.memory_space<vmem>>, vector<1x1x64xf32>
    %756 = vector.shape_cast %755 : vector<1x1x64xf32> to vector<1x64xf32>
    %757 = arith.truncf %1 : vector<16x32xf32> to vector<16x32xbf16>
    %cst_244 = arith.constant dense<0.000000e+00> : vector<16x64xf32>
    %758 = tpu.matmul %757, %754, %cst_244 {dimension_numbers = #tpu.dot_dimension_numbers<[1], [0], [0], [1], [0, 0, 1, 1], [], []>} : vector<16x32xbf16>, vector<32x64xbf16>, vector<16x64xf32> -> vector<16x64xf32>
    %759 = vector.broadcast %756 : vector<1x64xf32> to vector<16x64xf32>
    %760 = arith.addf %758, %759 : vector<16x64xf32>
    %761 = vector.extract_strided_slice %760 {offsets = [0, 0], sizes = [16, 32], strides = [1, 1]} : vector<16x64xf32> to vector<16x32xf32>
    %762 = vector.extract_strided_slice %760 {offsets = [0, 32], sizes = [16, 32], strides = [1, 1]} : vector<16x64xf32> to vector<16x32xf32>
    %763 = vector.extract_strided_slice %752 {offsets = [0, 0], sizes = [8, 32], strides = [1, 1]} : vector<16x32xf32> to vector<8x32xf32>
    %764 = vector.extract_strided_slice %761 {offsets = [0, 0], sizes = [8, 32], strides = [1, 1]} : vector<16x32xf32> to vector<8x32xf32>
    %765 = vector.extract_strided_slice %762 {offsets = [0, 0], sizes = [8, 32], strides = [1, 1]} : vector<16x32xf32> to vector<8x32xf32>
    %766 = vector.extract_strided_slice %763 {offsets = [0, 0], sizes = [8, 8], strides = [1, 1]} : vector<8x32xf32> to vector<8x8xf32>
    %767 = vector.extract_strided_slice %764 {offsets = [0, 0], sizes = [8, 8], strides = [1, 1]} : vector<8x32xf32> to vector<8x8xf32>
    %768 = vector.extract_strided_slice %765 {offsets = [0, 0], sizes = [8, 8], strides = [1, 1]} : vector<8x32xf32> to vector<8x8xf32>
    %769 = arith.truncf %766 : vector<8x8xf32> to vector<8x8xbf16>
    %770 = arith.truncf %767 : vector<8x8xf32> to vector<8x8xbf16>
    %cst_245 = arith.constant dense<0.000000e+00> : vector<8x8xf32>
    %771 = tpu.matmul %769, %770, %cst_245 {dimension_numbers = #tpu.dot_dimension_numbers<[1], [1], [0], [0], [0, 0, 1, 0], [], []>} : vector<8x8xbf16>, vector<8x8xbf16>, vector<8x8xf32> -> vector<8x8xf32>
    %cst_246 = arith.constant 0.353553385 : f32
    %772 = vector.broadcast %cst_246 : f32 to vector<8x8xf32>
    %773 = arith.mulf %771, %772 : vector<8x8xf32>
    %cst_247 = arith.constant dense<0xFF800000> : vector<8xf32>
    %774 = vector.multi_reduction <maximumf>, %773, %cst_247 [1] : vector<8x8xf32> to vector<8xf32>
    %775 = vector.shape_cast %774 : vector<8xf32> to vector<8x1xf32>
    %776 = vector.broadcast %775 : vector<8x1xf32> to vector<8x8xf32>
    %777 = arith.subf %773, %776 : vector<8x8xf32>
    %778 = math.exp %777 : vector<8x8xf32>
    %cst_248 = arith.constant dense<0.000000e+00> : vector<8xf32>
    %779 = vector.multi_reduction <add>, %778, %cst_248 [1] : vector<8x8xf32> to vector<8xf32>
    %780 = vector.shape_cast %779 : vector<8xf32> to vector<8x1xf32>
    %781 = tpu.reciprocal %780 {approx = true} : vector<8x1xf32> -> vector<8x1xf32>
    %782 = vector.broadcast %781 : vector<8x1xf32> to vector<8x8xf32>
    %783 = arith.mulf %778, %782 : vector<8x8xf32>
    %784 = arith.truncf %783 : vector<8x8xf32> to vector<8x8xbf16>
    %785 = arith.truncf %768 : vector<8x8xf32> to vector<8x8xbf16>
    %cst_249 = arith.constant dense<0.000000e+00> : vector<8x8xf32>
    %786 = tpu.matmul %784, %785, %cst_249 {dimension_numbers = #tpu.dot_dimension_numbers<[1], [0], [0], [1], [0, 0, 1, 1], [], []>} : vector<8x8xbf16>, vector<8x8xbf16>, vector<8x8xf32> -> vector<8x8xf32>
    %787 = vector.extract_strided_slice %763 {offsets = [0, 8], sizes = [8, 8], strides = [1, 1]} : vector<8x32xf32> to vector<8x8xf32>
    %788 = vector.extract_strided_slice %764 {offsets = [0, 8], sizes = [8, 8], strides = [1, 1]} : vector<8x32xf32> to vector<8x8xf32>
    %789 = vector.extract_strided_slice %765 {offsets = [0, 8], sizes = [8, 8], strides = [1, 1]} : vector<8x32xf32> to vector<8x8xf32>
    %790 = arith.truncf %787 : vector<8x8xf32> to vector<8x8xbf16>
    %791 = arith.truncf %788 : vector<8x8xf32> to vector<8x8xbf16>
    %cst_250 = arith.constant dense<0.000000e+00> : vector<8x8xf32>
    %792 = tpu.matmul %790, %791, %cst_250 {dimension_numbers = #tpu.dot_dimension_numbers<[1], [1], [0], [0], [0, 0, 1, 0], [], []>} : vector<8x8xbf16>, vector<8x8xbf16>, vector<8x8xf32> -> vector<8x8xf32>
    %cst_251 = arith.constant 0.353553385 : f32
    %793 = vector.broadcast %cst_251 : f32 to vector<8x8xf32>
    %794 = arith.mulf %792, %793 : vector<8x8xf32>
    %cst_252 = arith.constant dense<0xFF800000> : vector<8xf32>
    %795 = vector.multi_reduction <maximumf>, %794, %cst_252 [1] : vector<8x8xf32> to vector<8xf32>
    %796 = vector.shape_cast %795 : vector<8xf32> to vector<8x1xf32>
    %797 = vector.broadcast %796 : vector<8x1xf32> to vector<8x8xf32>
    %798 = arith.subf %794, %797 : vector<8x8xf32>
    %799 = math.exp %798 : vector<8x8xf32>
    %cst_253 = arith.constant dense<0.000000e+00> : vector<8xf32>
    %800 = vector.multi_reduction <add>, %799, %cst_253 [1] : vector<8x8xf32> to vector<8xf32>
    %801 = vector.shape_cast %800 : vector<8xf32> to vector<8x1xf32>
    %802 = tpu.reciprocal %801 {approx = true} : vector<8x1xf32> -> vector<8x1xf32>
    %803 = vector.broadcast %802 : vector<8x1xf32> to vector<8x8xf32>
    %804 = arith.mulf %799, %803 : vector<8x8xf32>
    %805 = arith.truncf %804 : vector<8x8xf32> to vector<8x8xbf16>
    %806 = arith.truncf %789 : vector<8x8xf32> to vector<8x8xbf16>
    %cst_254 = arith.constant dense<0.000000e+00> : vector<8x8xf32>
    %807 = tpu.matmul %805, %806, %cst_254 {dimension_numbers = #tpu.dot_dimension_numbers<[1], [0], [0], [1], [0, 0, 1, 1], [], []>} : vector<8x8xbf16>, vector<8x8xbf16>, vector<8x8xf32> -> vector<8x8xf32>
    %808 = vector.extract_strided_slice %763 {offsets = [0, 16], sizes = [8, 8], strides = [1, 1]} : vector<8x32xf32> to vector<8x8xf32>
    %809 = vector.extract_strided_slice %764 {offsets = [0, 16], sizes = [8, 8], strides = [1, 1]} : vector<8x32xf32> to vector<8x8xf32>
    %810 = vector.extract_strided_slice %765 {offsets = [0, 16], sizes = [8, 8], strides = [1, 1]} : vector<8x32xf32> to vector<8x8xf32>
    %811 = arith.truncf %808 : vector<8x8xf32> to vector<8x8xbf16>
    %812 = arith.truncf %809 : vector<8x8xf32> to vector<8x8xbf16>
    %cst_255 = arith.constant dense<0.000000e+00> : vector<8x8xf32>
    %813 = tpu.matmul %811, %812, %cst_255 {dimension_numbers = #tpu.dot_dimension_numbers<[1], [1], [0], [0], [0, 0, 1, 0], [], []>} : vector<8x8xbf16>, vector<8x8xbf16>, vector<8x8xf32> -> vector<8x8xf32>
    %cst_256 = arith.constant 0.353553385 : f32
    %814 = vector.broadcast %cst_256 : f32 to vector<8x8xf32>
    %815 = arith.mulf %813, %814 : vector<8x8xf32>
    %cst_257 = arith.constant dense<0xFF800000> : vector<8xf32>
    %816 = vector.multi_reduction <maximumf>, %815, %cst_257 [1] : vector<8x8xf32> to vector<8xf32>
    %817 = vector.shape_cast %816 : vector<8xf32> to vector<8x1xf32>
    %818 = vector.broadcast %817 : vector<8x1xf32> to vector<8x8xf32>
    %819 = arith.subf %815, %818 : vector<8x8xf32>
    %820 = math.exp %819 : vector<8x8xf32>
    %cst_258 = arith.constant dense<0.000000e+00> : vector<8xf32>
    %821 = vector.multi_reduction <add>, %820, %cst_258 [1] : vector<8x8xf32> to vector<8xf32>
    %822 = vector.shape_cast %821 : vector<8xf32> to vector<8x1xf32>
    %823 = tpu.reciprocal %822 {approx = true} : vector<8x1xf32> -> vector<8x1xf32>
    %824 = vector.broadcast %823 : vector<8x1xf32> to vector<8x8xf32>
    %825 = arith.mulf %820, %824 : vector<8x8xf32>
    %826 = arith.truncf %825 : vector<8x8xf32> to vector<8x8xbf16>
    %827 = arith.truncf %810 : vector<8x8xf32> to vector<8x8xbf16>
    %cst_259 = arith.constant dense<0.000000e+00> : vector<8x8xf32>
    %828 = tpu.matmul %826, %827, %cst_259 {dimension_numbers = #tpu.dot_dimension_numbers<[1], [0], [0], [1], [0, 0, 1, 1], [], []>} : vector<8x8xbf16>, vector<8x8xbf16>, vector<8x8xf32> -> vector<8x8xf32>
    %829 = vector.extract_strided_slice %763 {offsets = [0, 24], sizes = [8, 8], strides = [1, 1]} : vector<8x32xf32> to vector<8x8xf32>
    %830 = vector.extract_strided_slice %764 {offsets = [0, 24], sizes = [8, 8], strides = [1, 1]} : vector<8x32xf32> to vector<8x8xf32>
    %831 = vector.extract_strided_slice %765 {offsets = [0, 24], sizes = [8, 8], strides = [1, 1]} : vector<8x32xf32> to vector<8x8xf32>
    %832 = arith.truncf %829 : vector<8x8xf32> to vector<8x8xbf16>
    %833 = arith.truncf %830 : vector<8x8xf32> to vector<8x8xbf16>
    %cst_260 = arith.constant dense<0.000000e+00> : vector<8x8xf32>
    %834 = tpu.matmul %832, %833, %cst_260 {dimension_numbers = #tpu.dot_dimension_numbers<[1], [1], [0], [0], [0, 0, 1, 0], [], []>} : vector<8x8xbf16>, vector<8x8xbf16>, vector<8x8xf32> -> vector<8x8xf32>
    %cst_261 = arith.constant 0.353553385 : f32
    %835 = vector.broadcast %cst_261 : f32 to vector<8x8xf32>
    %836 = arith.mulf %834, %835 : vector<8x8xf32>
    %cst_262 = arith.constant dense<0xFF800000> : vector<8xf32>
    %837 = vector.multi_reduction <maximumf>, %836, %cst_262 [1] : vector<8x8xf32> to vector<8xf32>
    %838 = vector.shape_cast %837 : vector<8xf32> to vector<8x1xf32>
    %839 = vector.broadcast %838 : vector<8x1xf32> to vector<8x8xf32>
    %840 = arith.subf %836, %839 : vector<8x8xf32>
    %841 = math.exp %840 : vector<8x8xf32>
    %cst_263 = arith.constant dense<0.000000e+00> : vector<8xf32>
    %842 = vector.multi_reduction <add>, %841, %cst_263 [1] : vector<8x8xf32> to vector<8xf32>
    %843 = vector.shape_cast %842 : vector<8xf32> to vector<8x1xf32>
    %844 = tpu.reciprocal %843 {approx = true} : vector<8x1xf32> -> vector<8x1xf32>
    %845 = vector.broadcast %844 : vector<8x1xf32> to vector<8x8xf32>
    %846 = arith.mulf %841, %845 : vector<8x8xf32>
    %847 = arith.truncf %846 : vector<8x8xf32> to vector<8x8xbf16>
    %848 = arith.truncf %831 : vector<8x8xf32> to vector<8x8xbf16>
    %cst_264 = arith.constant dense<0.000000e+00> : vector<8x8xf32>
    %849 = tpu.matmul %847, %848, %cst_264 {dimension_numbers = #tpu.dot_dimension_numbers<[1], [0], [0], [1], [0, 0, 1, 1], [], []>} : vector<8x8xbf16>, vector<8x8xbf16>, vector<8x8xf32> -> vector<8x8xf32>
    %850 = tpu.concatenate %786, %807, %828, %849 in 1 : vector<8x8xf32>, vector<8x8xf32>, vector<8x8xf32>, vector<8x8xf32> -> vector<8x32xf32>
    %851 = vector.extract_strided_slice %752 {offsets = [8, 0], sizes = [8, 32], strides = [1, 1]} : vector<16x32xf32> to vector<8x32xf32>
    %852 = vector.extract_strided_slice %761 {offsets = [8, 0], sizes = [8, 32], strides = [1, 1]} : vector<16x32xf32> to vector<8x32xf32>
    %853 = vector.extract_strided_slice %762 {offsets = [8, 0], sizes = [8, 32], strides = [1, 1]} : vector<16x32xf32> to vector<8x32xf32>
    %854 = vector.extract_strided_slice %851 {offsets = [0, 0], sizes = [8, 8], strides = [1, 1]} : vector<8x32xf32> to vector<8x8xf32>
    %855 = vector.extract_strided_slice %852 {offsets = [0, 0], sizes = [8, 8], strides = [1, 1]} : vector<8x32xf32> to vector<8x8xf32>
    %856 = vector.extract_strided_slice %853 {offsets = [0, 0], sizes = [8, 8], strides = [1, 1]} : vector<8x32xf32> to vector<8x8xf32>
    %857 = arith.truncf %854 : vector<8x8xf32> to vector<8x8xbf16>
    %858 = arith.truncf %855 : vector<8x8xf32> to vector<8x8xbf16>
    %cst_265 = arith.constant dense<0.000000e+00> : vector<8x8xf32>
    %859 = tpu.matmul %857, %858, %cst_265 {dimension_numbers = #tpu.dot_dimension_numbers<[1], [1], [0], [0], [0, 0, 1, 0], [], []>} : vector<8x8xbf16>, vector<8x8xbf16>, vector<8x8xf32> -> vector<8x8xf32>
    %cst_266 = arith.constant 0.353553385 : f32
    %860 = vector.broadcast %cst_266 : f32 to vector<8x8xf32>
    %861 = arith.mulf %859, %860 : vector<8x8xf32>
    %cst_267 = arith.constant dense<0xFF800000> : vector<8xf32>
    %862 = vector.multi_reduction <maximumf>, %861, %cst_267 [1] : vector<8x8xf32> to vector<8xf32>
    %863 = vector.shape_cast %862 : vector<8xf32> to vector<8x1xf32>
    %864 = vector.broadcast %863 : vector<8x1xf32> to vector<8x8xf32>
    %865 = arith.subf %861, %864 : vector<8x8xf32>
    %866 = math.exp %865 : vector<8x8xf32>
    %cst_268 = arith.constant dense<0.000000e+00> : vector<8xf32>
    %867 = vector.multi_reduction <add>, %866, %cst_268 [1] : vector<8x8xf32> to vector<8xf32>
    %868 = vector.shape_cast %867 : vector<8xf32> to vector<8x1xf32>
    %869 = tpu.reciprocal %868 {approx = true} : vector<8x1xf32> -> vector<8x1xf32>
    %870 = vector.broadcast %869 : vector<8x1xf32> to vector<8x8xf32>
    %871 = arith.mulf %866, %870 : vector<8x8xf32>
    %872 = arith.truncf %871 : vector<8x8xf32> to vector<8x8xbf16>
    %873 = arith.truncf %856 : vector<8x8xf32> to vector<8x8xbf16>
    %cst_269 = arith.constant dense<0.000000e+00> : vector<8x8xf32>
    %874 = tpu.matmul %872, %873, %cst_269 {dimension_numbers = #tpu.dot_dimension_numbers<[1], [0], [0], [1], [0, 0, 1, 1], [], []>} : vector<8x8xbf16>, vector<8x8xbf16>, vector<8x8xf32> -> vector<8x8xf32>
    %875 = vector.extract_strided_slice %851 {offsets = [0, 8], sizes = [8, 8], strides = [1, 1]} : vector<8x32xf32> to vector<8x8xf32>
    %876 = vector.extract_strided_slice %852 {offsets = [0, 8], sizes = [8, 8], strides = [1, 1]} : vector<8x32xf32> to vector<8x8xf32>
    %877 = vector.extract_strided_slice %853 {offsets = [0, 8], sizes = [8, 8], strides = [1, 1]} : vector<8x32xf32> to vector<8x8xf32>
    %878 = arith.truncf %875 : vector<8x8xf32> to vector<8x8xbf16>
    %879 = arith.truncf %876 : vector<8x8xf32> to vector<8x8xbf16>
    %cst_270 = arith.constant dense<0.000000e+00> : vector<8x8xf32>
    %880 = tpu.matmul %878, %879, %cst_270 {dimension_numbers = #tpu.dot_dimension_numbers<[1], [1], [0], [0], [0, 0, 1, 0], [], []>} : vector<8x8xbf16>, vector<8x8xbf16>, vector<8x8xf32> -> vector<8x8xf32>
    %cst_271 = arith.constant 0.353553385 : f32
    %881 = vector.broadcast %cst_271 : f32 to vector<8x8xf32>
    %882 = arith.mulf %880, %881 : vector<8x8xf32>
    %cst_272 = arith.constant dense<0xFF800000> : vector<8xf32>
    %883 = vector.multi_reduction <maximumf>, %882, %cst_272 [1] : vector<8x8xf32> to vector<8xf32>
    %884 = vector.shape_cast %883 : vector<8xf32> to vector<8x1xf32>
    %885 = vector.broadcast %884 : vector<8x1xf32> to vector<8x8xf32>
    %886 = arith.subf %882, %885 : vector<8x8xf32>
    %887 = math.exp %886 : vector<8x8xf32>
    %cst_273 = arith.constant dense<0.000000e+00> : vector<8xf32>
    %888 = vector.multi_reduction <add>, %887, %cst_273 [1] : vector<8x8xf32> to vector<8xf32>
    %889 = vector.shape_cast %888 : vector<8xf32> to vector<8x1xf32>
    %890 = tpu.reciprocal %889 {approx = true} : vector<8x1xf32> -> vector<8x1xf32>
    %891 = vector.broadcast %890 : vector<8x1xf32> to vector<8x8xf32>
    %892 = arith.mulf %887, %891 : vector<8x8xf32>
    %893 = arith.truncf %892 : vector<8x8xf32> to vector<8x8xbf16>
    %894 = arith.truncf %877 : vector<8x8xf32> to vector<8x8xbf16>
    %cst_274 = arith.constant dense<0.000000e+00> : vector<8x8xf32>
    %895 = tpu.matmul %893, %894, %cst_274 {dimension_numbers = #tpu.dot_dimension_numbers<[1], [0], [0], [1], [0, 0, 1, 1], [], []>} : vector<8x8xbf16>, vector<8x8xbf16>, vector<8x8xf32> -> vector<8x8xf32>
    %896 = vector.extract_strided_slice %851 {offsets = [0, 16], sizes = [8, 8], strides = [1, 1]} : vector<8x32xf32> to vector<8x8xf32>
    %897 = vector.extract_strided_slice %852 {offsets = [0, 16], sizes = [8, 8], strides = [1, 1]} : vector<8x32xf32> to vector<8x8xf32>
    %898 = vector.extract_strided_slice %853 {offsets = [0, 16], sizes = [8, 8], strides = [1, 1]} : vector<8x32xf32> to vector<8x8xf32>
    %899 = arith.truncf %896 : vector<8x8xf32> to vector<8x8xbf16>
    %900 = arith.truncf %897 : vector<8x8xf32> to vector<8x8xbf16>
    %cst_275 = arith.constant dense<0.000000e+00> : vector<8x8xf32>
    %901 = tpu.matmul %899, %900, %cst_275 {dimension_numbers = #tpu.dot_dimension_numbers<[1], [1], [0], [0], [0, 0, 1, 0], [], []>} : vector<8x8xbf16>, vector<8x8xbf16>, vector<8x8xf32> -> vector<8x8xf32>
    %cst_276 = arith.constant 0.353553385 : f32
    %902 = vector.broadcast %cst_276 : f32 to vector<8x8xf32>
    %903 = arith.mulf %901, %902 : vector<8x8xf32>
    %cst_277 = arith.constant dense<0xFF800000> : vector<8xf32>
    %904 = vector.multi_reduction <maximumf>, %903, %cst_277 [1] : vector<8x8xf32> to vector<8xf32>
    %905 = vector.shape_cast %904 : vector<8xf32> to vector<8x1xf32>
    %906 = vector.broadcast %905 : vector<8x1xf32> to vector<8x8xf32>
    %907 = arith.subf %903, %906 : vector<8x8xf32>
    %908 = math.exp %907 : vector<8x8xf32>
    %cst_278 = arith.constant dense<0.000000e+00> : vector<8xf32>
    %909 = vector.multi_reduction <add>, %908, %cst_278 [1] : vector<8x8xf32> to vector<8xf32>
    %910 = vector.shape_cast %909 : vector<8xf32> to vector<8x1xf32>
    %911 = tpu.reciprocal %910 {approx = true} : vector<8x1xf32> -> vector<8x1xf32>
    %912 = vector.broadcast %911 : vector<8x1xf32> to vector<8x8xf32>
    %913 = arith.mulf %908, %912 : vector<8x8xf32>
    %914 = arith.truncf %913 : vector<8x8xf32> to vector<8x8xbf16>
    %915 = arith.truncf %898 : vector<8x8xf32> to vector<8x8xbf16>
    %cst_279 = arith.constant dense<0.000000e+00> : vector<8x8xf32>
    %916 = tpu.matmul %914, %915, %cst_279 {dimension_numbers = #tpu.dot_dimension_numbers<[1], [0], [0], [1], [0, 0, 1, 1], [], []>} : vector<8x8xbf16>, vector<8x8xbf16>, vector<8x8xf32> -> vector<8x8xf32>
    %917 = vector.extract_strided_slice %851 {offsets = [0, 24], sizes = [8, 8], strides = [1, 1]} : vector<8x32xf32> to vector<8x8xf32>
    %918 = vector.extract_strided_slice %852 {offsets = [0, 24], sizes = [8, 8], strides = [1, 1]} : vector<8x32xf32> to vector<8x8xf32>
    %919 = vector.extract_strided_slice %853 {offsets = [0, 24], sizes = [8, 8], strides = [1, 1]} : vector<8x32xf32> to vector<8x8xf32>
    %920 = arith.truncf %917 : vector<8x8xf32> to vector<8x8xbf16>
    %921 = arith.truncf %918 : vector<8x8xf32> to vector<8x8xbf16>
    %cst_280 = arith.constant dense<0.000000e+00> : vector<8x8xf32>
    %922 = tpu.matmul %920, %921, %cst_280 {dimension_numbers = #tpu.dot_dimension_numbers<[1], [1], [0], [0], [0, 0, 1, 0], [], []>} : vector<8x8xbf16>, vector<8x8xbf16>, vector<8x8xf32> -> vector<8x8xf32>
    %cst_281 = arith.constant 0.353553385 : f32
    %923 = vector.broadcast %cst_281 : f32 to vector<8x8xf32>
    %924 = arith.mulf %922, %923 : vector<8x8xf32>
    %cst_282 = arith.constant dense<0xFF800000> : vector<8xf32>
    %925 = vector.multi_reduction <maximumf>, %924, %cst_282 [1] : vector<8x8xf32> to vector<8xf32>
    %926 = vector.shape_cast %925 : vector<8xf32> to vector<8x1xf32>
    %927 = vector.broadcast %926 : vector<8x1xf32> to vector<8x8xf32>
    %928 = arith.subf %924, %927 : vector<8x8xf32>
    %929 = math.exp %928 : vector<8x8xf32>
    %cst_283 = arith.constant dense<0.000000e+00> : vector<8xf32>
    %930 = vector.multi_reduction <add>, %929, %cst_283 [1] : vector<8x8xf32> to vector<8xf32>
    %931 = vector.shape_cast %930 : vector<8xf32> to vector<8x1xf32>
    %932 = tpu.reciprocal %931 {approx = true} : vector<8x1xf32> -> vector<8x1xf32>
    %933 = vector.broadcast %932 : vector<8x1xf32> to vector<8x8xf32>
    %934 = arith.mulf %929, %933 : vector<8x8xf32>
    %935 = arith.truncf %934 : vector<8x8xf32> to vector<8x8xbf16>
    %936 = arith.truncf %919 : vector<8x8xf32> to vector<8x8xbf16>
    %cst_284 = arith.constant dense<0.000000e+00> : vector<8x8xf32>
    %937 = tpu.matmul %935, %936, %cst_284 {dimension_numbers = #tpu.dot_dimension_numbers<[1], [0], [0], [1], [0, 0, 1, 1], [], []>} : vector<8x8xbf16>, vector<8x8xbf16>, vector<8x8xf32> -> vector<8x8xf32>
    %938 = tpu.concatenate %874, %895, %916, %937 in 1 : vector<8x8xf32>, vector<8x8xf32>, vector<8x8xf32>, vector<8x8xf32> -> vector<8x32xf32>
    %939 = tpu.concatenate %850, %938 in 0 : vector<8x32xf32>, vector<8x32xf32> -> vector<16x32xf32>
    %c1_285 = arith.constant 1 : index
    %c0_286 = arith.constant 0 : index
    %c0_287 = arith.constant 0 : index
    %940 = vector.load %arg12[%c1_285, %c0_286, %c0_287] : memref<2x32x32xbf16, #tpu.memory_space<vmem>>, vector<1x32x32xbf16>
    %941 = vector.shape_cast %940 : vector<1x32x32xbf16> to vector<32x32xbf16>
    %c1_288 = arith.constant 1 : index
    %c0_289 = arith.constant 0 : index
    %c0_290 = arith.constant 0 : index
    %942 = vector.load %arg13[%c1_288, %c0_289, %c0_290] : memref<2x1x32xf32, #tpu.memory_space<vmem>>, vector<1x1x32xf32>
    %943 = vector.shape_cast %942 : vector<1x1x32xf32> to vector<1x32xf32>
    %944 = arith.truncf %939 : vector<16x32xf32> to vector<16x32xbf16>
    %cst_291 = arith.constant dense<0.000000e+00> : vector<16x32xf32>
    %945 = tpu.matmul %944, %941, %cst_291 {dimension_numbers = #tpu.dot_dimension_numbers<[1], [0], [0], [1], [0, 0, 1, 1], [], []>} : vector<16x32xbf16>, vector<32x32xbf16>, vector<16x32xf32> -> vector<16x32xf32>
    %946 = vector.broadcast %943 : vector<1x32xf32> to vector<16x32xf32>
    %947 = arith.addf %945, %946 : vector<16x32xf32>
    %948 = arith.addf %744, %947 : vector<16x32xf32>
    %c1_292 = arith.constant 1 : index
    %c0_293 = arith.constant 0 : index
    %c0_294 = arith.constant 0 : index
    %949 = vector.load %arg14[%c1_292, %c0_293, %c0_294] : memref<2x1x32xf32, #tpu.memory_space<vmem>>, vector<1x1x32xf32>
    %950 = vector.shape_cast %949 : vector<1x1x32xf32> to vector<1x32xf32>
    %c1_295 = arith.constant 1 : index
    %c0_296 = arith.constant 0 : index
    %c0_297 = arith.constant 0 : index
    %951 = vector.load %arg15[%c1_295, %c0_296, %c0_297] : memref<2x1x32xf32, #tpu.memory_space<vmem>>, vector<1x1x32xf32>
    %952 = vector.shape_cast %951 : vector<1x1x32xf32> to vector<1x32xf32>
    %cst_298 = arith.constant dense<0.000000e+00> : vector<16xf32>
    %953 = vector.multi_reduction <add>, %948, %cst_298 [1] : vector<16x32xf32> to vector<16xf32>
    %954 = vector.shape_cast %953 : vector<16xf32> to vector<16x1xf32>
    %cst_299 = arith.constant 3.200000e+01 : f32
    %955 = vector.broadcast %cst_299 : f32 to vector<16x1xf32>
    %956 = arith.divf %954, %955 : vector<16x1xf32>
    %957 = vector.broadcast %956 : vector<16x1xf32> to vector<16x32xf32>
    %958 = arith.subf %948, %957 : vector<16x32xf32>
    %959 = arith.mulf %958, %958 : vector<16x32xf32>
    %cst_300 = arith.constant dense<0.000000e+00> : vector<16xf32>
    %960 = vector.multi_reduction <add>, %959, %cst_300 [1] : vector<16x32xf32> to vector<16xf32>
    %961 = vector.shape_cast %960 : vector<16xf32> to vector<16x1xf32>
    %cst_301 = arith.constant 3.200000e+01 : f32
    %962 = vector.broadcast %cst_301 : f32 to vector<16x1xf32>
    %963 = arith.divf %961, %962 : vector<16x1xf32>
    %964 = vector.broadcast %956 : vector<16x1xf32> to vector<16x32xf32>
    %965 = arith.subf %948, %964 : vector<16x32xf32>
    %cst_302 = arith.constant 9.99999974E-6 : f32
    %966 = vector.broadcast %cst_302 : f32 to vector<16x1xf32>
    %967 = arith.addf %963, %966 : vector<16x1xf32>
    %968 = math.rsqrt %967 : vector<16x1xf32>
    %969 = vector.broadcast %968 : vector<16x1xf32> to vector<16x32xf32>
    %970 = arith.mulf %965, %969 : vector<16x32xf32>
    %971 = vector.broadcast %950 : vector<1x32xf32> to vector<16x32xf32>
    %972 = arith.mulf %970, %971 : vector<16x32xf32>
    %973 = vector.broadcast %952 : vector<1x32xf32> to vector<16x32xf32>
    %974 = arith.addf %972, %973 : vector<16x32xf32>
    %c1_303 = arith.constant 1 : index
    %c0_304 = arith.constant 0 : index
    %c0_305 = arith.constant 0 : index
    %975 = vector.load %arg16[%c1_303, %c0_304, %c0_305] : memref<2x32x64xbf16, #tpu.memory_space<vmem>>, vector<1x32x64xbf16>
    %976 = vector.shape_cast %975 : vector<1x32x64xbf16> to vector<32x64xbf16>
    %c1_306 = arith.constant 1 : index
    %c0_307 = arith.constant 0 : index
    %c0_308 = arith.constant 0 : index
    %977 = vector.load %arg17[%c1_306, %c0_307, %c0_308] : memref<2x1x64xf32, #tpu.memory_space<vmem>>, vector<1x1x64xf32>
    %978 = vector.shape_cast %977 : vector<1x1x64xf32> to vector<1x64xf32>
    %979 = arith.truncf %974 : vector<16x32xf32> to vector<16x32xbf16>
    %cst_309 = arith.constant dense<0.000000e+00> : vector<16x64xf32>
    %980 = tpu.matmul %979, %976, %cst_309 {dimension_numbers = #tpu.dot_dimension_numbers<[1], [0], [0], [1], [0, 0, 1, 1], [], []>} : vector<16x32xbf16>, vector<32x64xbf16>, vector<16x64xf32> -> vector<16x64xf32>
    %981 = vector.broadcast %978 : vector<1x64xf32> to vector<16x64xf32>
    %982 = arith.addf %980, %981 : vector<16x64xf32>
    %cst_310 = arith.constant 0.000000e+00 : f32
    %983 = vector.broadcast %cst_310 : f32 to vector<16x64xf32>
    %984 = arith.maximumf %982, %983 : vector<16x64xf32>
    %c1_311 = arith.constant 1 : index
    %c0_312 = arith.constant 0 : index
    %c0_313 = arith.constant 0 : index
    %985 = vector.load %arg18[%c1_311, %c0_312, %c0_313] : memref<2x64x32xbf16, #tpu.memory_space<vmem>>, vector<1x64x32xbf16>
    %986 = vector.shape_cast %985 : vector<1x64x32xbf16> to vector<64x32xbf16>
    %c1_314 = arith.constant 1 : index
    %c0_315 = arith.constant 0 : index
    %c0_316 = arith.constant 0 : index
    %987 = vector.load %arg19[%c1_314, %c0_315, %c0_316] : memref<2x1x32xf32, #tpu.memory_space<vmem>>, vector<1x1x32xf32>
    %988 = vector.shape_cast %987 : vector<1x1x32xf32> to vector<1x32xf32>
    %989 = arith.truncf %984 : vector<16x64xf32> to vector<16x64xbf16>
    %cst_317 = arith.constant dense<0.000000e+00> : vector<16x32xf32>
    %990 = tpu.matmul %989, %986, %cst_317 {dimension_numbers = #tpu.dot_dimension_numbers<[1], [0], [0], [1], [0, 0, 1, 1], [], []>} : vector<16x64xbf16>, vector<64x32xbf16>, vector<16x32xf32> -> vector<16x32xf32>
    %991 = vector.broadcast %988 : vector<1x32xf32> to vector<16x32xf32>
    %992 = arith.addf %990, %991 : vector<16x32xf32>
    %993 = arith.addf %974, %992 : vector<16x32xf32>
    %c1_318 = arith.constant 1 : index
    %c0_319 = arith.constant 0 : index
    %c0_320 = arith.constant 0 : index
    %994 = vector.load %arg20[%c1_318, %c0_319, %c0_320] : memref<2x1x32xf32, #tpu.memory_space<vmem>>, vector<1x1x32xf32>
    %995 = vector.shape_cast %994 : vector<1x1x32xf32> to vector<1x32xf32>
    %c1_321 = arith.constant 1 : index
    %c0_322 = arith.constant 0 : index
    %c0_323 = arith.constant 0 : index
    %996 = vector.load %arg21[%c1_321, %c0_322, %c0_323] : memref<2x1x32xf32, #tpu.memory_space<vmem>>, vector<1x1x32xf32>
    %997 = vector.shape_cast %996 : vector<1x1x32xf32> to vector<1x32xf32>
    %cst_324 = arith.constant dense<0.000000e+00> : vector<16xf32>
    %998 = vector.multi_reduction <add>, %993, %cst_324 [1] : vector<16x32xf32> to vector<16xf32>
    %999 = vector.shape_cast %998 : vector<16xf32> to vector<16x1xf32>
    %cst_325 = arith.constant 3.200000e+01 : f32
    %1000 = vector.broadcast %cst_325 : f32 to vector<16x1xf32>
    %1001 = arith.divf %999, %1000 : vector<16x1xf32>
    %1002 = vector.broadcast %1001 : vector<16x1xf32> to vector<16x32xf32>
    %1003 = arith.subf %993, %1002 : vector<16x32xf32>
    %1004 = arith.mulf %1003, %1003 : vector<16x32xf32>
    %cst_326 = arith.constant dense<0.000000e+00> : vector<16xf32>
    %1005 = vector.multi_reduction <add>, %1004, %cst_326 [1] : vector<16x32xf32> to vector<16xf32>
    %1006 = vector.shape_cast %1005 : vector<16xf32> to vector<16x1xf32>
    %cst_327 = arith.constant 3.200000e+01 : f32
    %1007 = vector.broadcast %cst_327 : f32 to vector<16x1xf32>
    %1008 = arith.divf %1006, %1007 : vector<16x1xf32>
    %1009 = vector.broadcast %1001 : vector<16x1xf32> to vector<16x32xf32>
    %1010 = arith.subf %993, %1009 : vector<16x32xf32>
    %cst_328 = arith.constant 9.99999974E-6 : f32
    %1011 = vector.broadcast %cst_328 : f32 to vector<16x1xf32>
    %1012 = arith.addf %1008, %1011 : vector<16x1xf32>
    %1013 = math.rsqrt %1012 : vector<16x1xf32>
    %1014 = vector.broadcast %1013 : vector<16x1xf32> to vector<16x32xf32>
    %1015 = arith.mulf %1010, %1014 : vector<16x32xf32>
    %1016 = vector.broadcast %995 : vector<1x32xf32> to vector<16x32xf32>
    %1017 = arith.mulf %1015, %1016 : vector<16x32xf32>
    %1018 = vector.broadcast %997 : vector<1x32xf32> to vector<16x32xf32>
    %1019 = arith.addf %1017, %1018 : vector<16x32xf32>
    %c0_329 = arith.constant 0 : index
    %c0_330 = arith.constant 0 : index
    %1020 = vector.load %arg22[%c0_329, %c0_330] : memref<32x128xbf16, #tpu.memory_space<vmem>>, vector<32x128xbf16>
    %c0_331 = arith.constant 0 : index
    %c0_332 = arith.constant 0 : index
    %1021 = vector.load %arg23[%c0_331, %c0_332] : memref<1x128xf32, #tpu.memory_space<vmem>>, vector<1x128xf32>
    %1022 = arith.truncf %1019 : vector<16x32xf32> to vector<16x32xbf16>
    %cst_333 = arith.constant dense<0.000000e+00> : vector<16x128xf32>
    %1023 = tpu.matmul %1022, %1020, %cst_333 {dimension_numbers = #tpu.dot_dimension_numbers<[1], [0], [0], [1], [0, 0, 1, 1], [], []>} : vector<16x32xbf16>, vector<32x128xbf16>, vector<16x128xf32> -> vector<16x128xf32>
    %1024 = vector.broadcast %1021 : vector<1x128xf32> to vector<16x128xf32>
    %1025 = arith.addf %1023, %1024 : vector<16x128xf32>
    %c0_334 = arith.constant 0 : index
    %c0_335 = arith.constant 0 : index
    %1026 = vector.load %arg24[%c0_334, %c0_335] : memref<16x128xf32, #tpu.memory_space<vmem>>, vector<16x128xf32>
    tpu.vector_store %arg24[%c0_334, %c0_335], %1025 {strides = array<i32>} : memref<16x128xf32, #tpu.memory_space<vmem>>, vector<16x128xf32>,
    return
  }
}

</mosaic_0001>

<bundles_post_ra>
// kernel: emoji_transformer_forward.2
= control target key start
LH: loop header
LB: loop body
LE: loop exit
PB: predicated region body
PF: predicated region fallthrough
CT: control target
= control target key end

     0   :  { %vm68_vm0 = vcmask 261120   ;;  %s1933_s18 = smov 104   ;;  %s1935_s19 = smov 96   ;;  %vm90_vm1 = vcmask 64512   ;;  %vm128_vm2 = vcmask 1043456   ;;  %vm329_vm3 = vcmask 130048   ;;  %s2464_s1 = inlined_call_operand.vmem [shape: bf16[2,32,96], index: 1, kind: input, shape index: {}]   ;;  %s2465_s0 = inlined_call_operand.vmem [shape: f32[16,32], index: 0, kind: input, shape index: {}]   ;;  %s2466_s2 = inlined_call_operand.vmem [shape: f32[2,1,96], index: 2, kind: input, shape index: {}]   ;;  %s2467_s4 = inlined_call_operand.vmem [shape: f32[2,1,32], index: 4, kind: input, shape index: {}]   ;;  %s2468_s3 = inlined_call_operand.vmem [shape: bf16[2,32,32], index: 3, kind: input, shape index: {}]   ;;  %s2469_s5 = inlined_call_operand.vmem [shape: f32[2,1,32], index: 5, kind: input, shape index: {}]   ;;  %s2470_s6 = inlined_call_operand.vmem [shape: f32[2,1,32], index: 6, kind: input, shape index: {}]   ;;  %s2471_s8 = inlined_call_operand.vmem [shape: f32[2,1,64], index: 8, kind: input, shape index: {}]   ;;  %s2472_s7 = inlined_call_operand.vmem [shape: bf16[2,32,64], index: 7, kind: input, shape index: {}]   ;;  %s2473_s10 = inlined_call_operand.vmem [shape: f32[2,1,32], index: 10, kind: input, shape index: {}]   ;;  %s2474_s9 = inlined_call_operand.vmem [shape: bf16[2,64,32], index: 9, kind: input, shape index: {}]   ;;  %s2475_s11 = inlined_call_operand.vmem [shape: f32[2,1,32], index: 11, kind: input, shape index: {}]   ;;  %s2476_s12 = inlined_call_operand.vmem [shape: f32[2,1,32], index: 12, kind: input, shape index: {}]   ;;  %s2477_s13 = inlined_call_operand.vmem [shape: f32[16,32], index: 13, kind: output, shape index: {}]  }
   0x1   :  { %v1771_v0 = vld [vmem:[%s2464_s1 + $0x8] sm:$0xff]  ;;  %v1770_v1 = vld [vmem:[%s2464_s1] sm:$0xff]  ;;  %s1936_s20 = smov 80   ;;  %s1937_s21 = smov 72   ;;  %vm331_vm4 = vcmask 195584   ;;  %vm756_vm12 = vcmask 523264  }
   0x2   :  { %78 = vmatpush.bf16.msra.mxu0 %v1771_v0  ;;  %v2027_v2 = vld [vmem:[%s2465_s0] sm:$0xff]  ;;  %v2032_v3 = vld [vmem:[%s2465_s0 + $0x8] sm:$0xff]  ;;  %s1934_s0 = smov 120   ;;  %s1938_s22 = smov 88  }
   0x3   :  { %v52_v4 = vpack.c.bf16 %v2032_v3, %v2027_v2  ;;  %v1835_v5 = vld [vmem:[%s2466_s2] ss:$0 sm:$0xff]  ;;  %s1939_s23 = smov 112   ;;  %s1940_s24 = smov 56  }
   0x4   :  { %s1941_s25 = smov 64   ;;  %s2481_s26 = smov 48  }
   0x5   :  { %s2483_s27 = smov 40   ;;  %s2480_s28 = smov 8  }
   0x6   :  { %79 = vmatpush.bf16.msra.mxu0 %v1770_v1  ;;  %s2479_s29 = smov 16   ;;  %s2478_s30 = smov 24  }
   0x9   :  { %1630 = vmatmul.msk.bf16.vlgmr.msra.gmra.mxu0 %vm68_vm0, %v52_v4 }
  0x86   :  { %v81_v6 = vpop.f32.mrf.mxu0 }
  0x87   :  { %v82_v7 = vadd.f32 %v1835_v5, %v81_v6 }
  0x89   :  { %v2040_v8 = vpack.c.bf16 %v82_v7, %v82_v7 }
  0x8b   :  { %259 = vrot.lane.b32.xlu2 %v2040_v8, %s1933_s18  ;;  %145 = vrot.lane.b32.xlu1 %v2040_v8, %s1934_s0 }
  0x8c   :  { %88 = vrot.lane.b32.xlu0 %v2040_v8, %s1935_s19 }
  0x8e   :  { %v83_v9 = vpop.f32.mrf.mxu0 }
  0x8f   :  { %v84_v10 = vadd.f32 %v1835_v5, %v83_v9 }
  0x91   :  { %v2054_v11 = vpack.c.bf16 %v84_v10, %v84_v10 }
  0x93   :  { %204 = vrot.lane.b32.xlu2 %v2040_v8, %s1936_s20  ;;  %261 = vrot.lane.b32.xlu1 %v2040_v8, %s1937_s21 }
  0x94   :  { %147 = vrot.lane.b32.xlu0 %v2040_v8, %s1938_s22 }
  0x9b   :  { %390 = vrot.lane.b32.xlu2 %v2054_v11, %s1934_s0  ;;  %202 = vrot.lane.b32.xlu1 %v2040_v8, %s1939_s23 }
  0x9c   :  { %392 = vrot.lane.b32.xlu0 %v2054_v11, %s1938_s22 }
  0xa3   :  { %504 = vrot.lane.b32.xlu2 %v2054_v11, %s1933_s18  ;;  %506 = vrot.lane.b32.xlu1 %v2054_v11, %s1937_s21 }
  0xa4   :  { %335 = vrot.lane.b32.xlu0 %v2054_v11, %s1935_s19 }
  0xab   :  { %447 = vrot.lane.b32.xlu1 %v2054_v11, %s1939_s23 }
  0xac   :  { %449 = vrot.lane.b32.xlu0 %v2054_v11, %s1936_s20 }
  0xb3   :  { %181 = vrot.lane.b32.xlu1 %v2040_v8, %s1940_s24 }
  0xe5   :  { %v260_v12 = vpop.permute.xlu2 %259 }
  0xed   :  { %v205_v13 = vpop.permute.xlu2 %204 }
  0xee   :  { %v210_v14 = vsel %vm90_vm1, %v205_v13, 0 }
  0xef   :  { %219 = vmatpush.bf16.xpose.msrb.mxu0 %v210_v14 }
  0xf5   :  { %v391_v31 = vpop.permute.xlu2 %390 }
  0xfd   :  { %v146_v15 = vpop.permute.xlu1 %145  ;;  %v505_v33 = vpop.permute.xlu2 %504 }
  0xfe   :  { %v89_v16 = vpop.permute.xlu0 %88 }
  0xff   :  { %v95_v17 = vsel %vm90_vm1, %v89_v16, 0 }
 0x100   :  { %104 = vmatpush.bf16.xpose.msra.mxu1 %v95_v17 }
 0x105   :  { %v262_v18 = vpop.permute.xlu1 %261 }
 0x106   :  { %v148_v19 = vpop.permute.xlu0 %147  ;;  %v267_v20 = vsel %vm90_vm1, %v262_v18, 0 }
 0x107   :  { %1631 = vmatmul.msk.bf16.vlgmr.msra.gmra.mxu1 %vm90_vm1, %v2040_v8  ;;  %v153_v21 = vsel %vm90_vm1, %v148_v19, 0 }
 0x108   :  { %162 = vmatpush.bf16.xpose.msra.mxu3 %v153_v21 }
 0x10d   :  { %v203_v22 = vpop.permute.xlu1 %202 }
 0x10e   :  { %v393_v23 = vpop.permute.xlu0 %392  ;;  %1635 = vmatmul.msk.bf16.vlgmr.msrb.gmra.mxu0 %vm90_vm1, %v203_v22 }
 0x10f   :  { %v398_v24 = vsel %vm90_vm1, %v393_v23, 0  ;;  %1633 = vmatmul.msk.bf16.vlgmr.msra.gmra.mxu3 %vm90_vm1, %v146_v15 }
 0x110   :  { %276 = vmatpush.bf16.xpose.msrb.mxu3 %v267_v20 }
 0x115   :  { %v507_v27 = vpop.permute.xlu1 %506 }
 0x116   :  { %v336_v25 = vpop.permute.xlu0 %335  ;;  %v512_v29 = vsel %vm90_vm1, %v507_v27, 0 }
 0x117   :  { %v341_v26 = vsel %vm90_vm1, %v336_v25, 0 }
 0x118   :  { %407 = vmatpush.bf16.xpose.msra.mxu3 %v398_v24  ;;  %350 = vmatpush.bf16.xpose.msra.mxu0 %v341_v26 }
 0x11d   :  { %v448_v32 = vpop.permute.xlu1 %447 }
 0x11e   :  { %v450_v28 = vpop.permute.xlu0 %449 }
 0x11f   :  { %v455_v30 = vsel %vm90_vm1, %v450_v28, 0  ;;  %1637 = vmatmul.msk.bf16.vlgmr.msrb.gmra.mxu3 %vm90_vm1, %v260_v12  ;;  %1639 = vmatmul.msk.bf16.vlgmr.msra.gmra.mxu0 %vm90_vm1, %v2054_v11 }
 0x120   :  { %521 = vmatpush.bf16.xpose.msrb.mxu3 %v512_v29  ;;  %464 = vmatpush.bf16.xpose.msrb.mxu0 %v455_v30 }
 0x125   :  { %v182_v15 = vpop.permute.xlu1 %181 }
 0x126   :  { %v187_v20 = vsel %vm128_vm2, %v182_v15, 0 }
 0x12f   :  { %1641 = vmatmul.msk.bf16.vlgmr.msra.gmra.mxu3 %vm90_vm1, %v391_v31  ;;  %1643 = vmatmul.msk.bf16.vlgmr.msrb.gmra.mxu0 %vm90_vm1, %v448_v32 }
 0x13f   :  { %1645 = vmatmul.msk.bf16.vlgmr.msrb.gmra.mxu3 %vm90_vm1, %v505_v33 }
 0x184   :  { %v106_v34 = vpop.f32.mrf.mxu1 }
 0x185   :  { %v110_v35 = vmul.f32 0.35355338, %v106_v34 }
 0x187   :  { %v111_v36 = vsel %vm90_vm1, %v110_v35, -inf }
 0x188   :  { %112 = vmax.xlane.f32.xlu2 %v111_v36 }
 0x18b   :  { %v221_v37 = vpop.f32.mrf.mxu0 }
 0x18c   :  { %v108_v38 = vpop.f32.mrf.mxu1  ;;  %v225_v39 = vmul.f32 0.35355338, %v221_v37 }
 0x18e   :  { %v226_v40 = vsel %vm90_vm1, %v225_v39, -inf }
 0x190   :  { %227 = vmax.xlane.f32.xlu2 %v226_v40 }
 0x192   :  { %v164_v41 = vpop.f32.mrf.mxu3 }
 0x193   :  { %v168_v42 = vmul.f32 0.35355338, %v164_v41  ;;  %v223_v43 = vpop.f32.mrf.mxu0 }
 0x195   :  { %v169_v44 = vsel %vm90_vm1, %v168_v42, -inf }
 0x196   :  { %170 = vmax.xlane.f32.xlu0 %v169_v44 }
 0x19a   :  { %v166_v45 = vpop.f32.mrf.mxu3 }
 0x19c   :  { %v352_v46 = vpop.f32.mrf.mxu0 }
 0x19d   :  { %v2095_v47 = vmul.f32 0.35355338, %v352_v46 }
 0x19f   :  { %v357_v48 = vsel %vm90_vm1, %v2095_v47, -inf }
 0x1a0   :  { %358 = vmax.xlane.f32.xlu1 %v357_v48 }
 0x1a2   :  { %v278_v49 = vpop.f32.mrf.mxu3 }
 0x1a3   :  { %v2099_v50 = vmul.f32 0.35355338, %v278_v49 }
 0x1a4   :  { %v354_v51 = vpop.f32.mrf.mxu0 }
 0x1a5   :  { %v283_v52 = vsel %vm90_vm1, %v2099_v50, -inf }
 0x1a8   :  { %123 = vrot.lane.b32.xlu2 %v2040_v8, %s1941_s25  ;;  %284 = vmax.xlane.f32.xlu1 %v283_v52 }
 0x1aa   :  { %v280_v53 = vpop.f32.mrf.mxu3 }
 0x1ac   :  { %v466_v54 = vpop.f32.mrf.mxu0 }
 0x1ad   :  { %v470_v55 = vmul.f32 0.35355338, %v466_v54 }
 0x1af   :  { %v471_v56 = vsel %vm90_vm1, %v470_v55, -inf }
 0x1b0   :  { %472 = vmax.xlane.f32.xlu0 %v471_v56 }
 0x1b2   :  { %v409_v57 = vpop.f32.mrf.mxu3 }
 0x1b3   :  { %v413_v0 = vmul.f32 0.35355338, %v409_v57 }
 0x1b4   :  { %v468_v58 = vpop.f32.mrf.mxu0 }
 0x1b5   :  { %v414_v1 = vsel %vm90_vm1, %v413_v0, -inf }
 0x1ba   :  { %v411_v59 = vpop.f32.mrf.mxu3 }
 0x1c1   :  { %238 = vrot.lane.b32.xlu1 %v2040_v8, %s2481_s26 }
 0x1c2   :  { %v523_v60 = vpop.f32.mrf.mxu3 }
 0x1c3   :  { %v527_v61 = vmul.f32 0.35355338, %v523_v60 }
 0x1c5   :  { %v528_v62 = vsel %vm90_vm1, %v527_v61, -inf }
 0x1c6   :  { %529 = vmax.xlane.f32.xlu0 %v528_v62 }
 0x1ca   :  { %v525_v63 = vpop.f32.mrf.mxu3 }
 0x1d1   :  { %415 = vmax.xlane.f32.xlu2 %v414_v1 }
 0x1fb   :  { %v113_v4 = vpop.xlane.xlu2 %112 }
 0x1fc   :  { %v114_v5 = vsub.f32 %v110_v35, %v113_v4 }
 0x1fe   :  { %v115_v6 = vmul.f32 1.442695, %v114_v5 }
 0x200   :  { %1851 = vpow2.f32 %v115_v6 }
 0x203   :  { %v228_v7 = vpop.xlane.xlu2 %227 }
 0x204   :  { %v229_v9 = vsub.f32 %v225_v39, %v228_v7 }
 0x206   :  { %v2110_v10 = vpop.eup %1851  ;;  %v230_v12 = vmul.f32 1.442695, %v229_v9 }
 0x207   :  { %v117_v13 = vsel %vm90_vm1, %v2110_v10, 0.0 }
 0x208   :  { %1853 = vpow2.f32 %v230_v12  ;;  %118 = vadd.xlane.f32.xlu0 %v117_v13 }
 0x209   :  { %v171_v14 = vpop.xlane.xlu0 %170 }
 0x20a   :  { %v172_v16 = vsub.f32 %v168_v42, %v171_v14 }
 0x20b   :  { %v124_v17 = vpop.permute.xlu2 %123 }
 0x20c   :  { %v173_v18 = vmul.f32 1.442695, %v172_v16  ;;  %v130_v19 = vsel %vm128_vm2, %v124_v17, 0 }
 0x20d   :  { %139 = vmatpush.bf16.msra.mxu2 %v130_v19 }
 0x20e   :  { %v2116_v21 = vpop.eup %1853  ;;  %1855 = vpow2.f32 %v173_v18 }
 0x20f   :  { %v232_v22 = vsel %vm90_vm1, %v2116_v21, 0.0 }
 0x210   :  { %233 = vadd.xlane.f32.xlu2 %v232_v22 }
 0x211   :  { %196 = vmatpush.bf16.msrb.mxu2 %v187_v20 }
 0x213   :  { %v359_v25 = vpop.xlane.xlu1 %358 }
 0x214   :  { %v2120_v23 = vpop.eup %1855  ;;  %v360_v28 = vsub.f32 %v2095_v47, %v359_v25 }
 0x215   :  { %v175_v24 = vsel %vm90_vm1, %v2120_v23, 0.0 }
 0x216   :  { %176 = vadd.xlane.f32.xlu1 %v175_v24  ;;  %v361_v30 = vmul.f32 1.442695, %v360_v28 }
 0x218   :  { %1857 = vpow2.f32 %v361_v30 }
 0x21b   :  { %v285_v26 = vpop.xlane.xlu1 %284 }
 0x21c   :  { %295 = vrot.lane.b32.xlu0 %v2040_v8, %s2483_s27  ;;  %v286_v32 = vsub.f32 %v2099_v50, %v285_v26 }
 0x21e   :  { %v287_v33 = vmul.f32 1.442695, %v286_v32  ;;  %v1858_v35 = vpop.eup %1857 }
 0x21f   :  { %v363_v39 = vsel %vm90_vm1, %v1858_v35, 0.0 }
 0x220   :  { %1859 = vpow2.f32 %v287_v33 }
 0x223   :  { %v473_v31 = vpop.xlane.xlu0 %472 }
 0x224   :  { %v474_v8 = vsub.f32 %v470_v55, %v473_v31 }
 0x226   :  { %v475_v36 = vmul.f32 1.442695, %v474_v8  ;;  %v1860_v42 = vpop.eup %1859 }
 0x227   :  { %v289_v45 = vsel %vm90_vm1, %v1860_v42, 0.0 }
 0x228   :  { %426 = vrot.lane.b32.xlu2 %v2054_v11, %s1940_s24  ;;  %1861 = vpow2.f32 %v475_v36 }
 0x22e   :  { %v2134_v44 = vpop.eup %1861 }
 0x22f   :  { %369 = vrot.lane.b32.xlu1 %v2054_v11, %s1941_s25  ;;  %v477_v46 = vsel %vm90_vm1, %v2134_v44, 0.0 }
 0x233   :  { %v239_v27 = vpop.permute.xlu1 %238 }
 0x234   :  { %v244_v29 = vsel %vm128_vm2, %v239_v27, 0 }
 0x235   :  { %253 = vmatpush.bf16.msrb.mxu1 %v244_v29 }
 0x239   :  { %v530_v34 = vpop.xlane.xlu0 %529 }
 0x23a   :  { %v531_v37 = vsub.f32 %v527_v61, %v530_v34 }
 0x23c   :  { %v532_v41 = vmul.f32 1.442695, %v531_v37 }
 0x23e   :  { %1863 = vpow2.f32 %v532_v41 }
 0x244   :  { %v416_v38 = vpop.xlane.xlu2 %415  ;;  %v2139_v47 = vpop.eup %1863 }
 0x245   :  { %v417_v40 = vsub.f32 %v413_v0, %v416_v38  ;;  %v534_v49 = vsel %vm90_vm1, %v2139_v47, 0.0 }
 0x246   :  { %364 = vadd.xlane.f32.xlu0 %v363_v39 }
 0x247   :  { %v418_v43 = vmul.f32 1.442695, %v417_v40 }
 0x249   :  { %1865 = vpow2.f32 %v418_v43 }
 0x24e   :  { %290 = vadd.xlane.f32.xlu0 %v289_v45 }
 0x24f   :  { %v1866_v48 = vpop.eup %1865 }
 0x250   :  { %v420_v50 = vsel %vm90_vm1, %v1866_v48, 0.0 }
 0x251   :  { %478 = vadd.xlane.f32.xlu2 %v477_v46 }
 0x256   :  { %535 = vadd.xlane.f32.xlu0 %v534_v49 }
 0x259   :  { %421 = vadd.xlane.f32.xlu1 %v420_v50  ;;  %v1773_v50 = vld [vmem:[%s2468_s3 + $0x8] sm:$0xff] }
 0x25a   :  { %606 = vmatpush.bf16.msra.mxu0 %v1773_v50  ;;  %v1837_v50 = vld [vmem:[%s2469_s5] ss:$0 sm:$0xff] }
 0x26a   :  { %540 = vrot.lane.b32.xlu0 %v2054_v11, %s2483_s27 }
 0x272   :  { %483 = vrot.lane.b32.xlu1 %v2054_v11, %s2481_s26 }
 0x27b   :  { %v119_v51 = vpop.xlane.xlu0 %118 }
 0x27c   :  { %1867 = vrcp.f32 %v119_v51  ;;  %v1772_v51 = vld [vmem:[%s2468_s3] sm:$0xff] }
 0x27d   :  { %607 = vmatpush.bf16.msra.mxu0 %v1772_v51 }
 0x282   :  { %v1868_v52 = vpop.eup %1867 }
 0x283   :  { %v234_v53 = vpop.xlane.xlu2 %233  ;;  %v121_v54 = vmul.f32 %v1868_v52, %v2110_v10 }
 0x284   :  { %1869 = vrcp.f32 %v234_v53 }
 0x285   :  { %v122_v55 = vpack.c.bf16 %v121_v54, %v121_v54 }
 0x287   :  { %1632 = vmatmul.msk.bf16.vlgmr.msra.gmra.mxu2 %vm90_vm1, %v122_v55 }
 0x289   :  { %v177_v56 = vpop.xlane.xlu1 %176 }
 0x28a   :  { %v1870_v57 = vpop.eup %1869  ;;  %1871 = vrcp.f32 %v177_v56 }
 0x28b   :  { %v236_v58 = vmul.f32 %v1870_v57, %v2116_v21  ;;  %v427_v63 = vpop.permute.xlu2 %426 }
 0x28c   :  { %v432_v1 = vsel %vm128_vm2, %v427_v63, 0 }
 0x28d   :  { %v237_v59 = vpack.c.bf16 %v236_v58, %v236_v58 }
 0x28e   :  { %v296_v60 = vpop.permute.xlu0 %295 }
 0x28f   :  { %v301_v61 = vsel %vm128_vm2, %v296_v60, 0  ;;  %1636 = vmatmul.msk.bf16.vlgmr.msrb.gmra.mxu1 %vm90_vm1, %v237_v59 }
 0x290   :  { %v1872_v11 = vpop.eup %1871  ;;  %310 = vmatpush.bf16.msra.mxu2 %v301_v61 }
 0x291   :  { %v179_v62 = vmul.f32 %v1872_v11, %v2120_v23 }
 0x293   :  { %v180_v0 = vpack.c.bf16 %v179_v62, %v179_v62 }
 0x297   :  { %1634 = vmatmul.msk.bf16.vlgmr.msrb.gmra.mxu2 %vm90_vm1, %v180_v0 }
 0x298   :  { %441 = vmatpush.bf16.msrb.mxu2 %v432_v1 }
 0x2a1   :  { %v370_v4 = vpop.permute.xlu1 %369 }
 0x2a2   :  { %v375_v5 = vsel %vm128_vm2, %v370_v4, 0 }
 0x2a3   :  { %384 = vmatpush.bf16.msra.mxu1 %v375_v5  ;;  %v1836_v5 = vld [vmem:[%s2467_s4] ss:$0 sm:$0xff] }
 0x2b9   :  { %v365_v6 = vpop.xlane.xlu0 %364 }
 0x2ba   :  { %1873 = vrcp.f32 %v365_v6 }
 0x2c0   :  { %v1874_v7 = vpop.eup %1873 }
 0x2c1   :  { %v367_v9 = vmul.f32 %v1874_v7, %v1858_v35  ;;  %v291_v10 = vpop.xlane.xlu0 %290 }
 0x2c2   :  { %1875 = vrcp.f32 %v291_v10 }
 0x2c3   :  { %v368_v12 = vpack.c.bf16 %v367_v9, %v367_v9 }
 0x2c4   :  { %v479_v19 = vpop.xlane.xlu2 %478 }
 0x2c5   :  { %1640 = vmatmul.msk.bf16.vlgmr.msra.gmra.mxu1 %vm90_vm1, %v368_v12 }
 0x2c8   :  { %v1876_v13 = vpop.eup %1875 }
 0x2c9   :  { %v293_v14 = vmul.f32 %v1876_v13, %v1860_v42  ;;  %v536_v18 = vpop.xlane.xlu0 %535 }
 0x2cb   :  { %v294_v15 = vpack.c.bf16 %v293_v14, %v293_v14 }
 0x2cc   :  { %v422_v16 = vpop.xlane.xlu1 %421 }
 0x2cd   :  { %1638 = vmatmul.msk.bf16.vlgmr.msra.gmra.mxu2 %vm90_vm1, %v294_v15  ;;  %1877 = vrcp.f32 %v422_v16  ;;  %v1947_v16 = vmov 32.0  }
 0x2ce   :  { %1879 = vrcp.f32 %v479_v19 }
 0x2cf   :  { %1881 = vrcp.f32 %v536_v18 }
 0x2d0   :  { %1883 = vrcp.f32 %v1947_v16 }
 0x2d3   :  { %v1878_v17 = vpop.eup %1877 }
 0x2d4   :  { %v424_v20 = vmul.f32 %v1878_v17, %v1866_v48  ;;  %v1880_v24 = vpop.eup %1879 }
 0x2d5   :  { %v481_v25 = vmul.f32 %v1880_v24, %v2134_v44  ;;  %v1882_v26 = vpop.eup %1881 }
 0x2d6   :  { %v425_v21 = vpack.c.bf16 %v424_v20, %v424_v20  ;;  %v538_v30 = vmul.f32 %v1882_v26, %v2139_v47  ;;  %v1884_v17 = vpop.eup %1883 }
 0x2d7   :  { %v482_v29 = vpack.c.bf16 %v481_v25, %v481_v25  ;;  %v625_v18 = vmul.f32 32.0, %v1884_v17  ;;  %vm629_vm5 = vweird.f32 %v1884_v17 }
 0x2d8   :  { %v539_v31 = vpack.c.bf16 %v538_v30, %v538_v30 }
 0x2d9   :  { %v626_v19 = vsub.f32 1.0, %v625_v18 }
 0x2db   :  { %v627_v20 = vmul.f32 %v1884_v17, %v626_v19 }
 0x2dc   :  { %v541_v22 = vpop.permute.xlu0 %540 }
 0x2dd   :  { %v546_v23 = vsel %vm128_vm2, %v541_v22, 0  ;;  %1642 = vmatmul.msk.bf16.vlgmr.msrb.gmra.mxu2 %vm90_vm1, %v425_v21  ;;  %v628_v21 = vadd.f32 %v1884_v17, %v627_v20 }
 0x2de   :  { %555 = vmatpush.bf16.msra.mxu2 %v546_v23 }
 0x2df   :  { %v2189_v22 = vsel %vm629_vm5, %v1884_v17, %v628_v21 }
 0x2e4   :  { %v484_v27 = vpop.permute.xlu1 %483 }
 0x2e5   :  { %v489_v28 = vsel %vm128_vm2, %v484_v27, 0 }
 0x2e6   :  { %498 = vmatpush.bf16.msrb.mxu1 %v489_v28 }
 0x2e9   :  { %1644 = vmatmul.msk.bf16.vlgmr.msrb.gmra.mxu1 %vm90_vm1, %v482_v29 }
 0x2ed   :  { %1646 = vmatmul.msk.bf16.vlgmr.msra.gmra.mxu2 %vm90_vm1, %v539_v31  ;;  %v1775_v31 = vld [vmem:[%s2472_s7 + $0x8] sm:$0xff] }
 0x2ee   :  { %709 = vmatpush.bf16.msra.mxu1 %v1775_v31 }
 0x30a   :  { %v141_v32 = vpop.f32.mrf.mxu2 }
 0x30c   :  { %v255_v8 = vpop.f32.mrf.mxu1 }
 0x312   :  { %v143_v33 = vpop.f32.mrf.mxu2 }
 0x314   :  { %v257_v34 = vpop.f32.mrf.mxu1 }
 0x315   :  { %v1774_v34 = vld [vmem:[%s2472_s7] sm:$0xff] }
 0x316   :  { %710 = vmatpush.bf16.msra.mxu1 %v1774_v34 }
 0x31a   :  { %v198_v35 = vpop.f32.mrf.mxu2 }
 0x322   :  { %v200_v36 = vpop.f32.mrf.mxu2 }
 0x342   :  { %v386_v37 = vpop.f32.mrf.mxu1 }
 0x34a   :  { %v388_v38 = vpop.f32.mrf.mxu1 }
 0x350   :  { %v312_v39 = vpop.f32.mrf.mxu2 }
 0x358   :  { %v314_v40 = vpop.f32.mrf.mxu2 }
 0x360   :  { %v443_v41 = vpop.f32.mrf.mxu2 }
 0x361   :  { %v1810_v42 = vpack.i.bf16 %v443_v41, %v198_v35 }
 0x363   :  { %1811 = vrot.lane.b32.xlu0 %v1810_v42, %s2480_s28 }
 0x366   :  { %v500_v43 = vpop.f32.mrf.mxu1 }
 0x367   :  { %v1805_v44 = vpack.i.bf16 %v500_v43, %v255_v8 }
 0x368   :  { %v445_v45 = vpop.f32.mrf.mxu2 }
 0x369   :  { %1806 = vrot.lane.b32.xlu1 %v1805_v44, %s2479_s29 }
 0x36e   :  { %v502_v46 = vpop.f32.mrf.mxu1 }
 0x370   :  { %v557_v47 = vpop.f32.mrf.mxu2 }
 0x371   :  { %v1815_v48 = vpack.i.bf16 %v557_v47, %v312_v39 }
 0x373   :  { %1816 = vrot.lane.b32.xlu0 %v1815_v48, %s2478_s30 }
 0x378   :  { %v559_v49 = vpop.f32.mrf.mxu2 }
 0x3d5   :  { %v1812_v52 = vpop.permute.xlu0 %1811 }
 0x3d6   :  { %v1814_v54 = vunpack.i.h.bf16 %v1812_v52  ;;  %v1813_v55 = vunpack.i.l.bf16 %v1812_v52 }
 0x3d8   :  { %v573_v59 = vsel %vm90_vm1, %v386_v37, %v1814_v54  ;;  %v328_v60 = vsel %vm90_vm1, %v141_v32, %v1813_v55  ;;  %v1838_v54 = vld [vmem:[%s2470_s6] ss:$0 sm:$0xff] }
 0x3db   :  { %v1807_v53 = vpop.permute.xlu1 %1806 }
 0x3dc   :  { %v1809_v56 = vunpack.i.h.bf16 %v1807_v53  ;;  %v1808_v57 = vunpack.i.l.bf16 %v1807_v53 }
 0x3de   :  { %v330_v62 = vsel %vm329_vm3, %v328_v60, %v1808_v57  ;;  %v574_v63 = vsel %vm329_vm3, %v573_v59, %v1809_v56 }
 0x3e5   :  { %v1817_v58 = vpop.permute.xlu0 %1816 }
 0x3e6   :  { %v1819_v61 = vunpack.i.h.bf16 %v1817_v58  ;;  %v1818_v11 = vunpack.i.l.bf16 %v1817_v58 }
 0x3e8   :  { %v332_v0 = vsel %vm331_vm4, %v330_v62, %v1818_v11  ;;  %v575_v1 = vsel %vm331_vm4, %v574_v63, %v1819_v61  ;;  %v1779_v61 = vld [vmem:[%s2474_s9 + $0x18] sm:$0xff]  ;;  %v1778_v11 = vld [vmem:[%s2474_s9 + $0x10] sm:$0xff]  ;;  %v1777_v62 = vld [vmem:[%s2474_s9 + $0x8] sm:$0xff] }
 0x3e9   :  { %v581_v4 = vpack.c.bf16 %v575_v1, %v332_v0  ;;  %764 = vmatpush.bf16.msra.mxu3 %v1779_v61  ;;  %v1776_v63 = vld [vmem:[%s2474_s9] sm:$0xff] }
 0x3ea   :  { %v1839_v1 = vld [vmem:[%s2471_s8] ss:$0 sm:$0xff] }
 0x3eb   :  { %1655 = vmatmul.msk.bf16.vlgmr.msra.gmra.mxu0 %vm68_vm0, %v581_v4 }
 0x3ed   :  { %765 = vmatpush.bf16.msra.mxu3 %v1778_v11 }
 0x3f1   :  { %766 = vmatpush.bf16.msra.mxu3 %v1777_v62 }
 0x3f5   :  { %767 = vmatpush.bf16.msra.mxu3 %v1776_v63 }
 0x468   :  { %v609_v6 = vpop.f32.mrf.mxu0 }
 0x469   :  { %v610_v7 = vadd.f32 %v1836_v5, %v609_v6 }
 0x46b   :  { %v614_v9 = vadd.f32 %v610_v7, %v2027_v2 }
 0x46d   :  { %v618_v10 = vsel %vm68_vm0, %v614_v9, 0.0 }
 0x46e   :  { %619 = vadd.xlane.f32.xlu1 %v618_v10 }
 0x470   :  { %v611_v12 = vpop.f32.mrf.mxu0 }
 0x471   :  { %v612_v13 = vadd.f32 %v1836_v5, %v611_v12  ;;  %v1840_v12 = vld [vmem:[%s2473_s10] ss:$0 sm:$0xff] }
 0x473   :  { %v615_v14 = vadd.f32 %v612_v13, %v2032_v3 }
 0x475   :  { %v621_v15 = vsel %vm68_vm0, %v615_v14, 0.0 }
 0x476   :  { %622 = vadd.xlane.f32.xlu2 %v621_v15 }
 0x4e1   :  { %v620_v2 = vpop.xlane.xlu1 %619 }
 0x4e2   :  { %v631_v23 = vmul.f32 %v2189_v22, %v620_v2 }
 0x4e4   :  { %v633_v24 = vsub.f32 %v614_v9, %v631_v23 }
 0x4e6   :  { %v635_v25 = vmul.f32 %v633_v24, %v633_v24 }
 0x4e8   :  { %v637_v3 = vsel %vm68_vm0, %v635_v25, 0.0 }
 0x4e9   :  { %v623_v26 = vpop.xlane.xlu2 %622  ;;  %638 = vadd.xlane.f32.xlu0 %v637_v3 }
 0x4ea   :  { %v632_v27 = vmul.f32 %v2189_v22, %v623_v26 }
 0x4ec   :  { %v634_v28 = vsub.f32 %v615_v14, %v632_v27 }
 0x4ee   :  { %v636_v29 = vmul.f32 %v634_v28, %v634_v28 }
 0x4f0   :  { %v640_v30 = vsel %vm68_vm0, %v636_v29, 0.0 }
 0x4f1   :  { %641 = vadd.xlane.f32.xlu2 %v640_v30  ;;  %v1781_v30 = vld [vmem:[%s2464_s1 + $0x18] sm:$0xff] }
 0x4f2   :  { %864 = vmatpush.bf16.msrb.mxu2 %v1781_v30 }
 0x55c   :  { %v639_v32 = vpop.xlane.xlu0 %638 }
 0x55d   :  { %v643_v8 = vmul.f32 %v639_v32, %v2189_v22 }
 0x55f   :  { %v645_v33 = vadd.f32 1e-05, %v643_v8 }
 0x561   :  { %1885 = vrsqrt.f32 %v645_v33  ;;  %vm653_vm7 = vweird.f32 %v645_v33 }
 0x564   :  { %v642_v35 = vpop.xlane.xlu2 %641 }
 0x565   :  { %v644_v36 = vmul.f32 %v642_v35, %v2189_v22 }
 0x567   :  { %v1886_v37 = vpop.eup %1885  ;;  %v646_v38 = vadd.f32 1e-05, %v644_v36 }
 0x568   :  { %v648_v39 = vmul.f32 %v1886_v37, %v645_v33  ;;  %vm654_vm6 = vweird.f32 %v1886_v37  ;;  %v1780_v33 = vld [vmem:[%s2464_s1 + $0x10] sm:$0xff] }
 0x569   :  { %1887 = vrsqrt.f32 %v646_v38  ;;  %vm655_vm8 = vmor %vm653_vm7, %vm654_vm6  ;;  %vm663_vm10 = vweird.f32 %v646_v38  ;;  %865 = vmatpush.bf16.msrb.mxu2 %v1780_v33 }
 0x56a   :  { %v649_v40 = vmul.f32 %v1886_v37, %v648_v39 }
 0x56c   :  { %v650_v41 = vmul.f32 0.5, %v649_v40 }
 0x56e   :  { %v651_v42 = vsub.f32 1.5, %v650_v41 }
 0x56f   :  { %v1888_v43 = vpop.eup %1887 }
 0x570   :  { %v652_v44 = vmul.f32 %v1886_v37, %v651_v42  ;;  %v658_v45 = vmul.f32 %v1888_v43, %v646_v38  ;;  %vm664_vm9 = vweird.f32 %v1888_v43 }
 0x571   :  { %vm665_vm11 = vmor %vm663_vm10, %vm664_vm9 }
 0x572   :  { %v659_v46 = vmul.f32 %v1888_v43, %v658_v45  ;;  %v656_v47 = vsel %vm655_vm8, %v1886_v37, %v652_v44 }
 0x573   :  { %v667_v51 = vmul.f32 %v656_v47, %v633_v24 }
 0x574   :  { %v660_v48 = vmul.f32 0.5, %v659_v46 }
 0x575   :  { %v672_v55 = vmul.f32 %v1837_v50, %v667_v51 }
 0x576   :  { %v661_v49 = vsub.f32 1.5, %v660_v48 }
 0x577   :  { %v677_v58 = vadd.f32 %v1838_v54, %v672_v55 }
 0x578   :  { %v662_v52 = vmul.f32 %v1888_v43, %v661_v49  ;;  %v1841_v49 = vld [vmem:[%s2475_s11] ss:$0 sm:$0xff] }
 0x57a   :  { %v666_v53 = vsel %vm665_vm11, %v1888_v43, %v662_v52 }
 0x57b   :  { %v668_v56 = vmul.f32 %v666_v53, %v634_v28  ;;  %v1842_v53 = vld [vmem:[%s2476_s12] ss:$0 sm:$0xff] }
 0x57d   :  { %v673_v57 = vmul.f32 %v1837_v50, %v668_v56 }
 0x57f   :  { %v678_v59 = vadd.f32 %v1838_v54, %v673_v57 }
 0x581   :  { %v684_v60 = vpack.c.bf16 %v678_v59, %v677_v58 }
 0x583   :  { %1664 = vmatmul.msk.bf16.vlgmr.msra.gmra.mxu1 %vm68_vm0, %v684_v60  ;;  %v1843_v60 = vld [vmem:[%s2466_s2 + $0x1] ss:$0 sm:$0xff]  ;;  %s2485_s2 = smov 40  }
 0x600   :  { %v712_v0 = vpop.f32.mrf.mxu1 }
 0x601   :  { %v713_v4 = vadd.f32 %v1839_v1, %v712_v0 }
 0x603   :  { %v717_v7 = vmax.f32 %v713_v4, 0.0 }
 0x608   :  { %v714_v5 = vpop.f32.mrf.mxu1 }
 0x609   :  { %v715_v6 = vadd.f32 %v1839_v1, %v714_v5 }
 0x60b   :  { %v718_v9 = vmax.f32 %v715_v6, 0.0 }
 0x60d   :  { %v728_v10 = vpack.c.bf16 %v718_v9, %v717_v7 }
 0x60f   :  { %1681 = vmatmul.msk.bf16.vlgmr.msra.gmra.mxu3 %vm756_vm12, %v728_v10 }
 0x692   :  { %v769_v13 = vpop.f32.mrf.mxu3 }
 0x693   :  { %v770_v14 = vadd.f32 %v1840_v12, %v769_v13 }
 0x695   :  { %v774_v15 = vadd.f32 %v770_v14, %v677_v58 }
 0x697   :  { %v778_v16 = vsel %vm68_vm0, %v774_v15, 0.0 }
 0x698   :  { %779 = vadd.xlane.f32.xlu2 %v778_v16 }
 0x69a   :  { %v771_v17 = vpop.f32.mrf.mxu3 }
 0x69b   :  { %v772_v18 = vadd.f32 %v1840_v12, %v771_v17 }
 0x69d   :  { %v775_v19 = vadd.f32 %v772_v18, %v678_v59 }
 0x69f   :  { %v781_v20 = vsel %vm68_vm0, %v775_v19, 0.0 }
 0x6a0   :  { %782 = vadd.xlane.f32.xlu2 %v781_v20 }
 0x70b   :  { %v780_v21 = vpop.xlane.xlu2 %779 }
 0x70c   :  { %v784_v2 = vmul.f32 %v780_v21, %v2189_v22 }
 0x70e   :  { %v786_v23 = vsub.f32 %v774_v15, %v784_v2 }
 0x710   :  { %v788_v24 = vmul.f32 %v786_v23, %v786_v23 }
 0x712   :  { %v790_v25 = vsel %vm68_vm0, %v788_v24, 0.0 }
 0x713   :  { %791 = vadd.xlane.f32.xlu2 %v790_v25  ;;  %v783_v3 = vpop.xlane.xlu2 %782 }
 0x714   :  { %v785_v26 = vmul.f32 %v783_v3, %v2189_v22 }
 0x716   :  { %v787_v27 = vsub.f32 %v775_v19, %v785_v26 }
 0x718   :  { %v789_v28 = vmul.f32 %v787_v27, %v787_v27 }
 0x71a   :  { %v793_v29 = vsel %vm68_vm0, %v789_v28, 0.0 }
 0x71b   :  { %794 = vadd.xlane.f32.xlu1 %v793_v29 }
 0x786   :  { %v792_v31 = vpop.xlane.xlu2 %791 }
 0x787   :  { %v796_v32 = vmul.f32 %v792_v31, %v2189_v22 }
 0x789   :  { %v798_v8 = vadd.f32 1e-05, %v796_v32 }
 0x78b   :  { %1889 = vrsqrt.f32 %v798_v8  ;;  %vm806_vm14 = vweird.f32 %v798_v8 }
 0x78e   :  { %v795_v34 = vpop.xlane.xlu1 %794 }
 0x78f   :  { %v797_v35 = vmul.f32 %v795_v34, %v2189_v22 }
 0x791   :  { %v1890_v36 = vpop.eup %1889  ;;  %v799_v37 = vadd.f32 1e-05, %v797_v35 }
 0x792   :  { %v801_v38 = vmul.f32 %v1890_v36, %v798_v8  ;;  %vm807_vm13 = vweird.f32 %v1890_v36 }
 0x793   :  { %1891 = vrsqrt.f32 %v799_v37  ;;  %vm808_vm15 = vmor %vm806_vm14, %vm807_vm13  ;;  %vm816_vm6 = vweird.f32 %v799_v37 }
 0x794   :  { %v802_v39 = vmul.f32 %v1890_v36, %v801_v38 }
 0x796   :  { %v803_v40 = vmul.f32 0.5, %v802_v39 }
 0x798   :  { %v804_v41 = vsub.f32 1.5, %v803_v40 }
 0x799   :  { %v1892_v42 = vpop.eup %1891 }
 0x79a   :  { %v805_v43 = vmul.f32 %v1890_v36, %v804_v41  ;;  %v811_v44 = vmul.f32 %v1892_v42, %v799_v37  ;;  %vm817_vm5 = vweird.f32 %v1892_v42 }
 0x79b   :  { %vm818_vm7 = vmor %vm816_vm6, %vm817_vm5 }
 0x79c   :  { %v812_v45 = vmul.f32 %v1892_v42, %v811_v44  ;;  %v809_v46 = vsel %vm808_vm15, %v1890_v36, %v805_v43 }
 0x79d   :  { %v820_v50 = vmul.f32 %v809_v46, %v786_v23 }
 0x79e   :  { %v813_v47 = vmul.f32 0.5, %v812_v45 }
 0x79f   :  { %v825_v54 = vmul.f32 %v1841_v49, %v820_v50 }
 0x7a0   :  { %v814_v48 = vsub.f32 1.5, %v813_v47 }
 0x7a1   :  { %v2249_v57 = vadd.f32 %v1842_v53, %v825_v54 }
 0x7a2   :  { %v815_v51 = vmul.f32 %v1892_v42, %v814_v48 }
 0x7a4   :  { %v819_v52 = vsel %vm818_vm7, %v1892_v42, %v815_v51 }
 0x7a5   :  { %v821_v55 = vmul.f32 %v819_v52, %v787_v27 }
 0x7a7   :  { %v826_v56 = vmul.f32 %v1841_v49, %v821_v55 }
 0x7a9   :  { %v2251_v58 = vadd.f32 %v1842_v53, %v826_v56 }
 0x7ab   :  { %v839_v59 = vpack.c.bf16 %v2251_v58, %v2249_v57 }
 0x7ad   :  { %1695 = vmatmul.msk.bf16.vlgmr.msrb.gmra.mxu2 %vm68_vm0, %v839_v59 }
 0x830   :  { %v867_v61 = vpop.f32.mrf.mxu2 }
 0x831   :  { %v868_v11 = vadd.f32 %v1843_v60, %v867_v61 }
 0x833   :  { %v2259_v62 = vpack.c.bf16 %v868_v11, %v868_v11 }
 0x835   :  { %874 = vrot.lane.b32.xlu1 %v2259_v62, %s1935_s19  ;;  %929 = vrot.lane.b32.xlu0 %v2259_v62, %s1934_s0 }
 0x836   :  { %931 = vrot.lane.b32.xlu2 %v2259_v62, %s1938_s22 }
 0x838   :  { %v869_v63 = vpop.f32.mrf.mxu2 }
 0x839   :  { %v870_v0 = vadd.f32 %v1843_v60, %v869_v63 }
 0x83b   :  { %v2273_v1 = vpack.c.bf16 %v870_v0, %v870_v0 }
 0x83d   :  { %988 = vrot.lane.b32.xlu1 %v2259_v62, %s1936_s20  ;;  %1045 = vrot.lane.b32.xlu0 %v2259_v62, %s1937_s21 }
 0x83e   :  { %1043 = vrot.lane.b32.xlu2 %v2259_v62, %s1933_s18 }
 0x845   :  { %1172 = vrot.lane.b32.xlu1 %v2273_v1, %s1934_s0  ;;  %1174 = vrot.lane.b32.xlu0 %v2273_v1, %s1938_s22  ;;  %s2487_s0 = smov 8  }
 0x846   :  { %986 = vrot.lane.b32.xlu2 %v2259_v62, %s1939_s23 }
 0x84d   :  { %1286 = vrot.lane.b32.xlu1 %v2273_v1, %s1933_s18  ;;  %1117 = vrot.lane.b32.xlu0 %v2273_v1, %s1935_s19  ;;  %s2486_s18 = smov 48   ;;  %s2488_s19 = smov 16  }
 0x84e   :  { %1288 = vrot.lane.b32.xlu2 %v2273_v1, %s1937_s21 }
 0x855   :  { %1231 = vrot.lane.b32.xlu0 %v2273_v1, %s1936_s20  ;;  %s2489_s20 = smov 24  }
 0x856   :  { %1229 = vrot.lane.b32.xlu2 %v2273_v1, %s1939_s23 }
 0x85d   :  { %965 = vrot.lane.b32.xlu0 %v2259_v62, %s1940_s24 }
 0x890   :  { %v932_v4 = vpop.permute.xlu2 %931 }
 0x891   :  { %v937_v5 = vsel %vm90_vm1, %v932_v4, 0 }
 0x892   :  { %946 = vmatpush.bf16.xpose.msrb.mxu3 %v937_v5 }
 0x898   :  { %v1044_v6 = vpop.permute.xlu2 %1043 }
 0x8a0   :  { %v987_v12 = vpop.permute.xlu2 %986 }
 0x8a7   :  { %v875_v7 = vpop.permute.xlu1 %874  ;;  %v930_v9 = vpop.permute.xlu0 %929 }
 0x8a8   :  { %v880_v10 = vsel %vm90_vm1, %v875_v7, 0  ;;  %1698 = vmatmul.msk.bf16.vlgmr.msrb.gmra.mxu3 %vm90_vm1, %v930_v9  ;;  %v1289_v17 = vpop.permute.xlu2 %1288 }
 0x8a9   :  { %889 = vmatpush.bf16.xpose.msrb.mxu0 %v880_v10  ;;  %v1294_v20 = vsel %vm90_vm1, %v1289_v17, 0 }
 0x8af   :  { %v989_v13 = vpop.permute.xlu1 %988  ;;  %v1046_v14 = vpop.permute.xlu0 %1045 }
 0x8b0   :  { %v994_v15 = vsel %vm90_vm1, %v989_v13, 0  ;;  %v1051_v16 = vsel %vm90_vm1, %v1046_v14, 0  ;;  %1696 = vmatmul.msk.bf16.vlgmr.msrb.gmra.mxu0 %vm90_vm1, %v2259_v62  ;;  %v1230_v28 = vpop.permute.xlu2 %1229 }
 0x8b1   :  { %1003 = vmatpush.bf16.xpose.msra.mxu0 %v994_v15  ;;  %1060 = vmatpush.bf16.xpose.msra.mxu3 %v1051_v16 }
 0x8b7   :  { %v1175_v18 = vpop.permute.xlu0 %1174  ;;  %v1173_v23 = vpop.permute.xlu1 %1172 }
 0x8b8   :  { %v1180_v19 = vsel %vm90_vm1, %v1175_v18, 0  ;;  %1702 = vmatmul.msk.bf16.vlgmr.msra.gmra.mxu3 %vm90_vm1, %v1044_v6 }
 0x8b9   :  { %1189 = vmatpush.bf16.xpose.msrb.mxu3 %v1180_v19 }
 0x8bf   :  { %v1118_v21 = vpop.permute.xlu0 %1117  ;;  %v1287_v27 = vpop.permute.xlu1 %1286 }
 0x8c0   :  { %v1123_v2 = vsel %vm90_vm1, %v1118_v21, 0  ;;  %1700 = vmatmul.msk.bf16.vlgmr.msra.gmra.mxu0 %vm90_vm1, %v987_v12 }
 0x8c1   :  { %1303 = vmatpush.bf16.xpose.msra.mxu3 %v1294_v20  ;;  %1132 = vmatpush.bf16.xpose.msrb.mxu0 %v1123_v2 }
 0x8c7   :  { %v1232_v24 = vpop.permute.xlu0 %1231 }
 0x8c8   :  { %v1237_v25 = vsel %vm90_vm1, %v1232_v24, 0  ;;  %1706 = vmatmul.msk.bf16.vlgmr.msrb.gmra.mxu3 %vm90_vm1, %v1173_v23 }
 0x8c9   :  { %1246 = vmatpush.bf16.xpose.msra.mxu0 %v1237_v25 }
 0x8cf   :  { %v966_v3 = vpop.permute.xlu0 %965 }
 0x8d0   :  { %v971_v26 = vsel %vm128_vm2, %v966_v3, 0  ;;  %1704 = vmatmul.msk.bf16.vlgmr.msrb.gmra.mxu0 %vm90_vm1, %v2273_v1 }
 0x8d1   :  { %980 = vmatpush.bf16.msra.mxu2 %v971_v26 }
 0x8d8   :  { %1710 = vmatmul.msk.bf16.vlgmr.msra.gmra.mxu3 %vm90_vm1, %v1287_v27 }
 0x8e0   :  { %1708 = vmatmul.msk.bf16.vlgmr.msra.gmra.mxu0 %vm90_vm1, %v1230_v28 }
 0x92b   :  { %v948_v29 = vpop.f32.mrf.mxu3 }
 0x92c   :  { %v952_v30 = vmul.f32 0.35355338, %v948_v29 }
 0x92d   :  { %v891_v31 = vpop.f32.mrf.mxu0 }
 0x92e   :  { %v895_v32 = vmul.f32 0.35355338, %v891_v31  ;;  %v953_v8 = vsel %vm90_vm1, %v952_v30, -inf }
 0x92f   :  { %954 = vmax.xlane.f32.xlu1 %v953_v8 }
 0x930   :  { %v896_v33 = vsel %vm90_vm1, %v895_v32, -inf }
 0x931   :  { %897 = vmax.xlane.f32.xlu0 %v896_v33 }
 0x933   :  { %v950_v34 = vpop.f32.mrf.mxu3 }
 0x935   :  { %v893_v35 = vpop.f32.mrf.mxu0 }
 0x93b   :  { %v1062_v36 = vpop.f32.mrf.mxu3 }
 0x93c   :  { %v2314_v37 = vmul.f32 0.35355338, %v1062_v36 }
 0x93d   :  { %v1005_v38 = vpop.f32.mrf.mxu0 }
 0x93e   :  { %v2316_v39 = vmul.f32 0.35355338, %v1005_v38  ;;  %v1067_v40 = vsel %vm90_vm1, %v2314_v37, -inf }
 0x93f   :  { %1068 = vmax.xlane.f32.xlu2 %v1067_v40 }
 0x940   :  { %v1010_v41 = vsel %vm90_vm1, %v2316_v39, -inf }
 0x941   :  { %1011 = vmax.xlane.f32.xlu1 %v1010_v41 }
 0x943   :  { %v1064_v42 = vpop.f32.mrf.mxu3 }
 0x945   :  { %v1007_v43 = vpop.f32.mrf.mxu0 }
 0x94b   :  { %v1191_v44 = vpop.f32.mrf.mxu3 }
 0x94c   :  { %v1195_v45 = vmul.f32 0.35355338, %v1191_v44 }
 0x94d   :  { %v1134_v46 = vpop.f32.mrf.mxu0 }
 0x94e   :  { %v1138_v47 = vmul.f32 0.35355338, %v1134_v46  ;;  %v1196_v48 = vsel %vm90_vm1, %v1195_v45, -inf }
 0x94f   :  { %1197 = vmax.xlane.f32.xlu0 %v1196_v48 }
 0x950   :  { %v1139_v49 = vsel %vm90_vm1, %v1138_v47, -inf }
 0x951   :  { %1140 = vmax.xlane.f32.xlu2 %v1139_v49 }
 0x953   :  { %v1193_v50 = vpop.f32.mrf.mxu3 }
 0x955   :  { %v1136_v51 = vpop.f32.mrf.mxu0 }
 0x95b   :  { %v1305_v52 = vpop.f32.mrf.mxu3 }
 0x95c   :  { %v2324_v53 = vmul.f32 0.35355338, %v1305_v52 }
 0x95d   :  { %v1248_v54 = vpop.f32.mrf.mxu0 }
 0x95e   :  { %v1252_v55 = vmul.f32 0.35355338, %v1248_v54  ;;  %v1310_v56 = vsel %vm90_vm1, %v2324_v53, -inf }
 0x95f   :  { %1311 = vmax.xlane.f32.xlu1 %v1310_v56 }
 0x960   :  { %v1253_v59 = vsel %vm90_vm1, %v1252_v55, -inf }
 0x961   :  { %1254 = vmax.xlane.f32.xlu2 %v1253_v59 }
 0x963   :  { %v1307_v60 = vpop.f32.mrf.mxu3 }
 0x965   :  { %v1250_v61 = vpop.f32.mrf.mxu0 }
 0x979   :  { %908 = vrot.lane.b32.xlu2 %v2259_v62, %s1941_s25 }
 0x9a2   :  { %v955_v11 = vpop.xlane.xlu1 %954 }
 0x9a3   :  { %v956_v63 = vsub.f32 %v952_v30, %v955_v11 }
 0x9a4   :  { %v898_v0 = vpop.xlane.xlu0 %897 }
 0x9a5   :  { %v957_v4 = vmul.f32 1.442695, %v956_v63  ;;  %v899_v5 = vsub.f32 %v895_v32, %v898_v0 }
 0x9a7   :  { %1893 = vpow2.f32 %v957_v4  ;;  %v900_v6 = vmul.f32 1.442695, %v899_v5 }
 0x9a9   :  { %1895 = vpow2.f32 %v900_v6 }
 0x9ad   :  { %v1894_v7 = vpop.eup %1893 }
 0x9ae   :  { %v959_v9 = vsel %vm90_vm1, %v1894_v7, 0.0 }
 0x9af   :  { %v1896_v10 = vpop.eup %1895  ;;  %960 = vadd.xlane.f32.xlu0 %v959_v9 }
 0x9b0   :  { %v902_v12 = vsel %vm90_vm1, %v1896_v10, 0.0 }
 0x9b1   :  { %903 = vadd.xlane.f32.xlu1 %v902_v12 }
 0x9b2   :  { %v1069_v15 = vpop.xlane.xlu2 %1068 }
 0x9b3   :  { %v1070_v32 = vsub.f32 %v2314_v37, %v1069_v15 }
 0x9b4   :  { %v1012_v27 = vpop.xlane.xlu1 %1011 }
 0x9b5   :  { %v1013_v29 = vsub.f32 %v2316_v39, %v1012_v27  ;;  %v1071_v8 = vmul.f32 1.442695, %v1070_v32 }
 0x9b7   :  { %v1014_v31 = vmul.f32 1.442695, %v1013_v29 }
 0x9c2   :  { %v1198_v13 = vpop.xlane.xlu0 %1197 }
 0x9c3   :  { %v1199_v14 = vsub.f32 %v1195_v45, %v1198_v13  ;;  %1079 = vrot.lane.b32.xlu0 %v2259_v62, %s2485_s2 }
 0x9c4   :  { %v1141_v17 = vpop.xlane.xlu2 %1140 }
 0x9c5   :  { %v1200_v16 = vmul.f32 1.442695, %v1199_v14  ;;  %v1142_v23 = vsub.f32 %v1138_v47, %v1141_v17 }
 0x9c7   :  { %1897 = vpow2.f32 %v1200_v16  ;;  %v1143_v3 = vmul.f32 1.442695, %v1142_v23 }
 0x9ca   :  { %1022 = vrot.lane.b32.xlu1 %v2259_v62, %s2486_s18 }
 0x9cd   :  { %v2337_v18 = vpop.eup %1897 }
 0x9ce   :  { %v1202_v19 = vsel %vm90_vm1, %v2337_v18, 0.0 }
 0x9cf   :  { %1203 = vadd.xlane.f32.xlu2 %v1202_v19 }
 0x9d2   :  { %1208 = vrot.lane.b32.xlu1 %v2273_v1, %s1940_s24  ;;  %v1312_v38 = vpop.xlane.xlu1 %1311 }
 0x9d3   :  { %v1313_v46 = vsub.f32 %v2324_v53, %v1312_v38 }
 0x9d4   :  { %v1255_v20 = vpop.xlane.xlu2 %1254 }
 0x9d5   :  { %v1256_v21 = vsub.f32 %v1252_v55, %v1255_v20 }
 0x9d7   :  { %v1257_v2 = vmul.f32 1.442695, %v1256_v21 }
 0x9d9   :  { %1899 = vpow2.f32 %v1257_v2 }
 0x9da   :  { %1901 = vpow2.f32 %v1143_v3 }
 0x9db   :  { %1903 = vpow2.f32 %v1014_v31 }
 0x9dc   :  { %v909_v24 = vpop.permute.xlu2 %908  ;;  %1905 = vpow2.f32 %v1071_v8 }
 0x9dd   :  { %v914_v25 = vsel %vm128_vm2, %v909_v24, 0 }
 0x9de   :  { %923 = vmatpush.bf16.msrb.mxu1 %v914_v25 }
 0x9df   :  { %v2344_v62 = vpop.eup %1899 }
 0x9e0   :  { %v1259_v26 = vsel %vm90_vm1, %v2344_v62, 0.0  ;;  %v2348_v28 = vpop.eup %1901 }
 0x9e1   :  { %1260 = vadd.xlane.f32.xlu2 %v1259_v26  ;;  %v1145_v30 = vsel %vm90_vm1, %v2348_v28, 0.0  ;;  %v1904_v33 = vpop.eup %1903 }
 0x9e2   :  { %v1016_v34 = vsel %vm90_vm1, %v1904_v33, 0.0  ;;  %v1906_v35 = vpop.eup %1905 }
 0x9e3   :  { %v1073_v36 = vsel %vm90_vm1, %v1906_v35, 0.0 }
 0x9ed   :  { %1146 = vadd.xlane.f32.xlu0 %v1145_v30 }
 0x9f9   :  { %1265 = vrot.lane.b32.xlu2 %v2273_v1, %s2486_s18 }
 0x9fc   :  { %1017 = vadd.xlane.f32.xlu1 %v1016_v34 }
 0xa01   :  { %1322 = vrot.lane.b32.xlu0 %v2273_v1, %s2485_s2 }
 0xa04   :  { %1074 = vadd.xlane.f32.xlu1 %v1073_v36 }
 0xa1d   :  { %1151 = vrot.lane.b32.xlu1 %v2273_v1, %s1941_s25  ;;  %v1314_v1 = vmul.f32 1.442695, %v1313_v46 }
 0xa22   :  { %v961_v37 = vpop.xlane.xlu0 %960 }
 0xa23   :  { %1907 = vrcp.f32 %v961_v37 }
 0xa24   :  { %v904_v39 = vpop.xlane.xlu1 %903 }
 0xa25   :  { %1909 = vrcp.f32 %v904_v39 }
 0xa26   :  { %1911 = vpow2.f32 %v1314_v1 }
 0xa29   :  { %v1908_v40 = vpop.eup %1907 }
 0xa2a   :  { %v963_v41 = vmul.f32 %v1908_v40, %v1894_v7 }
 0xa2b   :  { %v1910_v42 = vpop.eup %1909 }
 0xa2c   :  { %v964_v43 = vpack.c.bf16 %v963_v41, %v963_v41  ;;  %v906_v44 = vmul.f32 %v1910_v42, %v1896_v10  ;;  %v1912_v51 = vpop.eup %1911 }
 0xa2d   :  { %v1316_v55 = vsel %vm90_vm1, %v1912_v51, 0.0 }
 0xa2e   :  { %v907_v45 = vpack.c.bf16 %v906_v44, %v906_v44  ;;  %1699 = vmatmul.msk.bf16.vlgmr.msra.gmra.mxu2 %vm90_vm1, %v964_v43  ;;  %v1783_v44 = vld [vmem:[%s2468_s3 + $0x18] sm:$0xff] }
 0xa2f   :  { %1390 = vmatpush.bf16.msrb.mxu0 %v1783_v44 }
 0xa30   :  { %1697 = vmatmul.msk.bf16.vlgmr.msrb.gmra.mxu1 %vm90_vm1, %v907_v45  ;;  %v1782_v45 = vld [vmem:[%s2468_s3 + $0x10] sm:$0xff] }
 0xa33   :  { %1391 = vmatpush.bf16.msrb.mxu0 %v1782_v45 }
 0xa35   :  { %v1080_v47 = vpop.permute.xlu0 %1079 }
 0xa36   :  { %v1085_v48 = vsel %vm128_vm2, %v1080_v47, 0 }
 0xa37   :  { %1094 = vmatpush.bf16.msrb.mxu2 %v1085_v48 }
 0xa3c   :  { %v1023_v49 = vpop.permute.xlu1 %1022 }
 0xa3d   :  { %v1028_v50 = vsel %vm128_vm2, %v1023_v49, 0 }
 0xa3e   :  { %1037 = vmatpush.bf16.msra.mxu1 %v1028_v50 }
 0xa42   :  { %v1204_v63 = vpop.xlane.xlu2 %1203 }
 0xa44   :  { %v1209_v52 = vpop.permute.xlu1 %1208 }
 0xa45   :  { %v1214_v54 = vsel %vm128_vm2, %v1209_v52, 0 }
 0xa46   :  { %1223 = vmatpush.bf16.msra.mxu2 %v1214_v54 }
 0xa47   :  { %1317 = vadd.xlane.f32.xlu1 %v1316_v55 }
 0xa54   :  { %v1261_v9 = vpop.xlane.xlu2 %1260 }
 0xa5c   :  { %v1266_v14 = vpop.permute.xlu2 %1265 }
 0xa5d   :  { %v1271_v20 = vsel %vm128_vm2, %v1266_v14, 0 }
 0xa60   :  { %v1147_v61 = vpop.xlane.xlu0 %1146 }
 0xa6f   :  { %v1018_v56 = vpop.xlane.xlu1 %1017 }
 0xa70   :  { %1913 = vrcp.f32 %v1018_v56 }
 0xa73   :  { %v1323_v5 = vpop.permute.xlu0 %1322 }
 0xa74   :  { %v1328_v7 = vsel %vm128_vm2, %v1323_v5, 0 }
 0xa76   :  { %v1914_v53 = vpop.eup %1913 }
 0xa77   :  { %v1020_v59 = vmul.f32 %v1914_v53, %v1904_v33  ;;  %v1075_v60 = vpop.xlane.xlu1 %1074 }
 0xa78   :  { %1915 = vrcp.f32 %v1075_v60 }
 0xa79   :  { %v1021_v11 = vpack.c.bf16 %v1020_v59, %v1020_v59  ;;  %1917 = vrcp.f32 %v1204_v63  ;;  %v1844_v63 = vld [vmem:[%s2467_s4 + $0x1] ss:$0 sm:$0xff] }
 0xa7a   :  { %1919 = vrcp.f32 %v1147_v61 }
 0xa7b   :  { %1701 = vmatmul.msk.bf16.vlgmr.msra.gmra.mxu1 %vm90_vm1, %v1021_v11  ;;  %1921 = vrcp.f32 %v1261_v9 }
 0xa7e   :  { %v1916_v0 = vpop.eup %1915 }
 0xa7f   :  { %v1077_v4 = vmul.f32 %v1916_v0, %v1906_v35  ;;  %v1918_v10 = vpop.eup %1917 }
 0xa80   :  { %v1920_v12 = vpop.eup %1919  ;;  %v1206_v13 = vmul.f32 %v1918_v10, %v2337_v18 }
 0xa81   :  { %v1078_v6 = vpack.c.bf16 %v1077_v4, %v1077_v4  ;;  %v1149_v15 = vmul.f32 %v1920_v12, %v2348_v28  ;;  %v1922_v2 = vpop.eup %1921 }
 0xa82   :  { %v1207_v19 = vpack.c.bf16 %v1206_v13, %v1206_v13  ;;  %v1263_v18 = vmul.f32 %v1922_v2, %v2344_v62 }
 0xa83   :  { %1703 = vmatmul.msk.bf16.vlgmr.msrb.gmra.mxu2 %vm90_vm1, %v1078_v6  ;;  %v1150_v21 = vpack.c.bf16 %v1149_v15, %v1149_v15 }
 0xa84   :  { %1337 = vmatpush.bf16.msrb.mxu2 %v1328_v7  ;;  %v1264_v23 = vpack.c.bf16 %v1263_v18, %v1263_v18 }
 0xa8f   :  { %v1152_v16 = vpop.permute.xlu1 %1151 }
 0xa90   :  { %v1157_v17 = vsel %vm128_vm2, %v1152_v16, 0 }
 0xa91   :  { %1166 = vmatpush.bf16.msrb.mxu1 %v1157_v17 }
 0xa93   :  { %1707 = vmatmul.msk.bf16.vlgmr.msra.gmra.mxu2 %vm90_vm1, %v1207_v19 }
 0xa94   :  { %1705 = vmatmul.msk.bf16.vlgmr.msrb.gmra.mxu1 %vm90_vm1, %v1150_v21 }
 0xa95   :  { %1280 = vmatpush.bf16.msra.mxu1 %v1271_v20 }
 0xaa4   :  { %1709 = vmatmul.msk.bf16.vlgmr.msra.gmra.mxu1 %vm90_vm1, %v1264_v23 }
 0xaad   :  { %v925_v24 = vpop.f32.mrf.mxu1 }
 0xab1   :  { %v982_v25 = vpop.f32.mrf.mxu2 }
 0xab5   :  { %v927_v3 = vpop.f32.mrf.mxu1 }
 0xab9   :  { %v984_v26 = vpop.f32.mrf.mxu2 }
 0xaba   :  { %v1318_v27 = vpop.xlane.xlu1 %1317 }
 0xabb   :  { %1923 = vrcp.f32 %v1318_v27 }
 0xac1   :  { %v1924_v28 = vpop.eup %1923 }
 0xac2   :  { %v1320_v29 = vmul.f32 %v1924_v28, %v1912_v51 }
 0xac4   :  { %v1321_v30 = vpack.c.bf16 %v1320_v29, %v1320_v29 }
 0xac6   :  { %1711 = vmatmul.msk.bf16.vlgmr.msrb.gmra.mxu2 %vm90_vm1, %v1321_v30 }
 0xaf8   :  { %v1039_v31 = vpop.f32.mrf.mxu1 }
 0xb00   :  { %v1041_v32 = vpop.f32.mrf.mxu1 }
 0xb06   :  { %v1096_v8 = vpop.f32.mrf.mxu2 }
 0xb0e   :  { %v1098_v33 = vpop.f32.mrf.mxu2 }
 0xb11   :  { %v1168_v34 = vpop.f32.mrf.mxu1 }
 0xb16   :  { %v1225_v62 = vpop.f32.mrf.mxu2 }
 0xb17   :  { %v1820_v35 = vpack.i.bf16 %v1225_v62, %v982_v25  ;;  %v1784_v25 = vld [vmem:[%s2472_s7 + $0x10] sm:$0xff] }
 0xb19   :  { %v1170_v36 = vpop.f32.mrf.mxu1  ;;  %1821 = vrot.lane.b32.xlu0 %v1820_v35, %s2487_s0 }
 0xb1e   :  { %v1227_v38 = vpop.f32.mrf.mxu2 }
 0xb21   :  { %v1282_v37 = vpop.f32.mrf.mxu1 }
 0xb22   :  { %v1825_v39 = vpack.i.bf16 %v1282_v37, %v1039_v31  ;;  %v1845_v37 = vld [vmem:[%s2469_s5 + $0x1] ss:$0 sm:$0xff] }
 0xb24   :  { %1826 = vrot.lane.b32.xlu2 %v1825_v39, %s2488_s19 }
 0xb29   :  { %v1284_v40 = vpop.f32.mrf.mxu1 }
 0xb49   :  { %v1339_v41 = vpop.f32.mrf.mxu2 }
 0xb4a   :  { %v1830_v42 = vpack.i.bf16 %v1339_v41, %v1096_v8 }
 0xb4c   :  { %1831 = vrot.lane.b32.xlu0 %v1830_v42, %s2489_s20  ;;  %v1846_v42 = vld [vmem:[%s2470_s6 + $0x1] ss:$0 sm:$0xff] }
 0xb51   :  { %v1341_v43 = vpop.f32.mrf.mxu2 }
 0xb7e   :  { %v1827_v1 = vpop.permute.xlu2 %1826 }
 0xb7f   :  { %v1829_v51 = vunpack.i.h.bf16 %v1827_v1  ;;  %v1828_v52 = vunpack.i.l.bf16 %v1827_v1  ;;  %v1789_v1 = vld [vmem:[%s2474_s9 + $0x38] sm:$0xff] }
 0xb80   :  { %1546 = vmatpush.bf16.msrb.mxu3 %v1789_v1 }
 0xb8b   :  { %v1822_v46 = vpop.permute.xlu0 %1821 }
 0xb8c   :  { %v1824_v47 = vunpack.i.h.bf16 %v1822_v46  ;;  %v1823_v48 = vunpack.i.l.bf16 %v1822_v46 }
 0xb8e   :  { %v1355_v49 = vsel %vm90_vm1, %v1168_v34, %v1824_v47  ;;  %v1112_v50 = vsel %vm90_vm1, %v925_v24, %v1823_v48 }
 0xb8f   :  { %v1113_v53 = vsel %vm329_vm3, %v1112_v50, %v1828_v52  ;;  %v1356_v59 = vsel %vm329_vm3, %v1355_v49, %v1829_v51  ;;  %v1788_v49 = vld [vmem:[%s2474_s9 + $0x30] sm:$0xff]  ;;  %v1787_v50 = vld [vmem:[%s2474_s9 + $0x28] sm:$0xff]  ;;  %v1786_v51 = vld [vmem:[%s2474_s9 + $0x20] sm:$0xff] }
 0xb90   :  { %1547 = vmatpush.bf16.msrb.mxu3 %v1788_v49 }
 0xb94   :  { %1548 = vmatpush.bf16.msrb.mxu3 %v1787_v50 }
 0xb98   :  { %1549 = vmatpush.bf16.msrb.mxu3 %v1786_v51 }
 0xbbe   :  { %v1832_v54 = vpop.permute.xlu0 %1831 }
 0xbbf   :  { %v1834_v55 = vunpack.i.h.bf16 %v1832_v54  ;;  %v1833_v56 = vunpack.i.l.bf16 %v1832_v54  ;;  %v1847_v54 = vld [vmem:[%s2471_s8 + $0x1] ss:$0 sm:$0xff] }
 0xbc1   :  { %v1114_v60 = vsel %vm331_vm4, %v1113_v53, %v1833_v56  ;;  %v1357_v61 = vsel %vm331_vm4, %v1356_v59, %v1834_v55 }
 0xbc2   :  { %v1365_v11 = vpack.c.bf16 %v1357_v61, %v1114_v60 }
 0xbc4   :  { %1725 = vmatmul.msk.bf16.vlgmr.msrb.gmra.mxu0 %vm68_vm0, %v1365_v11  ;;  %v1848_v11 = vld [vmem:[%s2473_s10 + $0x1] ss:$0 sm:$0xff] }
 0xc41   :  { %v1393_v0 = vpop.f32.mrf.mxu0 }
 0xc42   :  { %v1394_v4 = vadd.f32 %v1844_v63, %v1393_v0 }
 0xc44   :  { %v1398_v5 = vadd.f32 %v1394_v4, %v2249_v57 }
 0xc46   :  { %v1404_v6 = vsel %vm68_vm0, %v1398_v5, 0.0 }
 0xc47   :  { %1405 = vadd.xlane.f32.xlu2 %v1404_v6 }
 0xc49   :  { %v1395_v7 = vpop.f32.mrf.mxu0 }
 0xc4a   :  { %v1396_v9 = vadd.f32 %v1844_v63, %v1395_v7 }
 0xc4c   :  { %v1399_v10 = vadd.f32 %v1396_v9, %v2251_v58  ;;  %v1785_v58 = vld [vmem:[%s2472_s7 + $0x18] sm:$0xff] }
 0xc4d   :  { %1490 = vmatpush.bf16.msrb.mxu1 %v1785_v58 }
 0xc4e   :  { %v1407_v12 = vsel %vm68_vm0, %v1399_v10, 0.0 }
 0xc4f   :  { %1408 = vadd.xlane.f32.xlu0 %v1407_v12 }
 0xc51   :  { %1491 = vmatpush.bf16.msrb.mxu1 %v1784_v25 }
 0xcba   :  { %v1406_v13 = vpop.xlane.xlu2 %1405 }
 0xcbb   :  { %v1410_v14 = vmul.f32 %v1406_v13, %v2189_v22 }
 0xcbd   :  { %v1412_v15 = vsub.f32 %v1398_v5, %v1410_v14 }
 0xcbf   :  { %v1414_v16 = vmul.f32 %v1412_v15, %v1412_v15 }
 0xcc1   :  { %v1416_v17 = vsel %vm68_vm0, %v1414_v16, 0.0 }
 0xcc2   :  { %v1409_v19 = vpop.xlane.xlu0 %1408  ;;  %1417 = vadd.xlane.f32.xlu1 %v1416_v17 }
 0xcc3   :  { %v1411_v57 = vmul.f32 %v1409_v19, %v2189_v22 }
 0xcc5   :  { %v1413_v20 = vsub.f32 %v1399_v10, %v1411_v57 }
 0xcc7   :  { %v1415_v21 = vmul.f32 %v1413_v20, %v1413_v20 }
 0xcc9   :  { %v1419_v2 = vsel %vm68_vm0, %v1415_v21, 0.0 }
 0xcca   :  { %1420 = vadd.xlane.f32.xlu1 %v1419_v2 }
 0xd35   :  { %v1418_v18 = vpop.xlane.xlu1 %1417 }
 0xd36   :  { %v1422_v23 = vmul.f32 %v1418_v18, %v2189_v22 }
 0xd38   :  { %v1424_v24 = vadd.f32 1e-05, %v1422_v23 }
 0xd3a   :  { %1925 = vrsqrt.f32 %v1424_v24  ;;  %vm1432_vm2 = vweird.f32 %v1424_v24 }
 0xd3d   :  { %v1421_v3 = vpop.xlane.xlu1 %1420 }
 0xd3e   :  { %v1423_v26 = vmul.f32 %v1421_v3, %v2189_v22 }
 0xd40   :  { %v1926_v27 = vpop.eup %1925  ;;  %v1425_v28 = vadd.f32 1e-05, %v1423_v26 }
 0xd41   :  { %v1427_v29 = vmul.f32 %v1926_v27, %v1424_v24  ;;  %vm1433_vm1 = vweird.f32 %v1926_v27 }
 0xd42   :  { %1927 = vrsqrt.f32 %v1425_v28  ;;  %vm1434_vm3 = vmor %vm1432_vm2, %vm1433_vm1  ;;  %vm1442_vm8 = vweird.f32 %v1425_v28 }
 0xd43   :  { %v1428_v30 = vmul.f32 %v1926_v27, %v1427_v29 }
 0xd45   :  { %v1429_v31 = vmul.f32 0.5, %v1428_v30 }
 0xd47   :  { %v1430_v32 = vsub.f32 1.5, %v1429_v31 }
 0xd48   :  { %v1928_v8 = vpop.eup %1927 }
 0xd49   :  { %v1431_v33 = vmul.f32 %v1926_v27, %v1430_v32  ;;  %v1437_v34 = vmul.f32 %v1928_v8, %v1425_v28  ;;  %vm1443_vm4 = vweird.f32 %v1928_v8 }
 0xd4a   :  { %vm1444_vm9 = vmor %vm1442_vm8, %vm1443_vm4 }
 0xd4b   :  { %v1438_v62 = vmul.f32 %v1928_v8, %v1437_v34  ;;  %v1435_v35 = vsel %vm1434_vm3, %v1926_v27, %v1431_v33 }
 0xd4c   :  { %v1446_v39 = vmul.f32 %v1435_v35, %v1412_v15 }
 0xd4d   :  { %v1439_v36 = vmul.f32 0.5, %v1438_v62 }
 0xd4e   :  { %v1451_v43 = vmul.f32 %v1845_v37, %v1446_v39 }
 0xd4f   :  { %v1440_v38 = vsub.f32 1.5, %v1439_v36 }
 0xd50   :  { %v1456_v46 = vadd.f32 %v1846_v42, %v1451_v43 }
 0xd51   :  { %v1441_v40 = vmul.f32 %v1928_v8, %v1440_v38 }
 0xd53   :  { %v1445_v41 = vsel %vm1444_vm9, %v1928_v8, %v1441_v40  ;;  %v1849_v8 = vld [vmem:[%s2475_s11 + $0x1] ss:$0 sm:$0xff] }
 0xd54   :  { %v1447_v44 = vmul.f32 %v1445_v41, %v1413_v20 }
 0xd56   :  { %v1452_v45 = vmul.f32 %v1845_v37, %v1447_v44 }
 0xd58   :  { %v1457_v47 = vadd.f32 %v1846_v42, %v1452_v45 }
 0xd5a   :  { %v1465_v48 = vpack.c.bf16 %v1457_v47, %v1456_v46 }
 0xd5c   :  { %1741 = vmatmul.msk.bf16.vlgmr.msrb.gmra.mxu1 %vm68_vm0, %v1465_v48 }
 0xdd9   :  { %v1493_v52 = vpop.f32.mrf.mxu1 }
 0xdda   :  { %v1494_v55 = vadd.f32 %v1847_v54, %v1493_v52 }
 0xddc   :  { %v1498_v59 = vmax.f32 %v1494_v55, 0.0 }
 0xde1   :  { %v1495_v56 = vpop.f32.mrf.mxu1 }
 0xde2   :  { %v1496_v53 = vadd.f32 %v1847_v54, %v1495_v56 }
 0xde4   :  { %v1499_v60 = vmax.f32 %v1496_v53, 0.0 }
 0xde6   :  { %v1511_v61 = vpack.c.bf16 %v1499_v60, %v1498_v59 }
 0xde8   :  { %1767 = vmatmul.msk.bf16.vlgmr.msrb.gmra.mxu3 %vm756_vm12, %v1511_v61 }
 0xe6b   :  { %v1551_v63 = vpop.f32.mrf.mxu3 }
 0xe6c   :  { %v1552_v0 = vadd.f32 %v1848_v11, %v1551_v63 }
 0xe6e   :  { %v1556_v4 = vadd.f32 %v1552_v0, %v1456_v46 }
 0xe70   :  { %v1562_v5 = vsel %vm68_vm0, %v1556_v4, 0.0 }
 0xe71   :  { %1563 = vadd.xlane.f32.xlu1 %v1562_v5 }
 0xe73   :  { %v1553_v6 = vpop.f32.mrf.mxu3 }
 0xe74   :  { %v1554_v7 = vadd.f32 %v1848_v11, %v1553_v6 }
 0xe76   :  { %v1557_v9 = vadd.f32 %v1554_v7, %v1457_v47 }
 0xe78   :  { %v1565_v10 = vsel %vm68_vm0, %v1557_v9, 0.0 }
 0xe79   :  { %1566 = vadd.xlane.f32.xlu1 %v1565_v10 }
 0xee4   :  { %v1564_v12 = vpop.xlane.xlu1 %1563 }
 0xee5   :  { %v1568_v13 = vmul.f32 %v1564_v12, %v2189_v22 }
 0xee7   :  { %v1570_v14 = vsub.f32 %v1556_v4, %v1568_v13 }
 0xee9   :  { %v1572_v15 = vmul.f32 %v1570_v14, %v1570_v14 }
 0xeeb   :  { %v1574_v16 = vsel %vm68_vm0, %v1572_v15, 0.0 }
 0xeec   :  { %1575 = vadd.xlane.f32.xlu1 %v1574_v16  ;;  %v1567_v17 = vpop.xlane.xlu1 %1566 }
 0xeed   :  { %v1569_v19 = vmul.f32 %v1567_v17, %v2189_v22 }
 0xeef   :  { %v1571_v57 = vsub.f32 %v1557_v9, %v1569_v19 }
 0xef1   :  { %v1573_v20 = vmul.f32 %v1571_v57, %v1571_v57 }
 0xef3   :  { %v1577_v21 = vsel %vm68_vm0, %v1573_v20, 0.0 }
 0xef4   :  { %1578 = vadd.xlane.f32.xlu1 %v1577_v21 }
 0xf5f   :  { %v1576_v2 = vpop.xlane.xlu1 %1575 }
 0xf60   :  { %v1580_v58 = vmul.f32 %v1576_v2, %v2189_v22 }
 0xf62   :  { %v1582_v18 = vadd.f32 1e-05, %v1580_v58 }
 0xf64   :  { %1929 = vrsqrt.f32 %v1582_v18  ;;  %vm1590_vm11 = vweird.f32 %v1582_v18 }
 0xf67   :  { %v1579_v23 = vpop.xlane.xlu1 %1578 }
 0xf68   :  { %v1581_v24 = vmul.f32 %v1579_v23, %v2189_v22  ;;  %v1850_v22 = vld [vmem:[%s2476_s12 + $0x1] ss:$0 sm:$0xff] }
 0xf6a   :  { %v1930_v25 = vpop.eup %1929  ;;  %v1583_v3 = vadd.f32 1e-05, %v1581_v24 }
 0xf6b   :  { %v1585_v26 = vmul.f32 %v1930_v25, %v1582_v18  ;;  %vm1591_vm10 = vweird.f32 %v1930_v25 }
 0xf6c   :  { %1931 = vrsqrt.f32 %v1583_v3  ;;  %vm1592_vm12 = vmor %vm1590_vm11, %vm1591_vm10  ;;  %vm1600_vm14 = vweird.f32 %v1583_v3 }
 0xf6d   :  { %v1586_v27 = vmul.f32 %v1930_v25, %v1585_v26 }
 0xf6f   :  { %v1587_v28 = vmul.f32 0.5, %v1586_v27 }
 0xf71   :  { %v1588_v29 = vsub.f32 1.5, %v1587_v28 }
 0xf72   :  { %v1932_v30 = vpop.eup %1931 }
 0xf73   :  { %v1589_v31 = vmul.f32 %v1930_v25, %v1588_v29  ;;  %v1595_v32 = vmul.f32 %v1932_v30, %v1583_v3  ;;  %vm1601_vm13 = vweird.f32 %v1932_v30 }
 0xf74   :  { %vm1602_vm15 = vmor %vm1600_vm14, %vm1601_vm13 }
 0xf75   :  { %v1593_v33 = vsel %vm1592_vm12, %v1930_v25, %v1589_v31  ;;  %v1596_v34 = vmul.f32 %v1932_v30, %v1595_v32 }
 0xf76   :  { %v1604_v62 = vmul.f32 %v1593_v33, %v1570_v14 }
 0xf77   :  { %v1597_v35 = vmul.f32 0.5, %v1596_v34 }
 0xf78   :  { %v1609_v36 = vmul.f32 %v1849_v8, %v1604_v62 }
 0xf79   :  { %v1598_v38 = vsub.f32 1.5, %v1597_v35 }
 0xf7a   :  { %v1614_v37 = vadd.f32 %v1850_v22, %v1609_v36 }
 0xf7b   :  { %v1599_v39 = vmul.f32 %v1932_v30, %v1598_v38 }
 0xf7c   :  { %1616 = vst.msk [vmem:[%s2477_s13] sm:$0xff] %vm68_vm0, %v1614_v37 }
 0xf7d   :  { %v1603_v40 = vsel %vm1602_vm15, %v1932_v30, %v1599_v39 }
 0xf7e   :  { %v1605_v41 = vmul.f32 %v1603_v40, %v1571_v57 }
 0xf80   :  { %v1610_v42 = vmul.f32 %v1849_v8, %v1605_v41 }
 0xf82   :  { %v1615_v43 = vadd.f32 %v1850_v22, %v1610_v42 }
 0xf84   :  { %1617 = vst.msk [vmem:[%s2477_s13 + $0x8] sm:$0xff] %vm68_vm0, %v1615_v43 }

// kernel: emoji_transformer_forward.3
= control target key start
LH: loop header
LB: loop body
LE: loop exit
PB: predicated region body
PF: predicated region fallthrough
CT: control target
= control target key end

     0   :  { %vm109_vm0 = vcmask 261120   ;;  %s4618_s26 = smov 80   ;;  %s4610_s28 = smov 72   ;;  %vm131_vm1 = vcmask 64512   ;;  %v82_v34 = vlaneseq  ;;  %v3596_v38 = vmov 0.0   ;;  %s4568_s2 = inlined_call_operand.vmem [shape: bf16[2,32,96], index: 2, kind: input, shape index: {}]   ;;  %s4569_s0 = inlined_call_operand.vmem [shape: f32[16,32], index: 0, kind: input, shape index: {}]   ;;  %s4570_s3 = inlined_call_operand.vmem [shape: f32[2,1,96], index: 3, kind: input, shape index: {}]   ;;  %s4571_s5 = inlined_call_operand.vmem [shape: f32[2,1,32], index: 5, kind: input, shape index: {}]   ;;  %s4572_s4 = inlined_call_operand.vmem [shape: bf16[2,32,32], index: 4, kind: input, shape index: {}]   ;;  %s4573_s6 = inlined_call_operand.vmem [shape: f32[2,1,32], index: 6, kind: input, shape index: {}]   ;;  %s4574_s7 = inlined_call_operand.vmem [shape: f32[2,1,32], index: 7, kind: input, shape index: {}]   ;;  %s4575_s10 = inlined_call_operand.vmem [shape: bf16[2,32,64], index: 10, kind: input, shape index: {}]   ;;  %s4576_s1 = inlined_call_operand.vmem [shape: f32[16,32], index: 1, kind: input, shape index: {}]   ;;  %s4577_s11 = inlined_call_operand.vmem [shape: f32[2,1,64], index: 11, kind: input, shape index: {}]   ;;  %s4578_s9 = inlined_call_operand.vmem [shape: f32[2,1,32], index: 9, kind: input, shape index: {}]   ;;  %s4579_s8 = inlined_call_operand.vmem [shape: bf16[2,32,32], index: 8, kind: input, shape index: {}]   ;;  %s4580_s13 = inlined_call_operand.vmem [shape: f32[2,1,32], index: 13, kind: input, shape index: {}]   ;;  %s4581_s12 = inlined_call_operand.vmem [shape: bf16[2,32,32], index: 12, kind: input, shape index: {}]   ;;  %s4582_s14 = inlined_call_operand.vmem [shape: f32[2,1,32], index: 14, kind: input, shape index: {}]   ;;  %s4583_s15 = inlined_call_operand.vmem [shape: f32[2,1,32], index: 15, kind: input, shape index: {}]   ;;  %s4584_s17 = inlined_call_operand.vmem [shape: f32[2,1,64], index: 17, kind: input, shape index: {}]   ;;  %s4585_s16 = inlined_call_operand.vmem [shape: bf16[2,32,64], index: 16, kind: input, shape index: {}]   ;;  %s4586_s19 = inlined_call_operand.vmem [shape: f32[2,1,32], index: 19, kind: input, shape index: {}]   ;;  %s4587_s18 = inlined_call_operand.vmem [shape: bf16[2,64,32], index: 18, kind: input, shape index: {}]   ;;  %s4588_s20 = inlined_call_operand.vmem [shape: f32[2,1,32], index: 20, kind: input, shape index: {}]   ;;  %s4589_s21 = inlined_call_operand.vmem [shape: f32[2,1,32], index: 21, kind: input, shape index: {}]   ;;  %s4590_s23 = inlined_call_operand.vmem [shape: f32[1,128], index: 23, kind: input, shape index: {}]   ;;  %s4591_s22 = inlined_call_operand.vmem [shape: bf16[32,128], index: 22, kind: input, shape index: {}]   ;;  %s4592_s24 = inlined_call_operand.vmem [shape: f32[16,128], index: 24, kind: output, shape index: {}]  }
   0x1   :  { %4640 = sst [smem:[#allocation2_spill]] %s4568_s2  ;;  %s4608_s29 = smov 56   ;;  %vm170_vm3 = vcmask 1043456   ;;  %vm374_vm4 = vcmask 130048   ;;  %vm376_vm5 = vcmask 195584  }
   0x2   :  { %4641 = sst [smem:[#allocation3_spill]] %s4569_s0  ;;  %s4628_s0 = smov 120   ;;  %v83_v35 = vshrl.u32 %v82_v34, 7  ;;  %v85_v36 = vand.u32 127, %v82_v34 }
   0x3   :  { %4642 = sst [smem:[#allocation4_spill]] %s4570_s3  ;;  %s4624_s3 = smov 112  }
   0x4   :  { %4643 = sst [smem:[#allocation5_spill]] %s4571_s5  ;;  %vm86_vm2 = vcmp.gt.s32.totalorder %v85_v36, %v83_v35  ;;  %s4606_s30 = smov 40  }
   0x5   :  { %4644 = sst [smem:[#allocation6_spill]] %s4572_s4  ;;  %s4626_s4 = smov 104   ;;  %v3803_v39 = vsel %vm86_vm2, -1e+09, %v3596_v38 }
   0x6   :  { %4645 = sst [smem:[#allocation7_spill]] %s4573_s6  ;;  %s4620_s6 = smov 96  }
   0x7   :  { %4646 = sst [smem:[#allocation8_spill]] %s4574_s7  ;;  %s4622_s7 = smov 88  }
   0x8   :  { %4647 = sst [smem:[#allocation9_spill]] %s4575_s10  ;;  %s4602_s10 = smov 48  }
   0x9   :  { %4648 = sst [smem:[#allocation10_spill]] %s4576_s1  ;;  %s4612_s1 = smov 8  }
   0xa   :  { %4649 = sst [smem:[#allocation11_spill]] %s4578_s9  ;;  %s4616_s5 = smov 16  }
   0xb   :  { %4650 = sst [smem:[#allocation12_spill]] %s4580_s13 }
   0xc   :  { %4651 = sst [smem:[#allocation13_spill]] %s4581_s12 }
   0xd   :  { %4652 = sst [smem:[#allocation14_spill]] %s4582_s14 }
   0xe   :  { %4653 = sst [smem:[#allocation15_spill]] %s4583_s15 }
   0xf   :  { %4654 = sst [smem:[#allocation16_spill]] %s4585_s16 }
  0x10   :  { %4655 = sst [smem:[#allocation17_spill]] %s4590_s23 }
  0x11   :  { %4656 = sst [smem:[#allocation18_spill]] %s4591_s22 }
  0x12   :  { %4657 = sst [smem:[#allocation19_spill]] %s4592_s24  ;;  %s4675_s24 = smov 24  }
  0x13   :  { %s4658_s27 = sld [smem:[#allocation2_spill]] }
  0x14   :  { %s4659_s2 = sld [smem:[#allocation3_spill]] }
  0x15   :  { %s4660_s25 = sld [smem:[#allocation4_spill]] }
  0x19   :  { %v3298_v0 = vld [vmem:[%s4658_s27 + $0x8] sm:$0xff]  ;;  %v3297_v1 = vld [vmem:[%s4658_s27] sm:$0xff] }
  0x1a   :  { %119 = vmatpush.bf16.msra.mxu0 %v3298_v0  ;;  %v3738_v2 = vld [vmem:[%s4659_s2] sm:$0xff]  ;;  %v3743_v3 = vld [vmem:[%s4659_s2 + $0x8] sm:$0xff]  ;;  %s4604_s2 = smov 64  }
  0x1b   :  { %v93_v4 = vpack.c.bf16 %v3743_v3, %v3738_v2  ;;  %v3407_v5 = vld [vmem:[%s4660_s25] ss:$0 sm:$0xff] }
  0x1e   :  { %120 = vmatpush.bf16.msra.mxu0 %v3297_v1 }
  0x21   :  { %3045 = vmatmul.msk.bf16.vlgmr.msra.gmra.mxu0 %vm109_vm0, %v93_v4 }
  0x9e   :  { %v122_v6 = vpop.f32.mrf.mxu0 }
  0x9f   :  { %v123_v7 = vadd.f32 %v3407_v5, %v122_v6 }
  0xa1   :  { %v3751_v8 = vpack.c.bf16 %v123_v7, %v123_v7 }
  0xa3   :  { %303 = vrot.lane.b32.xlu2 %v3751_v8, %s4626_s4  ;;  %187 = vrot.lane.b32.xlu1 %v3751_v8, %s4628_s0 }
  0xa4   :  { %129 = vrot.lane.b32.xlu0 %v3751_v8, %s4620_s6 }
  0xa6   :  { %v124_v9 = vpop.f32.mrf.mxu0 }
  0xa7   :  { %v125_v10 = vadd.f32 %v3407_v5, %v124_v9 }
  0xa9   :  { %v3765_v11 = vpack.c.bf16 %v125_v10, %v125_v10 }
  0xab   :  { %247 = vrot.lane.b32.xlu2 %v3751_v8, %s4618_s26  ;;  %305 = vrot.lane.b32.xlu1 %v3751_v8, %s4610_s28 }
  0xac   :  { %189 = vrot.lane.b32.xlu0 %v3751_v8, %s4622_s7 }
  0xb3   :  { %436 = vrot.lane.b32.xlu2 %v3765_v11, %s4628_s0  ;;  %245 = vrot.lane.b32.xlu1 %v3751_v8, %s4624_s3 }
  0xb4   :  { %438 = vrot.lane.b32.xlu0 %v3765_v11, %s4622_s7  ;;  %s4664_s7 = sld [smem:[#allocation10_spill]] }
  0xbb   :  { %552 = vrot.lane.b32.xlu2 %v3765_v11, %s4626_s4  ;;  %554 = vrot.lane.b32.xlu1 %v3765_v11, %s4610_s28  ;;  %s4669_s4 = smov 88   ;;  %s4673_s28 = smov 8  }
  0xbc   :  { %380 = vrot.lane.b32.xlu0 %v3765_v11, %s4620_s6  ;;  %s4667_s6 = sld [smem:[#allocation7_spill]] }
  0xc3   :  { %494 = vrot.lane.b32.xlu1 %v3765_v11, %s4624_s3  ;;  %s4668_s3 = sld [smem:[#allocation8_spill]] }
  0xc4   :  { %496 = vrot.lane.b32.xlu0 %v3765_v11, %s4618_s26  ;;  %s4670_s26 = smov 96  }
  0xcb   :  { %224 = vrot.lane.b32.xlu1 %v3751_v8, %s4608_s29 }
  0xfd   :  { %v304_v12 = vpop.permute.xlu2 %303 }
 0x105   :  { %v248_v13 = vpop.permute.xlu2 %247 }
 0x106   :  { %v253_v14 = vsel %vm131_vm1, %v248_v13, 0 }
 0x107   :  { %262 = vmatpush.bf16.xpose.msrb.mxu0 %v253_v14 }
 0x10d   :  { %v437_v31 = vpop.permute.xlu2 %436 }
 0x115   :  { %v188_v15 = vpop.permute.xlu1 %187  ;;  %v553_v33 = vpop.permute.xlu2 %552 }
 0x116   :  { %v130_v16 = vpop.permute.xlu0 %129 }
 0x117   :  { %v136_v17 = vsel %vm131_vm1, %v130_v16, 0 }
 0x118   :  { %145 = vmatpush.bf16.xpose.msra.mxu1 %v136_v17 }
 0x11d   :  { %v306_v18 = vpop.permute.xlu1 %305 }
 0x11e   :  { %v190_v19 = vpop.permute.xlu0 %189  ;;  %v311_v20 = vsel %vm131_vm1, %v306_v18, 0 }
 0x11f   :  { %3046 = vmatmul.msk.bf16.vlgmr.msra.gmra.mxu1 %vm131_vm1, %v3751_v8  ;;  %v195_v21 = vsel %vm131_vm1, %v190_v19, 0 }
 0x120   :  { %204 = vmatpush.bf16.xpose.msra.mxu3 %v195_v21 }
 0x125   :  { %v246_v22 = vpop.permute.xlu1 %245 }
 0x126   :  { %v439_v23 = vpop.permute.xlu0 %438  ;;  %3050 = vmatmul.msk.bf16.vlgmr.msrb.gmra.mxu0 %vm131_vm1, %v246_v22 }
 0x127   :  { %v444_v24 = vsel %vm131_vm1, %v439_v23, 0  ;;  %3048 = vmatmul.msk.bf16.vlgmr.msra.gmra.mxu3 %vm131_vm1, %v188_v15 }
 0x128   :  { %320 = vmatpush.bf16.xpose.msrb.mxu3 %v311_v20 }
 0x12d   :  { %v555_v27 = vpop.permute.xlu1 %554 }
 0x12e   :  { %v381_v25 = vpop.permute.xlu0 %380  ;;  %v560_v29 = vsel %vm131_vm1, %v555_v27, 0 }
 0x12f   :  { %v386_v26 = vsel %vm131_vm1, %v381_v25, 0 }
 0x130   :  { %453 = vmatpush.bf16.xpose.msra.mxu3 %v444_v24  ;;  %395 = vmatpush.bf16.xpose.msra.mxu0 %v386_v26 }
 0x135   :  { %v495_v32 = vpop.permute.xlu1 %494 }
 0x136   :  { %v497_v28 = vpop.permute.xlu0 %496 }
 0x137   :  { %v502_v30 = vsel %vm131_vm1, %v497_v28, 0  ;;  %3052 = vmatmul.msk.bf16.vlgmr.msrb.gmra.mxu3 %vm131_vm1, %v304_v12  ;;  %3054 = vmatmul.msk.bf16.vlgmr.msra.gmra.mxu0 %vm131_vm1, %v3765_v11 }
 0x138   :  { %569 = vmatpush.bf16.xpose.msrb.mxu3 %v560_v29  ;;  %511 = vmatpush.bf16.xpose.msrb.mxu0 %v502_v30 }
 0x13d   :  { %v225_v28 = vpop.permute.xlu1 %224 }
 0x147   :  { %3056 = vmatmul.msk.bf16.vlgmr.msra.gmra.mxu3 %vm131_vm1, %v437_v31  ;;  %3058 = vmatmul.msk.bf16.vlgmr.msrb.gmra.mxu0 %vm131_vm1, %v495_v32 }
 0x157   :  { %3060 = vmatmul.msk.bf16.vlgmr.msrb.gmra.mxu3 %vm131_vm1, %v553_v33  ;;  %v230_v33 = vsel %vm170_vm3, %v225_v28, 0 }
 0x19c   :  { %v147_v37 = vpop.f32.mrf.mxu1 }
 0x19d   :  { %v151_v40 = vmul.f32 0.35355338, %v147_v37 }
 0x19f   :  { %v152_v41 = vadd.f32 %v151_v40, %v3803_v39 }
 0x1a1   :  { %v153_v42 = vsel %vm131_vm1, %v152_v41, -inf }
 0x1a2   :  { %154 = vmax.xlane.f32.xlu2 %v153_v42 }
 0x1a3   :  { %v264_v43 = vpop.f32.mrf.mxu0 }
 0x1a4   :  { %v149_v44 = vpop.f32.mrf.mxu1  ;;  %v268_v45 = vmul.f32 0.35355338, %v264_v43 }
 0x1a6   :  { %v269_v46 = vadd.f32 %v268_v45, %v3803_v39 }
 0x1a8   :  { %v270_v47 = vsel %vm131_vm1, %v269_v46, -inf }
 0x1aa   :  { %271 = vmax.xlane.f32.xlu2 %v270_v47  ;;  %v206_v48 = vpop.f32.mrf.mxu3 }
 0x1ab   :  { %v210_v49 = vmul.f32 0.35355338, %v206_v48  ;;  %v266_v50 = vpop.f32.mrf.mxu0 }
 0x1ad   :  { %v211_v51 = vadd.f32 %v210_v49, %v3803_v39 }
 0x1af   :  { %v212_v52 = vsel %vm131_vm1, %v211_v51, -inf }
 0x1b0   :  { %213 = vmax.xlane.f32.xlu0 %v212_v52 }
 0x1b2   :  { %v208_v53 = vpop.f32.mrf.mxu3 }
 0x1b4   :  { %v397_v54 = vpop.f32.mrf.mxu0 }
 0x1b5   :  { %v401_v55 = vmul.f32 0.35355338, %v397_v54 }
 0x1b7   :  { %v3812_v56 = vadd.f32 %v401_v55, %v3803_v39 }
 0x1b9   :  { %v403_v57 = vsel %vm131_vm1, %v3812_v56, -inf }
 0x1ba   :  { %v322_v58 = vpop.f32.mrf.mxu3  ;;  %404 = vmax.xlane.f32.xlu1 %v403_v57 }
 0x1bb   :  { %v326_v59 = vmul.f32 0.35355338, %v322_v58 }
 0x1bc   :  { %v399_v60 = vpop.f32.mrf.mxu0 }
 0x1bd   :  { %v3817_v61 = vadd.f32 %v326_v59, %v3803_v39 }
 0x1bf   :  { %v328_v62 = vsel %vm131_vm1, %v3817_v61, -inf }
 0x1c2   :  { %165 = vrot.lane.b32.xlu2 %v3751_v8, %s4604_s2  ;;  %v324_v63 = vpop.f32.mrf.mxu3  ;;  %329 = vmax.xlane.f32.xlu1 %v328_v62 }
 0x1c4   :  { %v513_v0 = vpop.f32.mrf.mxu0 }
 0x1c5   :  { %v517_v1 = vmul.f32 0.35355338, %v513_v0 }
 0x1c7   :  { %v3824_v4 = vadd.f32 %v517_v1, %v3803_v39 }
 0x1c9   :  { %v519_v5 = vsel %vm131_vm1, %v3824_v4, -inf }
 0x1ca   :  { %v455_v6 = vpop.f32.mrf.mxu3  ;;  %520 = vmax.xlane.f32.xlu0 %v519_v5 }
 0x1cb   :  { %v459_v15 = vmul.f32 0.35355338, %v455_v6 }
 0x1cc   :  { %v515_v7 = vpop.f32.mrf.mxu0 }
 0x1cd   :  { %v460_v17 = vadd.f32 %v459_v15, %v3803_v39 }
 0x1cf   :  { %v461_v18 = vsel %vm131_vm1, %v460_v17, -inf }
 0x1d2   :  { %v457_v9 = vpop.f32.mrf.mxu3 }
 0x1da   :  { %v571_v10 = vpop.f32.mrf.mxu3 }
 0x1db   :  { %v575_v12 = vmul.f32 0.35355338, %v571_v10  ;;  %282 = vrot.lane.b32.xlu1 %v3751_v8, %s4602_s10 }
 0x1dd   :  { %v576_v13 = vadd.f32 %v575_v12, %v3803_v39 }
 0x1df   :  { %v577_v14 = vsel %vm131_vm1, %v576_v13, -inf }
 0x1e0   :  { %578 = vmax.xlane.f32.xlu0 %v577_v14 }
 0x1e2   :  { %v573_v16 = vpop.f32.mrf.mxu3 }
 0x1eb   :  { %462 = vmax.xlane.f32.xlu2 %v461_v18 }
 0x215   :  { %v155_v19 = vpop.xlane.xlu2 %154 }
 0x216   :  { %v156_v20 = vsub.f32 %v152_v41, %v155_v19 }
 0x218   :  { %v157_v21 = vmul.f32 1.442695, %v156_v20 }
 0x21a   :  { %3434 = vpow2.f32 %v157_v21 }
 0x21d   :  { %v272_v22 = vpop.xlane.xlu2 %271 }
 0x21e   :  { %v273_v23 = vsub.f32 %v269_v46, %v272_v22 }
 0x220   :  { %v3834_v24 = vpop.eup %3434  ;;  %v274_v25 = vmul.f32 1.442695, %v273_v23 }
 0x221   :  { %v159_v26 = vsel %vm131_vm1, %v3834_v24, 0.0 }
 0x222   :  { %3436 = vpow2.f32 %v274_v25  ;;  %160 = vadd.xlane.f32.xlu0 %v159_v26 }
 0x223   :  { %v214_v27 = vpop.xlane.xlu0 %213 }
 0x224   :  { %v215_v29 = vsub.f32 %v211_v51, %v214_v27 }
 0x225   :  { %v166_v30 = vpop.permute.xlu2 %165 }
 0x226   :  { %v216_v31 = vmul.f32 1.442695, %v215_v29  ;;  %v172_v32 = vsel %vm170_vm3, %v166_v30, 0 }
 0x227   :  { %181 = vmatpush.bf16.msra.mxu2 %v172_v32 }
 0x228   :  { %v3840_v34 = vpop.eup %3436  ;;  %3438 = vpow2.f32 %v216_v31 }
 0x229   :  { %v276_v35 = vsel %vm131_vm1, %v3840_v34, 0.0 }
 0x22a   :  { %277 = vadd.xlane.f32.xlu2 %v276_v35 }
 0x22b   :  { %239 = vmatpush.bf16.msrb.mxu2 %v230_v33 }
 0x22d   :  { %v405_v38 = vpop.xlane.xlu1 %404 }
 0x22e   :  { %v3844_v36 = vpop.eup %3438  ;;  %v406_v42 = vsub.f32 %v3812_v56, %v405_v38 }
 0x22f   :  { %v218_v37 = vsel %vm131_vm1, %v3844_v36, 0.0 }
 0x230   :  { %219 = vadd.xlane.f32.xlu1 %v218_v37  ;;  %v407_v44 = vmul.f32 1.442695, %v406_v42 }
 0x232   :  { %3440 = vpow2.f32 %v407_v44 }
 0x235   :  { %v330_v40 = vpop.xlane.xlu1 %329 }
 0x236   :  { %340 = vrot.lane.b32.xlu0 %v3751_v8, %s4606_s30  ;;  %v331_v46 = vsub.f32 %v3817_v61, %v330_v40 }
 0x238   :  { %v332_v47 = vmul.f32 1.442695, %v331_v46  ;;  %v3441_v49 = vpop.eup %3440 }
 0x239   :  { %v409_v53 = vsel %vm131_vm1, %v3441_v49, 0.0 }
 0x23a   :  { %3442 = vpow2.f32 %v332_v47 }
 0x23d   :  { %v521_v45 = vpop.xlane.xlu0 %520 }
 0x23e   :  { %v522_v8 = vsub.f32 %v3824_v4, %v521_v45 }
 0x240   :  { %v523_v50 = vmul.f32 1.442695, %v522_v8  ;;  %v3443_v56 = vpop.eup %3442 }
 0x241   :  { %v334_v59 = vsel %vm131_vm1, %v3443_v56, 0.0 }
 0x242   :  { %473 = vrot.lane.b32.xlu2 %v3765_v11, %s4608_s29  ;;  %3444 = vpow2.f32 %v523_v50  ;;  %s4661_s29 = sld [smem:[#allocation6_spill]] }
 0x248   :  { %v3859_v58 = vpop.eup %3444 }
 0x249   :  { %415 = vrot.lane.b32.xlu1 %v3765_v11, %s4604_s2  ;;  %v525_v60 = vsel %vm131_vm1, %v3859_v58, 0.0  ;;  %s4663_s2 = sld [smem:[#allocation9_spill]] }
 0x24d   :  { %v283_v41 = vpop.permute.xlu1 %282 }
 0x24e   :  { %v288_v43 = vsel %vm170_vm3, %v283_v41, 0 }
 0x24f   :  { %297 = vmatpush.bf16.msrb.mxu1 %v288_v43 }
 0x253   :  { %v579_v48 = vpop.xlane.xlu0 %578 }
 0x254   :  { %v580_v51 = vsub.f32 %v576_v13, %v579_v48 }
 0x256   :  { %v581_v55 = vmul.f32 1.442695, %v580_v51 }
 0x258   :  { %3446 = vpow2.f32 %v581_v55 }
 0x25e   :  { %v463_v52 = vpop.xlane.xlu2 %462  ;;  %v3864_v61 = vpop.eup %3446 }
 0x25f   :  { %v464_v54 = vsub.f32 %v460_v17, %v463_v52  ;;  %v583_v63 = vsel %vm131_vm1, %v3864_v61, 0.0 }
 0x260   :  { %410 = vadd.xlane.f32.xlu0 %v409_v53 }
 0x261   :  { %v465_v57 = vmul.f32 1.442695, %v464_v54 }
 0x263   :  { %3448 = vpow2.f32 %v465_v57 }
 0x268   :  { %335 = vadd.xlane.f32.xlu0 %v334_v59 }
 0x269   :  { %v3449_v62 = vpop.eup %3448 }
 0x26a   :  { %v467_v0 = vsel %vm131_vm1, %v3449_v62, 0.0 }
 0x26b   :  { %526 = vadd.xlane.f32.xlu2 %v525_v60 }
 0x270   :  { %584 = vadd.xlane.f32.xlu0 %v583_v63 }
 0x273   :  { %468 = vadd.xlane.f32.xlu1 %v467_v0 }
 0x284   :  { %589 = vrot.lane.b32.xlu0 %v3765_v11, %s4606_s30  ;;  %s4662_s30 = sld [smem:[#allocation5_spill]] }
 0x28c   :  { %531 = vrot.lane.b32.xlu1 %v3765_v11, %s4602_s10  ;;  %s4614_s10 = smov 24  }
 0x295   :  { %v161_v1 = vpop.xlane.xlu0 %160 }
 0x296   :  { %3450 = vrcp.f32 %v161_v1  ;;  %v3300_v1 = vld [vmem:[%s4661_s29 + $0x8] sm:$0xff] }
 0x297   :  { %655 = vmatpush.bf16.msra.mxu0 %v3300_v1 }
 0x29c   :  { %v3451_v4 = vpop.eup %3450 }
 0x29d   :  { %v278_v5 = vpop.xlane.xlu2 %277  ;;  %v163_v6 = vmul.f32 %v3451_v4, %v3834_v24  ;;  %v3299_v4 = vld [vmem:[%s4661_s29] sm:$0xff] }
 0x29e   :  { %3452 = vrcp.f32 %v278_v5  ;;  %656 = vmatpush.bf16.msra.mxu0 %v3299_v4 }
 0x29f   :  { %v164_v7 = vpack.c.bf16 %v163_v6, %v163_v6 }
 0x2a1   :  { %3047 = vmatmul.msk.bf16.vlgmr.msra.gmra.mxu2 %vm131_vm1, %v164_v7 }
 0x2a3   :  { %v220_v9 = vpop.xlane.xlu1 %219 }
 0x2a4   :  { %v3453_v10 = vpop.eup %3452  ;;  %3454 = vrcp.f32 %v220_v9 }
 0x2a5   :  { %v280_v12 = vmul.f32 %v3453_v10, %v3840_v34  ;;  %v474_v17 = vpop.permute.xlu2 %473 }
 0x2a6   :  { %v479_v19 = vsel %vm170_vm3, %v474_v17, 0 }
 0x2a7   :  { %v281_v13 = vpack.c.bf16 %v280_v12, %v280_v12 }
 0x2a8   :  { %v341_v14 = vpop.permute.xlu0 %340 }
 0x2a9   :  { %v346_v15 = vsel %vm170_vm3, %v341_v14, 0  ;;  %3051 = vmatmul.msk.bf16.vlgmr.msrb.gmra.mxu1 %vm131_vm1, %v281_v13 }
 0x2aa   :  { %v3455_v11 = vpop.eup %3454  ;;  %355 = vmatpush.bf16.msra.mxu2 %v346_v15 }
 0x2ab   :  { %v222_v16 = vmul.f32 %v3455_v11, %v3844_v36 }
 0x2ad   :  { %v223_v18 = vpack.c.bf16 %v222_v16, %v222_v16 }
 0x2b1   :  { %3049 = vmatmul.msk.bf16.vlgmr.msrb.gmra.mxu2 %vm131_vm1, %v223_v18 }
 0x2b2   :  { %488 = vmatpush.bf16.msrb.mxu2 %v479_v19 }
 0x2bb   :  { %v416_v20 = vpop.permute.xlu1 %415 }
 0x2bc   :  { %v421_v21 = vsel %vm170_vm3, %v416_v20, 0 }
 0x2bd   :  { %430 = vmatpush.bf16.msra.mxu1 %v421_v21 }
 0x2d3   :  { %v411_v22 = vpop.xlane.xlu0 %410 }
 0x2d4   :  { %3456 = vrcp.f32 %v411_v22  ;;  %v3408_v22 = vld [vmem:[%s4662_s30] ss:$0 sm:$0xff] }
 0x2da   :  { %v3457_v23 = vpop.eup %3456 }
 0x2db   :  { %v413_v24 = vmul.f32 %v3457_v23, %v3441_v49  ;;  %v336_v25 = vpop.xlane.xlu0 %335 }
 0x2dc   :  { %3458 = vrcp.f32 %v336_v25 }
 0x2dd   :  { %v414_v26 = vpack.c.bf16 %v413_v24, %v413_v24 }
 0x2de   :  { %v527_v33 = vpop.xlane.xlu2 %526 }
 0x2df   :  { %3055 = vmatmul.msk.bf16.vlgmr.msra.gmra.mxu1 %vm131_vm1, %v414_v26 }
 0x2e2   :  { %v3459_v27 = vpop.eup %3458 }
 0x2e3   :  { %v338_v28 = vmul.f32 %v3459_v27, %v3443_v56  ;;  %v585_v32 = vpop.xlane.xlu0 %584 }
 0x2e5   :  { %v339_v29 = vpack.c.bf16 %v338_v28, %v338_v28 }
 0x2e6   :  { %v469_v30 = vpop.xlane.xlu1 %468 }
 0x2e7   :  { %3053 = vmatmul.msk.bf16.vlgmr.msra.gmra.mxu2 %vm131_vm1, %v339_v29  ;;  %3460 = vrcp.f32 %v469_v30 }
 0x2e8   :  { %3462 = vrcp.f32 %v527_v33 }
 0x2e9   :  { %3464 = vrcp.f32 %v585_v32 }
 0x2ed   :  { %v3461_v31 = vpop.eup %3460 }
 0x2ee   :  { %v471_v34 = vmul.f32 %v3461_v31, %v3449_v62  ;;  %v3463_v38 = vpop.eup %3462  ;;  %v3603_v31 = vmov 32.0  }
 0x2ef   :  { %v529_v40 = vmul.f32 %v3463_v38, %v3859_v58  ;;  %v3465_v41 = vpop.eup %3464  ;;  %3466 = vrcp.f32 %v3603_v31 }
 0x2f0   :  { %v472_v35 = vpack.c.bf16 %v471_v34, %v471_v34  ;;  %v587_v45 = vmul.f32 %v3465_v41, %v3864_v61  ;;  %v3304_v34 = vld [vmem:[%s4663_s2 + $0x8] sm:$0xff] }
 0x2f1   :  { %v530_v44 = vpack.c.bf16 %v529_v40, %v529_v40  ;;  %796 = vmatpush.bf16.msra.mxu3 %v3304_v34 }
 0x2f2   :  { %v588_v46 = vpack.c.bf16 %v587_v45, %v587_v45 }
 0x2f5   :  { %v3467_v32 = vpop.eup %3466 }
 0x2f6   :  { %v590_v36 = vpop.permute.xlu0 %589  ;;  %v674_v33 = vmul.f32 32.0, %v3467_v32  ;;  %vm678_vm6 = vweird.f32 %v3467_v32 }
 0x2f7   :  { %v595_v37 = vsel %vm170_vm3, %v590_v36, 0  ;;  %3057 = vmatmul.msk.bf16.vlgmr.msrb.gmra.mxu2 %vm131_vm1, %v472_v35  ;;  %v81_v36 = vld [vmem:[%s4664_s7 + $0x8] sm:$0xff] }
 0x2f8   :  { %604 = vmatpush.bf16.msra.mxu2 %v595_v37  ;;  %v675_v35 = vsub.f32 1.0, %v674_v33 }
 0x2fa   :  { %v676_v38 = vmul.f32 %v3467_v32, %v675_v35 }
 0x2fc   :  { %v677_v40 = vadd.f32 %v3467_v32, %v676_v38 }
 0x2fe   :  { %v532_v42 = vpop.permute.xlu1 %531  ;;  %v3930_v41 = vsel %vm678_vm6, %v3467_v32, %v677_v40  ;;  %v3412_v32 = vld [vmem:[%s4578_s9] ss:$0 sm:$0xff] }
 0x2ff   :  { %v537_v43 = vsel %vm170_vm3, %v532_v42, 0 }
 0x300   :  { %546 = vmatpush.bf16.msrb.mxu1 %v537_v43 }
 0x303   :  { %3059 = vmatmul.msk.bf16.vlgmr.msrb.gmra.mxu1 %vm131_vm1, %v530_v44 }
 0x307   :  { %3061 = vmatmul.msk.bf16.vlgmr.msra.gmra.mxu2 %vm131_vm1, %v588_v46 }
 0x324   :  { %v183_v8 = vpop.f32.mrf.mxu2 }
 0x326   :  { %v299_v47 = vpop.f32.mrf.mxu1 }
 0x32c   :  { %v185_v48 = vpop.f32.mrf.mxu2 }
 0x32e   :  { %v301_v49 = vpop.f32.mrf.mxu1 }
 0x334   :  { %v241_v50 = vpop.f32.mrf.mxu2 }
 0x33c   :  { %v243_v51 = vpop.f32.mrf.mxu2 }
 0x33d   :  { %v3302_v51 = vld [vmem:[%s4579_s8 + $0x8] sm:$0xff] }
 0x33e   :  { %758 = vmatpush.bf16.msra.mxu1 %v3302_v51 }
 0x35c   :  { %v432_v52 = vpop.f32.mrf.mxu1 }
 0x364   :  { %v434_v53 = vpop.f32.mrf.mxu1 }
 0x36a   :  { %v357_v54 = vpop.f32.mrf.mxu2 }
 0x372   :  { %v359_v55 = vpop.f32.mrf.mxu2 }
 0x373   :  { %v3301_v55 = vld [vmem:[%s4579_s8] sm:$0xff] }
 0x374   :  { %759 = vmatpush.bf16.msra.mxu1 %v3301_v55 }
 0x37a   :  { %v490_v56 = vpop.f32.mrf.mxu2 }
 0x37b   :  { %v3352_v57 = vpack.i.bf16 %v490_v56, %v241_v50  ;;  %v3411_v56 = vld [vmem:[%s4577_s11] ss:$0 sm:$0xff] }
 0x37d   :  { %3353 = vrot.lane.b32.xlu0 %v3352_v57, %s4612_s1  ;;  %s4666_s1 = smov 112  }
 0x380   :  { %v548_v58 = vpop.f32.mrf.mxu1 }
 0x381   :  { %v3347_v59 = vpack.i.bf16 %v548_v58, %v299_v47 }
 0x382   :  { %v492_v60 = vpop.f32.mrf.mxu2 }
 0x383   :  { %3348 = vrot.lane.b32.xlu1 %v3347_v59, %s4616_s5  ;;  %s4665_s5 = smov 104  }
 0x388   :  { %v550_v61 = vpop.f32.mrf.mxu1 }
 0x38a   :  { %v606_v62 = vpop.f32.mrf.mxu2 }
 0x38b   :  { %v3357_v63 = vpack.i.bf16 %v606_v62, %v357_v54 }
 0x38d   :  { %3358 = vrot.lane.b32.xlu0 %v3357_v63, %s4614_s10  ;;  %s4672_s10 = smov 72  }
 0x392   :  { %v608_v0 = vpop.f32.mrf.mxu2 }
 0x3ef   :  { %v3354_v5 = vpop.permute.xlu0 %3353 }
 0x3f0   :  { %v3356_v7 = vunpack.i.h.bf16 %v3354_v5  ;;  %v3355_v9 = vunpack.i.l.bf16 %v3354_v5 }
 0x3f2   :  { %v622_v14 = vsel %vm131_vm1, %v432_v52, %v3356_v7  ;;  %v373_v15 = vsel %vm131_vm1, %v183_v8, %v3355_v9 }
 0x3f5   :  { %v3349_v6 = vpop.permute.xlu1 %3348 }
 0x3f6   :  { %v3351_v10 = vunpack.i.h.bf16 %v3349_v6  ;;  %v3350_v12 = vunpack.i.l.bf16 %v3349_v6 }
 0x3f8   :  { %v375_v17 = vsel %vm374_vm4, %v373_v15, %v3350_v12  ;;  %v623_v18 = vsel %vm374_vm4, %v622_v14, %v3351_v10 }
 0x3ff   :  { %v3359_v13 = vpop.permute.xlu0 %3358 }
 0x400   :  { %v3361_v11 = vunpack.i.h.bf16 %v3359_v13  ;;  %v3360_v16 = vunpack.i.l.bf16 %v3359_v13 }
 0x402   :  { %v377_v19 = vsel %vm376_vm5, %v375_v17, %v3360_v16  ;;  %v624_v20 = vsel %vm376_vm5, %v623_v18, %v3361_v11  ;;  %v3409_v11 = vld [vmem:[%s4667_s6] ss:$0 sm:$0xff] }
 0x403   :  { %v630_v21 = vpack.c.bf16 %v624_v20, %v377_v19  ;;  %v3410_v19 = vld [vmem:[%s4668_s3] ss:$0 sm:$0xff]  ;;  %s4680_s3 = smov 48  }
 0x405   :  { %3070 = vmatmul.msk.bf16.vlgmr.msra.gmra.mxu0 %vm109_vm0, %v630_v21 }
 0x482   :  { %v658_v23 = vpop.f32.mrf.mxu0 }
 0x483   :  { %v659_v24 = vadd.f32 %v3408_v22, %v658_v23 }
 0x485   :  { %v663_v25 = vadd.f32 %v659_v24, %v3738_v2  ;;  %v3303_v2 = vld [vmem:[%s4663_s2] sm:$0xff] }
 0x486   :  { %797 = vmatpush.bf16.msra.mxu3 %v3303_v2 }
 0x487   :  { %v667_v26 = vsel %vm109_vm0, %v663_v25, 0.0 }
 0x488   :  { %668 = vadd.xlane.f32.xlu1 %v667_v26 }
 0x48a   :  { %v660_v27 = vpop.f32.mrf.mxu0 }
 0x48b   :  { %v661_v28 = vadd.f32 %v3408_v22, %v660_v27 }
 0x48d   :  { %v664_v29 = vadd.f32 %v661_v28, %v3743_v3  ;;  %v80_v3 = vld [vmem:[%s4664_s7] sm:$0xff]  ;;  %s4671_s7 = smov 80  }
 0x48e   :  { %v3926_v37 = vpack.c.bf16 %v81_v36, %v80_v3 }
 0x48f   :  { %v670_v30 = vsel %vm109_vm0, %v664_v29, 0.0 }
 0x490   :  { %671 = vadd.xlane.f32.xlu2 %v670_v30  ;;  %3088 = vmatmul.msk.bf16.vlgmr.msra.gmra.mxu3 %vm109_vm0, %v3926_v37 }
 0x4fb   :  { %v669_v42 = vpop.xlane.xlu1 %668 }
 0x4fc   :  { %v680_v43 = vmul.f32 %v3930_v41, %v669_v42 }
 0x4fe   :  { %v682_v44 = vsub.f32 %v663_v25, %v680_v43 }
 0x500   :  { %v684_v45 = vmul.f32 %v682_v44, %v682_v44 }
 0x502   :  { %v686_v46 = vsel %vm109_vm0, %v684_v45, 0.0 }
 0x503   :  { %v672_v8 = vpop.xlane.xlu2 %671  ;;  %687 = vadd.xlane.f32.xlu0 %v686_v46 }
 0x504   :  { %v681_v47 = vmul.f32 %v3930_v41, %v672_v8 }
 0x506   :  { %v683_v48 = vsub.f32 %v664_v29, %v681_v47 }
 0x508   :  { %v685_v49 = vmul.f32 %v683_v48, %v683_v48 }
 0x50a   :  { %v689_v50 = vsel %vm109_vm0, %v685_v49, 0.0 }
 0x50b   :  { %690 = vadd.xlane.f32.xlu2 %v689_v50 }
 0x513   :  { %v799_v57 = vpop.f32.mrf.mxu3 }
 0x514   :  { %v800_v60 = vadd.f32 %v3411_v56, %v799_v57 }
 0x516   :  { %v3947_v63 = vpack.c.bf16 %v800_v60, %v800_v60 }
 0x518   :  { %v810_v1 = vsel %vm131_vm1, %v3947_v63, 0  ;;  %977 = vrot.lane.b32.xlu0 %v3947_v63, %s4665_s5 }
 0x519   :  { %819 = vmatpush.bf16.xpose.msrb.mxu2 %v810_v1 }
 0x51b   :  { %v801_v30 = vpop.f32.mrf.mxu3 }
 0x51c   :  { %v802_v31 = vadd.f32 %v3411_v56, %v801_v30 }
 0x51e   :  { %v3975_v34 = vpack.c.bf16 %v802_v31, %v802_v31 }
 0x520   :  { %v1053_v3 = vsel %vm131_vm1, %v3975_v34, 0 }
 0x523   :  { %863 = vrot.lane.b32.xlu2 %v3947_v63, %s4628_s0 }
 0x52b   :  { %920 = vrot.lane.b32.xlu2 %v3947_v63, %s4666_s1 }
 0x576   :  { %v688_v52 = vpop.xlane.xlu0 %687 }
 0x577   :  { %v692_v53 = vmul.f32 %v688_v52, %v3930_v41 }
 0x579   :  { %v694_v54 = vadd.f32 1e-05, %v692_v53 }
 0x57b   :  { %3468 = vrsqrt.f32 %v694_v54  ;;  %vm702_vm8 = vweird.f32 %v694_v54 }
 0x57e   :  { %v691_v58 = vpop.xlane.xlu2 %690 }
 0x57f   :  { %v693_v59 = vmul.f32 %v691_v58, %v3930_v41 }
 0x581   :  { %v3469_v61 = vpop.eup %3468  ;;  %v695_v62 = vadd.f32 1e-05, %v693_v59 }
 0x582   :  { %v697_v0 = vmul.f32 %v3469_v61, %v694_v54  ;;  %vm703_vm7 = vweird.f32 %v3469_v61 }
 0x583   :  { %3470 = vrsqrt.f32 %v695_v62  ;;  %vm704_vm9 = vmor %vm702_vm8, %vm703_vm7  ;;  %vm712_vm11 = vweird.f32 %v695_v62  ;;  %vm1463_vm8 = vcmask 523264  }
 0x584   :  { %v698_v4 = vmul.f32 %v3469_v61, %v697_v0 }
 0x586   :  { %v699_v5 = vmul.f32 0.5, %v698_v4  ;;  %v864_v26 = vpop.permute.xlu2 %863 }
 0x587   :  { %v869_v27 = vsel %vm131_vm1, %v864_v26, 0 }
 0x588   :  { %v700_v6 = vsub.f32 1.5, %v699_v5  ;;  %878 = vmatpush.bf16.xpose.msrb.mxu1 %v869_v27 }
 0x589   :  { %v3471_v7 = vpop.eup %3470 }
 0x58a   :  { %v701_v9 = vmul.f32 %v3469_v61, %v700_v6  ;;  %v707_v10 = vmul.f32 %v3471_v7, %v695_v62  ;;  %vm713_vm10 = vweird.f32 %v3471_v7  ;;  %v978_v42 = vpop.permute.xlu0 %977 }
 0x58b   :  { %vm714_vm12 = vmor %vm712_vm11, %vm713_vm10  ;;  %v983_v43 = vsel %vm131_vm1, %v978_v42, 0 }
 0x58c   :  { %v708_v12 = vmul.f32 %v3471_v7, %v707_v10  ;;  %v705_v13 = vsel %vm704_vm9, %v3469_v61, %v701_v9 }
 0x58d   :  { %v716_v16 = vmul.f32 %v705_v13, %v682_v44 }
 0x58e   :  { %v709_v14 = vmul.f32 0.5, %v708_v12  ;;  %v921_v28 = vpop.permute.xlu2 %920 }
 0x58f   :  { %v721_v20 = vmul.f32 %v3409_v11, %v716_v16  ;;  %v926_v29 = vsel %vm131_vm1, %v921_v28, 0 }
 0x590   :  { %v710_v15 = vsub.f32 1.5, %v709_v14  ;;  %935 = vmatpush.bf16.xpose.msra.mxu2 %v926_v29 }
 0x591   :  { %v3963_v23 = vadd.f32 %v3410_v19, %v721_v20 }
 0x592   :  { %v711_v17 = vmul.f32 %v3471_v7, %v710_v15 }
 0x594   :  { %v715_v18 = vsel %vm714_vm12, %v3471_v7, %v711_v17 }
 0x595   :  { %v717_v21 = vmul.f32 %v715_v18, %v683_v48 }
 0x597   :  { %v722_v22 = vmul.f32 %v3409_v11, %v717_v21 }
 0x599   :  { %v3965_v24 = vadd.f32 %v3410_v19, %v722_v22 }
 0x59b   :  { %v733_v25 = vpack.c.bf16 %v3965_v24, %v3963_v23 }
 0x59d   :  { %3079 = vmatmul.msk.bf16.vlgmr.msra.gmra.mxu1 %vm109_vm0, %v733_v25 }
 0x59e   :  { %992 = vmatpush.bf16.xpose.msra.mxu1 %v983_v43 }
 0x61a   :  { %v761_v33 = vpop.f32.mrf.mxu1 }
 0x61b   :  { %v762_v35 = vadd.f32 %v3412_v32, %v761_v33 }
 0x61d   :  { %v804_v2 = vpack.c.bf16 %v762_v35, %v762_v35 }
 0x61f   :  { %918 = vrot.lane.b32.xlu2 %v804_v2, %s4666_s1  ;;  %861 = vrot.lane.b32.xlu1 %v804_v2, %s4628_s0 }
 0x620   :  { %3089 = vmatmul.msk.bf16.vlgmr.msrb.gmra.mxu2 %vm131_vm1, %v804_v2 }
 0x621   :  { %1062 = vmatpush.bf16.xpose.msrb.mxu2 %v1053_v3 }
 0x622   :  { %v763_v36 = vpop.f32.mrf.mxu1 }
 0x623   :  { %v764_v38 = vadd.f32 %v3412_v32, %v763_v36 }
 0x625   :  { %v1047_v40 = vpack.c.bf16 %v764_v38, %v764_v38 }
 0x627   :  { %1104 = vrot.lane.b32.xlu0 %v1047_v40, %s4628_s0  ;;  %975 = vrot.lane.b32.xlu2 %v804_v2, %s4665_s5 }
 0x628   :  { %1106 = vrot.lane.b32.xlu1 %v3975_v34, %s4628_s0  ;;  %s4674_s0 = smov 16  }
 0x62f   :  { %1161 = vrot.lane.b32.xlu0 %v1047_v40, %s4666_s1  ;;  %1163 = vrot.lane.b32.xlu2 %v3975_v34, %s4666_s1 }
 0x630   :  { %1220 = vrot.lane.b32.xlu1 %v3975_v34, %s4665_s5 }
 0x637   :  { %897 = vrot.lane.b32.xlu0 %v3947_v63, %s4669_s4  ;;  %1218 = vrot.lane.b32.xlu2 %v1047_v40, %s4665_s5 }
 0x679   :  { %v919_v44 = vpop.permute.xlu2 %918 }
 0x67a   :  { %3093 = vmatmul.msk.bf16.vlgmr.msra.gmra.mxu2 %vm131_vm1, %v919_v44 }
 0x681   :  { %v976_v45 = vpop.permute.xlu2 %975 }
 0x689   :  { %v1164_v46 = vpop.permute.xlu2 %1163 }
 0x68a   :  { %v1169_v8 = vsel %vm131_vm1, %v1164_v46, 0  ;;  %3097 = vmatmul.msk.bf16.vlgmr.msrb.gmra.mxu2 %vm131_vm1, %v1047_v40 }
 0x68b   :  { %1178 = vmatpush.bf16.xpose.msra.mxu2 %v1169_v8 }
 0x691   :  { %v862_v47 = vpop.permute.xlu1 %861  ;;  %v1219_v60 = vpop.permute.xlu2 %1218 }
 0x692   :  { %3091 = vmatmul.msk.bf16.vlgmr.msrb.gmra.mxu1 %vm131_vm1, %v862_v47 }
 0x699   :  { %v1105_v48 = vpop.permute.xlu0 %1104 }
 0x69a   :  { %v1107_v49 = vpop.permute.xlu1 %1106 }
 0x69b   :  { %v1112_v50 = vsel %vm131_vm1, %v1107_v49, 0 }
 0x69c   :  { %1121 = vmatpush.bf16.xpose.msrb.mxu1 %v1112_v50 }
 0x6a1   :  { %v1162_v51 = vpop.permute.xlu0 %1161 }
 0x6a2   :  { %v1221_v52 = vpop.permute.xlu1 %1220  ;;  %3095 = vmatmul.msk.bf16.vlgmr.msra.gmra.mxu1 %vm131_vm1, %v976_v45  ;;  %3101 = vmatmul.msk.bf16.vlgmr.msra.gmra.mxu2 %vm131_vm1, %v1162_v51 }
 0x6a3   :  { %v1226_v53 = vsel %vm131_vm1, %v1221_v52, 0  ;;  %v821_v54 = vpop.f32.mrf.mxu2 }
 0x6a4   :  { %v825_v55 = vmul.f32 0.35355338, %v821_v54  ;;  %1235 = vmatpush.bf16.xpose.msra.mxu1 %v1226_v53 }
 0x6a6   :  { %v826_v56 = vsel %vm131_vm1, %v825_v55, -inf }
 0x6a7   :  { %827 = vmax.xlane.f32.xlu0 %v826_v56 }
 0x6a9   :  { %v898_v57 = vpop.permute.xlu0 %897 }
 0x6aa   :  { %v903_v58 = vsel %vm170_vm3, %v898_v57, 0 }
 0x6ab   :  { %v823_v59 = vpop.f32.mrf.mxu2  ;;  %912 = vmatpush.bf16.msrb.mxu3 %v903_v58 }
 0x6b2   :  { %3099 = vmatmul.msk.bf16.vlgmr.msrb.gmra.mxu1 %vm131_vm1, %v1105_v48 }
 0x6c2   :  { %3103 = vmatmul.msk.bf16.vlgmr.msra.gmra.mxu1 %vm131_vm1, %v1219_v60 }
 0x6fd   :  { %v937_v61 = vpop.f32.mrf.mxu2 }
 0x6fe   :  { %v941_v7 = vmul.f32 0.35355338, %v937_v61 }
 0x700   :  { %v942_v12 = vsel %vm131_vm1, %v941_v7, -inf }
 0x705   :  { %v939_v62 = vpop.f32.mrf.mxu2 }
 0x70d   :  { %v1064_v0 = vpop.f32.mrf.mxu2 }
 0x70e   :  { %v4010_v19 = vmul.f32 0.35355338, %v1064_v0 }
 0x70f   :  { %v880_v1 = vpop.f32.mrf.mxu1 }
 0x710   :  { %v884_v4 = vmul.f32 0.35355338, %v880_v1  ;;  %v1069_v22 = vsel %vm131_vm1, %v4010_v19, -inf }
 0x712   :  { %v885_v5 = vsel %vm131_vm1, %v884_v4, -inf }
 0x713   :  { %886 = vmax.xlane.f32.xlu1 %v885_v5 }
 0x715   :  { %v1066_v6 = vpop.f32.mrf.mxu2 }
 0x717   :  { %v882_v9 = vpop.f32.mrf.mxu1 }
 0x71a   :  { %v828_v10 = vpop.xlane.xlu0 %827 }
 0x71b   :  { %v829_v13 = vsub.f32 %v825_v55, %v828_v10  ;;  %943 = vmax.xlane.f32.xlu1 %v942_v12 }
 0x71d   :  { %v830_v14 = vmul.f32 1.442695, %v829_v13 }
 0x71f   :  { %3472 = vpow2.f32 %v830_v14  ;;  %v994_v15 = vpop.f32.mrf.mxu1 }
 0x720   :  { %v998_v11 = vmul.f32 0.35355338, %v994_v15 }
 0x722   :  { %v999_v16 = vsel %vm131_vm1, %v998_v11, -inf }
 0x723   :  { %1000 = vmax.xlane.f32.xlu2 %v999_v16 }
 0x725   :  { %v3473_v17 = vpop.eup %3472  ;;  %v1180_v18 = vpop.f32.mrf.mxu2 }
 0x726   :  { %v832_v20 = vsel %vm131_vm1, %v3473_v17, 0.0  ;;  %v1184_v26 = vmul.f32 0.35355338, %v1180_v18 }
 0x727   :  { %833 = vadd.xlane.f32.xlu1 %v832_v20  ;;  %v996_v21 = vpop.f32.mrf.mxu1 }
 0x728   :  { %v1185_v30 = vsel %vm131_vm1, %v1184_v26, -inf }
 0x72b   :  { %1070 = vmax.xlane.f32.xlu2 %v1069_v22 }
 0x72d   :  { %v1182_v25 = vpop.f32.mrf.mxu2 }
 0x72f   :  { %v1123_v27 = vpop.f32.mrf.mxu1 }
 0x730   :  { %v1127_v28 = vmul.f32 0.35355338, %v1123_v27 }
 0x732   :  { %v1128_v29 = vsel %vm131_vm1, %v1127_v28, -inf }
 0x733   :  { %1129 = vmax.xlane.f32.xlu0 %v1128_v29  ;;  %1186 = vmax.xlane.f32.xlu2 %v1185_v30 }
 0x737   :  { %v1125_v31 = vpop.f32.mrf.mxu1 }
 0x73f   :  { %v1237_v32 = vpop.f32.mrf.mxu1 }
 0x740   :  { %v4017_v33 = vmul.f32 0.35355338, %v1237_v32 }
 0x742   :  { %v1242_v35 = vsel %vm131_vm1, %v4017_v33, -inf }
 0x743   :  { %1243 = vmax.xlane.f32.xlu1 %v1242_v35 }
 0x747   :  { %v1239_v2 = vpop.f32.mrf.mxu1 }
 0x74b   :  { %839 = vrot.lane.b32.xlu2 %v3947_v63, %s4670_s26 }
 0x75c   :  { %954 = vrot.lane.b32.xlu1 %v3947_v63, %s4671_s7 }
 0x764   :  { %1140 = vrot.lane.b32.xlu1 %v3975_v34, %s4669_s4 }
 0x786   :  { %v887_v3 = vpop.xlane.xlu1 %886 }
 0x787   :  { %v888_v36 = vsub.f32 %v884_v4, %v887_v3 }
 0x789   :  { %v889_v38 = vmul.f32 1.442695, %v888_v36 }
 0x78b   :  { %3474 = vpow2.f32 %v889_v38 }
 0x78e   :  { %v944_v40 = vpop.xlane.xlu1 %943 }
 0x78f   :  { %v945_v42 = vsub.f32 %v941_v7, %v944_v40 }
 0x791   :  { %v4027_v43 = vpop.eup %3474  ;;  %v946_v44 = vmul.f32 1.442695, %v945_v42 }
 0x792   :  { %v891_v45 = vsel %vm131_vm1, %v4027_v43, 0.0 }
 0x793   :  { %3476 = vpow2.f32 %v946_v44  ;;  %892 = vadd.xlane.f32.xlu0 %v891_v45 }
 0x796   :  { %v1001_v46 = vpop.xlane.xlu2 %1000 }
 0x797   :  { %v1002_v8 = vsub.f32 %v998_v11, %v1001_v46 }
 0x799   :  { %v3477_v47 = vpop.eup %3476  ;;  %v1003_v48 = vmul.f32 1.442695, %v1002_v8 }
 0x79a   :  { %v948_v49 = vsel %vm131_vm1, %v3477_v47, 0.0  ;;  %v834_v52 = vpop.xlane.xlu1 %833 }
 0x79b   :  { %3478 = vpow2.f32 %v1003_v48  ;;  %949 = vadd.xlane.f32.xlu1 %v948_v49 }
 0x79c   :  { %3480 = vrcp.f32 %v834_v52 }
 0x79e   :  { %v1071_v50 = vpop.xlane.xlu2 %1070 }
 0x79f   :  { %v1072_v7 = vsub.f32 %v4010_v19, %v1071_v50 }
 0x7a1   :  { %v4032_v51 = vpop.eup %3478  ;;  %v1073_v9 = vmul.f32 1.442695, %v1072_v7 }
 0x7a2   :  { %v1005_v53 = vsel %vm131_vm1, %v4032_v51, 0.0  ;;  %v3481_v58 = vpop.eup %3480 }
 0x7a3   :  { %1006 = vadd.xlane.f32.xlu1 %v1005_v53  ;;  %v836_v60 = vmul.f32 %v3481_v58, %v3473_v17 }
 0x7a5   :  { %v837_v1 = vpack.c.bf16 %v836_v60, %v836_v60 }
 0x7a6   :  { %v1187_v54 = vpop.xlane.xlu2 %1186  ;;  %v1130_v55 = vpop.xlane.xlu0 %1129 }
 0x7a7   :  { %v1131_v56 = vsub.f32 %v1127_v28, %v1130_v55  ;;  %1011 = vrot.lane.b32.xlu0 %v3947_v63, %s4672_s10  ;;  %v1188_v59 = vsub.f32 %v1184_v26, %v1187_v54 }
 0x7a9   :  { %v1132_v57 = vmul.f32 1.442695, %v1131_v56  ;;  %v1189_v61 = vmul.f32 1.442695, %v1188_v59 }
 0x7ab   :  { %3482 = vpow2.f32 %v1132_v57 }
 0x7ac   :  { %3484 = vpow2.f32 %v1189_v61 }
 0x7ad   :  { %3486 = vpow2.f32 %v1073_v9 }
 0x7ae   :  { %v840_v62 = vpop.permute.xlu2 %839 }
 0x7af   :  { %v845_v0 = vsel %vm170_vm3, %v840_v62, 0 }
 0x7b0   :  { %854 = vmatpush.bf16.msrb.mxu0 %v845_v0 }
 0x7b1   :  { %v3483_v4 = vpop.eup %3482 }
 0x7b2   :  { %v1134_v5 = vsel %vm131_vm1, %v3483_v4, 0.0  ;;  %v4041_v6 = vpop.eup %3484 }
 0x7b3   :  { %3090 = vmatmul.msk.bf16.vlgmr.msrb.gmra.mxu0 %vm131_vm1, %v837_v1  ;;  %1135 = vadd.xlane.f32.xlu2 %v1134_v5  ;;  %v1191_v63 = vsel %vm131_vm1, %v4041_v6, 0.0  ;;  %v3487_v12 = vpop.eup %3486 }
 0x7b4   :  { %v1075_v15 = vsel %vm131_vm1, %v3487_v12, 0.0 }
 0x7b6   :  { %v1244_v10 = vpop.xlane.xlu1 %1243 }
 0x7b7   :  { %v1245_v11 = vsub.f32 %v4017_v33, %v1244_v10 }
 0x7b9   :  { %v1246_v16 = vmul.f32 1.442695, %v1245_v11 }
 0x7bb   :  { %1192 = vadd.xlane.f32.xlu2 %v1191_v63  ;;  %3488 = vpow2.f32 %v1246_v16 }
 0x7bc   :  { %1082 = vrot.lane.b32.xlu1 %v3975_v34, %s4670_s26 }
 0x7c1   :  { %v3489_v17 = vpop.eup %3488 }
 0x7c2   :  { %v1248_v18 = vsel %vm131_vm1, %v3489_v17, 0.0 }
 0x7ce   :  { %v955_v13 = vpop.permute.xlu1 %954 }
 0x7cf   :  { %v960_v14 = vsel %vm170_vm3, %v955_v13, 0 }
 0x7d0   :  { %969 = vmatpush.bf16.msra.mxu0 %v960_v14 }
 0x7d1   :  { %1076 = vadd.xlane.f32.xlu0 %v1075_v15 }
 0x7d3   :  { %1197 = vrot.lane.b32.xlu2 %v3975_v34, %s4671_s7 }
 0x7d6   :  { %v1141_v19 = vpop.permute.xlu1 %1140 }
 0x7d7   :  { %v1146_v32 = vsel %vm170_vm3, %v1141_v19, 0 }
 0x7e5   :  { %1254 = vrot.lane.b32.xlu0 %v3975_v34, %s4672_s10 }
 0x7e6   :  { %1249 = vadd.xlane.f32.xlu1 %v1248_v18  ;;  %v3305_v18 = vld [vmem:[%s4581_s12] sm:$0xff] }
 0x806   :  { %v893_v20 = vpop.xlane.xlu0 %892 }
 0x807   :  { %3490 = vrcp.f32 %v893_v20 }
 0x80d   :  { %v3491_v21 = vpop.eup %3490 }
 0x80e   :  { %v895_v22 = vmul.f32 %v3491_v21, %v4027_v43  ;;  %v950_v25 = vpop.xlane.xlu1 %949 }
 0x80f   :  { %3492 = vrcp.f32 %v950_v25 }
 0x810   :  { %v896_v26 = vpack.c.bf16 %v895_v22, %v895_v22 }
 0x812   :  { %3092 = vmatmul.msk.bf16.vlgmr.msrb.gmra.mxu3 %vm131_vm1, %v896_v26 }
 0x815   :  { %v3493_v27 = vpop.eup %3492 }
 0x816   :  { %v952_v28 = vmul.f32 %v3493_v27, %v3477_v47  ;;  %v1007_v29 = vpop.xlane.xlu1 %1006 }
 0x817   :  { %3494 = vrcp.f32 %v1007_v29 }
 0x818   :  { %v953_v30 = vpack.c.bf16 %v952_v28, %v952_v28 }
 0x819   :  { %v1012_v34 = vpop.permute.xlu0 %1011 }
 0x81a   :  { %v1017_v31 = vsel %vm170_vm3, %v1012_v34, 0  ;;  %3094 = vmatmul.msk.bf16.vlgmr.msra.gmra.mxu0 %vm131_vm1, %v953_v30 }
 0x81b   :  { %1026 = vmatpush.bf16.msra.mxu3 %v1017_v31 }
 0x81d   :  { %v3495_v33 = vpop.eup %3494 }
 0x81e   :  { %v1009_v35 = vmul.f32 %v3495_v33, %v4032_v51 }
 0x81f   :  { %1155 = vmatpush.bf16.msrb.mxu3 %v1146_v32 }
 0x820   :  { %v1010_v2 = vpack.c.bf16 %v1009_v35, %v1009_v35 }
 0x822   :  { %3096 = vmatmul.msk.bf16.vlgmr.msra.gmra.mxu3 %vm131_vm1, %v1010_v2 }
 0x826   :  { %v1136_v3 = vpop.xlane.xlu2 %1135 }
 0x827   :  { %3496 = vrcp.f32 %v1136_v3  ;;  %v3413_v3 = vld [vmem:[%s4580_s13] ss:$0 sm:$0xff]  ;;  %s4678_s13 = smov 40  }
 0x82d   :  { %v3497_v36 = vpop.eup %3496 }
 0x82e   :  { %v1083_v38 = vpop.permute.xlu1 %1082  ;;  %v1138_v40 = vmul.f32 %v3497_v36, %v3483_v4  ;;  %v1193_v43 = vpop.xlane.xlu2 %1192 }
 0x82f   :  { %v1088_v42 = vsel %vm170_vm3, %v1083_v38, 0 }
 0x830   :  { %v4064_v44 = vpop.f32.mrf.mxu0  ;;  %1097 = vmatpush.bf16.msrb.mxu0 %v1088_v42  ;;  %v1139_v45 = vpack.c.bf16 %v1138_v40, %v1138_v40 }
 0x832   :  { %3100 = vmatmul.msk.bf16.vlgmr.msrb.gmra.mxu3 %vm131_vm1, %v1139_v45 }
 0x836   :  { %v1198_v46 = vpop.permute.xlu2 %1197 }
 0x837   :  { %v1203_v8 = vsel %vm170_vm3, %v1198_v46, 0 }
 0x838   :  { %v858_v47 = vpop.f32.mrf.mxu0  ;;  %1212 = vmatpush.bf16.msra.mxu0 %v1203_v8 }
 0x844   :  { %v1077_v48 = vpop.xlane.xlu0 %1076 }
 0x845   :  { %3498 = vrcp.f32 %v1077_v48 }
 0x846   :  { %3500 = vrcp.f32 %v1193_v43 }
 0x84b   :  { %v3499_v49 = vpop.eup %3498 }
 0x84c   :  { %v1079_v50 = vmul.f32 %v3499_v49, %v3487_v12  ;;  %v3501_v52 = vpop.eup %3500 }
 0x84d   :  { %v1195_v56 = vmul.f32 %v3501_v52, %v4041_v6 }
 0x84e   :  { %v1080_v51 = vpack.c.bf16 %v1079_v50, %v1079_v50 }
 0x84f   :  { %v1196_v57 = vpack.c.bf16 %v1195_v56, %v1195_v56 }
 0x850   :  { %3098 = vmatmul.msk.bf16.vlgmr.msrb.gmra.mxu0 %vm131_vm1, %v1080_v51 }
 0x857   :  { %v1255_v53 = vpop.permute.xlu0 %1254 }
 0x858   :  { %v1260_v54 = vsel %vm170_vm3, %v1255_v53, 0 }
 0x859   :  { %v1250_v55 = vpop.xlane.xlu1 %1249  ;;  %1269 = vmatpush.bf16.msra.mxu3 %v1260_v54 }
 0x85a   :  { %3502 = vrcp.f32 %v1250_v55  ;;  %v3308_v55 = vld [vmem:[%s4585_s16 + $0x8] sm:$0xff] }
 0x85b   :  { %1416 = vmatpush.bf16.msrb.mxu0 %v3308_v55 }
 0x860   :  { %v3503_v58 = vpop.eup %3502  ;;  %3102 = vmatmul.msk.bf16.vlgmr.msra.gmra.mxu0 %vm131_vm1, %v1196_v57 }
 0x861   :  { %v1252_v59 = vmul.f32 %v3503_v58, %v3489_v17  ;;  %v3306_v17 = vld [vmem:[%s4581_s12 + $0x8] sm:$0xff]  ;;  %v3307_v58 = vld [vmem:[%s4585_s16] sm:$0xff]  ;;  %s4676_s12 = smov 120  }
 0x862   :  { %1320 = vmatpush.bf16.msrb.mxu2 %v3306_v17  ;;  %1417 = vmatpush.bf16.msrb.mxu0 %v3307_v58  ;;  %v3415_v17 = vld [vmem:[%s4583_s15] ss:$0 sm:$0xff]  ;;  %s4679_s15 = smov 64  }
 0x863   :  { %v1253_v60 = vpack.c.bf16 %v1252_v59, %v1252_v59 }
 0x865   :  { %3104 = vmatmul.msk.bf16.vlgmr.msra.gmra.mxu3 %vm131_vm1, %v1253_v60 }
 0x866   :  { %1321 = vmatpush.bf16.msrb.mxu2 %v3305_v18 }
 0x895   :  { %v914_v61 = vpop.f32.mrf.mxu3 }
 0x897   :  { %v971_v62 = vpop.f32.mrf.mxu0 }
 0x89d   :  { %v916_v0 = vpop.f32.mrf.mxu3 }
 0x89f   :  { %v973_v1 = vpop.f32.mrf.mxu0 }
 0x8a5   :  { %v1028_v4 = vpop.f32.mrf.mxu3 }
 0x8ad   :  { %v1030_v5 = vpop.f32.mrf.mxu3 }
 0x8b5   :  { %v1157_v63 = vpop.f32.mrf.mxu3 }
 0x8b6   :  { %v3362_v7 = vpack.i.bf16 %v1157_v63, %v914_v61 }
 0x8b8   :  { %3363 = vrot.lane.b32.xlu0 %v3362_v7, %s4673_s28 }
 0x8bd   :  { %v1159_v6 = vpop.f32.mrf.mxu3 }
 0x8cd   :  { %v1099_v9 = vpop.f32.mrf.mxu0 }
 0x8d5   :  { %v1101_v10 = vpop.f32.mrf.mxu0 }
 0x8dd   :  { %v1214_v12 = vpop.f32.mrf.mxu0 }
 0x8de   :  { %v3367_v13 = vpack.i.bf16 %v1214_v12, %v971_v62 }
 0x8e0   :  { %3368 = vrot.lane.b32.xlu2 %v3367_v13, %s4674_s0 }
 0x8e5   :  { %v1216_v14 = vpop.f32.mrf.mxu0 }
 0x8e6   :  { %v3414_v14 = vld [vmem:[%s4582_s14] ss:$0 sm:$0xff]  ;;  %s4681_s14 = sld [smem:[#allocation8_spill]] }
 0x8e8   :  { %v1271_v15 = vpop.f32.mrf.mxu3 }
 0x8e9   :  { %v3372_v11 = vpack.i.bf16 %v1271_v15, %v1028_v4 }
 0x8eb   :  { %3373 = vrot.lane.b32.xlu0 %v3372_v11, %s4675_s24 }
 0x8f0   :  { %v1273_v16 = vpop.f32.mrf.mxu3 }
 0x92a   :  { %v3364_v19 = vpop.permute.xlu0 %3363 }
 0x92b   :  { %v3366_v21 = vunpack.i.h.bf16 %v3364_v19  ;;  %v3365_v22 = vunpack.i.l.bf16 %v3364_v19 }
 0x92d   :  { %v1287_v28 = vsel %vm131_vm1, %v1099_v9, %v3366_v21  ;;  %v1044_v29 = vsel %vm131_vm1, %v4064_v44, %v3365_v22 }
 0x93a   :  { %v3369_v20 = vpop.permute.xlu2 %3368 }
 0x93b   :  { %v3371_v25 = vunpack.i.h.bf16 %v3369_v20  ;;  %v3370_v26 = vunpack.i.l.bf16 %v3369_v20 }
 0x93d   :  { %v1045_v31 = vsel %vm374_vm4, %v1044_v29, %v3370_v26  ;;  %v1288_v32 = vsel %vm374_vm4, %v1287_v28, %v3371_v25  ;;  %v3312_v26 = vld [vmem:[%s4587_s18 + $0x18] sm:$0xff]  ;;  %v3310_v28 = vld [vmem:[%s4587_s18 + $0x8] sm:$0xff]  ;;  %v3309_v29 = vld [vmem:[%s4587_s18] sm:$0xff] }
 0x93e   :  { %1471 = vmatpush.bf16.msrb.mxu1 %v3312_v26 }
 0x95d   :  { %v3374_v27 = vpop.permute.xlu0 %3373 }
 0x95e   :  { %v3376_v30 = vunpack.i.h.bf16 %v3374_v27  ;;  %v3375_v34 = vunpack.i.l.bf16 %v3374_v27  ;;  %v3311_v27 = vld [vmem:[%s4587_s18 + $0x10] sm:$0xff] }
 0x95f   :  { %1472 = vmatpush.bf16.msrb.mxu1 %v3311_v27  ;;  %v3420_v27 = vld [vmem:[%s4660_s25 + $0x1] ss:$0 sm:$0xff]  ;;  %s4677_s25 = smov 56  }
 0x960   :  { %v1046_v33 = vsel %vm376_vm5, %v1045_v31, %v3375_v34  ;;  %v1289_v35 = vsel %vm376_vm5, %v1288_v32, %v3376_v30  ;;  %v3416_v34 = vld [vmem:[%s4584_s17] ss:$0 sm:$0xff] }
 0x961   :  { %v1295_v2 = vpack.c.bf16 %v1289_v35, %v1046_v33 }
 0x963   :  { %3113 = vmatmul.msk.bf16.vlgmr.msrb.gmra.mxu2 %vm109_vm0, %v1295_v2  ;;  %1473 = vmatpush.bf16.msrb.mxu1 %v3310_v28 }
 0x967   :  { %1474 = vmatpush.bf16.msrb.mxu1 %v3309_v29 }
 0x9e6   :  { %v1323_v36 = vpop.f32.mrf.mxu2 }
 0x9e7   :  { %v1324_v38 = vadd.f32 %v3413_v3, %v1323_v36  ;;  %v3417_v36 = vld [vmem:[%s4586_s19] ss:$0 sm:$0xff] }
 0x9e9   :  { %v1328_v40 = vadd.f32 %v1324_v38, %v3963_v23 }
 0x9eb   :  { %v1332_v42 = vsel %vm109_vm0, %v1328_v40, 0.0 }
 0x9ec   :  { %1333 = vadd.xlane.f32.xlu2 %v1332_v42 }
 0x9ee   :  { %v1325_v43 = vpop.f32.mrf.mxu2 }
 0x9ef   :  { %v1326_v44 = vadd.f32 %v3413_v3, %v1325_v43 }
 0x9f1   :  { %v1329_v45 = vadd.f32 %v1326_v44, %v3965_v24 }
 0x9f3   :  { %v1335_v46 = vsel %vm109_vm0, %v1329_v45, 0.0 }
 0x9f4   :  { %1336 = vadd.xlane.f32.xlu0 %v1335_v46 }
 0xa5f   :  { %v1334_v8 = vpop.xlane.xlu2 %1333 }
 0xa60   :  { %v1338_v47 = vmul.f32 %v1334_v8, %v3930_v41 }
 0xa62   :  { %v1340_v48 = vsub.f32 %v1328_v40, %v1338_v47 }
 0xa64   :  { %v1342_v49 = vmul.f32 %v1340_v48, %v1340_v48 }
 0xa66   :  { %v1344_v50 = vsel %vm109_vm0, %v1342_v49, 0.0 }
 0xa67   :  { %v1337_v51 = vpop.xlane.xlu0 %1336  ;;  %1345 = vadd.xlane.f32.xlu1 %v1344_v50 }
 0xa68   :  { %v1339_v23 = vmul.f32 %v1337_v51, %v3930_v41 }
 0xa6a   :  { %v1341_v52 = vsub.f32 %v1329_v45, %v1339_v23 }
 0xa6c   :  { %v1343_v53 = vmul.f32 %v1341_v52, %v1341_v52 }
 0xa6e   :  { %v1347_v54 = vsel %vm109_vm0, %v1343_v53, 0.0 }
 0xa6f   :  { %1348 = vadd.xlane.f32.xlu1 %v1347_v54 }
 0xada   :  { %v1346_v24 = vpop.xlane.xlu1 %1345 }
 0xadb   :  { %v1350_v56 = vmul.f32 %v1346_v24, %v3930_v41 }
 0xadd   :  { %v1352_v57 = vadd.f32 1e-05, %v1350_v56  ;;  %v3314_v56 = vld [vmem:[%s4658_s27 + $0x18] sm:$0xff] }
 0xade   :  { %1571 = vmatpush.bf16.msrb.mxu3 %v3314_v56 }
 0xadf   :  { %3504 = vrsqrt.f32 %v1352_v57  ;;  %vm1360_vm14 = vweird.f32 %v1352_v57 }
 0xae2   :  { %v1349_v59 = vpop.xlane.xlu1 %1348 }
 0xae3   :  { %v1351_v60 = vmul.f32 %v1349_v59, %v3930_v41  ;;  %v3313_v59 = vld [vmem:[%s4658_s27 + $0x10] sm:$0xff]  ;;  %s4686_s27 = sld [smem:[#allocation14_spill]] }
 0xae4   :  { %1572 = vmatpush.bf16.msrb.mxu3 %v3313_v59 }
 0xae5   :  { %v3505_v61 = vpop.eup %3504  ;;  %v1353_v62 = vadd.f32 1e-05, %v1351_v60 }
 0xae6   :  { %v1355_v0 = vmul.f32 %v3505_v61, %v1352_v57  ;;  %vm1361_vm13 = vweird.f32 %v3505_v61 }
 0xae7   :  { %3506 = vrsqrt.f32 %v1353_v62  ;;  %vm1362_vm15 = vmor %vm1360_vm14, %vm1361_vm13  ;;  %vm1370_vm6 = vweird.f32 %v1353_v62 }
 0xae8   :  { %v1356_v1 = vmul.f32 %v3505_v61, %v1355_v0 }
 0xaea   :  { %v1357_v4 = vmul.f32 0.5, %v1356_v1 }
 0xaec   :  { %v1358_v5 = vsub.f32 1.5, %v1357_v4 }
 0xaed   :  { %v3507_v63 = vpop.eup %3506 }
 0xaee   :  { %v1359_v7 = vmul.f32 %v3505_v61, %v1358_v5  ;;  %v1365_v6 = vmul.f32 %v3507_v63, %v1353_v62  ;;  %vm1371_vm2 = vweird.f32 %v3507_v63 }
 0xaef   :  { %vm1372_vm7 = vmor %vm1370_vm6, %vm1371_vm2 }
 0xaf0   :  { %v1366_v9 = vmul.f32 %v3507_v63, %v1365_v6  ;;  %v1363_v10 = vsel %vm1362_vm15, %v3505_v61, %v1359_v7 }
 0xaf1   :  { %v1374_v15 = vmul.f32 %v1363_v10, %v1340_v48 }
 0xaf2   :  { %v1367_v12 = vmul.f32 0.5, %v1366_v9 }
 0xaf3   :  { %v1379_v18 = vmul.f32 %v3414_v14, %v1374_v15  ;;  %v3418_v15 = vld [vmem:[%s4588_s20] ss:$0 sm:$0xff] }
 0xaf4   :  { %v1368_v13 = vsub.f32 1.5, %v1367_v12 }
 0xaf5   :  { %v1384_v21 = vadd.f32 %v3415_v17, %v1379_v18  ;;  %v3419_v18 = vld [vmem:[%s4589_s21] ss:$0 sm:$0xff] }
 0xaf6   :  { %v1369_v11 = vmul.f32 %v3507_v63, %v1368_v13 }
 0xaf8   :  { %v1373_v16 = vsel %vm1372_vm7, %v3507_v63, %v1369_v11 }
 0xaf9   :  { %v1375_v19 = vmul.f32 %v1373_v16, %v1341_v52 }
 0xafb   :  { %v1380_v20 = vmul.f32 %v3414_v14, %v1375_v19 }
 0xafd   :  { %v1385_v22 = vadd.f32 %v3415_v17, %v1380_v20 }
 0xaff   :  { %v1391_v25 = vpack.c.bf16 %v1385_v22, %v1384_v21 }
 0xb01   :  { %3122 = vmatmul.msk.bf16.vlgmr.msrb.gmra.mxu0 %vm109_vm0, %v1391_v25 }
 0xb7e   :  { %v1419_v30 = vpop.f32.mrf.mxu0 }
 0xb7f   :  { %v1420_v31 = vadd.f32 %v3416_v34, %v1419_v30 }
 0xb81   :  { %v1424_v35 = vmax.f32 %v1420_v31, 0.0 }
 0xb86   :  { %v1421_v32 = vpop.f32.mrf.mxu0 }
 0xb87   :  { %v1422_v33 = vadd.f32 %v3416_v34, %v1421_v32 }
 0xb89   :  { %v1425_v2 = vmax.f32 %v1422_v33, 0.0 }
 0xb8b   :  { %v1435_v3 = vpack.c.bf16 %v1425_v2, %v1424_v35 }
 0xb8d   :  { %3139 = vmatmul.msk.bf16.vlgmr.msrb.gmra.mxu1 %vm1463_vm8, %v1435_v3 }
 0xc0a   :  { %v1476_v38 = vpop.f32.mrf.mxu1 }
 0xc0b   :  { %v1477_v40 = vadd.f32 %v3417_v36, %v1476_v38 }
 0xc0d   :  { %v1481_v42 = vadd.f32 %v1477_v40, %v1384_v21 }
 0xc0f   :  { %v1485_v43 = vsel %vm109_vm0, %v1481_v42, 0.0 }
 0xc10   :  { %1486 = vadd.xlane.f32.xlu1 %v1485_v43 }
 0xc12   :  { %v1478_v44 = vpop.f32.mrf.mxu1 }
 0xc13   :  { %v1479_v45 = vadd.f32 %v3417_v36, %v1478_v44 }
 0xc15   :  { %v1482_v46 = vadd.f32 %v1479_v45, %v1385_v22 }
 0xc17   :  { %v1488_v8 = vsel %vm109_vm0, %v1482_v46, 0.0 }
 0xc18   :  { %1489 = vadd.xlane.f32.xlu1 %v1488_v8 }
 0xc83   :  { %v1487_v47 = vpop.xlane.xlu1 %1486 }
 0xc84   :  { %v1491_v48 = vmul.f32 %v1487_v47, %v3930_v41 }
 0xc86   :  { %v1493_v49 = vsub.f32 %v1481_v42, %v1491_v48 }
 0xc88   :  { %v1495_v50 = vmul.f32 %v1493_v49, %v1493_v49 }
 0xc8a   :  { %v1497_v51 = vsel %vm109_vm0, %v1495_v50, 0.0 }
 0xc8b   :  { %1498 = vadd.xlane.f32.xlu1 %v1497_v51  ;;  %v1490_v23 = vpop.xlane.xlu1 %1489 }
 0xc8c   :  { %v1492_v52 = vmul.f32 %v1490_v23, %v3930_v41 }
 0xc8e   :  { %v1494_v53 = vsub.f32 %v1482_v46, %v1492_v52 }
 0xc90   :  { %v1496_v54 = vmul.f32 %v1494_v53, %v1494_v53 }
 0xc92   :  { %v1500_v24 = vsel %vm109_vm0, %v1496_v54, 0.0 }
 0xc93   :  { %1501 = vadd.xlane.f32.xlu1 %v1500_v24 }
 0xcfe   :  { %v1499_v55 = vpop.xlane.xlu1 %1498 }
 0xcff   :  { %v1503_v57 = vmul.f32 %v1499_v55, %v3930_v41 }
 0xd01   :  { %v1505_v58 = vadd.f32 1e-05, %v1503_v57 }
 0xd03   :  { %3508 = vrsqrt.f32 %v1505_v58  ;;  %vm1513_vm10 = vweird.f32 %v1505_v58 }
 0xd06   :  { %v1502_v60 = vpop.xlane.xlu1 %1501 }
 0xd07   :  { %v1504_v61 = vmul.f32 %v1502_v60, %v3930_v41 }
 0xd09   :  { %v3509_v62 = vpop.eup %3508  ;;  %v1506_v0 = vadd.f32 1e-05, %v1504_v61 }
 0xd0a   :  { %v1508_v1 = vmul.f32 %v3509_v62, %v1505_v58  ;;  %vm1514_vm9 = vweird.f32 %v3509_v62 }
 0xd0b   :  { %3510 = vrsqrt.f32 %v1506_v0  ;;  %vm1515_vm11 = vmor %vm1513_vm10, %vm1514_vm9  ;;  %vm1523_vm13 = vweird.f32 %v1506_v0 }
 0xd0c   :  { %v1509_v4 = vmul.f32 %v3509_v62, %v1508_v1 }
 0xd0e   :  { %v1510_v5 = vmul.f32 0.5, %v1509_v4 }
 0xd10   :  { %v1511_v63 = vsub.f32 1.5, %v1510_v5 }
 0xd11   :  { %v3511_v7 = vpop.eup %3510 }
 0xd12   :  { %v1512_v6 = vmul.f32 %v3509_v62, %v1511_v63  ;;  %v1518_v9 = vmul.f32 %v3511_v7, %v1506_v0  ;;  %vm1524_vm12 = vweird.f32 %v3511_v7 }
 0xd13   :  { %vm1525_vm14 = vmor %vm1523_vm13, %vm1524_vm12 }
 0xd14   :  { %v1519_v10 = vmul.f32 %v3511_v7, %v1518_v9  ;;  %v1516_v12 = vsel %vm1515_vm11, %v3509_v62, %v1512_v6 }
 0xd15   :  { %v1527_v11 = vmul.f32 %v1516_v12, %v1493_v49 }
 0xd16   :  { %v1520_v13 = vmul.f32 0.5, %v1519_v10 }
 0xd17   :  { %v1532_v19 = vmul.f32 %v3418_v15, %v1527_v11 }
 0xd18   :  { %v1521_v14 = vsub.f32 1.5, %v1520_v13 }
 0xd19   :  { %v4155_v22 = vadd.f32 %v3419_v18, %v1532_v19 }
 0xd1a   :  { %v1522_v16 = vmul.f32 %v3511_v7, %v1521_v14 }
 0xd1c   :  { %v1526_v17 = vsel %vm1525_vm14, %v3511_v7, %v1522_v16 }
 0xd1d   :  { %v1528_v20 = vmul.f32 %v1526_v17, %v1494_v53 }
 0xd1f   :  { %v1533_v21 = vmul.f32 %v3418_v15, %v1528_v20 }
 0xd21   :  { %v4157_v25 = vadd.f32 %v3419_v18, %v1533_v21 }
 0xd23   :  { %v1546_v26 = vpack.c.bf16 %v4157_v25, %v4155_v22 }
 0xd25   :  { %3153 = vmatmul.msk.bf16.vlgmr.msrb.gmra.mxu3 %vm109_vm0, %v1546_v26 }
 0xda8   :  { %v1574_v28 = vpop.f32.mrf.mxu3 }
 0xda9   :  { %v1575_v29 = vadd.f32 %v3420_v27, %v1574_v28 }
 0xdab   :  { %v4165_v30 = vpack.c.bf16 %v1575_v29, %v1575_v29 }
 0xdad   :  { %1637 = vrot.lane.b32.xlu1 %v4165_v30, %s4676_s12  ;;  %1639 = vrot.lane.b32.xlu0 %v4165_v30, %s4669_s4 }
 0xdae   :  { %1581 = vrot.lane.b32.xlu2 %v4165_v30, %s4670_s26 }
 0xdb0   :  { %v1576_v34 = vpop.f32.mrf.mxu3 }
 0xdb1   :  { %v1577_v31 = vadd.f32 %v3420_v27, %v1576_v34 }
 0xdb3   :  { %v4173_v32 = vpack.c.bf16 %v1577_v31, %v1577_v31 }
 0xdb5   :  { %1828 = vrot.lane.b32.xlu1 %v4173_v32, %s4670_s26  ;;  %1697 = vrot.lane.b32.xlu0 %v4165_v30, %s4671_s7 }
 0xdb6   :  { %1755 = vrot.lane.b32.xlu2 %v4165_v30, %s4672_s10 }
 0xdbd   :  { %1944 = vrot.lane.b32.xlu1 %v4173_v32, %s4671_s7  ;;  %1695 = vrot.lane.b32.xlu0 %v4165_v30, %s4666_s1 }
 0xdbe   :  { %1753 = vrot.lane.b32.xlu2 %v4165_v30, %s4665_s5 }
 0xdc5   :  { %2000 = vrot.lane.b32.xlu1 %v4173_v32, %s4665_s5  ;;  %1886 = vrot.lane.b32.xlu0 %v4173_v32, %s4669_s4 }
 0xdc6   :  { %1884 = vrot.lane.b32.xlu2 %v4173_v32, %s4676_s12 }
 0xdcd   :  { %2002 = vrot.lane.b32.xlu0 %v4173_v32, %s4672_s10 }
 0xdce   :  { %1942 = vrot.lane.b32.xlu2 %v4173_v32, %s4666_s1 }
 0xdd6   :  { %1674 = vrot.lane.b32.xlu2 %v4165_v30, %s4677_s25 }
 0xe08   :  { %v1582_v33 = vpop.permute.xlu2 %1581 }
 0xe09   :  { %v1587_v35 = vsel %vm131_vm1, %v1582_v33, 0 }
 0xe0a   :  { %1596 = vmatpush.bf16.xpose.msra.mxu2 %v1587_v35 }
 0xe10   :  { %v1756_v2 = vpop.permute.xlu2 %1755 }
 0xe11   :  { %3154 = vmatmul.msk.bf16.vlgmr.msra.gmra.mxu2 %vm131_vm1, %v4165_v30  ;;  %v1761_v43 = vsel %vm131_vm1, %v1756_v2, 0 }
 0xe18   :  { %v1754_v3 = vpop.permute.xlu2 %1753 }
 0xe1f   :  { %v1638_v36 = vpop.permute.xlu1 %1637  ;;  %v1640_v38 = vpop.permute.xlu0 %1639 }
 0xe20   :  { %v1645_v40 = vsel %vm131_vm1, %v1640_v38, 0  ;;  %v1885_v42 = vpop.permute.xlu2 %1884 }
 0xe21   :  { %1654 = vmatpush.bf16.xpose.msra.mxu1 %v1645_v40 }
 0xe27   :  { %v1829_v44 = vpop.permute.xlu1 %1828  ;;  %v1698_v45 = vpop.permute.xlu0 %1697 }
 0xe28   :  { %v1834_v46 = vsel %vm131_vm1, %v1829_v44, 0  ;;  %v1703_v8 = vsel %vm131_vm1, %v1698_v45, 0  ;;  %v1943_v47 = vpop.permute.xlu2 %1942  ;;  %3156 = vmatmul.msk.bf16.vlgmr.msra.gmra.mxu1 %vm131_vm1, %v1638_v36 }
 0xe29   :  { %1770 = vmatpush.bf16.xpose.msrb.mxu1 %v1761_v43  ;;  %1712 = vmatpush.bf16.xpose.msrb.mxu2 %v1703_v8 }
 0xe2f   :  { %v1945_v48 = vpop.permute.xlu1 %1944  ;;  %v1696_v49 = vpop.permute.xlu0 %1695 }
 0xe30   :  { %v1950_v50 = vsel %vm131_vm1, %v1945_v48, 0  ;;  %v1675_v51 = vpop.permute.xlu2 %1674  ;;  %3158 = vmatmul.msk.bf16.vlgmr.msrb.gmra.mxu2 %vm131_vm1, %v1696_v49 }
 0xe31   :  { %1843 = vmatpush.bf16.xpose.msra.mxu2 %v1834_v46  ;;  %v1680_v23 = vsel %vm170_vm3, %v1675_v51, 0 }
 0xe32   :  { %1689 = vmatpush.bf16.msra.mxu3 %v1680_v23 }
 0xe37   :  { %v1887_v52 = vpop.permute.xlu0 %1886  ;;  %v2001_v55 = vpop.permute.xlu1 %2000 }
 0xe38   :  { %v1892_v53 = vsel %vm131_vm1, %v1887_v52, 0  ;;  %3160 = vmatmul.msk.bf16.vlgmr.msrb.gmra.mxu1 %vm131_vm1, %v1754_v3 }
 0xe39   :  { %1959 = vmatpush.bf16.xpose.msrb.mxu2 %v1950_v50  ;;  %1901 = vmatpush.bf16.xpose.msra.mxu1 %v1892_v53 }
 0xe3f   :  { %v2003_v54 = vpop.permute.xlu0 %2002 }
 0xe40   :  { %v2008_v24 = vsel %vm131_vm1, %v2003_v54, 0  ;;  %3162 = vmatmul.msk.bf16.vlgmr.msra.gmra.mxu2 %vm131_vm1, %v4173_v32 }
 0xe41   :  { %2017 = vmatpush.bf16.xpose.msrb.mxu1 %v2008_v24 }
 0xe48   :  { %3164 = vmatmul.msk.bf16.vlgmr.msra.gmra.mxu1 %vm131_vm1, %v1885_v42 }
 0xe50   :  { %3166 = vmatmul.msk.bf16.vlgmr.msrb.gmra.mxu2 %vm131_vm1, %v1943_v47 }
 0xe58   :  { %3168 = vmatmul.msk.bf16.vlgmr.msrb.gmra.mxu1 %vm131_vm1, %v2001_v55 }
 0xe94   :  { %v1598_v56 = vpop.f32.mrf.mxu2 }
 0xe95   :  { %v1602_v57 = vmul.f32 0.35355338, %v1598_v56 }
 0xe97   :  { %v1603_v58 = vadd.f32 %v1602_v57, %v3803_v39 }
 0xe99   :  { %v1604_v59 = vsel %vm131_vm1, %v1603_v58, -inf }
 0xe9a   :  { %1605 = vmax.xlane.f32.xlu2 %v1604_v59 }
 0xe9c   :  { %v1600_v60 = vpop.f32.mrf.mxu2 }
 0xea5   :  { %v1656_v61 = vpop.f32.mrf.mxu1 }
 0xea6   :  { %v1660_v62 = vmul.f32 0.35355338, %v1656_v61 }
 0xea8   :  { %v1661_v0 = vadd.f32 %v1660_v62, %v3803_v39 }
 0xeaa   :  { %v1662_v1 = vsel %vm131_vm1, %v1661_v0, -inf }
 0xeab   :  { %1663 = vmax.xlane.f32.xlu0 %v1662_v1 }
 0xead   :  { %v1658_v4 = vpop.f32.mrf.mxu1 }
 0xeb3   :  { %v1714_v5 = vpop.f32.mrf.mxu2 }
 0xeb4   :  { %v1718_v63 = vmul.f32 0.35355338, %v1714_v5 }
 0xeb5   :  { %v1772_v7 = vpop.f32.mrf.mxu1 }
 0xeb6   :  { %v1776_v6 = vmul.f32 0.35355338, %v1772_v7  ;;  %v1719_v9 = vadd.f32 %v1718_v63, %v3803_v39 }
 0xeb8   :  { %v1720_v10 = vsel %vm131_vm1, %v1719_v9, -inf  ;;  %v1777_v12 = vadd.f32 %v1776_v6, %v3803_v39 }
 0xeb9   :  { %1721 = vmax.xlane.f32.xlu0 %v1720_v10 }
 0xeba   :  { %v1778_v13 = vsel %vm131_vm1, %v1777_v12, -inf }
 0xebb   :  { %v1716_v14 = vpop.f32.mrf.mxu2  ;;  %1779 = vmax.xlane.f32.xlu1 %v1778_v13 }
 0xebd   :  { %v1774_v15 = vpop.f32.mrf.mxu1 }
 0xec3   :  { %v1845_v11 = vpop.f32.mrf.mxu2 }
 0xec4   :  { %v1849_v16 = vmul.f32 0.35355338, %v1845_v11 }
 0xec5   :  { %v1903_v17 = vpop.f32.mrf.mxu1 }
 0xec6   :  { %v1907_v18 = vmul.f32 0.35355338, %v1903_v17  ;;  %v4227_v19 = vadd.f32 %v1849_v16, %v3803_v39 }
 0xec8   :  { %v1851_v20 = vsel %vm131_vm1, %v4227_v19, -inf  ;;  %v1908_v21 = vadd.f32 %v1907_v18, %v3803_v39 }
 0xec9   :  { %1852 = vmax.xlane.f32.xlu1 %v1851_v20 }
 0xeca   :  { %v1909_v26 = vsel %vm131_vm1, %v1908_v21, -inf }
 0xecb   :  { %v1847_v27 = vpop.f32.mrf.mxu2  ;;  %1910 = vmax.xlane.f32.xlu2 %v1909_v26 }
 0xecd   :  { %v1905_v28 = vpop.f32.mrf.mxu1 }
 0xed3   :  { %v1961_v29 = vpop.f32.mrf.mxu2 }
 0xed4   :  { %v1965_v34 = vmul.f32 0.35355338, %v1961_v29 }
 0xed5   :  { %v2019_v31 = vpop.f32.mrf.mxu1 }
 0xed6   :  { %v2023_v33 = vmul.f32 0.35355338, %v2019_v31  ;;  %v1966_v35 = vadd.f32 %v1965_v34, %v3803_v39 }
 0xed8   :  { %v1967_v2 = vsel %vm131_vm1, %v1966_v35, -inf  ;;  %v4236_v3 = vadd.f32 %v2023_v33, %v3803_v39 }
 0xed9   :  { %1968 = vmax.xlane.f32.xlu1 %v1967_v2 }
 0xeda   :  { %v2025_v36 = vsel %vm131_vm1, %v4236_v3, -inf }
 0xedb   :  { %2026 = vmax.xlane.f32.xlu0 %v2025_v36  ;;  %v1963_v38 = vpop.f32.mrf.mxu2 }
 0xedd   :  { %v2021_v40 = vpop.f32.mrf.mxu1 }
 0xeef   :  { %1790 = vrot.lane.b32.xlu0 %v4165_v30, %s4678_s13 }
 0xef2   :  { %1616 = vrot.lane.b32.xlu1 %v4165_v30, %s4679_s15 }
 0xef7   :  { %1921 = vrot.lane.b32.xlu0 %v4173_v32, %s4677_s25  ;;  %s4682_s25 = sld [smem:[#allocation11_spill]] }
 0xf0d   :  { %v1606_v42 = vpop.xlane.xlu2 %1605 }
 0xf0e   :  { %v1607_v43 = vsub.f32 %v1603_v58, %v1606_v42 }
 0xf10   :  { %v1608_v39 = vmul.f32 1.442695, %v1607_v43 }
 0xf12   :  { %3512 = vpow2.f32 %v1608_v39 }
 0xf18   :  { %v4246_v44 = vpop.eup %3512 }
 0xf19   :  { %v1610_v8 = vsel %vm131_vm1, %v4246_v44, 0.0 }
 0xf1e   :  { %v1664_v45 = vpop.xlane.xlu0 %1663 }
 0xf1f   :  { %v1665_v46 = vsub.f32 %v1661_v0, %v1664_v45 }
 0xf21   :  { %v1666_v47 = vmul.f32 1.442695, %v1665_v46  ;;  %1611 = vadd.xlane.f32.xlu0 %v1610_v8 }
 0xf23   :  { %3514 = vpow2.f32 %v1666_v47 }
 0xf29   :  { %v4250_v48 = vpop.eup %3514 }
 0xf2a   :  { %v1668_v49 = vsel %vm131_vm1, %v4250_v48, 0.0 }
 0xf2b   :  { %1669 = vadd.xlane.f32.xlu2 %v1668_v49 }
 0xf2c   :  { %v1722_v50 = vpop.xlane.xlu0 %1721 }
 0xf2d   :  { %v1723_v52 = vsub.f32 %v1719_v9, %v1722_v50 }
 0xf2e   :  { %v1780_v51 = vpop.xlane.xlu1 %1779 }
 0xf2f   :  { %v1781_v23 = vsub.f32 %v1777_v12, %v1780_v51  ;;  %v1724_v54 = vmul.f32 1.442695, %v1723_v52 }
 0xf31   :  { %v1782_v53 = vmul.f32 1.442695, %v1781_v23 }
 0xf33   :  { %3516 = vpow2.f32 %v1782_v53 }
 0xf34   :  { %3518 = vpow2.f32 %v1724_v54 }
 0xf39   :  { %v4254_v24 = vpop.eup %3516 }
 0xf3a   :  { %v1784_v55 = vsel %vm131_vm1, %v4254_v24, 0.0  ;;  %v4258_v57 = vpop.eup %3518 }
 0xf3b   :  { %1785 = vadd.xlane.f32.xlu0 %v1784_v55  ;;  %v1726_v60 = vsel %vm131_vm1, %v4258_v57, 0.0 }
 0xf3c   :  { %v1853_v61 = vpop.xlane.xlu1 %1852 }
 0xf3d   :  { %v1854_v6 = vsub.f32 %v4227_v19, %v1853_v61 }
 0xf3e   :  { %v1911_v56 = vpop.xlane.xlu2 %1910 }
 0xf3f   :  { %v1912_v58 = vsub.f32 %v1908_v21, %v1911_v56  ;;  %v1855_v9 = vmul.f32 1.442695, %v1854_v6 }
 0xf41   :  { %v1913_v59 = vmul.f32 1.442695, %v1912_v58 }
 0xf43   :  { %3520 = vpow2.f32 %v1913_v59  ;;  %1732 = vrot.lane.b32.xlu2 %v4165_v30, %s4680_s3  ;;  %1727 = vadd.xlane.f32.xlu0 %v1726_v60 }
 0xf49   :  { %v4264_v62 = vpop.eup %3520 }
 0xf4a   :  { %v1915_v0 = vsel %vm131_vm1, %v4264_v62, 0.0 }
 0xf4b   :  { %1916 = vadd.xlane.f32.xlu1 %v1915_v0 }
 0xf4c   :  { %v1969_v1 = vpop.xlane.xlu1 %1968 }
 0xf4d   :  { %v1970_v4 = vsub.f32 %v1966_v35, %v1969_v1 }
 0xf4e   :  { %v2027_v7 = vpop.xlane.xlu0 %2026 }
 0xf4f   :  { %v1971_v5 = vmul.f32 1.442695, %v1970_v4  ;;  %v2028_v16 = vsub.f32 %v4236_v3, %v2027_v7 }
 0xf51   :  { %3522 = vpow2.f32 %v1971_v5  ;;  %v2029_v17 = vmul.f32 1.442695, %v2028_v16 }
 0xf52   :  { %3524 = vpow2.f32 %v1855_v9 }
 0xf53   :  { %3526 = vpow2.f32 %v2029_v17 }
 0xf57   :  { %v4268_v63 = vpop.eup %3522  ;;  %1863 = vrot.lane.b32.xlu0 %v4173_v32, %s4679_s15 }
 0xf58   :  { %v1973_v30 = vsel %vm131_vm1, %v4268_v63, 0.0  ;;  %v3525_v15 = vpop.eup %3524 }
 0xf59   :  { %1974 = vadd.xlane.f32.xlu1 %v1973_v30  ;;  %v1857_v11 = vsel %vm131_vm1, %v3525_v15, 0.0  ;;  %v4281_v18 = vpop.eup %3526 }
 0xf5a   :  { %v2031_v19 = vsel %vm131_vm1, %v4281_v18, 0.0 }
 0xf61   :  { %v1791_v10 = vpop.permute.xlu0 %1790 }
 0xf62   :  { %v1796_v12 = vsel %vm170_vm3, %v1791_v10, 0 }
 0xf63   :  { %1805 = vmatpush.bf16.msrb.mxu3 %v1796_v12 }
 0xf64   :  { %v1617_v13 = vpop.permute.xlu1 %1616 }
 0xf65   :  { %v1622_v14 = vsel %vm170_vm3, %v1617_v13, 0 }
 0xf66   :  { %1631 = vmatpush.bf16.msra.mxu0 %v1622_v14 }
 0xf69   :  { %v1922_v20 = vpop.permute.xlu0 %1921 }
 0xf6c   :  { %1858 = vadd.xlane.f32.xlu2 %v1857_v11 }
 0xf72   :  { %1979 = vrot.lane.b32.xlu1 %v4173_v32, %s4680_s3 }
 0xf81   :  { %2032 = vadd.xlane.f32.xlu0 %v2031_v19 }
 0xf84   :  { %2037 = vrot.lane.b32.xlu2 %v4173_v32, %s4678_s13  ;;  %v1927_v32 = vsel %vm170_vm3, %v1922_v20, 0 }
 0xf94   :  { %v1612_v21 = vpop.xlane.xlu0 %1611 }
 0xf95   :  { %3528 = vrcp.f32 %v1612_v21  ;;  %v3316_v21 = vld [vmem:[%s4661_s29 + $0x18] sm:$0xff] }
 0xf96   :  { %2105 = vmatpush.bf16.msra.mxu2 %v3316_v21 }
 0xf9b   :  { %v3529_v26 = vpop.eup %3528 }
 0xf9c   :  { %v1614_v27 = vmul.f32 %v3529_v26, %v4246_v44  ;;  %v3315_v26 = vld [vmem:[%s4661_s29 + $0x10] sm:$0xff] }
 0xf9d   :  { %2106 = vmatpush.bf16.msra.mxu2 %v3315_v26 }
 0xf9e   :  { %v1615_v28 = vpack.c.bf16 %v1614_v27, %v1614_v27  ;;  %v1670_v29 = vpop.xlane.xlu2 %1669 }
 0xf9f   :  { %3530 = vrcp.f32 %v1670_v29 }
 0xfa0   :  { %3155 = vmatmul.msk.bf16.vlgmr.msra.gmra.mxu0 %vm131_vm1, %v1615_v28 }
 0xfa5   :  { %v3531_v34 = vpop.eup %3530 }
 0xfa6   :  { %v1672_v31 = vmul.f32 %v3531_v34, %v4250_v48  ;;  %v1733_v33 = vpop.permute.xlu2 %1732 }
 0xfa7   :  { %v1738_v35 = vsel %vm170_vm3, %v1733_v33, 0 }
 0xfa8   :  { %v1673_v2 = vpack.c.bf16 %v1672_v31, %v1672_v31  ;;  %1747 = vmatpush.bf16.msrb.mxu0 %v1738_v35 }
 0xfaa   :  { %3157 = vmatmul.msk.bf16.vlgmr.msra.gmra.mxu3 %vm131_vm1, %v1673_v2 }
 0xfab   :  { %1936 = vmatpush.bf16.msra.mxu3 %v1927_v32 }
 0xfae   :  { %v1786_v3 = vpop.xlane.xlu0 %1785 }
 0xfaf   :  { %3532 = vrcp.f32 %v1786_v3 }
 0xfb5   :  { %v3533_v36 = vpop.eup %3532 }
 0xfb6   :  { %v1788_v38 = vmul.f32 %v3533_v36, %v4254_v24  ;;  %v1728_v40 = vpop.xlane.xlu0 %1727 }
 0xfb7   :  { %3534 = vrcp.f32 %v1728_v40 }
 0xfb8   :  { %v1789_v42 = vpack.c.bf16 %v1788_v38, %v1788_v38 }
 0xfba   :  { %3161 = vmatmul.msk.bf16.vlgmr.msrb.gmra.mxu3 %vm131_vm1, %v1789_v42 }
 0xfbd   :  { %v3535_v43 = vpop.eup %3534 }
 0xfbe   :  { %v1730_v39 = vmul.f32 %v3535_v43, %v4258_v57  ;;  %v1917_v44 = vpop.xlane.xlu1 %1916 }
 0xfbf   :  { %3536 = vrcp.f32 %v1917_v44  ;;  %v3421_v44 = vld [vmem:[%s4662_s30 + $0x1] ss:$0 sm:$0xff]  ;;  %s4685_s30 = sld [smem:[#allocation16_spill]] }
 0xfc0   :  { %v1731_v45 = vpack.c.bf16 %v1730_v39, %v1730_v39 }
 0xfc2   :  { %3159 = vmatmul.msk.bf16.vlgmr.msrb.gmra.mxu0 %vm131_vm1, %v1731_v45 }
 0xfc5   :  { %v3537_v46 = vpop.eup %3536 }
 0xfc6   :  { %v1919_v8 = vmul.f32 %v3537_v46, %v4264_v62 }
 0xfc8   :  { %v1920_v47 = vpack.c.bf16 %v1919_v8, %v1919_v8 }
 0xfc9   :  { %v1864_v48 = vpop.permute.xlu0 %1863 }
 0xfca   :  { %v1869_v49 = vsel %vm170_vm3, %v1864_v48, 0  ;;  %3165 = vmatmul.msk.bf16.vlgmr.msra.gmra.mxu3 %vm131_vm1, %v1920_v47 }
 0xfcb   :  { %1878 = vmatpush.bf16.msra.mxu0 %v1869_v49 }
 0xfcc   :  { %v1975_v50 = vpop.xlane.xlu1 %1974 }
 0xfdf   :  { %v1859_v51 = vpop.xlane.xlu2 %1858 }
 0xfe0   :  { %3538 = vrcp.f32 %v1859_v51 }
 0xfe1   :  { %3540 = vrcp.f32 %v1975_v50 }
 0xfe4   :  { %v1980_v23 = vpop.permute.xlu1 %1979 }
 0xfe5   :  { %v1985_v52 = vsel %vm170_vm3, %v1980_v23, 0  ;;  %v3320_v23 = vld [vmem:[%s4663_s2 + $0x18] sm:$0xff] }
 0xfe6   :  { %v3539_v53 = vpop.eup %3538  ;;  %1994 = vmatpush.bf16.msrb.mxu0 %v1985_v52  ;;  %2241 = vmatpush.bf16.msra.mxu1 %v3320_v23  ;;  %v3319_v52 = vld [vmem:[%s4663_s2 + $0x10] sm:$0xff] }
 0xfe7   :  { %v1861_v54 = vmul.f32 %v3539_v53, %v3525_v15  ;;  %v2038_v24 = vpop.permute.xlu2 %2037  ;;  %v3541_v57 = vpop.eup %3540 }
 0xfe8   :  { %v2043_v55 = vsel %vm170_vm3, %v2038_v24, 0  ;;  %v1977_v59 = vmul.f32 %v3541_v57, %v4268_v63 }
 0xfe9   :  { %v1862_v56 = vpack.c.bf16 %v1861_v54, %v1861_v54  ;;  %2052 = vmatpush.bf16.msrb.mxu3 %v2043_v55 }
 0xfea   :  { %v1978_v60 = vpack.c.bf16 %v1977_v59, %v1977_v59  ;;  %2242 = vmatpush.bf16.msra.mxu1 %v3319_v52 }
 0xfeb   :  { %3163 = vmatmul.msk.bf16.vlgmr.msra.gmra.mxu0 %vm131_vm1, %v1862_v56 }
 0xfed   :  { %3213 = vmatmul.msk.bf16.vlgmr.msra.gmra.mxu1 %vm109_vm0, %v3926_v37  ;;  %v3318_v37 = vld [vmem:[%s4579_s8 + $0x18] sm:$0xff] }
 0xfee   :  { %2205 = vmatpush.bf16.msra.mxu0 %v3318_v37 }
 0xff4   :  { %v2033_v58 = vpop.xlane.xlu0 %2032 }
 0xff5   :  { %3542 = vrcp.f32 %v2033_v58 }
 0xffb   :  { %v3543_v61 = vpop.eup %3542  ;;  %3167 = vmatmul.msk.bf16.vlgmr.msrb.gmra.mxu0 %vm131_vm1, %v1978_v60 }
 0xffc   :  { %v2035_v62 = vmul.f32 %v3543_v61, %v4281_v18 }
 0xffe   :  { %v2036_v0 = vpack.c.bf16 %v2035_v62, %v2035_v62 }
0x1000   :  { %3169 = vmatmul.msk.bf16.vlgmr.msrb.gmra.mxu3 %vm131_vm1, %v2036_v0  ;;  %v3317_v0 = vld [vmem:[%s4579_s8 + $0x10] sm:$0xff]  ;;  %s4687_s8 = sld [smem:[#allocation15_spill]] }
0x1001   :  { %2206 = vmatpush.bf16.msra.mxu0 %v3317_v0 }
0x101d   :  { %v1633_v1 = vpop.f32.mrf.mxu0 }
0x1025   :  { %v1635_v4 = vpop.f32.mrf.mxu0 }
0x102d   :  { %v1691_v5 = vpop.f32.mrf.mxu3 }
0x1035   :  { %v1693_v30 = vpop.f32.mrf.mxu3 }
0x103d   :  { %v1807_v7 = vpop.f32.mrf.mxu3 }
0x103f   :  { %v1749_v6 = vpop.f32.mrf.mxu0 }
0x1045   :  { %v1809_v9 = vpop.f32.mrf.mxu3 }
0x1047   :  { %v1751_v10 = vpop.f32.mrf.mxu0 }
0x104d   :  { %v1938_v12 = vpop.f32.mrf.mxu3 }
0x104e   :  { %v3377_v63 = vpack.i.bf16 %v1938_v12, %v1691_v5 }
0x1050   :  { %3378 = vrot.lane.b32.xlu2 %v3377_v63, %s4673_s28 }
0x1055   :  { %v1940_v13 = vpop.f32.mrf.mxu3 }
0x1068   :  { %v1880_v14 = vpop.f32.mrf.mxu0 }
0x106a   :  { %v2244_v4 = vpop.f32.mrf.mxu1 }
0x1070   :  { %v1882_v15 = vpop.f32.mrf.mxu0 }
0x1078   :  { %v1996_v11 = vpop.f32.mrf.mxu0 }
0x1079   :  { %v3382_v16 = vpack.i.bf16 %v1996_v11, %v1749_v6  ;;  %v2246_v11 = vpop.f32.mrf.mxu1 }
0x107b   :  { %3383 = vrot.lane.b32.xlu0 %v3382_v16, %s4674_s0 }
0x1080   :  { %v1998_v17 = vpop.f32.mrf.mxu0 }
0x1083   :  { %v2054_v18 = vpop.f32.mrf.mxu3 }
0x1084   :  { %v3387_v19 = vpack.i.bf16 %v2054_v18, %v1807_v7 }
0x1086   :  { %3388 = vrot.lane.b32.xlu1 %v3387_v19, %s4675_s24 }
0x108b   :  { %v2056_v20 = vpop.f32.mrf.mxu3 }
0x10aa   :  { %v3379_v27 = vpop.permute.xlu2 %3378 }
0x10ab   :  { %v3381_v29 = vunpack.i.h.bf16 %v3379_v27  ;;  %v3380_v34 = vunpack.i.l.bf16 %v3379_v27 }
0x10ad   :  { %v2070_v2 = vsel %vm131_vm1, %v1880_v14, %v3381_v29  ;;  %v1823_v32 = vsel %vm131_vm1, %v1633_v1, %v3380_v34  ;;  %v3424_v1 = vld [vmem:[%s4577_s11 + $0x1] ss:$0 sm:$0xff] }
0x10ae   :  { %v2245_v7 = vadd.f32 %v3424_v1, %v2244_v4  ;;  %v2247_v19 = vadd.f32 %v3424_v1, %v2246_v11  ;;  %v3422_v29 = vld [vmem:[%s4667_s6 + $0x1] ss:$0 sm:$0xff] }
0x10b0   :  { %v4353_v10 = vpack.c.bf16 %v2245_v7, %v2245_v7  ;;  %v4363_v27 = vpack.c.bf16 %v2247_v19, %v2247_v19 }
0x10b2   :  { %v2255_v63 = vsel %vm131_vm1, %v4353_v10, 0 }
0x10b3   :  { %2264 = vmatpush.bf16.xpose.msra.mxu3 %v2255_v63 }
0x10ed   :  { %v3384_v28 = vpop.permute.xlu0 %3383 }
0x10ee   :  { %v3386_v31 = vunpack.i.h.bf16 %v3384_v28  ;;  %v3385_v33 = vunpack.i.l.bf16 %v3384_v28 }
0x10f0   :  { %v1824_v38 = vsel %vm374_vm4, %v1823_v32, %v3385_v33  ;;  %v2071_v40 = vsel %vm374_vm4, %v2070_v2, %v3386_v31 }
0x10f8   :  { %v3389_v35 = vpop.permute.xlu1 %3388 }
0x10f9   :  { %v3391_v3 = vunpack.i.h.bf16 %v3389_v35  ;;  %v3390_v36 = vunpack.i.l.bf16 %v3389_v35  ;;  %v3423_v35 = vld [vmem:[%s4681_s14 + $0x1] ss:$0 sm:$0xff] }
0x10fb   :  { %v1825_v42 = vsel %vm376_vm5, %v1824_v38, %v3390_v36  ;;  %v2072_v43 = vsel %vm376_vm5, %v2071_v40, %v3391_v3 }
0x10fc   :  { %v2080_v39 = vpack.c.bf16 %v2072_v43, %v1825_v42 }
0x10fe   :  { %3183 = vmatmul.msk.bf16.vlgmr.msra.gmra.mxu2 %vm109_vm0, %v2080_v39  ;;  %v3425_v39 = vld [vmem:[%s4682_s25 + $0x1] ss:$0 sm:$0xff] }
0x1181   :  { %v2108_v45 = vpop.f32.mrf.mxu2 }
0x1182   :  { %v2109_v46 = vadd.f32 %v3421_v44, %v2108_v45 }
0x1184   :  { %v2113_v8 = vadd.f32 %v2109_v46, %v4155_v22 }
0x1186   :  { %v2119_v47 = vsel %vm109_vm0, %v2113_v8, 0.0 }
0x1187   :  { %2120 = vadd.xlane.f32.xlu2 %v2119_v47 }
0x1189   :  { %v2110_v48 = vpop.f32.mrf.mxu2 }
0x118a   :  { %v2111_v49 = vadd.f32 %v3421_v44, %v2110_v48 }
0x118c   :  { %v2114_v50 = vadd.f32 %v2111_v49, %v4157_v25 }
0x118e   :  { %v2122_v51 = vsel %vm109_vm0, %v2114_v50, 0.0 }
0x118f   :  { %2123 = vadd.xlane.f32.xlu1 %v2122_v51  ;;  %v2498_v51 = vsel %vm131_vm1, %v4363_v27, 0 }
0x11a8   :  { %2308 = vrot.lane.b32.xlu1 %v4353_v10, %s4676_s12 }
0x11fa   :  { %v2121_v22 = vpop.xlane.xlu2 %2120 }
0x11fb   :  { %v2125_v53 = vmul.f32 %v2121_v22, %v3930_v41 }
0x11fd   :  { %v2127_v25 = vsub.f32 %v2113_v8, %v2125_v53 }
0x11ff   :  { %v2129_v54 = vmul.f32 %v2127_v25, %v2127_v25 }
0x1201   :  { %v2131_v24 = vsel %vm109_vm0, %v2129_v54, 0.0 }
0x1202   :  { %v2124_v55 = vpop.xlane.xlu1 %2123  ;;  %2132 = vadd.xlane.f32.xlu0 %v2131_v24 }
0x1203   :  { %v2126_v56 = vmul.f32 %v2124_v55, %v3930_v41 }
0x1205   :  { %v2128_v57 = vsub.f32 %v2114_v50, %v2126_v56 }
0x1207   :  { %v2130_v58 = vmul.f32 %v2128_v57, %v2128_v57 }
0x1209   :  { %v2134_v59 = vsel %vm109_vm0, %v2130_v58, 0.0 }
0x120a   :  { %2135 = vadd.xlane.f32.xlu2 %v2134_v59 }
0x121a   :  { %v2309_v45 = vpop.permute.xlu1 %2308 }
0x121b   :  { %v2314_v8 = vsel %vm131_vm1, %v2309_v45, 0 }
0x121c   :  { %2323 = vmatpush.bf16.xpose.msrb.mxu0 %v2314_v8 }
0x1222   :  { %2365 = vrot.lane.b32.xlu2 %v4353_v10, %s4666_s1 }
0x122a   :  { %2422 = vrot.lane.b32.xlu2 %v4353_v10, %s4665_s5 }
0x1232   :  { %2608 = vrot.lane.b32.xlu2 %v4363_v27, %s4666_s1 }
0x123a   :  { %2665 = vrot.lane.b32.xlu2 %v4363_v27, %s4665_s5 }
0x1242   :  { %2284 = vrot.lane.b32.xlu2 %v4353_v10, %s4670_s26 }
0x1275   :  { %v2133_v60 = vpop.xlane.xlu0 %2132 }
0x1276   :  { %v2137_v61 = vmul.f32 %v2133_v60, %v3930_v41 }
0x1278   :  { %v2139_v62 = vadd.f32 1e-05, %v2137_v61 }
0x127a   :  { %3544 = vrsqrt.f32 %v2139_v62  ;;  %vm2147_vm2 = vweird.f32 %v2139_v62 }
0x127d   :  { %v2136_v5 = vpop.xlane.xlu2 %2135 }
0x127e   :  { %v2138_v30 = vmul.f32 %v2136_v5, %v3930_v41 }
0x1280   :  { %v3545_v6 = vpop.eup %3544  ;;  %v2140_v9 = vadd.f32 1e-05, %v2138_v30 }
0x1281   :  { %v2142_v12 = vmul.f32 %v3545_v6, %v2139_v62  ;;  %vm2148_vm15 = vweird.f32 %v3545_v6 }
0x1282   :  { %3546 = vrsqrt.f32 %v2140_v9  ;;  %vm2149_vm6 = vmor %vm2147_vm2, %vm2148_vm15  ;;  %vm2157_vm9 = vweird.f32 %v2140_v9 }
0x1283   :  { %v2143_v13 = vmul.f32 %v3545_v6, %v2142_v12 }
0x1285   :  { %v2144_v14 = vmul.f32 0.5, %v2143_v13  ;;  %v2366_v42 = vpop.permute.xlu2 %2365 }
0x1286   :  { %v2371_v43 = vsel %vm131_vm1, %v2366_v42, 0 }
0x1287   :  { %v2145_v15 = vsub.f32 1.5, %v2144_v14  ;;  %2380 = vmatpush.bf16.xpose.msrb.mxu3 %v2371_v43 }
0x1288   :  { %v3547_v16 = vpop.eup %3546 }
0x1289   :  { %v2146_v17 = vmul.f32 %v3545_v6, %v2145_v15  ;;  %v2152_v18 = vmul.f32 %v3547_v16, %v2140_v9  ;;  %vm2158_vm7 = vweird.f32 %v3547_v16 }
0x128a   :  { %vm2159_vm10 = vmor %vm2157_vm9, %vm2158_vm7 }
0x128b   :  { %v2153_v20 = vmul.f32 %v3547_v16, %v2152_v18  ;;  %v2150_v21 = vsel %vm2149_vm6, %v3545_v6, %v2146_v17 }
0x128c   :  { %v2161_v34 = vmul.f32 %v2150_v21, %v2127_v25 }
0x128d   :  { %v2154_v26 = vmul.f32 0.5, %v2153_v20  ;;  %v2423_v44 = vpop.permute.xlu2 %2422 }
0x128e   :  { %v2166_v2 = vmul.f32 %v3422_v29, %v2161_v34  ;;  %v2428_v46 = vsel %vm131_vm1, %v2423_v44, 0 }
0x128f   :  { %v2155_v28 = vsub.f32 1.5, %v2154_v26 }
0x1290   :  { %v4373_v36 = vadd.f32 %v3423_v35, %v2166_v2 }
0x1291   :  { %v2156_v31 = vmul.f32 %v3547_v16, %v2155_v28 }
0x1293   :  { %v2160_v33 = vsel %vm2159_vm10, %v3547_v16, %v2156_v31 }
0x1294   :  { %v2162_v32 = vmul.f32 %v2160_v33, %v2128_v57 }
0x1295   :  { %v2609_v50 = vpop.permute.xlu2 %2608 }
0x1296   :  { %v2167_v3 = vmul.f32 %v3422_v29, %v2162_v32  ;;  %v2614_v56 = vsel %vm131_vm1, %v2609_v50, 0 }
0x1298   :  { %v4375_v38 = vadd.f32 %v3423_v35, %v2167_v3 }
0x129a   :  { %v2180_v40 = vpack.c.bf16 %v4375_v38, %v4373_v36 }
0x129c   :  { %3199 = vmatmul.msk.bf16.vlgmr.msra.gmra.mxu0 %vm109_vm0, %v2180_v40 }
0x129d   :  { %2437 = vmatpush.bf16.xpose.msra.mxu0 %v2428_v46  ;;  %v2666_v52 = vpop.permute.xlu2 %2665 }
0x129e   :  { %v2671_v60 = vsel %vm131_vm1, %v2666_v52, 0 }
0x12a5   :  { %v2285_v25 = vpop.permute.xlu2 %2284 }
0x12a6   :  { %v2290_v54 = vsel %vm170_vm3, %v2285_v25, 0 }
0x12a7   :  { %2299 = vmatpush.bf16.msrb.mxu2 %v2290_v54 }
0x1319   :  { %v2208_v47 = vpop.f32.mrf.mxu0 }
0x131a   :  { %v2209_v48 = vadd.f32 %v3425_v39, %v2208_v47 }
0x131c   :  { %v2249_v49 = vpack.c.bf16 %v2209_v48, %v2209_v48 }
0x131e   :  { %2363 = vrot.lane.b32.xlu1 %v2249_v49, %s4666_s1  ;;  %2306 = vrot.lane.b32.xlu0 %v2249_v49, %s4676_s12 }
0x131f   :  { %3214 = vmatmul.msk.bf16.vlgmr.msra.gmra.mxu3 %vm131_vm1, %v2249_v49 }
0x1320   :  { %2507 = vmatpush.bf16.xpose.msra.mxu3 %v2498_v51 }
0x1321   :  { %v2210_v23 = vpop.f32.mrf.mxu0 }
0x1322   :  { %v2211_v22 = vadd.f32 %v3425_v39, %v2210_v23 }
0x1324   :  { %v2492_v53 = vpack.c.bf16 %v2211_v22, %v2211_v22 }
0x1326   :  { %2551 = vrot.lane.b32.xlu1 %v4363_v27, %s4676_s12  ;;  %2420 = vrot.lane.b32.xlu0 %v2249_v49, %s4665_s5 }
0x132e   :  { %2606 = vrot.lane.b32.xlu1 %v2492_v53, %s4666_s1  ;;  %2549 = vrot.lane.b32.xlu0 %v2492_v53, %s4676_s12 }
0x1336   :  { %2663 = vrot.lane.b32.xlu0 %v2492_v53, %s4665_s5 }
0x1390   :  { %v2364_v24 = vpop.permute.xlu1 %2363  ;;  %v2307_v55 = vpop.permute.xlu0 %2306 }
0x1391   :  { %3216 = vmatmul.msk.bf16.vlgmr.msrb.gmra.mxu0 %vm131_vm1, %v2307_v55  ;;  %3218 = vmatmul.msk.bf16.vlgmr.msrb.gmra.mxu3 %vm131_vm1, %v2364_v24 }
0x1392   :  { %2623 = vmatpush.bf16.xpose.msrb.mxu3 %v2614_v56 }
0x1398   :  { %v2552_v57 = vpop.permute.xlu1 %2551  ;;  %v2421_v59 = vpop.permute.xlu0 %2420 }
0x1399   :  { %v2557_v58 = vsel %vm131_vm1, %v2552_v57, 0 }
0x139a   :  { %2566 = vmatpush.bf16.xpose.msrb.mxu0 %v2557_v58 }
0x13a0   :  { %v2607_v1 = vpop.permute.xlu1 %2606  ;;  %v2550_v4 = vpop.permute.xlu0 %2549 }
0x13a1   :  { %3220 = vmatmul.msk.bf16.vlgmr.msra.gmra.mxu0 %vm131_vm1, %v2421_v59  ;;  %3222 = vmatmul.msk.bf16.vlgmr.msra.gmra.mxu3 %vm131_vm1, %v2492_v53 }
0x13a2   :  { %v2266_v37 = vpop.f32.mrf.mxu3  ;;  %2680 = vmatpush.bf16.xpose.msra.mxu0 %v2671_v60 }
0x13a3   :  { %v2270_v61 = vmul.f32 0.35355338, %v2266_v37 }
0x13a5   :  { %v2271_v62 = vsel %vm131_vm1, %v2270_v61, -inf }
0x13a6   :  { %2272 = vmax.xlane.f32.xlu1 %v2271_v62 }
0x13a8   :  { %v2664_v5 = vpop.permute.xlu0 %2663 }
0x13aa   :  { %v2268_v0 = vpop.f32.mrf.mxu3 }
0x13b1   :  { %3224 = vmatmul.msk.bf16.vlgmr.msrb.gmra.mxu0 %vm131_vm1, %v2550_v4  ;;  %3226 = vmatmul.msk.bf16.vlgmr.msrb.gmra.mxu3 %vm131_vm1, %v2607_v1 }
0x13c1   :  { %3228 = vmatmul.msk.bf16.vlgmr.msra.gmra.mxu0 %vm131_vm1, %v2664_v5 }
0x140e   :  { %v2325_v30 = vpop.f32.mrf.mxu0 }
0x140f   :  { %v2329_v7 = vmul.f32 0.35355338, %v2325_v30 }
0x1411   :  { %v2330_v6 = vsel %vm131_vm1, %v2329_v7, -inf }
0x1412   :  { %2331 = vmax.xlane.f32.xlu2 %v2330_v6 }
0x1414   :  { %v2382_v9 = vpop.f32.mrf.mxu3 }
0x1415   :  { %v2386_v12 = vmul.f32 0.35355338, %v2382_v9 }
0x1416   :  { %v2327_v63 = vpop.f32.mrf.mxu0 }
0x1417   :  { %v2387_v13 = vsel %vm131_vm1, %v2386_v12, -inf }
0x1418   :  { %2388 = vmax.xlane.f32.xlu0 %v2387_v13 }
0x1419   :  { %v2273_v14 = vpop.xlane.xlu1 %2272 }
0x141a   :  { %v2274_v15 = vsub.f32 %v2270_v61, %v2273_v14 }
0x141c   :  { %v2275_v11 = vmul.f32 1.442695, %v2274_v15  ;;  %v2384_v16 = vpop.f32.mrf.mxu3 }
0x141e   :  { %3548 = vpow2.f32 %v2275_v11  ;;  %v2439_v17 = vpop.f32.mrf.mxu0 }
0x141f   :  { %v2443_v18 = vmul.f32 0.35355338, %v2439_v17 }
0x1421   :  { %v2444_v19 = vsel %vm131_vm1, %v2443_v18, -inf }
0x1422   :  { %2445 = vmax.xlane.f32.xlu1 %v2444_v19 }
0x1424   :  { %v3549_v20 = vpop.eup %3548  ;;  %v2509_v21 = vpop.f32.mrf.mxu3 }
0x1425   :  { %v2277_v26 = vsel %vm131_vm1, %v3549_v20, 0.0  ;;  %v2513_v29 = vmul.f32 0.35355338, %v2509_v21 }
0x1426   :  { %2278 = vadd.xlane.f32.xlu2 %v2277_v26  ;;  %v2441_v28 = vpop.f32.mrf.mxu0 }
0x1427   :  { %v2514_v31 = vsel %vm131_vm1, %v2513_v29, -inf }
0x142c   :  { %v2511_v34 = vpop.f32.mrf.mxu3 }
0x142e   :  { %2515 = vmax.xlane.f32.xlu2 %v2514_v31  ;;  %v2568_v33 = vpop.f32.mrf.mxu0 }
0x142f   :  { %v2572_v35 = vmul.f32 0.35355338, %v2568_v33 }
0x1431   :  { %v2573_v2 = vsel %vm131_vm1, %v2572_v35, -inf }
0x1432   :  { %2574 = vmax.xlane.f32.xlu0 %v2573_v2 }
0x1434   :  { %v2625_v32 = vpop.f32.mrf.mxu3 }
0x1435   :  { %v4419_v3 = vmul.f32 0.35355338, %v2625_v32 }
0x1436   :  { %v2570_v40 = vpop.f32.mrf.mxu0 }
0x1437   :  { %v2630_v42 = vsel %vm131_vm1, %v4419_v3, -inf }
0x1438   :  { %2631 = vmax.xlane.f32.xlu1 %v2630_v42 }
0x143c   :  { %v2627_v43 = vpop.f32.mrf.mxu3 }
0x143e   :  { %v2682_v39 = vpop.f32.mrf.mxu0 }
0x143f   :  { %v2686_v44 = vmul.f32 0.35355338, %v2682_v39 }
0x1441   :  { %v2687_v45 = vsel %vm131_vm1, %v2686_v44, -inf }
0x1442   :  { %2688 = vmax.xlane.f32.xlu0 %v2687_v45 }
0x1446   :  { %2456 = vrot.lane.b32.xlu2 %v4353_v10, %s4672_s10  ;;  %v2684_v46 = vpop.f32.mrf.mxu0 }
0x1451   :  { %2399 = vrot.lane.b32.xlu1 %v4353_v10, %s4671_s7 }
0x1456   :  { %2342 = vrot.lane.b32.xlu0 %v4353_v10, %s4669_s4 }
0x1459   :  { %2527 = vrot.lane.b32.xlu1 %v4363_v27, %s4670_s26 }
0x1485   :  { %v2332_v8 = vpop.xlane.xlu2 %2331 }
0x1486   :  { %v2333_v47 = vsub.f32 %v2329_v7, %v2332_v8 }
0x1488   :  { %v2334_v48 = vmul.f32 1.442695, %v2333_v47 }
0x148a   :  { %3550 = vpow2.f32 %v2334_v48 }
0x148b   :  { %v2389_v49 = vpop.xlane.xlu0 %2388 }
0x148c   :  { %v2390_v50 = vsub.f32 %v2386_v12, %v2389_v49 }
0x148e   :  { %v2391_v51 = vmul.f32 1.442695, %v2390_v50 }
0x1490   :  { %v4432_v23 = vpop.eup %3550  ;;  %3552 = vpow2.f32 %v2391_v51 }
0x1491   :  { %v2336_v52 = vsel %vm131_vm1, %v4432_v23, 0.0 }
0x1492   :  { %2337 = vadd.xlane.f32.xlu1 %v2336_v52 }
0x1495   :  { %v2446_v22 = vpop.xlane.xlu1 %2445 }
0x1496   :  { %v4436_v53 = vpop.eup %3552  ;;  %v2447_v10 = vsub.f32 %v2443_v18, %v2446_v22 }
0x1497   :  { %v2393_v24 = vsel %vm131_vm1, %v4436_v53, 0.0 }
0x1498   :  { %v2448_v25 = vmul.f32 1.442695, %v2447_v10 }
0x1499   :  { %v2279_v54 = vpop.xlane.xlu2 %2278 }
0x149a   :  { %3554 = vpow2.f32 %v2448_v25  ;;  %2394 = vadd.xlane.f32.xlu1 %v2393_v24 }
0x149b   :  { %3556 = vrcp.f32 %v2279_v54 }
0x14a0   :  { %v4440_v55 = vpop.eup %3554 }
0x14a1   :  { %v3557_v56 = vpop.eup %3556  ;;  %v2516_v57 = vpop.xlane.xlu2 %2515  ;;  %v2450_v58 = vsel %vm131_vm1, %v4440_v55, 0.0 }
0x14a2   :  { %v2281_v59 = vmul.f32 %v3557_v56, %v3549_v20  ;;  %v2517_v60 = vsub.f32 %v2513_v29, %v2516_v57  ;;  %2451 = vadd.xlane.f32.xlu1 %v2450_v58 }
0x14a4   :  { %v2282_v37 = vpack.c.bf16 %v2281_v59, %v2281_v59  ;;  %v2518_v61 = vmul.f32 1.442695, %v2517_v60 }
0x14a5   :  { %v2575_v62 = vpop.xlane.xlu0 %2574 }
0x14a6   :  { %3558 = vpow2.f32 %v2518_v61  ;;  %3215 = vmatmul.msk.bf16.vlgmr.msrb.gmra.mxu2 %vm131_vm1, %v2282_v37  ;;  %v2576_v0 = vsub.f32 %v2572_v35, %v2575_v62 }
0x14a8   :  { %v2577_v1 = vmul.f32 1.442695, %v2576_v0 }
0x14a9   :  { %v2457_v16 = vpop.permute.xlu2 %2456 }
0x14aa   :  { %3560 = vpow2.f32 %v2577_v1  ;;  %v2462_v19 = vsel %vm170_vm3, %v2457_v16, 0 }
0x14ab   :  { %v2632_v63 = vpop.xlane.xlu1 %2631 }
0x14ac   :  { %v3559_v4 = vpop.eup %3558  ;;  %v2633_v26 = vsub.f32 %v4419_v3, %v2632_v63 }
0x14ad   :  { %v2520_v5 = vsel %vm131_vm1, %v3559_v4, 0.0 }
0x14ae   :  { %2521 = vadd.xlane.f32.xlu0 %v2520_v5  ;;  %v2634_v28 = vmul.f32 1.442695, %v2633_v26 }
0x14b0   :  { %v3561_v30 = vpop.eup %3560 }
0x14b1   :  { %v2579_v7 = vsel %vm131_vm1, %v3561_v30, 0.0 }
0x14b2   :  { %2580 = vadd.xlane.f32.xlu2 %v2579_v7 }
0x14b5   :  { %v2689_v6 = vpop.xlane.xlu0 %2688 }
0x14b6   :  { %v2690_v9 = vsub.f32 %v2686_v44, %v2689_v6 }
0x14b8   :  { %v2691_v12 = vmul.f32 1.442695, %v2690_v9 }
0x14ba   :  { %3562 = vpow2.f32 %v2691_v12 }
0x14bb   :  { %2585 = vrot.lane.b32.xlu1 %v4363_v27, %s4669_s4  ;;  %3564 = vpow2.f32 %v2634_v28  ;;  %s4683_s4 = sld [smem:[#allocation13_spill]] }
0x14c0   :  { %v4449_v13 = vpop.eup %3562 }
0x14c1   :  { %v2693_v14 = vsel %vm131_vm1, %v4449_v13, 0.0  ;;  %v3565_v29 = vpop.eup %3564 }
0x14c2   :  { %2694 = vadd.xlane.f32.xlu0 %v2693_v14  ;;  %v2636_v34 = vsel %vm131_vm1, %v3565_v29, 0.0 }
0x14c3   :  { %v2400_v15 = vpop.permute.xlu1 %2399 }
0x14c4   :  { %v2405_v11 = vsel %vm170_vm3, %v2400_v15, 0 }
0x14c5   :  { %2414 = vmatpush.bf16.msra.mxu2 %v2405_v11 }
0x14c8   :  { %v2343_v17 = vpop.permute.xlu0 %2342 }
0x14c9   :  { %v2348_v18 = vsel %vm170_vm3, %v2343_v17, 0 }
0x14ca   :  { %2642 = vrot.lane.b32.xlu2 %v4363_v27, %s4671_s7  ;;  %2357 = vmatpush.bf16.msrb.mxu1 %v2348_v18  ;;  %v3322_v18 = vld [vmem:[%s4683_s4 + $0x18] sm:$0xff] }
0x14cb   :  { %v2528_v20 = vpop.permute.xlu1 %2527  ;;  %2767 = vmatpush.bf16.msra.mxu3 %v3322_v18 }
0x14cc   :  { %v2533_v21 = vsel %vm170_vm3, %v2528_v20, 0 }
0x14cd   :  { %2542 = vmatpush.bf16.msrb.mxu2 %v2533_v21 }
0x14ce   :  { %2471 = vmatpush.bf16.msra.mxu1 %v2462_v19  ;;  %v3321_v19 = vld [vmem:[%s4683_s4 + $0x10] sm:$0xff] }
0x14cf   :  { %2768 = vmatpush.bf16.msra.mxu3 %v3321_v19 }
0x14d6   :  { %2699 = vrot.lane.b32.xlu0 %v4363_v27, %s4672_s10  ;;  %s4684_s10 = sld [smem:[#allocation12_spill]] }
0x14e5   :  { %2637 = vadd.xlane.f32.xlu1 %v2636_v34 }
0x1505   :  { %v2338_v31 = vpop.xlane.xlu1 %2337 }
0x1506   :  { %3566 = vrcp.f32 %v2338_v31 }
0x150c   :  { %v3567_v33 = vpop.eup %3566 }
0x150d   :  { %v2340_v35 = vmul.f32 %v3567_v33, %v4432_v23  ;;  %v2395_v2 = vpop.xlane.xlu1 %2394 }
0x150e   :  { %3568 = vrcp.f32 %v2395_v2 }
0x150f   :  { %v2341_v32 = vpack.c.bf16 %v2340_v35, %v2340_v35 }
0x1511   :  { %3217 = vmatmul.msk.bf16.vlgmr.msrb.gmra.mxu1 %vm131_vm1, %v2341_v32 }
0x1514   :  { %v3569_v3 = vpop.eup %3568 }
0x1515   :  { %v2397_v40 = vmul.f32 %v3569_v3, %v4436_v53  ;;  %v2452_v27 = vpop.xlane.xlu1 %2451 }
0x1516   :  { %3570 = vrcp.f32 %v2452_v27 }
0x1517   :  { %v2398_v42 = vpack.c.bf16 %v2397_v40, %v2397_v40 }
0x1519   :  { %3219 = vmatmul.msk.bf16.vlgmr.msra.gmra.mxu2 %vm131_vm1, %v2398_v42 }
0x151c   :  { %v3571_v43 = vpop.eup %3570 }
0x151d   :  { %v2454_v39 = vmul.f32 %v3571_v43, %v4440_v55 }
0x151f   :  { %v2455_v44 = vpack.c.bf16 %v2454_v39, %v2454_v39  ;;  %v3426_v39 = vld [vmem:[%s4684_s10 + $0x1] ss:$0 sm:$0xff] }
0x1521   :  { %v2522_v45 = vpop.xlane.xlu0 %2521  ;;  %3221 = vmatmul.msk.bf16.vlgmr.msra.gmra.mxu1 %vm131_vm1, %v2455_v44 }
0x1522   :  { %3572 = vrcp.f32 %v2522_v45 }
0x1525   :  { %v2581_v46 = vpop.xlane.xlu2 %2580 }
0x1526   :  { %3574 = vrcp.f32 %v2581_v46 }
0x1528   :  { %v3573_v8 = vpop.eup %3572 }
0x1529   :  { %v2524_v47 = vmul.f32 %v3573_v8, %v3559_v4  ;;  %v2301_v48 = vpop.f32.mrf.mxu2 }
0x152b   :  { %v2525_v49 = vpack.c.bf16 %v2524_v47, %v2524_v47 }
0x152c   :  { %v3575_v50 = vpop.eup %3574 }
0x152d   :  { %v2583_v51 = vmul.f32 %v3575_v50, %v3561_v30  ;;  %3223 = vmatmul.msk.bf16.vlgmr.msrb.gmra.mxu2 %vm131_vm1, %v2525_v49  ;;  %v2586_v23 = vpop.permute.xlu1 %2585  ;;  %v2643_v52 = vpop.permute.xlu2 %2642 }
0x152e   :  { %v2591_v22 = vsel %vm170_vm3, %v2586_v23, 0  ;;  %v2648_v53 = vsel %vm170_vm3, %v2643_v52, 0 }
0x152f   :  { %v2584_v10 = vpack.c.bf16 %v2583_v51, %v2583_v51  ;;  %2600 = vmatpush.bf16.msrb.mxu1 %v2591_v22  ;;  %2657 = vmatpush.bf16.msra.mxu2 %v2648_v53 }
0x1531   :  { %v2303_v25 = vpop.f32.mrf.mxu2 }
0x1532   :  { %3225 = vmatmul.msk.bf16.vlgmr.msrb.gmra.mxu1 %vm131_vm1, %v2584_v10 }
0x1535   :  { %v2695_v54 = vpop.xlane.xlu0 %2694 }
0x1536   :  { %3576 = vrcp.f32 %v2695_v54 }
0x153c   :  { %v3577_v24 = vpop.eup %3576 }
0x153d   :  { %v2697_v55 = vmul.f32 %v3577_v24, %v4449_v13 }
0x153f   :  { %v2698_v58 = vpack.c.bf16 %v2697_v55, %v2697_v55  ;;  %v3324_v55 = vld [vmem:[%s4685_s30 + $0x18] sm:$0xff] }
0x1540   :  { %2867 = vmatpush.bf16.msrb.mxu2 %v3324_v55 }
0x1548   :  { %v2700_v56 = vpop.permute.xlu0 %2699 }
0x1549   :  { %v2705_v57 = vsel %vm170_vm3, %v2700_v56, 0 }
0x154a   :  { %2714 = vmatpush.bf16.msra.mxu1 %v2705_v57 }
0x154d   :  { %3229 = vmatmul.msk.bf16.vlgmr.msra.gmra.mxu1 %vm131_vm1, %v2698_v58  ;;  %v3323_v58 = vld [vmem:[%s4685_s30 + $0x10] sm:$0xff] }
0x154e   :  { %2868 = vmatpush.bf16.msrb.mxu2 %v3323_v58 }
0x1558   :  { %v2638_v59 = vpop.xlane.xlu1 %2637 }
0x1559   :  { %3578 = vrcp.f32 %v2638_v59 }
0x155f   :  { %v3579_v60 = vpop.eup %3578 }
0x1560   :  { %v2640_v37 = vmul.f32 %v3579_v60, %v3565_v29 }
0x1562   :  { %v2641_v61 = vpack.c.bf16 %v2640_v37, %v2640_v37 }
0x1564   :  { %3227 = vmatmul.msk.bf16.vlgmr.msra.gmra.mxu2 %vm131_vm1, %v2641_v61 }
0x158e   :  { %v2359_v62 = vpop.f32.mrf.mxu1 }
0x1596   :  { %v2361_v0 = vpop.f32.mrf.mxu1 }
0x159c   :  { %v2416_v1 = vpop.f32.mrf.mxu2 }
0x159e   :  { %v2473_v4 = vpop.f32.mrf.mxu1 }
0x15a4   :  { %v2418_v5 = vpop.f32.mrf.mxu2 }
0x15a6   :  { %v2475_v30 = vpop.f32.mrf.mxu1 }
0x15af   :  { %v2602_v7 = vpop.f32.mrf.mxu1 }
0x15b0   :  { %v2544_v6 = vpop.f32.mrf.mxu2  ;;  %v3392_v9 = vpack.i.bf16 %v2602_v7, %v2359_v62 }
0x15b2   :  { %3393 = vrot.lane.b32.xlu0 %v3392_v9, %s4673_s28 }
0x15b7   :  { %v2604_v12 = vpop.f32.mrf.mxu1 }
0x15b8   :  { %v2546_v63 = vpop.f32.mrf.mxu2 }
0x15ca   :  { %v2716_v13 = vpop.f32.mrf.mxu1 }
0x15cb   :  { %v3402_v14 = vpack.i.bf16 %v2716_v13, %v2473_v4  ;;  %v3427_v13 = vld [vmem:[%s4686_s27 + $0x1] ss:$0 sm:$0xff]  ;;  %s4690_s27 = sld [smem:[#allocation19_spill]] }
0x15cd   :  { %3403 = vrot.lane.b32.xlu0 %v3402_v14, %s4675_s24 }
0x15d2   :  { %v2718_v15 = vpop.f32.mrf.mxu1 }
0x15e7   :  { %v2659_v11 = vpop.f32.mrf.mxu2 }
0x15e8   :  { %v3397_v16 = vpack.i.bf16 %v2659_v11, %v2416_v1 }
0x15ea   :  { %3398 = vrot.lane.b32.xlu2 %v3397_v16, %s4674_s0  ;;  %v3428_v16 = vld [vmem:[%s4687_s8 + $0x1] ss:$0 sm:$0xff] }
0x15ef   :  { %v2661_v17 = vpop.f32.mrf.mxu2 }
0x1624   :  { %v3394_v20 = vpop.permute.xlu0 %3393 }
0x1625   :  { %v3396_v21 = vunpack.i.h.bf16 %v3394_v20  ;;  %v3395_v26 = vunpack.i.l.bf16 %v3394_v20 }
0x1627   :  { %v2732_v33 = vsel %vm131_vm1, %v2544_v6, %v3396_v21  ;;  %v2489_v35 = vsel %vm131_vm1, %v2301_v48, %v3395_v26 }
0x163f   :  { %v3404_v28 = vpop.permute.xlu0 %3403 }
0x1640   :  { %v3406_v2 = vunpack.i.h.bf16 %v3404_v28  ;;  %v3405_v32 = vunpack.i.l.bf16 %v3404_v28  ;;  %v3328_v28 = vld [vmem:[%s4587_s18 + $0x38] sm:$0xff] }
0x1641   :  { %2923 = vmatpush.bf16.msrb.mxu0 %v3328_v28 }
0x1644   :  { %v3399_v29 = vpop.permute.xlu2 %3398 }
0x1645   :  { %v3401_v34 = vunpack.i.h.bf16 %v3399_v29  ;;  %v3400_v31 = vunpack.i.l.bf16 %v3399_v29  ;;  %v3327_v29 = vld [vmem:[%s4587_s18 + $0x30] sm:$0xff] }
0x1646   :  { %2924 = vmatpush.bf16.msrb.mxu0 %v3327_v29 }
0x1647   :  { %v2733_v3 = vsel %vm374_vm4, %v2732_v33, %v3401_v34  ;;  %v2490_v40 = vsel %vm374_vm4, %v2489_v35, %v3400_v31  ;;  %v3326_v34 = vld [vmem:[%s4587_s18 + $0x28] sm:$0xff]  ;;  %v3325_v31 = vld [vmem:[%s4587_s18 + $0x20] sm:$0xff] }
0x1648   :  { %v2734_v27 = vsel %vm376_vm5, %v2733_v3, %v3406_v2  ;;  %v2491_v42 = vsel %vm376_vm5, %v2490_v40, %v3405_v32  ;;  %v3429_v35 = vld [vmem:[%s4584_s17 + $0x1] ss:$0 sm:$0xff] }
0x1649   :  { %v2742_v43 = vpack.c.bf16 %v2734_v27, %v2491_v42 }
0x164a   :  { %2925 = vmatpush.bf16.msrb.mxu0 %v3326_v34 }
0x164b   :  { %3243 = vmatmul.msk.bf16.vlgmr.msra.gmra.mxu3 %vm109_vm0, %v2742_v43  ;;  %v3430_v43 = vld [vmem:[%s4586_s19 + $0x1] ss:$0 sm:$0xff]  ;;  %s4688_s19 = sld [smem:[#allocation18_spill]] }
0x164e   :  { %2926 = vmatpush.bf16.msrb.mxu0 %v3325_v31 }
0x16ce   :  { %v2770_v44 = vpop.f32.mrf.mxu3 }
0x16cf   :  { %v2771_v45 = vadd.f32 %v3426_v39, %v2770_v44 }
0x16d1   :  { %v2775_v46 = vadd.f32 %v2771_v45, %v4373_v36 }
0x16d3   :  { %v2781_v8 = vsel %vm109_vm0, %v2775_v46, 0.0 }
0x16d4   :  { %2782 = vadd.xlane.f32.xlu2 %v2781_v8 }
0x16d6   :  { %v2772_v47 = vpop.f32.mrf.mxu3 }
0x16d7   :  { %v2773_v48 = vadd.f32 %v3426_v39, %v2772_v47 }
0x16d9   :  { %v2776_v49 = vadd.f32 %v2773_v48, %v4375_v38 }
0x16db   :  { %v2784_v50 = vsel %vm109_vm0, %v2776_v49, 0.0 }
0x16dc   :  { %2785 = vadd.xlane.f32.xlu1 %v2784_v50 }
0x1747   :  { %v2783_v51 = vpop.xlane.xlu2 %2782 }
0x1748   :  { %v2787_v23 = vmul.f32 %v2783_v51, %v3930_v41 }
0x174a   :  { %v2789_v52 = vsub.f32 %v2775_v46, %v2787_v23 }
0x174c   :  { %v2791_v22 = vmul.f32 %v2789_v52, %v2789_v52 }
0x174e   :  { %v2793_v53 = vsel %vm109_vm0, %v2791_v22, 0.0 }
0x174f   :  { %v2786_v10 = vpop.xlane.xlu1 %2785  ;;  %2794 = vadd.xlane.f32.xlu0 %v2793_v53 }
0x1750   :  { %v2788_v36 = vmul.f32 %v2786_v10, %v3930_v41 }
0x1752   :  { %v2790_v25 = vsub.f32 %v2776_v49, %v2788_v36 }
0x1754   :  { %v2792_v54 = vmul.f32 %v2790_v25, %v2790_v25 }
0x1756   :  { %v2796_v24 = vsel %vm109_vm0, %v2792_v54, 0.0 }
0x1757   :  { %2797 = vadd.xlane.f32.xlu1 %v2796_v24 }
0x17c2   :  { %v2795_v38 = vpop.xlane.xlu0 %2794 }
0x17c3   :  { %v2799_v56 = vmul.f32 %v2795_v38, %v3930_v41  ;;  %v3330_v38 = vld [vmem:[%s4688_s19 + $0x8] sm:$0xff] }
0x17c4   :  { %3023 = vmatpush.bf16.msrb.mxu1 %v3330_v38 }
0x17c5   :  { %v2801_v57 = vadd.f32 1e-05, %v2799_v56 }
0x17c7   :  { %3580 = vrsqrt.f32 %v2801_v57  ;;  %vm2809_vm3 = vweird.f32 %v2801_v57 }
0x17ca   :  { %v2798_v59 = vpop.xlane.xlu1 %2797 }
0x17cb   :  { %v2800_v60 = vmul.f32 %v2798_v59, %v3930_v41 }
0x17cd   :  { %v3581_v37 = vpop.eup %3580  ;;  %v2802_v61 = vadd.f32 1e-05, %v2800_v60 }
0x17ce   :  { %v2804_v62 = vmul.f32 %v3581_v37, %v2801_v57  ;;  %vm2810_vm1 = vweird.f32 %v3581_v37  ;;  %v3329_v57 = vld [vmem:[%s4688_s19] sm:$0xff] }
0x17cf   :  { %3582 = vrsqrt.f32 %v2802_v61  ;;  %vm2811_vm4 = vmor %vm2809_vm3, %vm2810_vm1  ;;  %vm2819_vm11 = vweird.f32 %v2802_v61  ;;  %3024 = vmatpush.bf16.msrb.mxu1 %v3329_v57 }
0x17d0   :  { %v2805_v0 = vmul.f32 %v3581_v37, %v2804_v62 }
0x17d2   :  { %v2806_v1 = vmul.f32 0.5, %v2805_v0 }
0x17d4   :  { %v2807_v4 = vsub.f32 1.5, %v2806_v1 }
0x17d5   :  { %v3583_v5 = vpop.eup %3582 }
0x17d6   :  { %v2808_v30 = vmul.f32 %v3581_v37, %v2807_v4  ;;  %v2814_v7 = vmul.f32 %v3583_v5, %v2802_v61  ;;  %vm2820_vm5 = vweird.f32 %v3583_v5 }
0x17d7   :  { %vm2821_vm12 = vmor %vm2819_vm11, %vm2820_vm5 }
0x17d8   :  { %v2815_v6 = vmul.f32 %v3583_v5, %v2814_v7  ;;  %v2812_v9 = vsel %vm2811_vm4, %v3581_v37, %v2808_v30 }
0x17d9   :  { %v2823_v14 = vmul.f32 %v2812_v9, %v2789_v52 }
0x17da   :  { %v2816_v12 = vmul.f32 0.5, %v2815_v6 }
0x17db   :  { %v2828_v17 = vmul.f32 %v3427_v13, %v2823_v14 }
0x17dc   :  { %v2817_v63 = vsub.f32 1.5, %v2816_v12 }
0x17dd   :  { %v2833_v20 = vadd.f32 %v3428_v16, %v2828_v17 }
0x17de   :  { %v2818_v15 = vmul.f32 %v3583_v5, %v2817_v63 }
0x17e0   :  { %v2822_v11 = vsel %vm2821_vm12, %v3583_v5, %v2818_v15  ;;  %v3432_v15 = vld [vmem:[%s4589_s21 + $0x1] ss:$0 sm:$0xff] }
0x17e1   :  { %v2824_v18 = vmul.f32 %v2822_v11, %v2790_v25 }
0x17e3   :  { %v2829_v19 = vmul.f32 %v3427_v13, %v2824_v18 }
0x17e5   :  { %v2834_v21 = vadd.f32 %v3428_v16, %v2829_v19 }
0x17e7   :  { %v2842_v26 = vpack.c.bf16 %v2834_v21, %v2833_v20 }
0x17e9   :  { %3259 = vmatmul.msk.bf16.vlgmr.msrb.gmra.mxu2 %vm109_vm0, %v2842_v26 }
0x186c   :  { %v2870_v33 = vpop.f32.mrf.mxu2 }
0x186d   :  { %v2871_v2 = vadd.f32 %v3429_v35, %v2870_v33 }
0x186f   :  { %v2875_v40 = vmax.f32 %v2871_v2, 0.0 }
0x1874   :  { %v2872_v32 = vpop.f32.mrf.mxu2 }
0x1875   :  { %v2873_v3 = vadd.f32 %v3429_v35, %v2872_v32 }
0x1877   :  { %v2876_v27 = vmax.f32 %v2873_v3, 0.0 }
0x1879   :  { %v2888_v42 = vpack.c.bf16 %v2876_v27, %v2875_v40 }
0x187b   :  { %3285 = vmatmul.msk.bf16.vlgmr.msrb.gmra.mxu0 %vm1463_vm8, %v2888_v42 }
0x18f8   :  { %v2928_v39 = vpop.f32.mrf.mxu0 }
0x18f9   :  { %v2929_v44 = vadd.f32 %v3430_v43, %v2928_v39 }
0x18fb   :  { %v2933_v45 = vadd.f32 %v2929_v44, %v2833_v20 }
0x18fd   :  { %v2939_v46 = vsel %vm109_vm0, %v2933_v45, 0.0 }
0x18fe   :  { %2940 = vadd.xlane.f32.xlu1 %v2939_v46 }
0x1900   :  { %v2930_v8 = vpop.f32.mrf.mxu0 }
0x1901   :  { %v2931_v47 = vadd.f32 %v3430_v43, %v2930_v8 }
0x1903   :  { %v2934_v48 = vadd.f32 %v2931_v47, %v2834_v21 }
0x1905   :  { %v2942_v49 = vsel %vm109_vm0, %v2934_v48, 0.0 }
0x1906   :  { %2943 = vadd.xlane.f32.xlu1 %v2942_v49 }
0x1971   :  { %v2941_v50 = vpop.xlane.xlu1 %2940 }
0x1972   :  { %v2945_v51 = vmul.f32 %v2941_v50, %v3930_v41 }
0x1974   :  { %v2947_v23 = vsub.f32 %v2933_v45, %v2945_v51 }
0x1976   :  { %v2949_v52 = vmul.f32 %v2947_v23, %v2947_v23 }
0x1978   :  { %v2951_v22 = vsel %vm109_vm0, %v2949_v52, 0.0 }
0x1979   :  { %2952 = vadd.xlane.f32.xlu1 %v2951_v22  ;;  %v2944_v53 = vpop.xlane.xlu1 %2943 }
0x197a   :  { %v2946_v10 = vmul.f32 %v2944_v53, %v3930_v41 }
0x197c   :  { %v2948_v36 = vsub.f32 %v2934_v48, %v2946_v10 }
0x197e   :  { %v2950_v25 = vmul.f32 %v2948_v36, %v2948_v36 }
0x1980   :  { %v2954_v54 = vsel %vm109_vm0, %v2950_v25, 0.0 }
0x1981   :  { %2955 = vadd.xlane.f32.xlu2 %v2954_v54 }
0x19ec   :  { %v2953_v24 = vpop.xlane.xlu1 %2952 }
0x19ed   :  { %v2957_v55 = vmul.f32 %v2953_v24, %v3930_v41 }
0x19ef   :  { %v2959_v56 = vadd.f32 1e-05, %v2957_v55 }
0x19f1   :  { %3584 = vrsqrt.f32 %v2959_v56  ;;  %vm2967_vm13 = vweird.f32 %v2959_v56 }
0x19f4   :  { %v2956_v58 = vpop.xlane.xlu2 %2955 }
0x19f5   :  { %v2958_v59 = vmul.f32 %v2956_v58, %v3930_v41  ;;  %v3431_v41 = vld [vmem:[%s4588_s20 + $0x1] ss:$0 sm:$0xff]  ;;  %s4689_s20 = sld [smem:[#allocation17_spill]] }
0x19f7   :  { %v3585_v60 = vpop.eup %3584  ;;  %v2960_v37 = vadd.f32 1e-05, %v2958_v59 }
0x19f8   :  { %v2962_v61 = vmul.f32 %v3585_v60, %v2959_v56  ;;  %vm2968_vm8 = vweird.f32 %v3585_v60 }
0x19f9   :  { %3586 = vrsqrt.f32 %v2960_v37  ;;  %vm2969_vm14 = vmor %vm2967_vm13, %vm2968_vm8  ;;  %vm2977_vm2 = vweird.f32 %v2960_v37 }
0x19fa   :  { %v2963_v62 = vmul.f32 %v3585_v60, %v2962_v61 }
0x19fb   :  { %v3433_v21 = vld [vmem:[%s4689_s20] ss:$0 sm:$0xff] }
0x19fc   :  { %v2964_v0 = vmul.f32 0.5, %v2963_v62 }
0x19fe   :  { %v2965_v1 = vsub.f32 1.5, %v2964_v0 }
0x19ff   :  { %v3587_v4 = vpop.eup %3586 }
0x1a00   :  { %v2966_v5 = vmul.f32 %v3585_v60, %v2965_v1  ;;  %v2972_v30 = vmul.f32 %v3587_v4, %v2960_v37  ;;  %vm2978_vm15 = vweird.f32 %v3587_v4 }
0x1a01   :  { %vm2979_vm6 = vmor %vm2977_vm2, %vm2978_vm15 }
0x1a02   :  { %v2973_v7 = vmul.f32 %v3587_v4, %v2972_v30  ;;  %v2970_v6 = vsel %vm2969_vm14, %v3585_v60, %v2966_v5 }
0x1a03   :  { %v2981_v63 = vmul.f32 %v2970_v6, %v2947_v23 }
0x1a04   :  { %v2974_v9 = vmul.f32 0.5, %v2973_v7 }
0x1a05   :  { %v2986_v11 = vmul.f32 %v3431_v41, %v2981_v63 }
0x1a06   :  { %v2975_v12 = vsub.f32 1.5, %v2974_v9 }
0x1a07   :  { %v2991_v18 = vadd.f32 %v3432_v15, %v2986_v11 }
0x1a08   :  { %v2976_v13 = vmul.f32 %v3587_v4, %v2975_v12 }
0x1a0a   :  { %v2980_v14 = vsel %vm2979_vm6, %v3587_v4, %v2976_v13 }
0x1a0b   :  { %v2982_v16 = vmul.f32 %v2980_v14, %v2948_v36 }
0x1a0d   :  { %v2987_v17 = vmul.f32 %v3431_v41, %v2982_v16 }
0x1a0f   :  { %v2992_v19 = vadd.f32 %v3432_v15, %v2987_v17 }
0x1a11   :  { %v2998_v20 = vpack.c.bf16 %v2992_v19, %v2991_v18 }
0x1a13   :  { %3296 = vmatmul.msk.bf16.vlgmr.msrb.gmra.mxu1 %vm109_vm0, %v2998_v20 }
0x1a90   :  { %v3026_v26 = vpop.f32.mrf.mxu1 }
0x1a91   :  { %v3027_v28 = vadd.f32 %v3433_v21, %v3026_v26 }
0x1a93   :  { %3031 = vst [vmem:[%s4690_s27] sm:$0xff] %v3027_v28 }
0x1a98   :  { %v3028_v29 = vpop.f32.mrf.mxu1 }
0x1a99   :  { %v3029_v34 = vadd.f32 %v3433_v21, %v3028_v29 }
0x1a9b   :  { %3032 = vst [vmem:[%s4690_s27 + $0x8] sm:$0xff] %v3029_v34 }

</bundles_post_ra>
